<compile_context>
chip_gen: v6e
topology: v6e:2x2x1
jax: 0.10.0
libtpu: 0.0.40
codegen_flags: <defaults>
</compile_context>

<pallas_src>
import jax
import jax.numpy as jnp
import numpy as np
from jax.experimental import pallas as pl
from jax.experimental.pallas import tpu as pltpu

H = 64          # lstm_units
L = 3           # lstm_layer
FC = 64         # fc_units
NFC_HID = 4     # number of (Linear -> ReLU) hidden FC layers (fc_layer=5)
IN = 10         # input feature size
OUT = 4         # mol-change outputs
TIME_STEP = 0.1
EPS = 1e-6


# ----------------------------------------------------------------------------
# Kernel factory: one grid step == TT time steps for one batch tile.
# ----------------------------------------------------------------------------
def _make_kernel(TT, BT):
    def kernel(x_ref,        # (TT, BT, IN)      time chunk of inputs
               wih0_ref,     # (IN, 4H)          LSTM layer-0 input weights (i,f,o,g packed)
               wih12_ref,    # (L-1, H, 4H)      LSTM layer-1..2 input weights
               whh_ref,      # (L, H, 4H)        LSTM hidden weights
               b_ref,        # (L, 4H)           b_ih + b_hh
               fcw_ref,      # (NFC_HID, FC, FC)
               fcb_ref,      # (NFC_HID, FC)
               fcwo_ref,     # (FC, OUT)
               fcbo_ref,     # (1, OUT)
               out_ref,      # (TT, BT, OUT+IN)  merged [mol | new_state]
               h_scr,        # (L, BT, H)        carried hidden state
               c_scr,        # (L, BT, H)        carried cell state
               hout_scr):    # (TT, BT, H)       top-layer h for this chunk
        ti = pl.program_id(1)

        @pl.when(ti == 0)
        def _():
            h_scr[...] = jnp.zeros_like(h_scr)
            c_scr[...] = jnp.zeros_like(c_scr)

        # ---- LSTM recurrence over the chunk (statically unrolled) ----------
        for tt in range(TT):
            x_t = x_ref[tt]                                     # (BT, IN)

            # Hoisted recurrent matmuls: all layers read only t-1 state, so
            # the MXU can stream them before the nonlinearity chain.
            hh = [jnp.dot(h_scr[l], whh_ref[l],
                          preferred_element_type=jnp.float32) + b_ref[l:l + 1, :]
                  for l in range(L)]

            inp = x_t
            for l in range(L):
                wih = wih0_ref[...] if l == 0 else wih12_ref[l - 1]
                gates = jnp.dot(inp, wih,
                                preferred_element_type=jnp.float32) + hh[l]
                # gates packed (i, f, o | g): one wide sigmoid + one tanh.
                sig = jax.nn.sigmoid(gates[:, 0:3 * H])
                g = jnp.tanh(gates[:, 3 * H:4 * H])
                i_g = sig[:, 0:H]
                f_g = sig[:, H:2 * H]
                o_g = sig[:, 2 * H:3 * H]
                c_new = f_g * c_scr[l] + i_g * g
                h_new = o_g * jnp.tanh(c_new)
                c_scr[l] = c_new
                h_scr[l] = h_new
                inp = h_new
            hout_scr[tt] = inp

        # ---- FC head, batched over the whole (TT*BT) chunk ------------------
        z = hout_scr[...].reshape(TT * BT, H)
        for k in range(NFC_HID):
            z = jnp.maximum(
                jnp.dot(z, fcw_ref[k], preferred_element_type=jnp.float32)
                + fcb_ref[k:k + 1, :], 0.0)
        mol = (jnp.dot(z, fcwo_ref[...], preferred_element_type=jnp.float32)
               + fcbo_ref[...])                                 # (TT*BT, OUT)

        # ---- PhysicsLayer, once per chunk (pure VPU elementwise) -------------
        xf = x_ref[...].reshape(TT * BT, IN)
        head = xf[:, 0:3]                                        # T, V, E
        CFLA = xf[:, 3:4]
        CFK = xf[:, 4:5]
        CALA = xf[:, 5:6]
        CBK = xf[:, 6:7]
        VF = xf[:, 7:8]
        VA = xf[:, 8:9]
        VB = xf[:, 9:10]

        d = mol * TIME_STEP
        dLA = d[:, 0:1]
        dK = d[:, 1:2]
        dVA = d[:, 2:3]
        dVB = d[:, 3:4]

        nVF = VF - dVA - dVB
        nVA = VA + dVA
        nVB = VB + dVB

        nCFLA = (CFLA * VF - dLA) / (nVF + EPS)
        nCFK = (CFK * VF - dK) / (nVF + EPS)
        nCALA = (CALA * VA + dLA) / (nVA + EPS)
        nCBK = (CBK * VB + dK) / (nVB + EPS)

        combined = jnp.concatenate(
            [mol, head, nCFLA, nCFK, nCALA, nCBK, nVF, nVA, nVB],
            axis=-1)                                             # (TT*BT, 14)
        out_ref[...] = combined.reshape(TT, BT, OUT + IN)

    return kernel


# ----------------------------------------------------------------------------
# Wrapper
# ----------------------------------------------------------------------------
def _round_up(n, m):
    return ((n + m - 1) // m) * m


def _pick_time_chunk(T, max_tt=8):
    for tt in range(min(T, max_tt), 0, -1):
        if T % tt == 0:
            return tt
    return 1


def _reorder_gates(w):
    """Permute the packed 4H gate axis from PyTorch (i, f, g, o) -> (i, f, o, g)."""
    i, f, g, o = jnp.split(w, 4, axis=-1)
    return jnp.concatenate([i, f, o, g], axis=-1)


def membrane_forward(x, params):
    """x: (B, T, 10) float32 -> (mol_changes (B,T,4), new_states (B,T,10))."""
    wih0, wih12, whh, b, fcw, fcb, fcwo, fcbo = params
    B, T, F = x.shape
    assert F == IN

    # Gate-column reorder (wrapper-side, once).
    wih0_k = _reorder_gates(wih0)
    wih12_k = _reorder_gates(wih12)
    whh_k = _reorder_gates(whh)
    b_k = _reorder_gates(b)

    # Pad batch to a full 8-sublane group, go time-major.
    B_pad = _round_up(B, 8)
    TT = _pick_time_chunk(T)
    xt = jnp.transpose(x, (1, 0, 2))                       # (T, B, IN)
    xt = jnp.pad(xt, ((0, 0), (0, B_pad - B), (0, 0)))     # (T, B_pad, IN)

    # Batch tile: whole padded batch for small B; split for very large B so
    # v7x's two TensorCores can each own an independent slice of the batch.
    if B_pad > 128 and (B_pad // 2) % 8 == 0:
        BT = B_pad // 2
    else:
        BT = B_pad
    nb = B_pad // BT
    nt = T // TT
    grid = (nb, nt)

    def const_spec(shape):
        n = len(shape)
        return pl.BlockSpec(shape, lambda bi, ti, _n=n: (0,) * _n)

    in_specs = [
        pl.BlockSpec((TT, BT, IN), lambda bi, ti: (ti, bi, 0)),   # x chunk
        const_spec((IN, 4 * H)),                                  # wih0
        const_spec((L - 1, H, 4 * H)),                            # wih1..2
        const_spec((L, H, 4 * H)),                                # whh
        const_spec((L, 4 * H)),                                   # bias
        const_spec((NFC_HID, FC, FC)),                            # fc hidden W
        const_spec((NFC_HID, FC)),                                # fc hidden b
        const_spec((FC, OUT)),                                    # fc out W
        const_spec((1, OUT)),                                     # fc out b
    ]
    out_specs = pl.BlockSpec((TT, BT, OUT + IN), lambda bi, ti: (ti, bi, 0))
    out_shape = jax.ShapeDtypeStruct((T, B_pad, OUT + IN), jnp.float32)
    scratch_shapes = [
        pltpu.VMEM((L, BT, H), jnp.float32),    # h state (persists across ti)
        pltpu.VMEM((L, BT, H), jnp.float32),    # c state
        pltpu.VMEM((TT, BT, H), jnp.float32),   # top-layer h for the chunk
    ]

    out_t = pl.pallas_call(
        _make_kernel(TT, BT),
        out_shape=out_shape,
        grid_spec=pltpu.PrefetchScalarGridSpec(
            num_scalar_prefetch=0,
            grid=grid,
            in_specs=in_specs,
            out_specs=out_specs,
            scratch_shapes=scratch_shapes,
        ),
        compiler_params=pltpu.CompilerParams(
            # batch tiles are independent (megacore-parallel on v7x);
            # the time axis carries the LSTM recurrence -> sequential.
            dimension_semantics=("parallel", "arbitrary")),
    )(xt, wih0_k, wih12_k, whh_k, b_k, fcw, fcb, fcwo, fcbo)

    out = jnp.transpose(out_t, (1, 0, 2))[:B]               # (B, T, 14)
    return out[..., :OUT], out[..., OUT:]


# ----------------------------------------------------------------------------
# Pure-JAX reference (same math, PyTorch gate order) for correctness check
# ----------------------------------------------------------------------------
def reference_forward(x, params):
    wih0, wih12, whh, b, fcw, fcb, fcwo, fcbo = params
    B, T, _ = x.shape
    h = jnp.zeros((L, B, H), jnp.float32)
    c = jnp.zeros((L, B, H), jnp.float32)
    mols, states = [], []
    for t in range(T):
        inp = x[:, t, :]
        for l in range(L):
            wih = wih0 if l == 0 else wih12[l - 1]
            gates = inp @ wih + h[l] @ whh[l] + b[l]
            i = jax.nn.sigmoid(gates[:, :H])
            f = jax.nn.sigmoid(gates[:, H:2 * H])
            g = jnp.tanh(gates[:, 2 * H:3 * H])
            o = jax.nn.sigmoid(gates[:, 3 * H:])
            cn = f * c[l] + i * g
            hn = o * jnp.tanh(cn)
            h = h.at[l].set(hn)
            c = c.at[l].set(cn)
            inp = hn
        z = inp
        for k in range(NFC_HID):
            z = jax.nn.relu(z @ fcw[k] + fcb[k])
        mol = z @ fcwo + fcbo[0]

        xt = x[:, t, :]
        T_, V, E = xt[:, 0:1], xt[:, 1:2], xt[:, 2:3]
        CFLA, CFK, CALA, CBK = xt[:, 3:4], xt[:, 4:5], xt[:, 5:6], xt[:, 6:7]
        VF, VA, VB = xt[:, 7:8], xt[:, 8:9], xt[:, 9:10]
        NFLA, NFK, NALA, NBK = CFLA * VF, CFK * VF, CALA * VA, CBK * VB
        dLA, dK = mol[:, 0:1] * TIME_STEP, mol[:, 1:2] * TIME_STEP
        dVA, dVB = mol[:, 2:3] * TIME_STEP, mol[:, 3:4] * TIME_STEP
        nVF, nVA, nVB = VF - dVA - dVB, VA + dVA, VB + dVB
        nNFLA, nNFK, nNALA, nNBK = NFLA - dLA, NFK - dK, NALA + dLA, NBK + dK
        new_state = jnp.concatenate(
            [T_, V, E,
             nNFLA / (nVF + EPS), nNFK / (nVF + EPS),
             nNALA / (nVA + EPS), nNBK / (nVB + EPS),
             nVF, nVA, nVB], axis=-1)
        mols.append(mol)
        states.append(new_state)
    return jnp.stack(mols, 1), jnp.stack(states, 1)


# ----------------------------------------------------------------------------
# Deterministic parameter construction (synthetic, PyTorch shapes transposed)
# ----------------------------------------------------------------------------
def make_params(key):
    ks = jax.random.split(key, 9)
    s = 1.0 / np.sqrt(H)
    wih0 = jax.random.uniform(ks[0], (IN, 4 * H), jnp.float32, -s, s)
    wih12 = jax.random.uniform(ks[1], (L - 1, H, 4 * H), jnp.float32, -s, s)
    whh = jax.random.uniform(ks[2], (L, H, 4 * H), jnp.float32, -s, s)
    b = jax.random.uniform(ks[3], (L, 4 * H), jnp.float32, -s, s)
    fcw = jax.random.uniform(ks[4], (NFC_HID, FC, FC), jnp.float32, -s, s)
    fcb = jax.random.uniform(ks[5], (NFC_HID, FC), jnp.float32, -s, s)
    fcwo = jax.random.uniform(ks[6], (FC, OUT), jnp.float32, -s, s)
    fcbo = jax.random.uniform(ks[7], (1, OUT), jnp.float32, -s, s)
    return (wih0, wih12, whh, b, fcw, fcb, fcwo, fcbo)


if __name__ == "__main__":
    key = jax.random.PRNGKey(0)
    kx, kp = jax.random.split(key)

    B, T = 2, 8
    # positive, well-conditioned features (volumes / concentrations)
    x = jax.random.uniform(kx, (B, T, IN), jnp.float32, 0.5, 1.5)
    params = make_params(kp)

    mol, new_states = jax.jit(membrane_forward)(x, params)
    jax.block_until_ready((mol, new_states))

    mol_ref, states_ref = reference_forward(x, params)
    assert mol.shape == (B, T, OUT) and new_states.shape == (B, T, IN)
    np.testing.assert_allclose(np.asarray(mol), np.asarray(mol_ref),
                               rtol=1e-4, atol=1e-5)
    np.testing.assert_allclose(np.asarray(new_states), np.asarray(states_ref),
                               rtol=1e-4, atol=1e-5)
    print("KERNEL_OK")
</pallas_src>

<mosaic_0001>
module attributes {stable_mosaic.version = 11 : i64} {
  func.func @kernel(%arg0: i32, %arg1: i32, %arg2: memref<8x8x10xf32, #tpu.memory_space<vmem>>, %arg3: memref<10x256xf32, #tpu.memory_space<vmem>>, %arg4: memref<2x64x256xf32, #tpu.memory_space<vmem>>, %arg5: memref<3x64x256xf32, #tpu.memory_space<vmem>>, %arg6: memref<3x256xf32, #tpu.memory_space<vmem>>, %arg7: memref<4x64x64xf32, #tpu.memory_space<vmem>>, %arg8: memref<4x64xf32, #tpu.memory_space<vmem>>, %arg9: memref<64x4xf32, #tpu.memory_space<vmem>>, %arg10: memref<1x4xf32, #tpu.memory_space<vmem>>, %arg11: memref<8x8x14xf32, #tpu.memory_space<vmem>>, %arg12: memref<3x8x64xf32, #tpu.memory_space<vmem>>, %arg13: memref<3x8x64xf32, #tpu.memory_space<vmem>>, %arg14: memref<8x8x64xf32, #tpu.memory_space<vmem>>) attributes {dimension_semantics = [#tpu.dimension_semantics<parallel>, #tpu.dimension_semantics<arbitrary>], iteration_bounds = array<i64: 1, 1>, scalar_prefetch = 0 : i64, scratch_operands = 3 : i64, tpu.core_type = #tpu.core_type<tc>, window_params = [{transform_indices = @transform_0, window_bounds = array<i64: 8, 8, 10>}, {pipeline_mode = #tpu.pipeline_mode<synchronous>, transform_indices = @transform_1, window_bounds = array<i64: 10, 256>}, {pipeline_mode = #tpu.pipeline_mode<synchronous>, transform_indices = @transform_2, window_bounds = array<i64: 2, 64, 256>}, {pipeline_mode = #tpu.pipeline_mode<synchronous>, transform_indices = @transform_3, window_bounds = array<i64: 3, 64, 256>}, {pipeline_mode = #tpu.pipeline_mode<synchronous>, transform_indices = @transform_4, window_bounds = array<i64: 3, 256>}, {pipeline_mode = #tpu.pipeline_mode<synchronous>, transform_indices = @transform_5, window_bounds = array<i64: 4, 64, 64>}, {pipeline_mode = #tpu.pipeline_mode<synchronous>, transform_indices = @transform_6, window_bounds = array<i64: 4, 64>}, {pipeline_mode = #tpu.pipeline_mode<synchronous>, transform_indices = @transform_7, window_bounds = array<i64: 64, 4>}, {pipeline_mode = #tpu.pipeline_mode<synchronous>, transform_indices = @transform_8, window_bounds = array<i64: 1, 4>}, {transform_indices = @transform_9, window_bounds = array<i64: 8, 8, 14>}]} {
    %c0_i32 = arith.constant 0 : i32
    %0 = arith.cmpi eq, %arg1, %c0_i32 : i32
    %1 = arith.extui %0 : i1 to i32
    %c0_i32_0 = arith.constant 0 : i32
    %2 = arith.cmpi ne, %1, %c0_i32_0 : i32
    scf.if %2 {
      %cst_631 = arith.constant 0.000000e+00 : f32
      %981 = vector.broadcast %cst_631 : f32 to vector<3x8x64xf32>
      %c0_632 = arith.constant 0 : index
      %c0_633 = arith.constant 0 : index
      %c0_634 = arith.constant 0 : index
      %982 = vector.load %arg12[%c0_632, %c0_633, %c0_634] : memref<3x8x64xf32, #tpu.memory_space<vmem>>, vector<3x8x64xf32>
      tpu.vector_store %arg12[%c0_632, %c0_633, %c0_634], %981 {strides = array<i32>} : memref<3x8x64xf32, #tpu.memory_space<vmem>>, vector<3x8x64xf32>,
      %cst_635 = arith.constant 0.000000e+00 : f32
      %983 = vector.broadcast %cst_635 : f32 to vector<3x8x64xf32>
      %c0_636 = arith.constant 0 : index
      %c0_637 = arith.constant 0 : index
      %c0_638 = arith.constant 0 : index
      %984 = vector.load %arg13[%c0_636, %c0_637, %c0_638] : memref<3x8x64xf32, #tpu.memory_space<vmem>>, vector<3x8x64xf32>
      tpu.vector_store %arg13[%c0_636, %c0_637, %c0_638], %983 {strides = array<i32>} : memref<3x8x64xf32, #tpu.memory_space<vmem>>, vector<3x8x64xf32>,
    } else {
    }
    %c0 = arith.constant 0 : index
    %c0_1 = arith.constant 0 : index
    %c0_2 = arith.constant 0 : index
    %3 = vector.load %arg2[%c0, %c0_1, %c0_2] : memref<8x8x10xf32, #tpu.memory_space<vmem>>, vector<1x8x10xf32>
    %4 = vector.shape_cast %3 : vector<1x8x10xf32> to vector<8x10xf32>
    %c0_3 = arith.constant 0 : index
    %c0_4 = arith.constant 0 : index
    %c0_5 = arith.constant 0 : index
    %5 = vector.load %arg12[%c0_3, %c0_4, %c0_5] : memref<3x8x64xf32, #tpu.memory_space<vmem>>, vector<1x8x64xf32>
    %6 = vector.shape_cast %5 : vector<1x8x64xf32> to vector<8x64xf32>
    %c0_6 = arith.constant 0 : index
    %c0_7 = arith.constant 0 : index
    %c0_8 = arith.constant 0 : index
    %7 = vector.load %arg5[%c0_6, %c0_7, %c0_8] : memref<3x64x256xf32, #tpu.memory_space<vmem>>, vector<1x64x256xf32>
    %8 = vector.shape_cast %7 : vector<1x64x256xf32> to vector<64x256xf32>
    %cst = arith.constant dense<0.000000e+00> : vector<8x256xf32>
    %9 = tpu.matmul %6, %8, %cst {dimension_numbers = #tpu.dot_dimension_numbers<[1], [0], [0], [1], [0, 0, 1, 1], [], []>} : vector<8x64xf32>, vector<64x256xf32>, vector<8x256xf32> -> vector<8x256xf32>
    %c0_9 = arith.constant 0 : index
    %c0_10 = arith.constant 0 : index
    %10 = vector.load %arg6[%c0_9, %c0_10] : memref<3x256xf32, #tpu.memory_space<vmem>>, vector<1x256xf32>
    %11 = vector.broadcast %10 : vector<1x256xf32> to vector<8x256xf32>
    %12 = arith.addf %9, %11 : vector<8x256xf32>
    %c1 = arith.constant 1 : index
    %c0_11 = arith.constant 0 : index
    %c0_12 = arith.constant 0 : index
    %13 = vector.load %arg12[%c1, %c0_11, %c0_12] : memref<3x8x64xf32, #tpu.memory_space<vmem>>, vector<1x8x64xf32>
    %14 = vector.shape_cast %13 : vector<1x8x64xf32> to vector<8x64xf32>
    %c1_13 = arith.constant 1 : index
    %c0_14 = arith.constant 0 : index
    %c0_15 = arith.constant 0 : index
    %15 = vector.load %arg5[%c1_13, %c0_14, %c0_15] : memref<3x64x256xf32, #tpu.memory_space<vmem>>, vector<1x64x256xf32>
    %16 = vector.shape_cast %15 : vector<1x64x256xf32> to vector<64x256xf32>
    %cst_16 = arith.constant dense<0.000000e+00> : vector<8x256xf32>
    %17 = tpu.matmul %14, %16, %cst_16 {dimension_numbers = #tpu.dot_dimension_numbers<[1], [0], [0], [1], [0, 0, 1, 1], [], []>} : vector<8x64xf32>, vector<64x256xf32>, vector<8x256xf32> -> vector<8x256xf32>
    %c1_17 = arith.constant 1 : index
    %c0_18 = arith.constant 0 : index
    %18 = vector.load %arg6[%c1_17, %c0_18] : memref<3x256xf32, #tpu.memory_space<vmem>>, vector<1x256xf32>
    %19 = vector.broadcast %18 : vector<1x256xf32> to vector<8x256xf32>
    %20 = arith.addf %17, %19 : vector<8x256xf32>
    %c2 = arith.constant 2 : index
    %c0_19 = arith.constant 0 : index
    %c0_20 = arith.constant 0 : index
    %21 = vector.load %arg12[%c2, %c0_19, %c0_20] : memref<3x8x64xf32, #tpu.memory_space<vmem>>, vector<1x8x64xf32>
    %22 = vector.shape_cast %21 : vector<1x8x64xf32> to vector<8x64xf32>
    %c2_21 = arith.constant 2 : index
    %c0_22 = arith.constant 0 : index
    %c0_23 = arith.constant 0 : index
    %23 = vector.load %arg5[%c2_21, %c0_22, %c0_23] : memref<3x64x256xf32, #tpu.memory_space<vmem>>, vector<1x64x256xf32>
    %24 = vector.shape_cast %23 : vector<1x64x256xf32> to vector<64x256xf32>
    %cst_24 = arith.constant dense<0.000000e+00> : vector<8x256xf32>
    %25 = tpu.matmul %22, %24, %cst_24 {dimension_numbers = #tpu.dot_dimension_numbers<[1], [0], [0], [1], [0, 0, 1, 1], [], []>} : vector<8x64xf32>, vector<64x256xf32>, vector<8x256xf32> -> vector<8x256xf32>
    %c2_25 = arith.constant 2 : index
    %c0_26 = arith.constant 0 : index
    %26 = vector.load %arg6[%c2_25, %c0_26] : memref<3x256xf32, #tpu.memory_space<vmem>>, vector<1x256xf32>
    %27 = vector.broadcast %26 : vector<1x256xf32> to vector<8x256xf32>
    %28 = arith.addf %25, %27 : vector<8x256xf32>
    %c0_27 = arith.constant 0 : index
    %c0_28 = arith.constant 0 : index
    %29 = vector.load %arg3[%c0_27, %c0_28] : memref<10x256xf32, #tpu.memory_space<vmem>>, vector<10x256xf32>
    %cst_29 = arith.constant dense<0.000000e+00> : vector<8x256xf32>
    %30 = tpu.matmul %4, %29, %cst_29 {dimension_numbers = #tpu.dot_dimension_numbers<[1], [0], [0], [1], [0, 0, 1, 1], [], []>} : vector<8x10xf32>, vector<10x256xf32>, vector<8x256xf32> -> vector<8x256xf32>
    %31 = arith.addf %30, %12 : vector<8x256xf32>
    %32 = vector.extract_strided_slice %31 {offsets = [0, 0], sizes = [8, 192], strides = [1, 1]} : vector<8x256xf32> to vector<8x192xf32>
    %33 = arith.negf %32 : vector<8x192xf32>
    %34 = math.exp %33 : vector<8x192xf32>
    %cst_30 = arith.constant 1.000000e+00 : f32
    %35 = vector.broadcast %cst_30 : f32 to vector<8x192xf32>
    %36 = arith.addf %35, %34 : vector<8x192xf32>
    %37 = arith.divf %35, %36 : vector<8x192xf32>
    %38 = vector.extract_strided_slice %31 {offsets = [0, 192], sizes = [8, 64], strides = [1, 1]} : vector<8x256xf32> to vector<8x64xf32>
    %39 = math.tanh %38 : vector<8x64xf32>
    %40 = vector.extract_strided_slice %37 {offsets = [0, 0], sizes = [8, 64], strides = [1, 1]} : vector<8x192xf32> to vector<8x64xf32>
    %41 = vector.extract_strided_slice %37 {offsets = [0, 64], sizes = [8, 64], strides = [1, 1]} : vector<8x192xf32> to vector<8x64xf32>
    %42 = vector.extract_strided_slice %37 {offsets = [0, 128], sizes = [8, 64], strides = [1, 1]} : vector<8x192xf32> to vector<8x64xf32>
    %c0_31 = arith.constant 0 : index
    %c0_32 = arith.constant 0 : index
    %c0_33 = arith.constant 0 : index
    %43 = vector.load %arg13[%c0_31, %c0_32, %c0_33] : memref<3x8x64xf32, #tpu.memory_space<vmem>>, vector<1x8x64xf32>
    %44 = vector.shape_cast %43 : vector<1x8x64xf32> to vector<8x64xf32>
    %45 = arith.mulf %41, %44 : vector<8x64xf32>
    %46 = arith.mulf %40, %39 : vector<8x64xf32>
    %47 = arith.addf %45, %46 : vector<8x64xf32>
    %48 = math.tanh %47 : vector<8x64xf32>
    %49 = arith.mulf %42, %48 : vector<8x64xf32>
    %c0_34 = arith.constant 0 : index
    %c0_35 = arith.constant 0 : index
    %c0_36 = arith.constant 0 : index
    %50 = vector.load %arg13[%c0_34, %c0_35, %c0_36] : memref<3x8x64xf32, #tpu.memory_space<vmem>>, vector<1x8x64xf32>
    %51 = vector.shape_cast %50 : vector<1x8x64xf32> to vector<8x64xf32>
    %52 = vector.shape_cast %47 : vector<8x64xf32> to vector<1x8x64xf32>
    tpu.vector_store %arg13[%c0_34, %c0_35, %c0_36], %52 {strides = array<i32>} : memref<3x8x64xf32, #tpu.memory_space<vmem>>, vector<1x8x64xf32>,
    %c0_37 = arith.constant 0 : index
    %c0_38 = arith.constant 0 : index
    %c0_39 = arith.constant 0 : index
    %53 = vector.load %arg12[%c0_37, %c0_38, %c0_39] : memref<3x8x64xf32, #tpu.memory_space<vmem>>, vector<1x8x64xf32>
    %54 = vector.shape_cast %53 : vector<1x8x64xf32> to vector<8x64xf32>
    %55 = vector.shape_cast %49 : vector<8x64xf32> to vector<1x8x64xf32>
    tpu.vector_store %arg12[%c0_37, %c0_38, %c0_39], %55 {strides = array<i32>} : memref<3x8x64xf32, #tpu.memory_space<vmem>>, vector<1x8x64xf32>,
    %c0_40 = arith.constant 0 : index
    %c0_41 = arith.constant 0 : index
    %c0_42 = arith.constant 0 : index
    %56 = vector.load %arg4[%c0_40, %c0_41, %c0_42] : memref<2x64x256xf32, #tpu.memory_space<vmem>>, vector<1x64x256xf32>
    %57 = vector.shape_cast %56 : vector<1x64x256xf32> to vector<64x256xf32>
    %cst_43 = arith.constant dense<0.000000e+00> : vector<8x256xf32>
    %58 = tpu.matmul %49, %57, %cst_43 {dimension_numbers = #tpu.dot_dimension_numbers<[1], [0], [0], [1], [0, 0, 1, 1], [], []>} : vector<8x64xf32>, vector<64x256xf32>, vector<8x256xf32> -> vector<8x256xf32>
    %59 = arith.addf %58, %20 : vector<8x256xf32>
    %60 = vector.extract_strided_slice %59 {offsets = [0, 0], sizes = [8, 192], strides = [1, 1]} : vector<8x256xf32> to vector<8x192xf32>
    %61 = arith.negf %60 : vector<8x192xf32>
    %62 = math.exp %61 : vector<8x192xf32>
    %cst_44 = arith.constant 1.000000e+00 : f32
    %63 = vector.broadcast %cst_44 : f32 to vector<8x192xf32>
    %64 = arith.addf %63, %62 : vector<8x192xf32>
    %65 = arith.divf %63, %64 : vector<8x192xf32>
    %66 = vector.extract_strided_slice %59 {offsets = [0, 192], sizes = [8, 64], strides = [1, 1]} : vector<8x256xf32> to vector<8x64xf32>
    %67 = math.tanh %66 : vector<8x64xf32>
    %68 = vector.extract_strided_slice %65 {offsets = [0, 0], sizes = [8, 64], strides = [1, 1]} : vector<8x192xf32> to vector<8x64xf32>
    %69 = vector.extract_strided_slice %65 {offsets = [0, 64], sizes = [8, 64], strides = [1, 1]} : vector<8x192xf32> to vector<8x64xf32>
    %70 = vector.extract_strided_slice %65 {offsets = [0, 128], sizes = [8, 64], strides = [1, 1]} : vector<8x192xf32> to vector<8x64xf32>
    %c1_45 = arith.constant 1 : index
    %c0_46 = arith.constant 0 : index
    %c0_47 = arith.constant 0 : index
    %71 = vector.load %arg13[%c1_45, %c0_46, %c0_47] : memref<3x8x64xf32, #tpu.memory_space<vmem>>, vector<1x8x64xf32>
    %72 = vector.shape_cast %71 : vector<1x8x64xf32> to vector<8x64xf32>
    %73 = arith.mulf %69, %72 : vector<8x64xf32>
    %74 = arith.mulf %68, %67 : vector<8x64xf32>
    %75 = arith.addf %73, %74 : vector<8x64xf32>
    %76 = math.tanh %75 : vector<8x64xf32>
    %77 = arith.mulf %70, %76 : vector<8x64xf32>
    %c1_48 = arith.constant 1 : index
    %c0_49 = arith.constant 0 : index
    %c0_50 = arith.constant 0 : index
    %78 = vector.load %arg13[%c1_48, %c0_49, %c0_50] : memref<3x8x64xf32, #tpu.memory_space<vmem>>, vector<1x8x64xf32>
    %79 = vector.shape_cast %78 : vector<1x8x64xf32> to vector<8x64xf32>
    %80 = vector.shape_cast %75 : vector<8x64xf32> to vector<1x8x64xf32>
    tpu.vector_store %arg13[%c1_48, %c0_49, %c0_50], %80 {strides = array<i32>} : memref<3x8x64xf32, #tpu.memory_space<vmem>>, vector<1x8x64xf32>,
    %c1_51 = arith.constant 1 : index
    %c0_52 = arith.constant 0 : index
    %c0_53 = arith.constant 0 : index
    %81 = vector.load %arg12[%c1_51, %c0_52, %c0_53] : memref<3x8x64xf32, #tpu.memory_space<vmem>>, vector<1x8x64xf32>
    %82 = vector.shape_cast %81 : vector<1x8x64xf32> to vector<8x64xf32>
    %83 = vector.shape_cast %77 : vector<8x64xf32> to vector<1x8x64xf32>
    tpu.vector_store %arg12[%c1_51, %c0_52, %c0_53], %83 {strides = array<i32>} : memref<3x8x64xf32, #tpu.memory_space<vmem>>, vector<1x8x64xf32>,
    %c1_54 = arith.constant 1 : index
    %c0_55 = arith.constant 0 : index
    %c0_56 = arith.constant 0 : index
    %84 = vector.load %arg4[%c1_54, %c0_55, %c0_56] : memref<2x64x256xf32, #tpu.memory_space<vmem>>, vector<1x64x256xf32>
    %85 = vector.shape_cast %84 : vector<1x64x256xf32> to vector<64x256xf32>
    %cst_57 = arith.constant dense<0.000000e+00> : vector<8x256xf32>
    %86 = tpu.matmul %77, %85, %cst_57 {dimension_numbers = #tpu.dot_dimension_numbers<[1], [0], [0], [1], [0, 0, 1, 1], [], []>} : vector<8x64xf32>, vector<64x256xf32>, vector<8x256xf32> -> vector<8x256xf32>
    %87 = arith.addf %86, %28 : vector<8x256xf32>
    %88 = vector.extract_strided_slice %87 {offsets = [0, 0], sizes = [8, 192], strides = [1, 1]} : vector<8x256xf32> to vector<8x192xf32>
    %89 = arith.negf %88 : vector<8x192xf32>
    %90 = math.exp %89 : vector<8x192xf32>
    %cst_58 = arith.constant 1.000000e+00 : f32
    %91 = vector.broadcast %cst_58 : f32 to vector<8x192xf32>
    %92 = arith.addf %91, %90 : vector<8x192xf32>
    %93 = arith.divf %91, %92 : vector<8x192xf32>
    %94 = vector.extract_strided_slice %87 {offsets = [0, 192], sizes = [8, 64], strides = [1, 1]} : vector<8x256xf32> to vector<8x64xf32>
    %95 = math.tanh %94 : vector<8x64xf32>
    %96 = vector.extract_strided_slice %93 {offsets = [0, 0], sizes = [8, 64], strides = [1, 1]} : vector<8x192xf32> to vector<8x64xf32>
    %97 = vector.extract_strided_slice %93 {offsets = [0, 64], sizes = [8, 64], strides = [1, 1]} : vector<8x192xf32> to vector<8x64xf32>
    %98 = vector.extract_strided_slice %93 {offsets = [0, 128], sizes = [8, 64], strides = [1, 1]} : vector<8x192xf32> to vector<8x64xf32>
    %c2_59 = arith.constant 2 : index
    %c0_60 = arith.constant 0 : index
    %c0_61 = arith.constant 0 : index
    %99 = vector.load %arg13[%c2_59, %c0_60, %c0_61] : memref<3x8x64xf32, #tpu.memory_space<vmem>>, vector<1x8x64xf32>
    %100 = vector.shape_cast %99 : vector<1x8x64xf32> to vector<8x64xf32>
    %101 = arith.mulf %97, %100 : vector<8x64xf32>
    %102 = arith.mulf %96, %95 : vector<8x64xf32>
    %103 = arith.addf %101, %102 : vector<8x64xf32>
    %104 = math.tanh %103 : vector<8x64xf32>
    %105 = arith.mulf %98, %104 : vector<8x64xf32>
    %c2_62 = arith.constant 2 : index
    %c0_63 = arith.constant 0 : index
    %c0_64 = arith.constant 0 : index
    %106 = vector.load %arg13[%c2_62, %c0_63, %c0_64] : memref<3x8x64xf32, #tpu.memory_space<vmem>>, vector<1x8x64xf32>
    %107 = vector.shape_cast %106 : vector<1x8x64xf32> to vector<8x64xf32>
    %108 = vector.shape_cast %103 : vector<8x64xf32> to vector<1x8x64xf32>
    tpu.vector_store %arg13[%c2_62, %c0_63, %c0_64], %108 {strides = array<i32>} : memref<3x8x64xf32, #tpu.memory_space<vmem>>, vector<1x8x64xf32>,
    %c2_65 = arith.constant 2 : index
    %c0_66 = arith.constant 0 : index
    %c0_67 = arith.constant 0 : index
    %109 = vector.load %arg12[%c2_65, %c0_66, %c0_67] : memref<3x8x64xf32, #tpu.memory_space<vmem>>, vector<1x8x64xf32>
    %110 = vector.shape_cast %109 : vector<1x8x64xf32> to vector<8x64xf32>
    %111 = vector.shape_cast %105 : vector<8x64xf32> to vector<1x8x64xf32>
    tpu.vector_store %arg12[%c2_65, %c0_66, %c0_67], %111 {strides = array<i32>} : memref<3x8x64xf32, #tpu.memory_space<vmem>>, vector<1x8x64xf32>,
    %c0_68 = arith.constant 0 : index
    %c0_69 = arith.constant 0 : index
    %c0_70 = arith.constant 0 : index
    %112 = vector.load %arg14[%c0_68, %c0_69, %c0_70] : memref<8x8x64xf32, #tpu.memory_space<vmem>>, vector<1x8x64xf32>
    %113 = vector.shape_cast %112 : vector<1x8x64xf32> to vector<8x64xf32>
    %114 = vector.shape_cast %105 : vector<8x64xf32> to vector<1x8x64xf32>
    tpu.vector_store %arg14[%c0_68, %c0_69, %c0_70], %114 {strides = array<i32>} : memref<8x8x64xf32, #tpu.memory_space<vmem>>, vector<1x8x64xf32>,
    %c1_71 = arith.constant 1 : index
    %c0_72 = arith.constant 0 : index
    %c0_73 = arith.constant 0 : index
    %115 = vector.load %arg2[%c1_71, %c0_72, %c0_73] : memref<8x8x10xf32, #tpu.memory_space<vmem>>, vector<1x8x10xf32>
    %116 = vector.shape_cast %115 : vector<1x8x10xf32> to vector<8x10xf32>
    %c0_74 = arith.constant 0 : index
    %c0_75 = arith.constant 0 : index
    %c0_76 = arith.constant 0 : index
    %117 = vector.load %arg12[%c0_74, %c0_75, %c0_76] : memref<3x8x64xf32, #tpu.memory_space<vmem>>, vector<1x8x64xf32>
    %118 = vector.shape_cast %117 : vector<1x8x64xf32> to vector<8x64xf32>
    %c0_77 = arith.constant 0 : index
    %c0_78 = arith.constant 0 : index
    %c0_79 = arith.constant 0 : index
    %119 = vector.load %arg5[%c0_77, %c0_78, %c0_79] : memref<3x64x256xf32, #tpu.memory_space<vmem>>, vector<1x64x256xf32>
    %120 = vector.shape_cast %119 : vector<1x64x256xf32> to vector<64x256xf32>
    %cst_80 = arith.constant dense<0.000000e+00> : vector<8x256xf32>
    %121 = tpu.matmul %118, %120, %cst_80 {dimension_numbers = #tpu.dot_dimension_numbers<[1], [0], [0], [1], [0, 0, 1, 1], [], []>} : vector<8x64xf32>, vector<64x256xf32>, vector<8x256xf32> -> vector<8x256xf32>
    %c0_81 = arith.constant 0 : index
    %c0_82 = arith.constant 0 : index
    %122 = vector.load %arg6[%c0_81, %c0_82] : memref<3x256xf32, #tpu.memory_space<vmem>>, vector<1x256xf32>
    %123 = vector.broadcast %122 : vector<1x256xf32> to vector<8x256xf32>
    %124 = arith.addf %121, %123 : vector<8x256xf32>
    %c1_83 = arith.constant 1 : index
    %c0_84 = arith.constant 0 : index
    %c0_85 = arith.constant 0 : index
    %125 = vector.load %arg12[%c1_83, %c0_84, %c0_85] : memref<3x8x64xf32, #tpu.memory_space<vmem>>, vector<1x8x64xf32>
    %126 = vector.shape_cast %125 : vector<1x8x64xf32> to vector<8x64xf32>
    %c1_86 = arith.constant 1 : index
    %c0_87 = arith.constant 0 : index
    %c0_88 = arith.constant 0 : index
    %127 = vector.load %arg5[%c1_86, %c0_87, %c0_88] : memref<3x64x256xf32, #tpu.memory_space<vmem>>, vector<1x64x256xf32>
    %128 = vector.shape_cast %127 : vector<1x64x256xf32> to vector<64x256xf32>
    %cst_89 = arith.constant dense<0.000000e+00> : vector<8x256xf32>
    %129 = tpu.matmul %126, %128, %cst_89 {dimension_numbers = #tpu.dot_dimension_numbers<[1], [0], [0], [1], [0, 0, 1, 1], [], []>} : vector<8x64xf32>, vector<64x256xf32>, vector<8x256xf32> -> vector<8x256xf32>
    %c1_90 = arith.constant 1 : index
    %c0_91 = arith.constant 0 : index
    %130 = vector.load %arg6[%c1_90, %c0_91] : memref<3x256xf32, #tpu.memory_space<vmem>>, vector<1x256xf32>
    %131 = vector.broadcast %130 : vector<1x256xf32> to vector<8x256xf32>
    %132 = arith.addf %129, %131 : vector<8x256xf32>
    %c2_92 = arith.constant 2 : index
    %c0_93 = arith.constant 0 : index
    %c0_94 = arith.constant 0 : index
    %133 = vector.load %arg12[%c2_92, %c0_93, %c0_94] : memref<3x8x64xf32, #tpu.memory_space<vmem>>, vector<1x8x64xf32>
    %134 = vector.shape_cast %133 : vector<1x8x64xf32> to vector<8x64xf32>
    %c2_95 = arith.constant 2 : index
    %c0_96 = arith.constant 0 : index
    %c0_97 = arith.constant 0 : index
    %135 = vector.load %arg5[%c2_95, %c0_96, %c0_97] : memref<3x64x256xf32, #tpu.memory_space<vmem>>, vector<1x64x256xf32>
    %136 = vector.shape_cast %135 : vector<1x64x256xf32> to vector<64x256xf32>
    %cst_98 = arith.constant dense<0.000000e+00> : vector<8x256xf32>
    %137 = tpu.matmul %134, %136, %cst_98 {dimension_numbers = #tpu.dot_dimension_numbers<[1], [0], [0], [1], [0, 0, 1, 1], [], []>} : vector<8x64xf32>, vector<64x256xf32>, vector<8x256xf32> -> vector<8x256xf32>
    %c2_99 = arith.constant 2 : index
    %c0_100 = arith.constant 0 : index
    %138 = vector.load %arg6[%c2_99, %c0_100] : memref<3x256xf32, #tpu.memory_space<vmem>>, vector<1x256xf32>
    %139 = vector.broadcast %138 : vector<1x256xf32> to vector<8x256xf32>
    %140 = arith.addf %137, %139 : vector<8x256xf32>
    %c0_101 = arith.constant 0 : index
    %c0_102 = arith.constant 0 : index
    %141 = vector.load %arg3[%c0_101, %c0_102] : memref<10x256xf32, #tpu.memory_space<vmem>>, vector<10x256xf32>
    %cst_103 = arith.constant dense<0.000000e+00> : vector<8x256xf32>
    %142 = tpu.matmul %116, %141, %cst_103 {dimension_numbers = #tpu.dot_dimension_numbers<[1], [0], [0], [1], [0, 0, 1, 1], [], []>} : vector<8x10xf32>, vector<10x256xf32>, vector<8x256xf32> -> vector<8x256xf32>
    %143 = arith.addf %142, %124 : vector<8x256xf32>
    %144 = vector.extract_strided_slice %143 {offsets = [0, 0], sizes = [8, 192], strides = [1, 1]} : vector<8x256xf32> to vector<8x192xf32>
    %145 = arith.negf %144 : vector<8x192xf32>
    %146 = math.exp %145 : vector<8x192xf32>
    %cst_104 = arith.constant 1.000000e+00 : f32
    %147 = vector.broadcast %cst_104 : f32 to vector<8x192xf32>
    %148 = arith.addf %147, %146 : vector<8x192xf32>
    %149 = arith.divf %147, %148 : vector<8x192xf32>
    %150 = vector.extract_strided_slice %143 {offsets = [0, 192], sizes = [8, 64], strides = [1, 1]} : vector<8x256xf32> to vector<8x64xf32>
    %151 = math.tanh %150 : vector<8x64xf32>
    %152 = vector.extract_strided_slice %149 {offsets = [0, 0], sizes = [8, 64], strides = [1, 1]} : vector<8x192xf32> to vector<8x64xf32>
    %153 = vector.extract_strided_slice %149 {offsets = [0, 64], sizes = [8, 64], strides = [1, 1]} : vector<8x192xf32> to vector<8x64xf32>
    %154 = vector.extract_strided_slice %149 {offsets = [0, 128], sizes = [8, 64], strides = [1, 1]} : vector<8x192xf32> to vector<8x64xf32>
    %c0_105 = arith.constant 0 : index
    %c0_106 = arith.constant 0 : index
    %c0_107 = arith.constant 0 : index
    %155 = vector.load %arg13[%c0_105, %c0_106, %c0_107] : memref<3x8x64xf32, #tpu.memory_space<vmem>>, vector<1x8x64xf32>
    %156 = vector.shape_cast %155 : vector<1x8x64xf32> to vector<8x64xf32>
    %157 = arith.mulf %153, %156 : vector<8x64xf32>
    %158 = arith.mulf %152, %151 : vector<8x64xf32>
    %159 = arith.addf %157, %158 : vector<8x64xf32>
    %160 = math.tanh %159 : vector<8x64xf32>
    %161 = arith.mulf %154, %160 : vector<8x64xf32>
    %c0_108 = arith.constant 0 : index
    %c0_109 = arith.constant 0 : index
    %c0_110 = arith.constant 0 : index
    %162 = vector.load %arg13[%c0_108, %c0_109, %c0_110] : memref<3x8x64xf32, #tpu.memory_space<vmem>>, vector<1x8x64xf32>
    %163 = vector.shape_cast %162 : vector<1x8x64xf32> to vector<8x64xf32>
    %164 = vector.shape_cast %159 : vector<8x64xf32> to vector<1x8x64xf32>
    tpu.vector_store %arg13[%c0_108, %c0_109, %c0_110], %164 {strides = array<i32>} : memref<3x8x64xf32, #tpu.memory_space<vmem>>, vector<1x8x64xf32>,
    %c0_111 = arith.constant 0 : index
    %c0_112 = arith.constant 0 : index
    %c0_113 = arith.constant 0 : index
    %165 = vector.load %arg12[%c0_111, %c0_112, %c0_113] : memref<3x8x64xf32, #tpu.memory_space<vmem>>, vector<1x8x64xf32>
    %166 = vector.shape_cast %165 : vector<1x8x64xf32> to vector<8x64xf32>
    %167 = vector.shape_cast %161 : vector<8x64xf32> to vector<1x8x64xf32>
    tpu.vector_store %arg12[%c0_111, %c0_112, %c0_113], %167 {strides = array<i32>} : memref<3x8x64xf32, #tpu.memory_space<vmem>>, vector<1x8x64xf32>,
    %c0_114 = arith.constant 0 : index
    %c0_115 = arith.constant 0 : index
    %c0_116 = arith.constant 0 : index
    %168 = vector.load %arg4[%c0_114, %c0_115, %c0_116] : memref<2x64x256xf32, #tpu.memory_space<vmem>>, vector<1x64x256xf32>
    %169 = vector.shape_cast %168 : vector<1x64x256xf32> to vector<64x256xf32>
    %cst_117 = arith.constant dense<0.000000e+00> : vector<8x256xf32>
    %170 = tpu.matmul %161, %169, %cst_117 {dimension_numbers = #tpu.dot_dimension_numbers<[1], [0], [0], [1], [0, 0, 1, 1], [], []>} : vector<8x64xf32>, vector<64x256xf32>, vector<8x256xf32> -> vector<8x256xf32>
    %171 = arith.addf %170, %132 : vector<8x256xf32>
    %172 = vector.extract_strided_slice %171 {offsets = [0, 0], sizes = [8, 192], strides = [1, 1]} : vector<8x256xf32> to vector<8x192xf32>
    %173 = arith.negf %172 : vector<8x192xf32>
    %174 = math.exp %173 : vector<8x192xf32>
    %cst_118 = arith.constant 1.000000e+00 : f32
    %175 = vector.broadcast %cst_118 : f32 to vector<8x192xf32>
    %176 = arith.addf %175, %174 : vector<8x192xf32>
    %177 = arith.divf %175, %176 : vector<8x192xf32>
    %178 = vector.extract_strided_slice %171 {offsets = [0, 192], sizes = [8, 64], strides = [1, 1]} : vector<8x256xf32> to vector<8x64xf32>
    %179 = math.tanh %178 : vector<8x64xf32>
    %180 = vector.extract_strided_slice %177 {offsets = [0, 0], sizes = [8, 64], strides = [1, 1]} : vector<8x192xf32> to vector<8x64xf32>
    %181 = vector.extract_strided_slice %177 {offsets = [0, 64], sizes = [8, 64], strides = [1, 1]} : vector<8x192xf32> to vector<8x64xf32>
    %182 = vector.extract_strided_slice %177 {offsets = [0, 128], sizes = [8, 64], strides = [1, 1]} : vector<8x192xf32> to vector<8x64xf32>
    %c1_119 = arith.constant 1 : index
    %c0_120 = arith.constant 0 : index
    %c0_121 = arith.constant 0 : index
    %183 = vector.load %arg13[%c1_119, %c0_120, %c0_121] : memref<3x8x64xf32, #tpu.memory_space<vmem>>, vector<1x8x64xf32>
    %184 = vector.shape_cast %183 : vector<1x8x64xf32> to vector<8x64xf32>
    %185 = arith.mulf %181, %184 : vector<8x64xf32>
    %186 = arith.mulf %180, %179 : vector<8x64xf32>
    %187 = arith.addf %185, %186 : vector<8x64xf32>
    %188 = math.tanh %187 : vector<8x64xf32>
    %189 = arith.mulf %182, %188 : vector<8x64xf32>
    %c1_122 = arith.constant 1 : index
    %c0_123 = arith.constant 0 : index
    %c0_124 = arith.constant 0 : index
    %190 = vector.load %arg13[%c1_122, %c0_123, %c0_124] : memref<3x8x64xf32, #tpu.memory_space<vmem>>, vector<1x8x64xf32>
    %191 = vector.shape_cast %190 : vector<1x8x64xf32> to vector<8x64xf32>
    %192 = vector.shape_cast %187 : vector<8x64xf32> to vector<1x8x64xf32>
    tpu.vector_store %arg13[%c1_122, %c0_123, %c0_124], %192 {strides = array<i32>} : memref<3x8x64xf32, #tpu.memory_space<vmem>>, vector<1x8x64xf32>,
    %c1_125 = arith.constant 1 : index
    %c0_126 = arith.constant 0 : index
    %c0_127 = arith.constant 0 : index
    %193 = vector.load %arg12[%c1_125, %c0_126, %c0_127] : memref<3x8x64xf32, #tpu.memory_space<vmem>>, vector<1x8x64xf32>
    %194 = vector.shape_cast %193 : vector<1x8x64xf32> to vector<8x64xf32>
    %195 = vector.shape_cast %189 : vector<8x64xf32> to vector<1x8x64xf32>
    tpu.vector_store %arg12[%c1_125, %c0_126, %c0_127], %195 {strides = array<i32>} : memref<3x8x64xf32, #tpu.memory_space<vmem>>, vector<1x8x64xf32>,
    %c1_128 = arith.constant 1 : index
    %c0_129 = arith.constant 0 : index
    %c0_130 = arith.constant 0 : index
    %196 = vector.load %arg4[%c1_128, %c0_129, %c0_130] : memref<2x64x256xf32, #tpu.memory_space<vmem>>, vector<1x64x256xf32>
    %197 = vector.shape_cast %196 : vector<1x64x256xf32> to vector<64x256xf32>
    %cst_131 = arith.constant dense<0.000000e+00> : vector<8x256xf32>
    %198 = tpu.matmul %189, %197, %cst_131 {dimension_numbers = #tpu.dot_dimension_numbers<[1], [0], [0], [1], [0, 0, 1, 1], [], []>} : vector<8x64xf32>, vector<64x256xf32>, vector<8x256xf32> -> vector<8x256xf32>
    %199 = arith.addf %198, %140 : vector<8x256xf32>
    %200 = vector.extract_strided_slice %199 {offsets = [0, 0], sizes = [8, 192], strides = [1, 1]} : vector<8x256xf32> to vector<8x192xf32>
    %201 = arith.negf %200 : vector<8x192xf32>
    %202 = math.exp %201 : vector<8x192xf32>
    %cst_132 = arith.constant 1.000000e+00 : f32
    %203 = vector.broadcast %cst_132 : f32 to vector<8x192xf32>
    %204 = arith.addf %203, %202 : vector<8x192xf32>
    %205 = arith.divf %203, %204 : vector<8x192xf32>
    %206 = vector.extract_strided_slice %199 {offsets = [0, 192], sizes = [8, 64], strides = [1, 1]} : vector<8x256xf32> to vector<8x64xf32>
    %207 = math.tanh %206 : vector<8x64xf32>
    %208 = vector.extract_strided_slice %205 {offsets = [0, 0], sizes = [8, 64], strides = [1, 1]} : vector<8x192xf32> to vector<8x64xf32>
    %209 = vector.extract_strided_slice %205 {offsets = [0, 64], sizes = [8, 64], strides = [1, 1]} : vector<8x192xf32> to vector<8x64xf32>
    %210 = vector.extract_strided_slice %205 {offsets = [0, 128], sizes = [8, 64], strides = [1, 1]} : vector<8x192xf32> to vector<8x64xf32>
    %c2_133 = arith.constant 2 : index
    %c0_134 = arith.constant 0 : index
    %c0_135 = arith.constant 0 : index
    %211 = vector.load %arg13[%c2_133, %c0_134, %c0_135] : memref<3x8x64xf32, #tpu.memory_space<vmem>>, vector<1x8x64xf32>
    %212 = vector.shape_cast %211 : vector<1x8x64xf32> to vector<8x64xf32>
    %213 = arith.mulf %209, %212 : vector<8x64xf32>
    %214 = arith.mulf %208, %207 : vector<8x64xf32>
    %215 = arith.addf %213, %214 : vector<8x64xf32>
    %216 = math.tanh %215 : vector<8x64xf32>
    %217 = arith.mulf %210, %216 : vector<8x64xf32>
    %c2_136 = arith.constant 2 : index
    %c0_137 = arith.constant 0 : index
    %c0_138 = arith.constant 0 : index
    %218 = vector.load %arg13[%c2_136, %c0_137, %c0_138] : memref<3x8x64xf32, #tpu.memory_space<vmem>>, vector<1x8x64xf32>
    %219 = vector.shape_cast %218 : vector<1x8x64xf32> to vector<8x64xf32>
    %220 = vector.shape_cast %215 : vector<8x64xf32> to vector<1x8x64xf32>
    tpu.vector_store %arg13[%c2_136, %c0_137, %c0_138], %220 {strides = array<i32>} : memref<3x8x64xf32, #tpu.memory_space<vmem>>, vector<1x8x64xf32>,
    %c2_139 = arith.constant 2 : index
    %c0_140 = arith.constant 0 : index
    %c0_141 = arith.constant 0 : index
    %221 = vector.load %arg12[%c2_139, %c0_140, %c0_141] : memref<3x8x64xf32, #tpu.memory_space<vmem>>, vector<1x8x64xf32>
    %222 = vector.shape_cast %221 : vector<1x8x64xf32> to vector<8x64xf32>
    %223 = vector.shape_cast %217 : vector<8x64xf32> to vector<1x8x64xf32>
    tpu.vector_store %arg12[%c2_139, %c0_140, %c0_141], %223 {strides = array<i32>} : memref<3x8x64xf32, #tpu.memory_space<vmem>>, vector<1x8x64xf32>,
    %c1_142 = arith.constant 1 : index
    %c0_143 = arith.constant 0 : index
    %c0_144 = arith.constant 0 : index
    %224 = vector.load %arg14[%c1_142, %c0_143, %c0_144] : memref<8x8x64xf32, #tpu.memory_space<vmem>>, vector<1x8x64xf32>
    %225 = vector.shape_cast %224 : vector<1x8x64xf32> to vector<8x64xf32>
    %226 = vector.shape_cast %217 : vector<8x64xf32> to vector<1x8x64xf32>
    tpu.vector_store %arg14[%c1_142, %c0_143, %c0_144], %226 {strides = array<i32>} : memref<8x8x64xf32, #tpu.memory_space<vmem>>, vector<1x8x64xf32>,
    %c2_145 = arith.constant 2 : index
    %c0_146 = arith.constant 0 : index
    %c0_147 = arith.constant 0 : index
    %227 = vector.load %arg2[%c2_145, %c0_146, %c0_147] : memref<8x8x10xf32, #tpu.memory_space<vmem>>, vector<1x8x10xf32>
    %228 = vector.shape_cast %227 : vector<1x8x10xf32> to vector<8x10xf32>
    %c0_148 = arith.constant 0 : index
    %c0_149 = arith.constant 0 : index
    %c0_150 = arith.constant 0 : index
    %229 = vector.load %arg12[%c0_148, %c0_149, %c0_150] : memref<3x8x64xf32, #tpu.memory_space<vmem>>, vector<1x8x64xf32>
    %230 = vector.shape_cast %229 : vector<1x8x64xf32> to vector<8x64xf32>
    %c0_151 = arith.constant 0 : index
    %c0_152 = arith.constant 0 : index
    %c0_153 = arith.constant 0 : index
    %231 = vector.load %arg5[%c0_151, %c0_152, %c0_153] : memref<3x64x256xf32, #tpu.memory_space<vmem>>, vector<1x64x256xf32>
    %232 = vector.shape_cast %231 : vector<1x64x256xf32> to vector<64x256xf32>
    %cst_154 = arith.constant dense<0.000000e+00> : vector<8x256xf32>
    %233 = tpu.matmul %230, %232, %cst_154 {dimension_numbers = #tpu.dot_dimension_numbers<[1], [0], [0], [1], [0, 0, 1, 1], [], []>} : vector<8x64xf32>, vector<64x256xf32>, vector<8x256xf32> -> vector<8x256xf32>
    %c0_155 = arith.constant 0 : index
    %c0_156 = arith.constant 0 : index
    %234 = vector.load %arg6[%c0_155, %c0_156] : memref<3x256xf32, #tpu.memory_space<vmem>>, vector<1x256xf32>
    %235 = vector.broadcast %234 : vector<1x256xf32> to vector<8x256xf32>
    %236 = arith.addf %233, %235 : vector<8x256xf32>
    %c1_157 = arith.constant 1 : index
    %c0_158 = arith.constant 0 : index
    %c0_159 = arith.constant 0 : index
    %237 = vector.load %arg12[%c1_157, %c0_158, %c0_159] : memref<3x8x64xf32, #tpu.memory_space<vmem>>, vector<1x8x64xf32>
    %238 = vector.shape_cast %237 : vector<1x8x64xf32> to vector<8x64xf32>
    %c1_160 = arith.constant 1 : index
    %c0_161 = arith.constant 0 : index
    %c0_162 = arith.constant 0 : index
    %239 = vector.load %arg5[%c1_160, %c0_161, %c0_162] : memref<3x64x256xf32, #tpu.memory_space<vmem>>, vector<1x64x256xf32>
    %240 = vector.shape_cast %239 : vector<1x64x256xf32> to vector<64x256xf32>
    %cst_163 = arith.constant dense<0.000000e+00> : vector<8x256xf32>
    %241 = tpu.matmul %238, %240, %cst_163 {dimension_numbers = #tpu.dot_dimension_numbers<[1], [0], [0], [1], [0, 0, 1, 1], [], []>} : vector<8x64xf32>, vector<64x256xf32>, vector<8x256xf32> -> vector<8x256xf32>
    %c1_164 = arith.constant 1 : index
    %c0_165 = arith.constant 0 : index
    %242 = vector.load %arg6[%c1_164, %c0_165] : memref<3x256xf32, #tpu.memory_space<vmem>>, vector<1x256xf32>
    %243 = vector.broadcast %242 : vector<1x256xf32> to vector<8x256xf32>
    %244 = arith.addf %241, %243 : vector<8x256xf32>
    %c2_166 = arith.constant 2 : index
    %c0_167 = arith.constant 0 : index
    %c0_168 = arith.constant 0 : index
    %245 = vector.load %arg12[%c2_166, %c0_167, %c0_168] : memref<3x8x64xf32, #tpu.memory_space<vmem>>, vector<1x8x64xf32>
    %246 = vector.shape_cast %245 : vector<1x8x64xf32> to vector<8x64xf32>
    %c2_169 = arith.constant 2 : index
    %c0_170 = arith.constant 0 : index
    %c0_171 = arith.constant 0 : index
    %247 = vector.load %arg5[%c2_169, %c0_170, %c0_171] : memref<3x64x256xf32, #tpu.memory_space<vmem>>, vector<1x64x256xf32>
    %248 = vector.shape_cast %247 : vector<1x64x256xf32> to vector<64x256xf32>
    %cst_172 = arith.constant dense<0.000000e+00> : vector<8x256xf32>
    %249 = tpu.matmul %246, %248, %cst_172 {dimension_numbers = #tpu.dot_dimension_numbers<[1], [0], [0], [1], [0, 0, 1, 1], [], []>} : vector<8x64xf32>, vector<64x256xf32>, vector<8x256xf32> -> vector<8x256xf32>
    %c2_173 = arith.constant 2 : index
    %c0_174 = arith.constant 0 : index
    %250 = vector.load %arg6[%c2_173, %c0_174] : memref<3x256xf32, #tpu.memory_space<vmem>>, vector<1x256xf32>
    %251 = vector.broadcast %250 : vector<1x256xf32> to vector<8x256xf32>
    %252 = arith.addf %249, %251 : vector<8x256xf32>
    %c0_175 = arith.constant 0 : index
    %c0_176 = arith.constant 0 : index
    %253 = vector.load %arg3[%c0_175, %c0_176] : memref<10x256xf32, #tpu.memory_space<vmem>>, vector<10x256xf32>
    %cst_177 = arith.constant dense<0.000000e+00> : vector<8x256xf32>
    %254 = tpu.matmul %228, %253, %cst_177 {dimension_numbers = #tpu.dot_dimension_numbers<[1], [0], [0], [1], [0, 0, 1, 1], [], []>} : vector<8x10xf32>, vector<10x256xf32>, vector<8x256xf32> -> vector<8x256xf32>
    %255 = arith.addf %254, %236 : vector<8x256xf32>
    %256 = vector.extract_strided_slice %255 {offsets = [0, 0], sizes = [8, 192], strides = [1, 1]} : vector<8x256xf32> to vector<8x192xf32>
    %257 = arith.negf %256 : vector<8x192xf32>
    %258 = math.exp %257 : vector<8x192xf32>
    %cst_178 = arith.constant 1.000000e+00 : f32
    %259 = vector.broadcast %cst_178 : f32 to vector<8x192xf32>
    %260 = arith.addf %259, %258 : vector<8x192xf32>
    %261 = arith.divf %259, %260 : vector<8x192xf32>
    %262 = vector.extract_strided_slice %255 {offsets = [0, 192], sizes = [8, 64], strides = [1, 1]} : vector<8x256xf32> to vector<8x64xf32>
    %263 = math.tanh %262 : vector<8x64xf32>
    %264 = vector.extract_strided_slice %261 {offsets = [0, 0], sizes = [8, 64], strides = [1, 1]} : vector<8x192xf32> to vector<8x64xf32>
    %265 = vector.extract_strided_slice %261 {offsets = [0, 64], sizes = [8, 64], strides = [1, 1]} : vector<8x192xf32> to vector<8x64xf32>
    %266 = vector.extract_strided_slice %261 {offsets = [0, 128], sizes = [8, 64], strides = [1, 1]} : vector<8x192xf32> to vector<8x64xf32>
    %c0_179 = arith.constant 0 : index
    %c0_180 = arith.constant 0 : index
    %c0_181 = arith.constant 0 : index
    %267 = vector.load %arg13[%c0_179, %c0_180, %c0_181] : memref<3x8x64xf32, #tpu.memory_space<vmem>>, vector<1x8x64xf32>
    %268 = vector.shape_cast %267 : vector<1x8x64xf32> to vector<8x64xf32>
    %269 = arith.mulf %265, %268 : vector<8x64xf32>
    %270 = arith.mulf %264, %263 : vector<8x64xf32>
    %271 = arith.addf %269, %270 : vector<8x64xf32>
    %272 = math.tanh %271 : vector<8x64xf32>
    %273 = arith.mulf %266, %272 : vector<8x64xf32>
    %c0_182 = arith.constant 0 : index
    %c0_183 = arith.constant 0 : index
    %c0_184 = arith.constant 0 : index
    %274 = vector.load %arg13[%c0_182, %c0_183, %c0_184] : memref<3x8x64xf32, #tpu.memory_space<vmem>>, vector<1x8x64xf32>
    %275 = vector.shape_cast %274 : vector<1x8x64xf32> to vector<8x64xf32>
    %276 = vector.shape_cast %271 : vector<8x64xf32> to vector<1x8x64xf32>
    tpu.vector_store %arg13[%c0_182, %c0_183, %c0_184], %276 {strides = array<i32>} : memref<3x8x64xf32, #tpu.memory_space<vmem>>, vector<1x8x64xf32>,
    %c0_185 = arith.constant 0 : index
    %c0_186 = arith.constant 0 : index
    %c0_187 = arith.constant 0 : index
    %277 = vector.load %arg12[%c0_185, %c0_186, %c0_187] : memref<3x8x64xf32, #tpu.memory_space<vmem>>, vector<1x8x64xf32>
    %278 = vector.shape_cast %277 : vector<1x8x64xf32> to vector<8x64xf32>
    %279 = vector.shape_cast %273 : vector<8x64xf32> to vector<1x8x64xf32>
    tpu.vector_store %arg12[%c0_185, %c0_186, %c0_187], %279 {strides = array<i32>} : memref<3x8x64xf32, #tpu.memory_space<vmem>>, vector<1x8x64xf32>,
    %c0_188 = arith.constant 0 : index
    %c0_189 = arith.constant 0 : index
    %c0_190 = arith.constant 0 : index
    %280 = vector.load %arg4[%c0_188, %c0_189, %c0_190] : memref<2x64x256xf32, #tpu.memory_space<vmem>>, vector<1x64x256xf32>
    %281 = vector.shape_cast %280 : vector<1x64x256xf32> to vector<64x256xf32>
    %cst_191 = arith.constant dense<0.000000e+00> : vector<8x256xf32>
    %282 = tpu.matmul %273, %281, %cst_191 {dimension_numbers = #tpu.dot_dimension_numbers<[1], [0], [0], [1], [0, 0, 1, 1], [], []>} : vector<8x64xf32>, vector<64x256xf32>, vector<8x256xf32> -> vector<8x256xf32>
    %283 = arith.addf %282, %244 : vector<8x256xf32>
    %284 = vector.extract_strided_slice %283 {offsets = [0, 0], sizes = [8, 192], strides = [1, 1]} : vector<8x256xf32> to vector<8x192xf32>
    %285 = arith.negf %284 : vector<8x192xf32>
    %286 = math.exp %285 : vector<8x192xf32>
    %cst_192 = arith.constant 1.000000e+00 : f32
    %287 = vector.broadcast %cst_192 : f32 to vector<8x192xf32>
    %288 = arith.addf %287, %286 : vector<8x192xf32>
    %289 = arith.divf %287, %288 : vector<8x192xf32>
    %290 = vector.extract_strided_slice %283 {offsets = [0, 192], sizes = [8, 64], strides = [1, 1]} : vector<8x256xf32> to vector<8x64xf32>
    %291 = math.tanh %290 : vector<8x64xf32>
    %292 = vector.extract_strided_slice %289 {offsets = [0, 0], sizes = [8, 64], strides = [1, 1]} : vector<8x192xf32> to vector<8x64xf32>
    %293 = vector.extract_strided_slice %289 {offsets = [0, 64], sizes = [8, 64], strides = [1, 1]} : vector<8x192xf32> to vector<8x64xf32>
    %294 = vector.extract_strided_slice %289 {offsets = [0, 128], sizes = [8, 64], strides = [1, 1]} : vector<8x192xf32> to vector<8x64xf32>
    %c1_193 = arith.constant 1 : index
    %c0_194 = arith.constant 0 : index
    %c0_195 = arith.constant 0 : index
    %295 = vector.load %arg13[%c1_193, %c0_194, %c0_195] : memref<3x8x64xf32, #tpu.memory_space<vmem>>, vector<1x8x64xf32>
    %296 = vector.shape_cast %295 : vector<1x8x64xf32> to vector<8x64xf32>
    %297 = arith.mulf %293, %296 : vector<8x64xf32>
    %298 = arith.mulf %292, %291 : vector<8x64xf32>
    %299 = arith.addf %297, %298 : vector<8x64xf32>
    %300 = math.tanh %299 : vector<8x64xf32>
    %301 = arith.mulf %294, %300 : vector<8x64xf32>
    %c1_196 = arith.constant 1 : index
    %c0_197 = arith.constant 0 : index
    %c0_198 = arith.constant 0 : index
    %302 = vector.load %arg13[%c1_196, %c0_197, %c0_198] : memref<3x8x64xf32, #tpu.memory_space<vmem>>, vector<1x8x64xf32>
    %303 = vector.shape_cast %302 : vector<1x8x64xf32> to vector<8x64xf32>
    %304 = vector.shape_cast %299 : vector<8x64xf32> to vector<1x8x64xf32>
    tpu.vector_store %arg13[%c1_196, %c0_197, %c0_198], %304 {strides = array<i32>} : memref<3x8x64xf32, #tpu.memory_space<vmem>>, vector<1x8x64xf32>,
    %c1_199 = arith.constant 1 : index
    %c0_200 = arith.constant 0 : index
    %c0_201 = arith.constant 0 : index
    %305 = vector.load %arg12[%c1_199, %c0_200, %c0_201] : memref<3x8x64xf32, #tpu.memory_space<vmem>>, vector<1x8x64xf32>
    %306 = vector.shape_cast %305 : vector<1x8x64xf32> to vector<8x64xf32>
    %307 = vector.shape_cast %301 : vector<8x64xf32> to vector<1x8x64xf32>
    tpu.vector_store %arg12[%c1_199, %c0_200, %c0_201], %307 {strides = array<i32>} : memref<3x8x64xf32, #tpu.memory_space<vmem>>, vector<1x8x64xf32>,
    %c1_202 = arith.constant 1 : index
    %c0_203 = arith.constant 0 : index
    %c0_204 = arith.constant 0 : index
    %308 = vector.load %arg4[%c1_202, %c0_203, %c0_204] : memref<2x64x256xf32, #tpu.memory_space<vmem>>, vector<1x64x256xf32>
    %309 = vector.shape_cast %308 : vector<1x64x256xf32> to vector<64x256xf32>
    %cst_205 = arith.constant dense<0.000000e+00> : vector<8x256xf32>
    %310 = tpu.matmul %301, %309, %cst_205 {dimension_numbers = #tpu.dot_dimension_numbers<[1], [0], [0], [1], [0, 0, 1, 1], [], []>} : vector<8x64xf32>, vector<64x256xf32>, vector<8x256xf32> -> vector<8x256xf32>
    %311 = arith.addf %310, %252 : vector<8x256xf32>
    %312 = vector.extract_strided_slice %311 {offsets = [0, 0], sizes = [8, 192], strides = [1, 1]} : vector<8x256xf32> to vector<8x192xf32>
    %313 = arith.negf %312 : vector<8x192xf32>
    %314 = math.exp %313 : vector<8x192xf32>
    %cst_206 = arith.constant 1.000000e+00 : f32
    %315 = vector.broadcast %cst_206 : f32 to vector<8x192xf32>
    %316 = arith.addf %315, %314 : vector<8x192xf32>
    %317 = arith.divf %315, %316 : vector<8x192xf32>
    %318 = vector.extract_strided_slice %311 {offsets = [0, 192], sizes = [8, 64], strides = [1, 1]} : vector<8x256xf32> to vector<8x64xf32>
    %319 = math.tanh %318 : vector<8x64xf32>
    %320 = vector.extract_strided_slice %317 {offsets = [0, 0], sizes = [8, 64], strides = [1, 1]} : vector<8x192xf32> to vector<8x64xf32>
    %321 = vector.extract_strided_slice %317 {offsets = [0, 64], sizes = [8, 64], strides = [1, 1]} : vector<8x192xf32> to vector<8x64xf32>
    %322 = vector.extract_strided_slice %317 {offsets = [0, 128], sizes = [8, 64], strides = [1, 1]} : vector<8x192xf32> to vector<8x64xf32>
    %c2_207 = arith.constant 2 : index
    %c0_208 = arith.constant 0 : index
    %c0_209 = arith.constant 0 : index
    %323 = vector.load %arg13[%c2_207, %c0_208, %c0_209] : memref<3x8x64xf32, #tpu.memory_space<vmem>>, vector<1x8x64xf32>
    %324 = vector.shape_cast %323 : vector<1x8x64xf32> to vector<8x64xf32>
    %325 = arith.mulf %321, %324 : vector<8x64xf32>
    %326 = arith.mulf %320, %319 : vector<8x64xf32>
    %327 = arith.addf %325, %326 : vector<8x64xf32>
    %328 = math.tanh %327 : vector<8x64xf32>
    %329 = arith.mulf %322, %328 : vector<8x64xf32>
    %c2_210 = arith.constant 2 : index
    %c0_211 = arith.constant 0 : index
    %c0_212 = arith.constant 0 : index
    %330 = vector.load %arg13[%c2_210, %c0_211, %c0_212] : memref<3x8x64xf32, #tpu.memory_space<vmem>>, vector<1x8x64xf32>
    %331 = vector.shape_cast %330 : vector<1x8x64xf32> to vector<8x64xf32>
    %332 = vector.shape_cast %327 : vector<8x64xf32> to vector<1x8x64xf32>
    tpu.vector_store %arg13[%c2_210, %c0_211, %c0_212], %332 {strides = array<i32>} : memref<3x8x64xf32, #tpu.memory_space<vmem>>, vector<1x8x64xf32>,
    %c2_213 = arith.constant 2 : index
    %c0_214 = arith.constant 0 : index
    %c0_215 = arith.constant 0 : index
    %333 = vector.load %arg12[%c2_213, %c0_214, %c0_215] : memref<3x8x64xf32, #tpu.memory_space<vmem>>, vector<1x8x64xf32>
    %334 = vector.shape_cast %333 : vector<1x8x64xf32> to vector<8x64xf32>
    %335 = vector.shape_cast %329 : vector<8x64xf32> to vector<1x8x64xf32>
    tpu.vector_store %arg12[%c2_213, %c0_214, %c0_215], %335 {strides = array<i32>} : memref<3x8x64xf32, #tpu.memory_space<vmem>>, vector<1x8x64xf32>,
    %c2_216 = arith.constant 2 : index
    %c0_217 = arith.constant 0 : index
    %c0_218 = arith.constant 0 : index
    %336 = vector.load %arg14[%c2_216, %c0_217, %c0_218] : memref<8x8x64xf32, #tpu.memory_space<vmem>>, vector<1x8x64xf32>
    %337 = vector.shape_cast %336 : vector<1x8x64xf32> to vector<8x64xf32>
    %338 = vector.shape_cast %329 : vector<8x64xf32> to vector<1x8x64xf32>
    tpu.vector_store %arg14[%c2_216, %c0_217, %c0_218], %338 {strides = array<i32>} : memref<8x8x64xf32, #tpu.memory_space<vmem>>, vector<1x8x64xf32>,
    %c3 = arith.constant 3 : index
    %c0_219 = arith.constant 0 : index
    %c0_220 = arith.constant 0 : index
    %339 = vector.load %arg2[%c3, %c0_219, %c0_220] : memref<8x8x10xf32, #tpu.memory_space<vmem>>, vector<1x8x10xf32>
    %340 = vector.shape_cast %339 : vector<1x8x10xf32> to vector<8x10xf32>
    %c0_221 = arith.constant 0 : index
    %c0_222 = arith.constant 0 : index
    %c0_223 = arith.constant 0 : index
    %341 = vector.load %arg12[%c0_221, %c0_222, %c0_223] : memref<3x8x64xf32, #tpu.memory_space<vmem>>, vector<1x8x64xf32>
    %342 = vector.shape_cast %341 : vector<1x8x64xf32> to vector<8x64xf32>
    %c0_224 = arith.constant 0 : index
    %c0_225 = arith.constant 0 : index
    %c0_226 = arith.constant 0 : index
    %343 = vector.load %arg5[%c0_224, %c0_225, %c0_226] : memref<3x64x256xf32, #tpu.memory_space<vmem>>, vector<1x64x256xf32>
    %344 = vector.shape_cast %343 : vector<1x64x256xf32> to vector<64x256xf32>
    %cst_227 = arith.constant dense<0.000000e+00> : vector<8x256xf32>
    %345 = tpu.matmul %342, %344, %cst_227 {dimension_numbers = #tpu.dot_dimension_numbers<[1], [0], [0], [1], [0, 0, 1, 1], [], []>} : vector<8x64xf32>, vector<64x256xf32>, vector<8x256xf32> -> vector<8x256xf32>
    %c0_228 = arith.constant 0 : index
    %c0_229 = arith.constant 0 : index
    %346 = vector.load %arg6[%c0_228, %c0_229] : memref<3x256xf32, #tpu.memory_space<vmem>>, vector<1x256xf32>
    %347 = vector.broadcast %346 : vector<1x256xf32> to vector<8x256xf32>
    %348 = arith.addf %345, %347 : vector<8x256xf32>
    %c1_230 = arith.constant 1 : index
    %c0_231 = arith.constant 0 : index
    %c0_232 = arith.constant 0 : index
    %349 = vector.load %arg12[%c1_230, %c0_231, %c0_232] : memref<3x8x64xf32, #tpu.memory_space<vmem>>, vector<1x8x64xf32>
    %350 = vector.shape_cast %349 : vector<1x8x64xf32> to vector<8x64xf32>
    %c1_233 = arith.constant 1 : index
    %c0_234 = arith.constant 0 : index
    %c0_235 = arith.constant 0 : index
    %351 = vector.load %arg5[%c1_233, %c0_234, %c0_235] : memref<3x64x256xf32, #tpu.memory_space<vmem>>, vector<1x64x256xf32>
    %352 = vector.shape_cast %351 : vector<1x64x256xf32> to vector<64x256xf32>
    %cst_236 = arith.constant dense<0.000000e+00> : vector<8x256xf32>
    %353 = tpu.matmul %350, %352, %cst_236 {dimension_numbers = #tpu.dot_dimension_numbers<[1], [0], [0], [1], [0, 0, 1, 1], [], []>} : vector<8x64xf32>, vector<64x256xf32>, vector<8x256xf32> -> vector<8x256xf32>
    %c1_237 = arith.constant 1 : index
    %c0_238 = arith.constant 0 : index
    %354 = vector.load %arg6[%c1_237, %c0_238] : memref<3x256xf32, #tpu.memory_space<vmem>>, vector<1x256xf32>
    %355 = vector.broadcast %354 : vector<1x256xf32> to vector<8x256xf32>
    %356 = arith.addf %353, %355 : vector<8x256xf32>
    %c2_239 = arith.constant 2 : index
    %c0_240 = arith.constant 0 : index
    %c0_241 = arith.constant 0 : index
    %357 = vector.load %arg12[%c2_239, %c0_240, %c0_241] : memref<3x8x64xf32, #tpu.memory_space<vmem>>, vector<1x8x64xf32>
    %358 = vector.shape_cast %357 : vector<1x8x64xf32> to vector<8x64xf32>
    %c2_242 = arith.constant 2 : index
    %c0_243 = arith.constant 0 : index
    %c0_244 = arith.constant 0 : index
    %359 = vector.load %arg5[%c2_242, %c0_243, %c0_244] : memref<3x64x256xf32, #tpu.memory_space<vmem>>, vector<1x64x256xf32>
    %360 = vector.shape_cast %359 : vector<1x64x256xf32> to vector<64x256xf32>
    %cst_245 = arith.constant dense<0.000000e+00> : vector<8x256xf32>
    %361 = tpu.matmul %358, %360, %cst_245 {dimension_numbers = #tpu.dot_dimension_numbers<[1], [0], [0], [1], [0, 0, 1, 1], [], []>} : vector<8x64xf32>, vector<64x256xf32>, vector<8x256xf32> -> vector<8x256xf32>
    %c2_246 = arith.constant 2 : index
    %c0_247 = arith.constant 0 : index
    %362 = vector.load %arg6[%c2_246, %c0_247] : memref<3x256xf32, #tpu.memory_space<vmem>>, vector<1x256xf32>
    %363 = vector.broadcast %362 : vector<1x256xf32> to vector<8x256xf32>
    %364 = arith.addf %361, %363 : vector<8x256xf32>
    %c0_248 = arith.constant 0 : index
    %c0_249 = arith.constant 0 : index
    %365 = vector.load %arg3[%c0_248, %c0_249] : memref<10x256xf32, #tpu.memory_space<vmem>>, vector<10x256xf32>
    %cst_250 = arith.constant dense<0.000000e+00> : vector<8x256xf32>
    %366 = tpu.matmul %340, %365, %cst_250 {dimension_numbers = #tpu.dot_dimension_numbers<[1], [0], [0], [1], [0, 0, 1, 1], [], []>} : vector<8x10xf32>, vector<10x256xf32>, vector<8x256xf32> -> vector<8x256xf32>
    %367 = arith.addf %366, %348 : vector<8x256xf32>
    %368 = vector.extract_strided_slice %367 {offsets = [0, 0], sizes = [8, 192], strides = [1, 1]} : vector<8x256xf32> to vector<8x192xf32>
    %369 = arith.negf %368 : vector<8x192xf32>
    %370 = math.exp %369 : vector<8x192xf32>
    %cst_251 = arith.constant 1.000000e+00 : f32
    %371 = vector.broadcast %cst_251 : f32 to vector<8x192xf32>
    %372 = arith.addf %371, %370 : vector<8x192xf32>
    %373 = arith.divf %371, %372 : vector<8x192xf32>
    %374 = vector.extract_strided_slice %367 {offsets = [0, 192], sizes = [8, 64], strides = [1, 1]} : vector<8x256xf32> to vector<8x64xf32>
    %375 = math.tanh %374 : vector<8x64xf32>
    %376 = vector.extract_strided_slice %373 {offsets = [0, 0], sizes = [8, 64], strides = [1, 1]} : vector<8x192xf32> to vector<8x64xf32>
    %377 = vector.extract_strided_slice %373 {offsets = [0, 64], sizes = [8, 64], strides = [1, 1]} : vector<8x192xf32> to vector<8x64xf32>
    %378 = vector.extract_strided_slice %373 {offsets = [0, 128], sizes = [8, 64], strides = [1, 1]} : vector<8x192xf32> to vector<8x64xf32>
    %c0_252 = arith.constant 0 : index
    %c0_253 = arith.constant 0 : index
    %c0_254 = arith.constant 0 : index
    %379 = vector.load %arg13[%c0_252, %c0_253, %c0_254] : memref<3x8x64xf32, #tpu.memory_space<vmem>>, vector<1x8x64xf32>
    %380 = vector.shape_cast %379 : vector<1x8x64xf32> to vector<8x64xf32>
    %381 = arith.mulf %377, %380 : vector<8x64xf32>
    %382 = arith.mulf %376, %375 : vector<8x64xf32>
    %383 = arith.addf %381, %382 : vector<8x64xf32>
    %384 = math.tanh %383 : vector<8x64xf32>
    %385 = arith.mulf %378, %384 : vector<8x64xf32>
    %c0_255 = arith.constant 0 : index
    %c0_256 = arith.constant 0 : index
    %c0_257 = arith.constant 0 : index
    %386 = vector.load %arg13[%c0_255, %c0_256, %c0_257] : memref<3x8x64xf32, #tpu.memory_space<vmem>>, vector<1x8x64xf32>
    %387 = vector.shape_cast %386 : vector<1x8x64xf32> to vector<8x64xf32>
    %388 = vector.shape_cast %383 : vector<8x64xf32> to vector<1x8x64xf32>
    tpu.vector_store %arg13[%c0_255, %c0_256, %c0_257], %388 {strides = array<i32>} : memref<3x8x64xf32, #tpu.memory_space<vmem>>, vector<1x8x64xf32>,
    %c0_258 = arith.constant 0 : index
    %c0_259 = arith.constant 0 : index
    %c0_260 = arith.constant 0 : index
    %389 = vector.load %arg12[%c0_258, %c0_259, %c0_260] : memref<3x8x64xf32, #tpu.memory_space<vmem>>, vector<1x8x64xf32>
    %390 = vector.shape_cast %389 : vector<1x8x64xf32> to vector<8x64xf32>
    %391 = vector.shape_cast %385 : vector<8x64xf32> to vector<1x8x64xf32>
    tpu.vector_store %arg12[%c0_258, %c0_259, %c0_260], %391 {strides = array<i32>} : memref<3x8x64xf32, #tpu.memory_space<vmem>>, vector<1x8x64xf32>,
    %c0_261 = arith.constant 0 : index
    %c0_262 = arith.constant 0 : index
    %c0_263 = arith.constant 0 : index
    %392 = vector.load %arg4[%c0_261, %c0_262, %c0_263] : memref<2x64x256xf32, #tpu.memory_space<vmem>>, vector<1x64x256xf32>
    %393 = vector.shape_cast %392 : vector<1x64x256xf32> to vector<64x256xf32>
    %cst_264 = arith.constant dense<0.000000e+00> : vector<8x256xf32>
    %394 = tpu.matmul %385, %393, %cst_264 {dimension_numbers = #tpu.dot_dimension_numbers<[1], [0], [0], [1], [0, 0, 1, 1], [], []>} : vector<8x64xf32>, vector<64x256xf32>, vector<8x256xf32> -> vector<8x256xf32>
    %395 = arith.addf %394, %356 : vector<8x256xf32>
    %396 = vector.extract_strided_slice %395 {offsets = [0, 0], sizes = [8, 192], strides = [1, 1]} : vector<8x256xf32> to vector<8x192xf32>
    %397 = arith.negf %396 : vector<8x192xf32>
    %398 = math.exp %397 : vector<8x192xf32>
    %cst_265 = arith.constant 1.000000e+00 : f32
    %399 = vector.broadcast %cst_265 : f32 to vector<8x192xf32>
    %400 = arith.addf %399, %398 : vector<8x192xf32>
    %401 = arith.divf %399, %400 : vector<8x192xf32>
    %402 = vector.extract_strided_slice %395 {offsets = [0, 192], sizes = [8, 64], strides = [1, 1]} : vector<8x256xf32> to vector<8x64xf32>
    %403 = math.tanh %402 : vector<8x64xf32>
    %404 = vector.extract_strided_slice %401 {offsets = [0, 0], sizes = [8, 64], strides = [1, 1]} : vector<8x192xf32> to vector<8x64xf32>
    %405 = vector.extract_strided_slice %401 {offsets = [0, 64], sizes = [8, 64], strides = [1, 1]} : vector<8x192xf32> to vector<8x64xf32>
    %406 = vector.extract_strided_slice %401 {offsets = [0, 128], sizes = [8, 64], strides = [1, 1]} : vector<8x192xf32> to vector<8x64xf32>
    %c1_266 = arith.constant 1 : index
    %c0_267 = arith.constant 0 : index
    %c0_268 = arith.constant 0 : index
    %407 = vector.load %arg13[%c1_266, %c0_267, %c0_268] : memref<3x8x64xf32, #tpu.memory_space<vmem>>, vector<1x8x64xf32>
    %408 = vector.shape_cast %407 : vector<1x8x64xf32> to vector<8x64xf32>
    %409 = arith.mulf %405, %408 : vector<8x64xf32>
    %410 = arith.mulf %404, %403 : vector<8x64xf32>
    %411 = arith.addf %409, %410 : vector<8x64xf32>
    %412 = math.tanh %411 : vector<8x64xf32>
    %413 = arith.mulf %406, %412 : vector<8x64xf32>
    %c1_269 = arith.constant 1 : index
    %c0_270 = arith.constant 0 : index
    %c0_271 = arith.constant 0 : index
    %414 = vector.load %arg13[%c1_269, %c0_270, %c0_271] : memref<3x8x64xf32, #tpu.memory_space<vmem>>, vector<1x8x64xf32>
    %415 = vector.shape_cast %414 : vector<1x8x64xf32> to vector<8x64xf32>
    %416 = vector.shape_cast %411 : vector<8x64xf32> to vector<1x8x64xf32>
    tpu.vector_store %arg13[%c1_269, %c0_270, %c0_271], %416 {strides = array<i32>} : memref<3x8x64xf32, #tpu.memory_space<vmem>>, vector<1x8x64xf32>,
    %c1_272 = arith.constant 1 : index
    %c0_273 = arith.constant 0 : index
    %c0_274 = arith.constant 0 : index
    %417 = vector.load %arg12[%c1_272, %c0_273, %c0_274] : memref<3x8x64xf32, #tpu.memory_space<vmem>>, vector<1x8x64xf32>
    %418 = vector.shape_cast %417 : vector<1x8x64xf32> to vector<8x64xf32>
    %419 = vector.shape_cast %413 : vector<8x64xf32> to vector<1x8x64xf32>
    tpu.vector_store %arg12[%c1_272, %c0_273, %c0_274], %419 {strides = array<i32>} : memref<3x8x64xf32, #tpu.memory_space<vmem>>, vector<1x8x64xf32>,
    %c1_275 = arith.constant 1 : index
    %c0_276 = arith.constant 0 : index
    %c0_277 = arith.constant 0 : index
    %420 = vector.load %arg4[%c1_275, %c0_276, %c0_277] : memref<2x64x256xf32, #tpu.memory_space<vmem>>, vector<1x64x256xf32>
    %421 = vector.shape_cast %420 : vector<1x64x256xf32> to vector<64x256xf32>
    %cst_278 = arith.constant dense<0.000000e+00> : vector<8x256xf32>
    %422 = tpu.matmul %413, %421, %cst_278 {dimension_numbers = #tpu.dot_dimension_numbers<[1], [0], [0], [1], [0, 0, 1, 1], [], []>} : vector<8x64xf32>, vector<64x256xf32>, vector<8x256xf32> -> vector<8x256xf32>
    %423 = arith.addf %422, %364 : vector<8x256xf32>
    %424 = vector.extract_strided_slice %423 {offsets = [0, 0], sizes = [8, 192], strides = [1, 1]} : vector<8x256xf32> to vector<8x192xf32>
    %425 = arith.negf %424 : vector<8x192xf32>
    %426 = math.exp %425 : vector<8x192xf32>
    %cst_279 = arith.constant 1.000000e+00 : f32
    %427 = vector.broadcast %cst_279 : f32 to vector<8x192xf32>
    %428 = arith.addf %427, %426 : vector<8x192xf32>
    %429 = arith.divf %427, %428 : vector<8x192xf32>
    %430 = vector.extract_strided_slice %423 {offsets = [0, 192], sizes = [8, 64], strides = [1, 1]} : vector<8x256xf32> to vector<8x64xf32>
    %431 = math.tanh %430 : vector<8x64xf32>
    %432 = vector.extract_strided_slice %429 {offsets = [0, 0], sizes = [8, 64], strides = [1, 1]} : vector<8x192xf32> to vector<8x64xf32>
    %433 = vector.extract_strided_slice %429 {offsets = [0, 64], sizes = [8, 64], strides = [1, 1]} : vector<8x192xf32> to vector<8x64xf32>
    %434 = vector.extract_strided_slice %429 {offsets = [0, 128], sizes = [8, 64], strides = [1, 1]} : vector<8x192xf32> to vector<8x64xf32>
    %c2_280 = arith.constant 2 : index
    %c0_281 = arith.constant 0 : index
    %c0_282 = arith.constant 0 : index
    %435 = vector.load %arg13[%c2_280, %c0_281, %c0_282] : memref<3x8x64xf32, #tpu.memory_space<vmem>>, vector<1x8x64xf32>
    %436 = vector.shape_cast %435 : vector<1x8x64xf32> to vector<8x64xf32>
    %437 = arith.mulf %433, %436 : vector<8x64xf32>
    %438 = arith.mulf %432, %431 : vector<8x64xf32>
    %439 = arith.addf %437, %438 : vector<8x64xf32>
    %440 = math.tanh %439 : vector<8x64xf32>
    %441 = arith.mulf %434, %440 : vector<8x64xf32>
    %c2_283 = arith.constant 2 : index
    %c0_284 = arith.constant 0 : index
    %c0_285 = arith.constant 0 : index
    %442 = vector.load %arg13[%c2_283, %c0_284, %c0_285] : memref<3x8x64xf32, #tpu.memory_space<vmem>>, vector<1x8x64xf32>
    %443 = vector.shape_cast %442 : vector<1x8x64xf32> to vector<8x64xf32>
    %444 = vector.shape_cast %439 : vector<8x64xf32> to vector<1x8x64xf32>
    tpu.vector_store %arg13[%c2_283, %c0_284, %c0_285], %444 {strides = array<i32>} : memref<3x8x64xf32, #tpu.memory_space<vmem>>, vector<1x8x64xf32>,
    %c2_286 = arith.constant 2 : index
    %c0_287 = arith.constant 0 : index
    %c0_288 = arith.constant 0 : index
    %445 = vector.load %arg12[%c2_286, %c0_287, %c0_288] : memref<3x8x64xf32, #tpu.memory_space<vmem>>, vector<1x8x64xf32>
    %446 = vector.shape_cast %445 : vector<1x8x64xf32> to vector<8x64xf32>
    %447 = vector.shape_cast %441 : vector<8x64xf32> to vector<1x8x64xf32>
    tpu.vector_store %arg12[%c2_286, %c0_287, %c0_288], %447 {strides = array<i32>} : memref<3x8x64xf32, #tpu.memory_space<vmem>>, vector<1x8x64xf32>,
    %c3_289 = arith.constant 3 : index
    %c0_290 = arith.constant 0 : index
    %c0_291 = arith.constant 0 : index
    %448 = vector.load %arg14[%c3_289, %c0_290, %c0_291] : memref<8x8x64xf32, #tpu.memory_space<vmem>>, vector<1x8x64xf32>
    %449 = vector.shape_cast %448 : vector<1x8x64xf32> to vector<8x64xf32>
    %450 = vector.shape_cast %441 : vector<8x64xf32> to vector<1x8x64xf32>
    tpu.vector_store %arg14[%c3_289, %c0_290, %c0_291], %450 {strides = array<i32>} : memref<8x8x64xf32, #tpu.memory_space<vmem>>, vector<1x8x64xf32>,
    %c4 = arith.constant 4 : index
    %c0_292 = arith.constant 0 : index
    %c0_293 = arith.constant 0 : index
    %451 = vector.load %arg2[%c4, %c0_292, %c0_293] : memref<8x8x10xf32, #tpu.memory_space<vmem>>, vector<1x8x10xf32>
    %452 = vector.shape_cast %451 : vector<1x8x10xf32> to vector<8x10xf32>
    %c0_294 = arith.constant 0 : index
    %c0_295 = arith.constant 0 : index
    %c0_296 = arith.constant 0 : index
    %453 = vector.load %arg12[%c0_294, %c0_295, %c0_296] : memref<3x8x64xf32, #tpu.memory_space<vmem>>, vector<1x8x64xf32>
    %454 = vector.shape_cast %453 : vector<1x8x64xf32> to vector<8x64xf32>
    %c0_297 = arith.constant 0 : index
    %c0_298 = arith.constant 0 : index
    %c0_299 = arith.constant 0 : index
    %455 = vector.load %arg5[%c0_297, %c0_298, %c0_299] : memref<3x64x256xf32, #tpu.memory_space<vmem>>, vector<1x64x256xf32>
    %456 = vector.shape_cast %455 : vector<1x64x256xf32> to vector<64x256xf32>
    %cst_300 = arith.constant dense<0.000000e+00> : vector<8x256xf32>
    %457 = tpu.matmul %454, %456, %cst_300 {dimension_numbers = #tpu.dot_dimension_numbers<[1], [0], [0], [1], [0, 0, 1, 1], [], []>} : vector<8x64xf32>, vector<64x256xf32>, vector<8x256xf32> -> vector<8x256xf32>
    %c0_301 = arith.constant 0 : index
    %c0_302 = arith.constant 0 : index
    %458 = vector.load %arg6[%c0_301, %c0_302] : memref<3x256xf32, #tpu.memory_space<vmem>>, vector<1x256xf32>
    %459 = vector.broadcast %458 : vector<1x256xf32> to vector<8x256xf32>
    %460 = arith.addf %457, %459 : vector<8x256xf32>
    %c1_303 = arith.constant 1 : index
    %c0_304 = arith.constant 0 : index
    %c0_305 = arith.constant 0 : index
    %461 = vector.load %arg12[%c1_303, %c0_304, %c0_305] : memref<3x8x64xf32, #tpu.memory_space<vmem>>, vector<1x8x64xf32>
    %462 = vector.shape_cast %461 : vector<1x8x64xf32> to vector<8x64xf32>
    %c1_306 = arith.constant 1 : index
    %c0_307 = arith.constant 0 : index
    %c0_308 = arith.constant 0 : index
    %463 = vector.load %arg5[%c1_306, %c0_307, %c0_308] : memref<3x64x256xf32, #tpu.memory_space<vmem>>, vector<1x64x256xf32>
    %464 = vector.shape_cast %463 : vector<1x64x256xf32> to vector<64x256xf32>
    %cst_309 = arith.constant dense<0.000000e+00> : vector<8x256xf32>
    %465 = tpu.matmul %462, %464, %cst_309 {dimension_numbers = #tpu.dot_dimension_numbers<[1], [0], [0], [1], [0, 0, 1, 1], [], []>} : vector<8x64xf32>, vector<64x256xf32>, vector<8x256xf32> -> vector<8x256xf32>
    %c1_310 = arith.constant 1 : index
    %c0_311 = arith.constant 0 : index
    %466 = vector.load %arg6[%c1_310, %c0_311] : memref<3x256xf32, #tpu.memory_space<vmem>>, vector<1x256xf32>
    %467 = vector.broadcast %466 : vector<1x256xf32> to vector<8x256xf32>
    %468 = arith.addf %465, %467 : vector<8x256xf32>
    %c2_312 = arith.constant 2 : index
    %c0_313 = arith.constant 0 : index
    %c0_314 = arith.constant 0 : index
    %469 = vector.load %arg12[%c2_312, %c0_313, %c0_314] : memref<3x8x64xf32, #tpu.memory_space<vmem>>, vector<1x8x64xf32>
    %470 = vector.shape_cast %469 : vector<1x8x64xf32> to vector<8x64xf32>
    %c2_315 = arith.constant 2 : index
    %c0_316 = arith.constant 0 : index
    %c0_317 = arith.constant 0 : index
    %471 = vector.load %arg5[%c2_315, %c0_316, %c0_317] : memref<3x64x256xf32, #tpu.memory_space<vmem>>, vector<1x64x256xf32>
    %472 = vector.shape_cast %471 : vector<1x64x256xf32> to vector<64x256xf32>
    %cst_318 = arith.constant dense<0.000000e+00> : vector<8x256xf32>
    %473 = tpu.matmul %470, %472, %cst_318 {dimension_numbers = #tpu.dot_dimension_numbers<[1], [0], [0], [1], [0, 0, 1, 1], [], []>} : vector<8x64xf32>, vector<64x256xf32>, vector<8x256xf32> -> vector<8x256xf32>
    %c2_319 = arith.constant 2 : index
    %c0_320 = arith.constant 0 : index
    %474 = vector.load %arg6[%c2_319, %c0_320] : memref<3x256xf32, #tpu.memory_space<vmem>>, vector<1x256xf32>
    %475 = vector.broadcast %474 : vector<1x256xf32> to vector<8x256xf32>
    %476 = arith.addf %473, %475 : vector<8x256xf32>
    %c0_321 = arith.constant 0 : index
    %c0_322 = arith.constant 0 : index
    %477 = vector.load %arg3[%c0_321, %c0_322] : memref<10x256xf32, #tpu.memory_space<vmem>>, vector<10x256xf32>
    %cst_323 = arith.constant dense<0.000000e+00> : vector<8x256xf32>
    %478 = tpu.matmul %452, %477, %cst_323 {dimension_numbers = #tpu.dot_dimension_numbers<[1], [0], [0], [1], [0, 0, 1, 1], [], []>} : vector<8x10xf32>, vector<10x256xf32>, vector<8x256xf32> -> vector<8x256xf32>
    %479 = arith.addf %478, %460 : vector<8x256xf32>
    %480 = vector.extract_strided_slice %479 {offsets = [0, 0], sizes = [8, 192], strides = [1, 1]} : vector<8x256xf32> to vector<8x192xf32>
    %481 = arith.negf %480 : vector<8x192xf32>
    %482 = math.exp %481 : vector<8x192xf32>
    %cst_324 = arith.constant 1.000000e+00 : f32
    %483 = vector.broadcast %cst_324 : f32 to vector<8x192xf32>
    %484 = arith.addf %483, %482 : vector<8x192xf32>
    %485 = arith.divf %483, %484 : vector<8x192xf32>
    %486 = vector.extract_strided_slice %479 {offsets = [0, 192], sizes = [8, 64], strides = [1, 1]} : vector<8x256xf32> to vector<8x64xf32>
    %487 = math.tanh %486 : vector<8x64xf32>
    %488 = vector.extract_strided_slice %485 {offsets = [0, 0], sizes = [8, 64], strides = [1, 1]} : vector<8x192xf32> to vector<8x64xf32>
    %489 = vector.extract_strided_slice %485 {offsets = [0, 64], sizes = [8, 64], strides = [1, 1]} : vector<8x192xf32> to vector<8x64xf32>
    %490 = vector.extract_strided_slice %485 {offsets = [0, 128], sizes = [8, 64], strides = [1, 1]} : vector<8x192xf32> to vector<8x64xf32>
    %c0_325 = arith.constant 0 : index
    %c0_326 = arith.constant 0 : index
    %c0_327 = arith.constant 0 : index
    %491 = vector.load %arg13[%c0_325, %c0_326, %c0_327] : memref<3x8x64xf32, #tpu.memory_space<vmem>>, vector<1x8x64xf32>
    %492 = vector.shape_cast %491 : vector<1x8x64xf32> to vector<8x64xf32>
    %493 = arith.mulf %489, %492 : vector<8x64xf32>
    %494 = arith.mulf %488, %487 : vector<8x64xf32>
    %495 = arith.addf %493, %494 : vector<8x64xf32>
    %496 = math.tanh %495 : vector<8x64xf32>
    %497 = arith.mulf %490, %496 : vector<8x64xf32>
    %c0_328 = arith.constant 0 : index
    %c0_329 = arith.constant 0 : index
    %c0_330 = arith.constant 0 : index
    %498 = vector.load %arg13[%c0_328, %c0_329, %c0_330] : memref<3x8x64xf32, #tpu.memory_space<vmem>>, vector<1x8x64xf32>
    %499 = vector.shape_cast %498 : vector<1x8x64xf32> to vector<8x64xf32>
    %500 = vector.shape_cast %495 : vector<8x64xf32> to vector<1x8x64xf32>
    tpu.vector_store %arg13[%c0_328, %c0_329, %c0_330], %500 {strides = array<i32>} : memref<3x8x64xf32, #tpu.memory_space<vmem>>, vector<1x8x64xf32>,
    %c0_331 = arith.constant 0 : index
    %c0_332 = arith.constant 0 : index
    %c0_333 = arith.constant 0 : index
    %501 = vector.load %arg12[%c0_331, %c0_332, %c0_333] : memref<3x8x64xf32, #tpu.memory_space<vmem>>, vector<1x8x64xf32>
    %502 = vector.shape_cast %501 : vector<1x8x64xf32> to vector<8x64xf32>
    %503 = vector.shape_cast %497 : vector<8x64xf32> to vector<1x8x64xf32>
    tpu.vector_store %arg12[%c0_331, %c0_332, %c0_333], %503 {strides = array<i32>} : memref<3x8x64xf32, #tpu.memory_space<vmem>>, vector<1x8x64xf32>,
    %c0_334 = arith.constant 0 : index
    %c0_335 = arith.constant 0 : index
    %c0_336 = arith.constant 0 : index
    %504 = vector.load %arg4[%c0_334, %c0_335, %c0_336] : memref<2x64x256xf32, #tpu.memory_space<vmem>>, vector<1x64x256xf32>
    %505 = vector.shape_cast %504 : vector<1x64x256xf32> to vector<64x256xf32>
    %cst_337 = arith.constant dense<0.000000e+00> : vector<8x256xf32>
    %506 = tpu.matmul %497, %505, %cst_337 {dimension_numbers = #tpu.dot_dimension_numbers<[1], [0], [0], [1], [0, 0, 1, 1], [], []>} : vector<8x64xf32>, vector<64x256xf32>, vector<8x256xf32> -> vector<8x256xf32>
    %507 = arith.addf %506, %468 : vector<8x256xf32>
    %508 = vector.extract_strided_slice %507 {offsets = [0, 0], sizes = [8, 192], strides = [1, 1]} : vector<8x256xf32> to vector<8x192xf32>
    %509 = arith.negf %508 : vector<8x192xf32>
    %510 = math.exp %509 : vector<8x192xf32>
    %cst_338 = arith.constant 1.000000e+00 : f32
    %511 = vector.broadcast %cst_338 : f32 to vector<8x192xf32>
    %512 = arith.addf %511, %510 : vector<8x192xf32>
    %513 = arith.divf %511, %512 : vector<8x192xf32>
    %514 = vector.extract_strided_slice %507 {offsets = [0, 192], sizes = [8, 64], strides = [1, 1]} : vector<8x256xf32> to vector<8x64xf32>
    %515 = math.tanh %514 : vector<8x64xf32>
    %516 = vector.extract_strided_slice %513 {offsets = [0, 0], sizes = [8, 64], strides = [1, 1]} : vector<8x192xf32> to vector<8x64xf32>
    %517 = vector.extract_strided_slice %513 {offsets = [0, 64], sizes = [8, 64], strides = [1, 1]} : vector<8x192xf32> to vector<8x64xf32>
    %518 = vector.extract_strided_slice %513 {offsets = [0, 128], sizes = [8, 64], strides = [1, 1]} : vector<8x192xf32> to vector<8x64xf32>
    %c1_339 = arith.constant 1 : index
    %c0_340 = arith.constant 0 : index
    %c0_341 = arith.constant 0 : index
    %519 = vector.load %arg13[%c1_339, %c0_340, %c0_341] : memref<3x8x64xf32, #tpu.memory_space<vmem>>, vector<1x8x64xf32>
    %520 = vector.shape_cast %519 : vector<1x8x64xf32> to vector<8x64xf32>
    %521 = arith.mulf %517, %520 : vector<8x64xf32>
    %522 = arith.mulf %516, %515 : vector<8x64xf32>
    %523 = arith.addf %521, %522 : vector<8x64xf32>
    %524 = math.tanh %523 : vector<8x64xf32>
    %525 = arith.mulf %518, %524 : vector<8x64xf32>
    %c1_342 = arith.constant 1 : index
    %c0_343 = arith.constant 0 : index
    %c0_344 = arith.constant 0 : index
    %526 = vector.load %arg13[%c1_342, %c0_343, %c0_344] : memref<3x8x64xf32, #tpu.memory_space<vmem>>, vector<1x8x64xf32>
    %527 = vector.shape_cast %526 : vector<1x8x64xf32> to vector<8x64xf32>
    %528 = vector.shape_cast %523 : vector<8x64xf32> to vector<1x8x64xf32>
    tpu.vector_store %arg13[%c1_342, %c0_343, %c0_344], %528 {strides = array<i32>} : memref<3x8x64xf32, #tpu.memory_space<vmem>>, vector<1x8x64xf32>,
    %c1_345 = arith.constant 1 : index
    %c0_346 = arith.constant 0 : index
    %c0_347 = arith.constant 0 : index
    %529 = vector.load %arg12[%c1_345, %c0_346, %c0_347] : memref<3x8x64xf32, #tpu.memory_space<vmem>>, vector<1x8x64xf32>
    %530 = vector.shape_cast %529 : vector<1x8x64xf32> to vector<8x64xf32>
    %531 = vector.shape_cast %525 : vector<8x64xf32> to vector<1x8x64xf32>
    tpu.vector_store %arg12[%c1_345, %c0_346, %c0_347], %531 {strides = array<i32>} : memref<3x8x64xf32, #tpu.memory_space<vmem>>, vector<1x8x64xf32>,
    %c1_348 = arith.constant 1 : index
    %c0_349 = arith.constant 0 : index
    %c0_350 = arith.constant 0 : index
    %532 = vector.load %arg4[%c1_348, %c0_349, %c0_350] : memref<2x64x256xf32, #tpu.memory_space<vmem>>, vector<1x64x256xf32>
    %533 = vector.shape_cast %532 : vector<1x64x256xf32> to vector<64x256xf32>
    %cst_351 = arith.constant dense<0.000000e+00> : vector<8x256xf32>
    %534 = tpu.matmul %525, %533, %cst_351 {dimension_numbers = #tpu.dot_dimension_numbers<[1], [0], [0], [1], [0, 0, 1, 1], [], []>} : vector<8x64xf32>, vector<64x256xf32>, vector<8x256xf32> -> vector<8x256xf32>
    %535 = arith.addf %534, %476 : vector<8x256xf32>
    %536 = vector.extract_strided_slice %535 {offsets = [0, 0], sizes = [8, 192], strides = [1, 1]} : vector<8x256xf32> to vector<8x192xf32>
    %537 = arith.negf %536 : vector<8x192xf32>
    %538 = math.exp %537 : vector<8x192xf32>
    %cst_352 = arith.constant 1.000000e+00 : f32
    %539 = vector.broadcast %cst_352 : f32 to vector<8x192xf32>
    %540 = arith.addf %539, %538 : vector<8x192xf32>
    %541 = arith.divf %539, %540 : vector<8x192xf32>
    %542 = vector.extract_strided_slice %535 {offsets = [0, 192], sizes = [8, 64], strides = [1, 1]} : vector<8x256xf32> to vector<8x64xf32>
    %543 = math.tanh %542 : vector<8x64xf32>
    %544 = vector.extract_strided_slice %541 {offsets = [0, 0], sizes = [8, 64], strides = [1, 1]} : vector<8x192xf32> to vector<8x64xf32>
    %545 = vector.extract_strided_slice %541 {offsets = [0, 64], sizes = [8, 64], strides = [1, 1]} : vector<8x192xf32> to vector<8x64xf32>
    %546 = vector.extract_strided_slice %541 {offsets = [0, 128], sizes = [8, 64], strides = [1, 1]} : vector<8x192xf32> to vector<8x64xf32>
    %c2_353 = arith.constant 2 : index
    %c0_354 = arith.constant 0 : index
    %c0_355 = arith.constant 0 : index
    %547 = vector.load %arg13[%c2_353, %c0_354, %c0_355] : memref<3x8x64xf32, #tpu.memory_space<vmem>>, vector<1x8x64xf32>
    %548 = vector.shape_cast %547 : vector<1x8x64xf32> to vector<8x64xf32>
    %549 = arith.mulf %545, %548 : vector<8x64xf32>
    %550 = arith.mulf %544, %543 : vector<8x64xf32>
    %551 = arith.addf %549, %550 : vector<8x64xf32>
    %552 = math.tanh %551 : vector<8x64xf32>
    %553 = arith.mulf %546, %552 : vector<8x64xf32>
    %c2_356 = arith.constant 2 : index
    %c0_357 = arith.constant 0 : index
    %c0_358 = arith.constant 0 : index
    %554 = vector.load %arg13[%c2_356, %c0_357, %c0_358] : memref<3x8x64xf32, #tpu.memory_space<vmem>>, vector<1x8x64xf32>
    %555 = vector.shape_cast %554 : vector<1x8x64xf32> to vector<8x64xf32>
    %556 = vector.shape_cast %551 : vector<8x64xf32> to vector<1x8x64xf32>
    tpu.vector_store %arg13[%c2_356, %c0_357, %c0_358], %556 {strides = array<i32>} : memref<3x8x64xf32, #tpu.memory_space<vmem>>, vector<1x8x64xf32>,
    %c2_359 = arith.constant 2 : index
    %c0_360 = arith.constant 0 : index
    %c0_361 = arith.constant 0 : index
    %557 = vector.load %arg12[%c2_359, %c0_360, %c0_361] : memref<3x8x64xf32, #tpu.memory_space<vmem>>, vector<1x8x64xf32>
    %558 = vector.shape_cast %557 : vector<1x8x64xf32> to vector<8x64xf32>
    %559 = vector.shape_cast %553 : vector<8x64xf32> to vector<1x8x64xf32>
    tpu.vector_store %arg12[%c2_359, %c0_360, %c0_361], %559 {strides = array<i32>} : memref<3x8x64xf32, #tpu.memory_space<vmem>>, vector<1x8x64xf32>,
    %c4_362 = arith.constant 4 : index
    %c0_363 = arith.constant 0 : index
    %c0_364 = arith.constant 0 : index
    %560 = vector.load %arg14[%c4_362, %c0_363, %c0_364] : memref<8x8x64xf32, #tpu.memory_space<vmem>>, vector<1x8x64xf32>
    %561 = vector.shape_cast %560 : vector<1x8x64xf32> to vector<8x64xf32>
    %562 = vector.shape_cast %553 : vector<8x64xf32> to vector<1x8x64xf32>
    tpu.vector_store %arg14[%c4_362, %c0_363, %c0_364], %562 {strides = array<i32>} : memref<8x8x64xf32, #tpu.memory_space<vmem>>, vector<1x8x64xf32>,
    %c5 = arith.constant 5 : index
    %c0_365 = arith.constant 0 : index
    %c0_366 = arith.constant 0 : index
    %563 = vector.load %arg2[%c5, %c0_365, %c0_366] : memref<8x8x10xf32, #tpu.memory_space<vmem>>, vector<1x8x10xf32>
    %564 = vector.shape_cast %563 : vector<1x8x10xf32> to vector<8x10xf32>
    %c0_367 = arith.constant 0 : index
    %c0_368 = arith.constant 0 : index
    %c0_369 = arith.constant 0 : index
    %565 = vector.load %arg12[%c0_367, %c0_368, %c0_369] : memref<3x8x64xf32, #tpu.memory_space<vmem>>, vector<1x8x64xf32>
    %566 = vector.shape_cast %565 : vector<1x8x64xf32> to vector<8x64xf32>
    %c0_370 = arith.constant 0 : index
    %c0_371 = arith.constant 0 : index
    %c0_372 = arith.constant 0 : index
    %567 = vector.load %arg5[%c0_370, %c0_371, %c0_372] : memref<3x64x256xf32, #tpu.memory_space<vmem>>, vector<1x64x256xf32>
    %568 = vector.shape_cast %567 : vector<1x64x256xf32> to vector<64x256xf32>
    %cst_373 = arith.constant dense<0.000000e+00> : vector<8x256xf32>
    %569 = tpu.matmul %566, %568, %cst_373 {dimension_numbers = #tpu.dot_dimension_numbers<[1], [0], [0], [1], [0, 0, 1, 1], [], []>} : vector<8x64xf32>, vector<64x256xf32>, vector<8x256xf32> -> vector<8x256xf32>
    %c0_374 = arith.constant 0 : index
    %c0_375 = arith.constant 0 : index
    %570 = vector.load %arg6[%c0_374, %c0_375] : memref<3x256xf32, #tpu.memory_space<vmem>>, vector<1x256xf32>
    %571 = vector.broadcast %570 : vector<1x256xf32> to vector<8x256xf32>
    %572 = arith.addf %569, %571 : vector<8x256xf32>
    %c1_376 = arith.constant 1 : index
    %c0_377 = arith.constant 0 : index
    %c0_378 = arith.constant 0 : index
    %573 = vector.load %arg12[%c1_376, %c0_377, %c0_378] : memref<3x8x64xf32, #tpu.memory_space<vmem>>, vector<1x8x64xf32>
    %574 = vector.shape_cast %573 : vector<1x8x64xf32> to vector<8x64xf32>
    %c1_379 = arith.constant 1 : index
    %c0_380 = arith.constant 0 : index
    %c0_381 = arith.constant 0 : index
    %575 = vector.load %arg5[%c1_379, %c0_380, %c0_381] : memref<3x64x256xf32, #tpu.memory_space<vmem>>, vector<1x64x256xf32>
    %576 = vector.shape_cast %575 : vector<1x64x256xf32> to vector<64x256xf32>
    %cst_382 = arith.constant dense<0.000000e+00> : vector<8x256xf32>
    %577 = tpu.matmul %574, %576, %cst_382 {dimension_numbers = #tpu.dot_dimension_numbers<[1], [0], [0], [1], [0, 0, 1, 1], [], []>} : vector<8x64xf32>, vector<64x256xf32>, vector<8x256xf32> -> vector<8x256xf32>
    %c1_383 = arith.constant 1 : index
    %c0_384 = arith.constant 0 : index
    %578 = vector.load %arg6[%c1_383, %c0_384] : memref<3x256xf32, #tpu.memory_space<vmem>>, vector<1x256xf32>
    %579 = vector.broadcast %578 : vector<1x256xf32> to vector<8x256xf32>
    %580 = arith.addf %577, %579 : vector<8x256xf32>
    %c2_385 = arith.constant 2 : index
    %c0_386 = arith.constant 0 : index
    %c0_387 = arith.constant 0 : index
    %581 = vector.load %arg12[%c2_385, %c0_386, %c0_387] : memref<3x8x64xf32, #tpu.memory_space<vmem>>, vector<1x8x64xf32>
    %582 = vector.shape_cast %581 : vector<1x8x64xf32> to vector<8x64xf32>
    %c2_388 = arith.constant 2 : index
    %c0_389 = arith.constant 0 : index
    %c0_390 = arith.constant 0 : index
    %583 = vector.load %arg5[%c2_388, %c0_389, %c0_390] : memref<3x64x256xf32, #tpu.memory_space<vmem>>, vector<1x64x256xf32>
    %584 = vector.shape_cast %583 : vector<1x64x256xf32> to vector<64x256xf32>
    %cst_391 = arith.constant dense<0.000000e+00> : vector<8x256xf32>
    %585 = tpu.matmul %582, %584, %cst_391 {dimension_numbers = #tpu.dot_dimension_numbers<[1], [0], [0], [1], [0, 0, 1, 1], [], []>} : vector<8x64xf32>, vector<64x256xf32>, vector<8x256xf32> -> vector<8x256xf32>
    %c2_392 = arith.constant 2 : index
    %c0_393 = arith.constant 0 : index
    %586 = vector.load %arg6[%c2_392, %c0_393] : memref<3x256xf32, #tpu.memory_space<vmem>>, vector<1x256xf32>
    %587 = vector.broadcast %586 : vector<1x256xf32> to vector<8x256xf32>
    %588 = arith.addf %585, %587 : vector<8x256xf32>
    %c0_394 = arith.constant 0 : index
    %c0_395 = arith.constant 0 : index
    %589 = vector.load %arg3[%c0_394, %c0_395] : memref<10x256xf32, #tpu.memory_space<vmem>>, vector<10x256xf32>
    %cst_396 = arith.constant dense<0.000000e+00> : vector<8x256xf32>
    %590 = tpu.matmul %564, %589, %cst_396 {dimension_numbers = #tpu.dot_dimension_numbers<[1], [0], [0], [1], [0, 0, 1, 1], [], []>} : vector<8x10xf32>, vector<10x256xf32>, vector<8x256xf32> -> vector<8x256xf32>
    %591 = arith.addf %590, %572 : vector<8x256xf32>
    %592 = vector.extract_strided_slice %591 {offsets = [0, 0], sizes = [8, 192], strides = [1, 1]} : vector<8x256xf32> to vector<8x192xf32>
    %593 = arith.negf %592 : vector<8x192xf32>
    %594 = math.exp %593 : vector<8x192xf32>
    %cst_397 = arith.constant 1.000000e+00 : f32
    %595 = vector.broadcast %cst_397 : f32 to vector<8x192xf32>
    %596 = arith.addf %595, %594 : vector<8x192xf32>
    %597 = arith.divf %595, %596 : vector<8x192xf32>
    %598 = vector.extract_strided_slice %591 {offsets = [0, 192], sizes = [8, 64], strides = [1, 1]} : vector<8x256xf32> to vector<8x64xf32>
    %599 = math.tanh %598 : vector<8x64xf32>
    %600 = vector.extract_strided_slice %597 {offsets = [0, 0], sizes = [8, 64], strides = [1, 1]} : vector<8x192xf32> to vector<8x64xf32>
    %601 = vector.extract_strided_slice %597 {offsets = [0, 64], sizes = [8, 64], strides = [1, 1]} : vector<8x192xf32> to vector<8x64xf32>
    %602 = vector.extract_strided_slice %597 {offsets = [0, 128], sizes = [8, 64], strides = [1, 1]} : vector<8x192xf32> to vector<8x64xf32>
    %c0_398 = arith.constant 0 : index
    %c0_399 = arith.constant 0 : index
    %c0_400 = arith.constant 0 : index
    %603 = vector.load %arg13[%c0_398, %c0_399, %c0_400] : memref<3x8x64xf32, #tpu.memory_space<vmem>>, vector<1x8x64xf32>
    %604 = vector.shape_cast %603 : vector<1x8x64xf32> to vector<8x64xf32>
    %605 = arith.mulf %601, %604 : vector<8x64xf32>
    %606 = arith.mulf %600, %599 : vector<8x64xf32>
    %607 = arith.addf %605, %606 : vector<8x64xf32>
    %608 = math.tanh %607 : vector<8x64xf32>
    %609 = arith.mulf %602, %608 : vector<8x64xf32>
    %c0_401 = arith.constant 0 : index
    %c0_402 = arith.constant 0 : index
    %c0_403 = arith.constant 0 : index
    %610 = vector.load %arg13[%c0_401, %c0_402, %c0_403] : memref<3x8x64xf32, #tpu.memory_space<vmem>>, vector<1x8x64xf32>
    %611 = vector.shape_cast %610 : vector<1x8x64xf32> to vector<8x64xf32>
    %612 = vector.shape_cast %607 : vector<8x64xf32> to vector<1x8x64xf32>
    tpu.vector_store %arg13[%c0_401, %c0_402, %c0_403], %612 {strides = array<i32>} : memref<3x8x64xf32, #tpu.memory_space<vmem>>, vector<1x8x64xf32>,
    %c0_404 = arith.constant 0 : index
    %c0_405 = arith.constant 0 : index
    %c0_406 = arith.constant 0 : index
    %613 = vector.load %arg12[%c0_404, %c0_405, %c0_406] : memref<3x8x64xf32, #tpu.memory_space<vmem>>, vector<1x8x64xf32>
    %614 = vector.shape_cast %613 : vector<1x8x64xf32> to vector<8x64xf32>
    %615 = vector.shape_cast %609 : vector<8x64xf32> to vector<1x8x64xf32>
    tpu.vector_store %arg12[%c0_404, %c0_405, %c0_406], %615 {strides = array<i32>} : memref<3x8x64xf32, #tpu.memory_space<vmem>>, vector<1x8x64xf32>,
    %c0_407 = arith.constant 0 : index
    %c0_408 = arith.constant 0 : index
    %c0_409 = arith.constant 0 : index
    %616 = vector.load %arg4[%c0_407, %c0_408, %c0_409] : memref<2x64x256xf32, #tpu.memory_space<vmem>>, vector<1x64x256xf32>
    %617 = vector.shape_cast %616 : vector<1x64x256xf32> to vector<64x256xf32>
    %cst_410 = arith.constant dense<0.000000e+00> : vector<8x256xf32>
    %618 = tpu.matmul %609, %617, %cst_410 {dimension_numbers = #tpu.dot_dimension_numbers<[1], [0], [0], [1], [0, 0, 1, 1], [], []>} : vector<8x64xf32>, vector<64x256xf32>, vector<8x256xf32> -> vector<8x256xf32>
    %619 = arith.addf %618, %580 : vector<8x256xf32>
    %620 = vector.extract_strided_slice %619 {offsets = [0, 0], sizes = [8, 192], strides = [1, 1]} : vector<8x256xf32> to vector<8x192xf32>
    %621 = arith.negf %620 : vector<8x192xf32>
    %622 = math.exp %621 : vector<8x192xf32>
    %cst_411 = arith.constant 1.000000e+00 : f32
    %623 = vector.broadcast %cst_411 : f32 to vector<8x192xf32>
    %624 = arith.addf %623, %622 : vector<8x192xf32>
    %625 = arith.divf %623, %624 : vector<8x192xf32>
    %626 = vector.extract_strided_slice %619 {offsets = [0, 192], sizes = [8, 64], strides = [1, 1]} : vector<8x256xf32> to vector<8x64xf32>
    %627 = math.tanh %626 : vector<8x64xf32>
    %628 = vector.extract_strided_slice %625 {offsets = [0, 0], sizes = [8, 64], strides = [1, 1]} : vector<8x192xf32> to vector<8x64xf32>
    %629 = vector.extract_strided_slice %625 {offsets = [0, 64], sizes = [8, 64], strides = [1, 1]} : vector<8x192xf32> to vector<8x64xf32>
    %630 = vector.extract_strided_slice %625 {offsets = [0, 128], sizes = [8, 64], strides = [1, 1]} : vector<8x192xf32> to vector<8x64xf32>
    %c1_412 = arith.constant 1 : index
    %c0_413 = arith.constant 0 : index
    %c0_414 = arith.constant 0 : index
    %631 = vector.load %arg13[%c1_412, %c0_413, %c0_414] : memref<3x8x64xf32, #tpu.memory_space<vmem>>, vector<1x8x64xf32>
    %632 = vector.shape_cast %631 : vector<1x8x64xf32> to vector<8x64xf32>
    %633 = arith.mulf %629, %632 : vector<8x64xf32>
    %634 = arith.mulf %628, %627 : vector<8x64xf32>
    %635 = arith.addf %633, %634 : vector<8x64xf32>
    %636 = math.tanh %635 : vector<8x64xf32>
    %637 = arith.mulf %630, %636 : vector<8x64xf32>
    %c1_415 = arith.constant 1 : index
    %c0_416 = arith.constant 0 : index
    %c0_417 = arith.constant 0 : index
    %638 = vector.load %arg13[%c1_415, %c0_416, %c0_417] : memref<3x8x64xf32, #tpu.memory_space<vmem>>, vector<1x8x64xf32>
    %639 = vector.shape_cast %638 : vector<1x8x64xf32> to vector<8x64xf32>
    %640 = vector.shape_cast %635 : vector<8x64xf32> to vector<1x8x64xf32>
    tpu.vector_store %arg13[%c1_415, %c0_416, %c0_417], %640 {strides = array<i32>} : memref<3x8x64xf32, #tpu.memory_space<vmem>>, vector<1x8x64xf32>,
    %c1_418 = arith.constant 1 : index
    %c0_419 = arith.constant 0 : index
    %c0_420 = arith.constant 0 : index
    %641 = vector.load %arg12[%c1_418, %c0_419, %c0_420] : memref<3x8x64xf32, #tpu.memory_space<vmem>>, vector<1x8x64xf32>
    %642 = vector.shape_cast %641 : vector<1x8x64xf32> to vector<8x64xf32>
    %643 = vector.shape_cast %637 : vector<8x64xf32> to vector<1x8x64xf32>
    tpu.vector_store %arg12[%c1_418, %c0_419, %c0_420], %643 {strides = array<i32>} : memref<3x8x64xf32, #tpu.memory_space<vmem>>, vector<1x8x64xf32>,
    %c1_421 = arith.constant 1 : index
    %c0_422 = arith.constant 0 : index
    %c0_423 = arith.constant 0 : index
    %644 = vector.load %arg4[%c1_421, %c0_422, %c0_423] : memref<2x64x256xf32, #tpu.memory_space<vmem>>, vector<1x64x256xf32>
    %645 = vector.shape_cast %644 : vector<1x64x256xf32> to vector<64x256xf32>
    %cst_424 = arith.constant dense<0.000000e+00> : vector<8x256xf32>
    %646 = tpu.matmul %637, %645, %cst_424 {dimension_numbers = #tpu.dot_dimension_numbers<[1], [0], [0], [1], [0, 0, 1, 1], [], []>} : vector<8x64xf32>, vector<64x256xf32>, vector<8x256xf32> -> vector<8x256xf32>
    %647 = arith.addf %646, %588 : vector<8x256xf32>
    %648 = vector.extract_strided_slice %647 {offsets = [0, 0], sizes = [8, 192], strides = [1, 1]} : vector<8x256xf32> to vector<8x192xf32>
    %649 = arith.negf %648 : vector<8x192xf32>
    %650 = math.exp %649 : vector<8x192xf32>
    %cst_425 = arith.constant 1.000000e+00 : f32
    %651 = vector.broadcast %cst_425 : f32 to vector<8x192xf32>
    %652 = arith.addf %651, %650 : vector<8x192xf32>
    %653 = arith.divf %651, %652 : vector<8x192xf32>
    %654 = vector.extract_strided_slice %647 {offsets = [0, 192], sizes = [8, 64], strides = [1, 1]} : vector<8x256xf32> to vector<8x64xf32>
    %655 = math.tanh %654 : vector<8x64xf32>
    %656 = vector.extract_strided_slice %653 {offsets = [0, 0], sizes = [8, 64], strides = [1, 1]} : vector<8x192xf32> to vector<8x64xf32>
    %657 = vector.extract_strided_slice %653 {offsets = [0, 64], sizes = [8, 64], strides = [1, 1]} : vector<8x192xf32> to vector<8x64xf32>
    %658 = vector.extract_strided_slice %653 {offsets = [0, 128], sizes = [8, 64], strides = [1, 1]} : vector<8x192xf32> to vector<8x64xf32>
    %c2_426 = arith.constant 2 : index
    %c0_427 = arith.constant 0 : index
    %c0_428 = arith.constant 0 : index
    %659 = vector.load %arg13[%c2_426, %c0_427, %c0_428] : memref<3x8x64xf32, #tpu.memory_space<vmem>>, vector<1x8x64xf32>
    %660 = vector.shape_cast %659 : vector<1x8x64xf32> to vector<8x64xf32>
    %661 = arith.mulf %657, %660 : vector<8x64xf32>
    %662 = arith.mulf %656, %655 : vector<8x64xf32>
    %663 = arith.addf %661, %662 : vector<8x64xf32>
    %664 = math.tanh %663 : vector<8x64xf32>
    %665 = arith.mulf %658, %664 : vector<8x64xf32>
    %c2_429 = arith.constant 2 : index
    %c0_430 = arith.constant 0 : index
    %c0_431 = arith.constant 0 : index
    %666 = vector.load %arg13[%c2_429, %c0_430, %c0_431] : memref<3x8x64xf32, #tpu.memory_space<vmem>>, vector<1x8x64xf32>
    %667 = vector.shape_cast %666 : vector<1x8x64xf32> to vector<8x64xf32>
    %668 = vector.shape_cast %663 : vector<8x64xf32> to vector<1x8x64xf32>
    tpu.vector_store %arg13[%c2_429, %c0_430, %c0_431], %668 {strides = array<i32>} : memref<3x8x64xf32, #tpu.memory_space<vmem>>, vector<1x8x64xf32>,
    %c2_432 = arith.constant 2 : index
    %c0_433 = arith.constant 0 : index
    %c0_434 = arith.constant 0 : index
    %669 = vector.load %arg12[%c2_432, %c0_433, %c0_434] : memref<3x8x64xf32, #tpu.memory_space<vmem>>, vector<1x8x64xf32>
    %670 = vector.shape_cast %669 : vector<1x8x64xf32> to vector<8x64xf32>
    %671 = vector.shape_cast %665 : vector<8x64xf32> to vector<1x8x64xf32>
    tpu.vector_store %arg12[%c2_432, %c0_433, %c0_434], %671 {strides = array<i32>} : memref<3x8x64xf32, #tpu.memory_space<vmem>>, vector<1x8x64xf32>,
    %c5_435 = arith.constant 5 : index
    %c0_436 = arith.constant 0 : index
    %c0_437 = arith.constant 0 : index
    %672 = vector.load %arg14[%c5_435, %c0_436, %c0_437] : memref<8x8x64xf32, #tpu.memory_space<vmem>>, vector<1x8x64xf32>
    %673 = vector.shape_cast %672 : vector<1x8x64xf32> to vector<8x64xf32>
    %674 = vector.shape_cast %665 : vector<8x64xf32> to vector<1x8x64xf32>
    tpu.vector_store %arg14[%c5_435, %c0_436, %c0_437], %674 {strides = array<i32>} : memref<8x8x64xf32, #tpu.memory_space<vmem>>, vector<1x8x64xf32>,
    %c6 = arith.constant 6 : index
    %c0_438 = arith.constant 0 : index
    %c0_439 = arith.constant 0 : index
    %675 = vector.load %arg2[%c6, %c0_438, %c0_439] : memref<8x8x10xf32, #tpu.memory_space<vmem>>, vector<1x8x10xf32>
    %676 = vector.shape_cast %675 : vector<1x8x10xf32> to vector<8x10xf32>
    %c0_440 = arith.constant 0 : index
    %c0_441 = arith.constant 0 : index
    %c0_442 = arith.constant 0 : index
    %677 = vector.load %arg12[%c0_440, %c0_441, %c0_442] : memref<3x8x64xf32, #tpu.memory_space<vmem>>, vector<1x8x64xf32>
    %678 = vector.shape_cast %677 : vector<1x8x64xf32> to vector<8x64xf32>
    %c0_443 = arith.constant 0 : index
    %c0_444 = arith.constant 0 : index
    %c0_445 = arith.constant 0 : index
    %679 = vector.load %arg5[%c0_443, %c0_444, %c0_445] : memref<3x64x256xf32, #tpu.memory_space<vmem>>, vector<1x64x256xf32>
    %680 = vector.shape_cast %679 : vector<1x64x256xf32> to vector<64x256xf32>
    %cst_446 = arith.constant dense<0.000000e+00> : vector<8x256xf32>
    %681 = tpu.matmul %678, %680, %cst_446 {dimension_numbers = #tpu.dot_dimension_numbers<[1], [0], [0], [1], [0, 0, 1, 1], [], []>} : vector<8x64xf32>, vector<64x256xf32>, vector<8x256xf32> -> vector<8x256xf32>
    %c0_447 = arith.constant 0 : index
    %c0_448 = arith.constant 0 : index
    %682 = vector.load %arg6[%c0_447, %c0_448] : memref<3x256xf32, #tpu.memory_space<vmem>>, vector<1x256xf32>
    %683 = vector.broadcast %682 : vector<1x256xf32> to vector<8x256xf32>
    %684 = arith.addf %681, %683 : vector<8x256xf32>
    %c1_449 = arith.constant 1 : index
    %c0_450 = arith.constant 0 : index
    %c0_451 = arith.constant 0 : index
    %685 = vector.load %arg12[%c1_449, %c0_450, %c0_451] : memref<3x8x64xf32, #tpu.memory_space<vmem>>, vector<1x8x64xf32>
    %686 = vector.shape_cast %685 : vector<1x8x64xf32> to vector<8x64xf32>
    %c1_452 = arith.constant 1 : index
    %c0_453 = arith.constant 0 : index
    %c0_454 = arith.constant 0 : index
    %687 = vector.load %arg5[%c1_452, %c0_453, %c0_454] : memref<3x64x256xf32, #tpu.memory_space<vmem>>, vector<1x64x256xf32>
    %688 = vector.shape_cast %687 : vector<1x64x256xf32> to vector<64x256xf32>
    %cst_455 = arith.constant dense<0.000000e+00> : vector<8x256xf32>
    %689 = tpu.matmul %686, %688, %cst_455 {dimension_numbers = #tpu.dot_dimension_numbers<[1], [0], [0], [1], [0, 0, 1, 1], [], []>} : vector<8x64xf32>, vector<64x256xf32>, vector<8x256xf32> -> vector<8x256xf32>
    %c1_456 = arith.constant 1 : index
    %c0_457 = arith.constant 0 : index
    %690 = vector.load %arg6[%c1_456, %c0_457] : memref<3x256xf32, #tpu.memory_space<vmem>>, vector<1x256xf32>
    %691 = vector.broadcast %690 : vector<1x256xf32> to vector<8x256xf32>
    %692 = arith.addf %689, %691 : vector<8x256xf32>
    %c2_458 = arith.constant 2 : index
    %c0_459 = arith.constant 0 : index
    %c0_460 = arith.constant 0 : index
    %693 = vector.load %arg12[%c2_458, %c0_459, %c0_460] : memref<3x8x64xf32, #tpu.memory_space<vmem>>, vector<1x8x64xf32>
    %694 = vector.shape_cast %693 : vector<1x8x64xf32> to vector<8x64xf32>
    %c2_461 = arith.constant 2 : index
    %c0_462 = arith.constant 0 : index
    %c0_463 = arith.constant 0 : index
    %695 = vector.load %arg5[%c2_461, %c0_462, %c0_463] : memref<3x64x256xf32, #tpu.memory_space<vmem>>, vector<1x64x256xf32>
    %696 = vector.shape_cast %695 : vector<1x64x256xf32> to vector<64x256xf32>
    %cst_464 = arith.constant dense<0.000000e+00> : vector<8x256xf32>
    %697 = tpu.matmul %694, %696, %cst_464 {dimension_numbers = #tpu.dot_dimension_numbers<[1], [0], [0], [1], [0, 0, 1, 1], [], []>} : vector<8x64xf32>, vector<64x256xf32>, vector<8x256xf32> -> vector<8x256xf32>
    %c2_465 = arith.constant 2 : index
    %c0_466 = arith.constant 0 : index
    %698 = vector.load %arg6[%c2_465, %c0_466] : memref<3x256xf32, #tpu.memory_space<vmem>>, vector<1x256xf32>
    %699 = vector.broadcast %698 : vector<1x256xf32> to vector<8x256xf32>
    %700 = arith.addf %697, %699 : vector<8x256xf32>
    %c0_467 = arith.constant 0 : index
    %c0_468 = arith.constant 0 : index
    %701 = vector.load %arg3[%c0_467, %c0_468] : memref<10x256xf32, #tpu.memory_space<vmem>>, vector<10x256xf32>
    %cst_469 = arith.constant dense<0.000000e+00> : vector<8x256xf32>
    %702 = tpu.matmul %676, %701, %cst_469 {dimension_numbers = #tpu.dot_dimension_numbers<[1], [0], [0], [1], [0, 0, 1, 1], [], []>} : vector<8x10xf32>, vector<10x256xf32>, vector<8x256xf32> -> vector<8x256xf32>
    %703 = arith.addf %702, %684 : vector<8x256xf32>
    %704 = vector.extract_strided_slice %703 {offsets = [0, 0], sizes = [8, 192], strides = [1, 1]} : vector<8x256xf32> to vector<8x192xf32>
    %705 = arith.negf %704 : vector<8x192xf32>
    %706 = math.exp %705 : vector<8x192xf32>
    %cst_470 = arith.constant 1.000000e+00 : f32
    %707 = vector.broadcast %cst_470 : f32 to vector<8x192xf32>
    %708 = arith.addf %707, %706 : vector<8x192xf32>
    %709 = arith.divf %707, %708 : vector<8x192xf32>
    %710 = vector.extract_strided_slice %703 {offsets = [0, 192], sizes = [8, 64], strides = [1, 1]} : vector<8x256xf32> to vector<8x64xf32>
    %711 = math.tanh %710 : vector<8x64xf32>
    %712 = vector.extract_strided_slice %709 {offsets = [0, 0], sizes = [8, 64], strides = [1, 1]} : vector<8x192xf32> to vector<8x64xf32>
    %713 = vector.extract_strided_slice %709 {offsets = [0, 64], sizes = [8, 64], strides = [1, 1]} : vector<8x192xf32> to vector<8x64xf32>
    %714 = vector.extract_strided_slice %709 {offsets = [0, 128], sizes = [8, 64], strides = [1, 1]} : vector<8x192xf32> to vector<8x64xf32>
    %c0_471 = arith.constant 0 : index
    %c0_472 = arith.constant 0 : index
    %c0_473 = arith.constant 0 : index
    %715 = vector.load %arg13[%c0_471, %c0_472, %c0_473] : memref<3x8x64xf32, #tpu.memory_space<vmem>>, vector<1x8x64xf32>
    %716 = vector.shape_cast %715 : vector<1x8x64xf32> to vector<8x64xf32>
    %717 = arith.mulf %713, %716 : vector<8x64xf32>
    %718 = arith.mulf %712, %711 : vector<8x64xf32>
    %719 = arith.addf %717, %718 : vector<8x64xf32>
    %720 = math.tanh %719 : vector<8x64xf32>
    %721 = arith.mulf %714, %720 : vector<8x64xf32>
    %c0_474 = arith.constant 0 : index
    %c0_475 = arith.constant 0 : index
    %c0_476 = arith.constant 0 : index
    %722 = vector.load %arg13[%c0_474, %c0_475, %c0_476] : memref<3x8x64xf32, #tpu.memory_space<vmem>>, vector<1x8x64xf32>
    %723 = vector.shape_cast %722 : vector<1x8x64xf32> to vector<8x64xf32>
    %724 = vector.shape_cast %719 : vector<8x64xf32> to vector<1x8x64xf32>
    tpu.vector_store %arg13[%c0_474, %c0_475, %c0_476], %724 {strides = array<i32>} : memref<3x8x64xf32, #tpu.memory_space<vmem>>, vector<1x8x64xf32>,
    %c0_477 = arith.constant 0 : index
    %c0_478 = arith.constant 0 : index
    %c0_479 = arith.constant 0 : index
    %725 = vector.load %arg12[%c0_477, %c0_478, %c0_479] : memref<3x8x64xf32, #tpu.memory_space<vmem>>, vector<1x8x64xf32>
    %726 = vector.shape_cast %725 : vector<1x8x64xf32> to vector<8x64xf32>
    %727 = vector.shape_cast %721 : vector<8x64xf32> to vector<1x8x64xf32>
    tpu.vector_store %arg12[%c0_477, %c0_478, %c0_479], %727 {strides = array<i32>} : memref<3x8x64xf32, #tpu.memory_space<vmem>>, vector<1x8x64xf32>,
    %c0_480 = arith.constant 0 : index
    %c0_481 = arith.constant 0 : index
    %c0_482 = arith.constant 0 : index
    %728 = vector.load %arg4[%c0_480, %c0_481, %c0_482] : memref<2x64x256xf32, #tpu.memory_space<vmem>>, vector<1x64x256xf32>
    %729 = vector.shape_cast %728 : vector<1x64x256xf32> to vector<64x256xf32>
    %cst_483 = arith.constant dense<0.000000e+00> : vector<8x256xf32>
    %730 = tpu.matmul %721, %729, %cst_483 {dimension_numbers = #tpu.dot_dimension_numbers<[1], [0], [0], [1], [0, 0, 1, 1], [], []>} : vector<8x64xf32>, vector<64x256xf32>, vector<8x256xf32> -> vector<8x256xf32>
    %731 = arith.addf %730, %692 : vector<8x256xf32>
    %732 = vector.extract_strided_slice %731 {offsets = [0, 0], sizes = [8, 192], strides = [1, 1]} : vector<8x256xf32> to vector<8x192xf32>
    %733 = arith.negf %732 : vector<8x192xf32>
    %734 = math.exp %733 : vector<8x192xf32>
    %cst_484 = arith.constant 1.000000e+00 : f32
    %735 = vector.broadcast %cst_484 : f32 to vector<8x192xf32>
    %736 = arith.addf %735, %734 : vector<8x192xf32>
    %737 = arith.divf %735, %736 : vector<8x192xf32>
    %738 = vector.extract_strided_slice %731 {offsets = [0, 192], sizes = [8, 64], strides = [1, 1]} : vector<8x256xf32> to vector<8x64xf32>
    %739 = math.tanh %738 : vector<8x64xf32>
    %740 = vector.extract_strided_slice %737 {offsets = [0, 0], sizes = [8, 64], strides = [1, 1]} : vector<8x192xf32> to vector<8x64xf32>
    %741 = vector.extract_strided_slice %737 {offsets = [0, 64], sizes = [8, 64], strides = [1, 1]} : vector<8x192xf32> to vector<8x64xf32>
    %742 = vector.extract_strided_slice %737 {offsets = [0, 128], sizes = [8, 64], strides = [1, 1]} : vector<8x192xf32> to vector<8x64xf32>
    %c1_485 = arith.constant 1 : index
    %c0_486 = arith.constant 0 : index
    %c0_487 = arith.constant 0 : index
    %743 = vector.load %arg13[%c1_485, %c0_486, %c0_487] : memref<3x8x64xf32, #tpu.memory_space<vmem>>, vector<1x8x64xf32>
    %744 = vector.shape_cast %743 : vector<1x8x64xf32> to vector<8x64xf32>
    %745 = arith.mulf %741, %744 : vector<8x64xf32>
    %746 = arith.mulf %740, %739 : vector<8x64xf32>
    %747 = arith.addf %745, %746 : vector<8x64xf32>
    %748 = math.tanh %747 : vector<8x64xf32>
    %749 = arith.mulf %742, %748 : vector<8x64xf32>
    %c1_488 = arith.constant 1 : index
    %c0_489 = arith.constant 0 : index
    %c0_490 = arith.constant 0 : index
    %750 = vector.load %arg13[%c1_488, %c0_489, %c0_490] : memref<3x8x64xf32, #tpu.memory_space<vmem>>, vector<1x8x64xf32>
    %751 = vector.shape_cast %750 : vector<1x8x64xf32> to vector<8x64xf32>
    %752 = vector.shape_cast %747 : vector<8x64xf32> to vector<1x8x64xf32>
    tpu.vector_store %arg13[%c1_488, %c0_489, %c0_490], %752 {strides = array<i32>} : memref<3x8x64xf32, #tpu.memory_space<vmem>>, vector<1x8x64xf32>,
    %c1_491 = arith.constant 1 : index
    %c0_492 = arith.constant 0 : index
    %c0_493 = arith.constant 0 : index
    %753 = vector.load %arg12[%c1_491, %c0_492, %c0_493] : memref<3x8x64xf32, #tpu.memory_space<vmem>>, vector<1x8x64xf32>
    %754 = vector.shape_cast %753 : vector<1x8x64xf32> to vector<8x64xf32>
    %755 = vector.shape_cast %749 : vector<8x64xf32> to vector<1x8x64xf32>
    tpu.vector_store %arg12[%c1_491, %c0_492, %c0_493], %755 {strides = array<i32>} : memref<3x8x64xf32, #tpu.memory_space<vmem>>, vector<1x8x64xf32>,
    %c1_494 = arith.constant 1 : index
    %c0_495 = arith.constant 0 : index
    %c0_496 = arith.constant 0 : index
    %756 = vector.load %arg4[%c1_494, %c0_495, %c0_496] : memref<2x64x256xf32, #tpu.memory_space<vmem>>, vector<1x64x256xf32>
    %757 = vector.shape_cast %756 : vector<1x64x256xf32> to vector<64x256xf32>
    %cst_497 = arith.constant dense<0.000000e+00> : vector<8x256xf32>
    %758 = tpu.matmul %749, %757, %cst_497 {dimension_numbers = #tpu.dot_dimension_numbers<[1], [0], [0], [1], [0, 0, 1, 1], [], []>} : vector<8x64xf32>, vector<64x256xf32>, vector<8x256xf32> -> vector<8x256xf32>
    %759 = arith.addf %758, %700 : vector<8x256xf32>
    %760 = vector.extract_strided_slice %759 {offsets = [0, 0], sizes = [8, 192], strides = [1, 1]} : vector<8x256xf32> to vector<8x192xf32>
    %761 = arith.negf %760 : vector<8x192xf32>
    %762 = math.exp %761 : vector<8x192xf32>
    %cst_498 = arith.constant 1.000000e+00 : f32
    %763 = vector.broadcast %cst_498 : f32 to vector<8x192xf32>
    %764 = arith.addf %763, %762 : vector<8x192xf32>
    %765 = arith.divf %763, %764 : vector<8x192xf32>
    %766 = vector.extract_strided_slice %759 {offsets = [0, 192], sizes = [8, 64], strides = [1, 1]} : vector<8x256xf32> to vector<8x64xf32>
    %767 = math.tanh %766 : vector<8x64xf32>
    %768 = vector.extract_strided_slice %765 {offsets = [0, 0], sizes = [8, 64], strides = [1, 1]} : vector<8x192xf32> to vector<8x64xf32>
    %769 = vector.extract_strided_slice %765 {offsets = [0, 64], sizes = [8, 64], strides = [1, 1]} : vector<8x192xf32> to vector<8x64xf32>
    %770 = vector.extract_strided_slice %765 {offsets = [0, 128], sizes = [8, 64], strides = [1, 1]} : vector<8x192xf32> to vector<8x64xf32>
    %c2_499 = arith.constant 2 : index
    %c0_500 = arith.constant 0 : index
    %c0_501 = arith.constant 0 : index
    %771 = vector.load %arg13[%c2_499, %c0_500, %c0_501] : memref<3x8x64xf32, #tpu.memory_space<vmem>>, vector<1x8x64xf32>
    %772 = vector.shape_cast %771 : vector<1x8x64xf32> to vector<8x64xf32>
    %773 = arith.mulf %769, %772 : vector<8x64xf32>
    %774 = arith.mulf %768, %767 : vector<8x64xf32>
    %775 = arith.addf %773, %774 : vector<8x64xf32>
    %776 = math.tanh %775 : vector<8x64xf32>
    %777 = arith.mulf %770, %776 : vector<8x64xf32>
    %c2_502 = arith.constant 2 : index
    %c0_503 = arith.constant 0 : index
    %c0_504 = arith.constant 0 : index
    %778 = vector.load %arg13[%c2_502, %c0_503, %c0_504] : memref<3x8x64xf32, #tpu.memory_space<vmem>>, vector<1x8x64xf32>
    %779 = vector.shape_cast %778 : vector<1x8x64xf32> to vector<8x64xf32>
    %780 = vector.shape_cast %775 : vector<8x64xf32> to vector<1x8x64xf32>
    tpu.vector_store %arg13[%c2_502, %c0_503, %c0_504], %780 {strides = array<i32>} : memref<3x8x64xf32, #tpu.memory_space<vmem>>, vector<1x8x64xf32>,
    %c2_505 = arith.constant 2 : index
    %c0_506 = arith.constant 0 : index
    %c0_507 = arith.constant 0 : index
    %781 = vector.load %arg12[%c2_505, %c0_506, %c0_507] : memref<3x8x64xf32, #tpu.memory_space<vmem>>, vector<1x8x64xf32>
    %782 = vector.shape_cast %781 : vector<1x8x64xf32> to vector<8x64xf32>
    %783 = vector.shape_cast %777 : vector<8x64xf32> to vector<1x8x64xf32>
    tpu.vector_store %arg12[%c2_505, %c0_506, %c0_507], %783 {strides = array<i32>} : memref<3x8x64xf32, #tpu.memory_space<vmem>>, vector<1x8x64xf32>,
    %c6_508 = arith.constant 6 : index
    %c0_509 = arith.constant 0 : index
    %c0_510 = arith.constant 0 : index
    %784 = vector.load %arg14[%c6_508, %c0_509, %c0_510] : memref<8x8x64xf32, #tpu.memory_space<vmem>>, vector<1x8x64xf32>
    %785 = vector.shape_cast %784 : vector<1x8x64xf32> to vector<8x64xf32>
    %786 = vector.shape_cast %777 : vector<8x64xf32> to vector<1x8x64xf32>
    tpu.vector_store %arg14[%c6_508, %c0_509, %c0_510], %786 {strides = array<i32>} : memref<8x8x64xf32, #tpu.memory_space<vmem>>, vector<1x8x64xf32>,
    %c7 = arith.constant 7 : index
    %c0_511 = arith.constant 0 : index
    %c0_512 = arith.constant 0 : index
    %787 = vector.load %arg2[%c7, %c0_511, %c0_512] : memref<8x8x10xf32, #tpu.memory_space<vmem>>, vector<1x8x10xf32>
    %788 = vector.shape_cast %787 : vector<1x8x10xf32> to vector<8x10xf32>
    %c0_513 = arith.constant 0 : index
    %c0_514 = arith.constant 0 : index
    %c0_515 = arith.constant 0 : index
    %789 = vector.load %arg12[%c0_513, %c0_514, %c0_515] : memref<3x8x64xf32, #tpu.memory_space<vmem>>, vector<1x8x64xf32>
    %790 = vector.shape_cast %789 : vector<1x8x64xf32> to vector<8x64xf32>
    %c0_516 = arith.constant 0 : index
    %c0_517 = arith.constant 0 : index
    %c0_518 = arith.constant 0 : index
    %791 = vector.load %arg5[%c0_516, %c0_517, %c0_518] : memref<3x64x256xf32, #tpu.memory_space<vmem>>, vector<1x64x256xf32>
    %792 = vector.shape_cast %791 : vector<1x64x256xf32> to vector<64x256xf32>
    %cst_519 = arith.constant dense<0.000000e+00> : vector<8x256xf32>
    %793 = tpu.matmul %790, %792, %cst_519 {dimension_numbers = #tpu.dot_dimension_numbers<[1], [0], [0], [1], [0, 0, 1, 1], [], []>} : vector<8x64xf32>, vector<64x256xf32>, vector<8x256xf32> -> vector<8x256xf32>
    %c0_520 = arith.constant 0 : index
    %c0_521 = arith.constant 0 : index
    %794 = vector.load %arg6[%c0_520, %c0_521] : memref<3x256xf32, #tpu.memory_space<vmem>>, vector<1x256xf32>
    %795 = vector.broadcast %794 : vector<1x256xf32> to vector<8x256xf32>
    %796 = arith.addf %793, %795 : vector<8x256xf32>
    %c1_522 = arith.constant 1 : index
    %c0_523 = arith.constant 0 : index
    %c0_524 = arith.constant 0 : index
    %797 = vector.load %arg12[%c1_522, %c0_523, %c0_524] : memref<3x8x64xf32, #tpu.memory_space<vmem>>, vector<1x8x64xf32>
    %798 = vector.shape_cast %797 : vector<1x8x64xf32> to vector<8x64xf32>
    %c1_525 = arith.constant 1 : index
    %c0_526 = arith.constant 0 : index
    %c0_527 = arith.constant 0 : index
    %799 = vector.load %arg5[%c1_525, %c0_526, %c0_527] : memref<3x64x256xf32, #tpu.memory_space<vmem>>, vector<1x64x256xf32>
    %800 = vector.shape_cast %799 : vector<1x64x256xf32> to vector<64x256xf32>
    %cst_528 = arith.constant dense<0.000000e+00> : vector<8x256xf32>
    %801 = tpu.matmul %798, %800, %cst_528 {dimension_numbers = #tpu.dot_dimension_numbers<[1], [0], [0], [1], [0, 0, 1, 1], [], []>} : vector<8x64xf32>, vector<64x256xf32>, vector<8x256xf32> -> vector<8x256xf32>
    %c1_529 = arith.constant 1 : index
    %c0_530 = arith.constant 0 : index
    %802 = vector.load %arg6[%c1_529, %c0_530] : memref<3x256xf32, #tpu.memory_space<vmem>>, vector<1x256xf32>
    %803 = vector.broadcast %802 : vector<1x256xf32> to vector<8x256xf32>
    %804 = arith.addf %801, %803 : vector<8x256xf32>
    %c2_531 = arith.constant 2 : index
    %c0_532 = arith.constant 0 : index
    %c0_533 = arith.constant 0 : index
    %805 = vector.load %arg12[%c2_531, %c0_532, %c0_533] : memref<3x8x64xf32, #tpu.memory_space<vmem>>, vector<1x8x64xf32>
    %806 = vector.shape_cast %805 : vector<1x8x64xf32> to vector<8x64xf32>
    %c2_534 = arith.constant 2 : index
    %c0_535 = arith.constant 0 : index
    %c0_536 = arith.constant 0 : index
    %807 = vector.load %arg5[%c2_534, %c0_535, %c0_536] : memref<3x64x256xf32, #tpu.memory_space<vmem>>, vector<1x64x256xf32>
    %808 = vector.shape_cast %807 : vector<1x64x256xf32> to vector<64x256xf32>
    %cst_537 = arith.constant dense<0.000000e+00> : vector<8x256xf32>
    %809 = tpu.matmul %806, %808, %cst_537 {dimension_numbers = #tpu.dot_dimension_numbers<[1], [0], [0], [1], [0, 0, 1, 1], [], []>} : vector<8x64xf32>, vector<64x256xf32>, vector<8x256xf32> -> vector<8x256xf32>
    %c2_538 = arith.constant 2 : index
    %c0_539 = arith.constant 0 : index
    %810 = vector.load %arg6[%c2_538, %c0_539] : memref<3x256xf32, #tpu.memory_space<vmem>>, vector<1x256xf32>
    %811 = vector.broadcast %810 : vector<1x256xf32> to vector<8x256xf32>
    %812 = arith.addf %809, %811 : vector<8x256xf32>
    %c0_540 = arith.constant 0 : index
    %c0_541 = arith.constant 0 : index
    %813 = vector.load %arg3[%c0_540, %c0_541] : memref<10x256xf32, #tpu.memory_space<vmem>>, vector<10x256xf32>
    %cst_542 = arith.constant dense<0.000000e+00> : vector<8x256xf32>
    %814 = tpu.matmul %788, %813, %cst_542 {dimension_numbers = #tpu.dot_dimension_numbers<[1], [0], [0], [1], [0, 0, 1, 1], [], []>} : vector<8x10xf32>, vector<10x256xf32>, vector<8x256xf32> -> vector<8x256xf32>
    %815 = arith.addf %814, %796 : vector<8x256xf32>
    %816 = vector.extract_strided_slice %815 {offsets = [0, 0], sizes = [8, 192], strides = [1, 1]} : vector<8x256xf32> to vector<8x192xf32>
    %817 = arith.negf %816 : vector<8x192xf32>
    %818 = math.exp %817 : vector<8x192xf32>
    %cst_543 = arith.constant 1.000000e+00 : f32
    %819 = vector.broadcast %cst_543 : f32 to vector<8x192xf32>
    %820 = arith.addf %819, %818 : vector<8x192xf32>
    %821 = arith.divf %819, %820 : vector<8x192xf32>
    %822 = vector.extract_strided_slice %815 {offsets = [0, 192], sizes = [8, 64], strides = [1, 1]} : vector<8x256xf32> to vector<8x64xf32>
    %823 = math.tanh %822 : vector<8x64xf32>
    %824 = vector.extract_strided_slice %821 {offsets = [0, 0], sizes = [8, 64], strides = [1, 1]} : vector<8x192xf32> to vector<8x64xf32>
    %825 = vector.extract_strided_slice %821 {offsets = [0, 64], sizes = [8, 64], strides = [1, 1]} : vector<8x192xf32> to vector<8x64xf32>
    %826 = vector.extract_strided_slice %821 {offsets = [0, 128], sizes = [8, 64], strides = [1, 1]} : vector<8x192xf32> to vector<8x64xf32>
    %c0_544 = arith.constant 0 : index
    %c0_545 = arith.constant 0 : index
    %c0_546 = arith.constant 0 : index
    %827 = vector.load %arg13[%c0_544, %c0_545, %c0_546] : memref<3x8x64xf32, #tpu.memory_space<vmem>>, vector<1x8x64xf32>
    %828 = vector.shape_cast %827 : vector<1x8x64xf32> to vector<8x64xf32>
    %829 = arith.mulf %825, %828 : vector<8x64xf32>
    %830 = arith.mulf %824, %823 : vector<8x64xf32>
    %831 = arith.addf %829, %830 : vector<8x64xf32>
    %832 = math.tanh %831 : vector<8x64xf32>
    %833 = arith.mulf %826, %832 : vector<8x64xf32>
    %c0_547 = arith.constant 0 : index
    %c0_548 = arith.constant 0 : index
    %c0_549 = arith.constant 0 : index
    %834 = vector.load %arg13[%c0_547, %c0_548, %c0_549] : memref<3x8x64xf32, #tpu.memory_space<vmem>>, vector<1x8x64xf32>
    %835 = vector.shape_cast %834 : vector<1x8x64xf32> to vector<8x64xf32>
    %836 = vector.shape_cast %831 : vector<8x64xf32> to vector<1x8x64xf32>
    tpu.vector_store %arg13[%c0_547, %c0_548, %c0_549], %836 {strides = array<i32>} : memref<3x8x64xf32, #tpu.memory_space<vmem>>, vector<1x8x64xf32>,
    %c0_550 = arith.constant 0 : index
    %c0_551 = arith.constant 0 : index
    %c0_552 = arith.constant 0 : index
    %837 = vector.load %arg12[%c0_550, %c0_551, %c0_552] : memref<3x8x64xf32, #tpu.memory_space<vmem>>, vector<1x8x64xf32>
    %838 = vector.shape_cast %837 : vector<1x8x64xf32> to vector<8x64xf32>
    %839 = vector.shape_cast %833 : vector<8x64xf32> to vector<1x8x64xf32>
    tpu.vector_store %arg12[%c0_550, %c0_551, %c0_552], %839 {strides = array<i32>} : memref<3x8x64xf32, #tpu.memory_space<vmem>>, vector<1x8x64xf32>,
    %c0_553 = arith.constant 0 : index
    %c0_554 = arith.constant 0 : index
    %c0_555 = arith.constant 0 : index
    %840 = vector.load %arg4[%c0_553, %c0_554, %c0_555] : memref<2x64x256xf32, #tpu.memory_space<vmem>>, vector<1x64x256xf32>
    %841 = vector.shape_cast %840 : vector<1x64x256xf32> to vector<64x256xf32>
    %cst_556 = arith.constant dense<0.000000e+00> : vector<8x256xf32>
    %842 = tpu.matmul %833, %841, %cst_556 {dimension_numbers = #tpu.dot_dimension_numbers<[1], [0], [0], [1], [0, 0, 1, 1], [], []>} : vector<8x64xf32>, vector<64x256xf32>, vector<8x256xf32> -> vector<8x256xf32>
    %843 = arith.addf %842, %804 : vector<8x256xf32>
    %844 = vector.extract_strided_slice %843 {offsets = [0, 0], sizes = [8, 192], strides = [1, 1]} : vector<8x256xf32> to vector<8x192xf32>
    %845 = arith.negf %844 : vector<8x192xf32>
    %846 = math.exp %845 : vector<8x192xf32>
    %cst_557 = arith.constant 1.000000e+00 : f32
    %847 = vector.broadcast %cst_557 : f32 to vector<8x192xf32>
    %848 = arith.addf %847, %846 : vector<8x192xf32>
    %849 = arith.divf %847, %848 : vector<8x192xf32>
    %850 = vector.extract_strided_slice %843 {offsets = [0, 192], sizes = [8, 64], strides = [1, 1]} : vector<8x256xf32> to vector<8x64xf32>
    %851 = math.tanh %850 : vector<8x64xf32>
    %852 = vector.extract_strided_slice %849 {offsets = [0, 0], sizes = [8, 64], strides = [1, 1]} : vector<8x192xf32> to vector<8x64xf32>
    %853 = vector.extract_strided_slice %849 {offsets = [0, 64], sizes = [8, 64], strides = [1, 1]} : vector<8x192xf32> to vector<8x64xf32>
    %854 = vector.extract_strided_slice %849 {offsets = [0, 128], sizes = [8, 64], strides = [1, 1]} : vector<8x192xf32> to vector<8x64xf32>
    %c1_558 = arith.constant 1 : index
    %c0_559 = arith.constant 0 : index
    %c0_560 = arith.constant 0 : index
    %855 = vector.load %arg13[%c1_558, %c0_559, %c0_560] : memref<3x8x64xf32, #tpu.memory_space<vmem>>, vector<1x8x64xf32>
    %856 = vector.shape_cast %855 : vector<1x8x64xf32> to vector<8x64xf32>
    %857 = arith.mulf %853, %856 : vector<8x64xf32>
    %858 = arith.mulf %852, %851 : vector<8x64xf32>
    %859 = arith.addf %857, %858 : vector<8x64xf32>
    %860 = math.tanh %859 : vector<8x64xf32>
    %861 = arith.mulf %854, %860 : vector<8x64xf32>
    %c1_561 = arith.constant 1 : index
    %c0_562 = arith.constant 0 : index
    %c0_563 = arith.constant 0 : index
    %862 = vector.load %arg13[%c1_561, %c0_562, %c0_563] : memref<3x8x64xf32, #tpu.memory_space<vmem>>, vector<1x8x64xf32>
    %863 = vector.shape_cast %862 : vector<1x8x64xf32> to vector<8x64xf32>
    %864 = vector.shape_cast %859 : vector<8x64xf32> to vector<1x8x64xf32>
    tpu.vector_store %arg13[%c1_561, %c0_562, %c0_563], %864 {strides = array<i32>} : memref<3x8x64xf32, #tpu.memory_space<vmem>>, vector<1x8x64xf32>,
    %c1_564 = arith.constant 1 : index
    %c0_565 = arith.constant 0 : index
    %c0_566 = arith.constant 0 : index
    %865 = vector.load %arg12[%c1_564, %c0_565, %c0_566] : memref<3x8x64xf32, #tpu.memory_space<vmem>>, vector<1x8x64xf32>
    %866 = vector.shape_cast %865 : vector<1x8x64xf32> to vector<8x64xf32>
    %867 = vector.shape_cast %861 : vector<8x64xf32> to vector<1x8x64xf32>
    tpu.vector_store %arg12[%c1_564, %c0_565, %c0_566], %867 {strides = array<i32>} : memref<3x8x64xf32, #tpu.memory_space<vmem>>, vector<1x8x64xf32>,
    %c1_567 = arith.constant 1 : index
    %c0_568 = arith.constant 0 : index
    %c0_569 = arith.constant 0 : index
    %868 = vector.load %arg4[%c1_567, %c0_568, %c0_569] : memref<2x64x256xf32, #tpu.memory_space<vmem>>, vector<1x64x256xf32>
    %869 = vector.shape_cast %868 : vector<1x64x256xf32> to vector<64x256xf32>
    %cst_570 = arith.constant dense<0.000000e+00> : vector<8x256xf32>
    %870 = tpu.matmul %861, %869, %cst_570 {dimension_numbers = #tpu.dot_dimension_numbers<[1], [0], [0], [1], [0, 0, 1, 1], [], []>} : vector<8x64xf32>, vector<64x256xf32>, vector<8x256xf32> -> vector<8x256xf32>
    %871 = arith.addf %870, %812 : vector<8x256xf32>
    %872 = vector.extract_strided_slice %871 {offsets = [0, 0], sizes = [8, 192], strides = [1, 1]} : vector<8x256xf32> to vector<8x192xf32>
    %873 = arith.negf %872 : vector<8x192xf32>
    %874 = math.exp %873 : vector<8x192xf32>
    %cst_571 = arith.constant 1.000000e+00 : f32
    %875 = vector.broadcast %cst_571 : f32 to vector<8x192xf32>
    %876 = arith.addf %875, %874 : vector<8x192xf32>
    %877 = arith.divf %875, %876 : vector<8x192xf32>
    %878 = vector.extract_strided_slice %871 {offsets = [0, 192], sizes = [8, 64], strides = [1, 1]} : vector<8x256xf32> to vector<8x64xf32>
    %879 = math.tanh %878 : vector<8x64xf32>
    %880 = vector.extract_strided_slice %877 {offsets = [0, 0], sizes = [8, 64], strides = [1, 1]} : vector<8x192xf32> to vector<8x64xf32>
    %881 = vector.extract_strided_slice %877 {offsets = [0, 64], sizes = [8, 64], strides = [1, 1]} : vector<8x192xf32> to vector<8x64xf32>
    %882 = vector.extract_strided_slice %877 {offsets = [0, 128], sizes = [8, 64], strides = [1, 1]} : vector<8x192xf32> to vector<8x64xf32>
    %c2_572 = arith.constant 2 : index
    %c0_573 = arith.constant 0 : index
    %c0_574 = arith.constant 0 : index
    %883 = vector.load %arg13[%c2_572, %c0_573, %c0_574] : memref<3x8x64xf32, #tpu.memory_space<vmem>>, vector<1x8x64xf32>
    %884 = vector.shape_cast %883 : vector<1x8x64xf32> to vector<8x64xf32>
    %885 = arith.mulf %881, %884 : vector<8x64xf32>
    %886 = arith.mulf %880, %879 : vector<8x64xf32>
    %887 = arith.addf %885, %886 : vector<8x64xf32>
    %888 = math.tanh %887 : vector<8x64xf32>
    %889 = arith.mulf %882, %888 : vector<8x64xf32>
    %c2_575 = arith.constant 2 : index
    %c0_576 = arith.constant 0 : index
    %c0_577 = arith.constant 0 : index
    %890 = vector.load %arg13[%c2_575, %c0_576, %c0_577] : memref<3x8x64xf32, #tpu.memory_space<vmem>>, vector<1x8x64xf32>
    %891 = vector.shape_cast %890 : vector<1x8x64xf32> to vector<8x64xf32>
    %892 = vector.shape_cast %887 : vector<8x64xf32> to vector<1x8x64xf32>
    tpu.vector_store %arg13[%c2_575, %c0_576, %c0_577], %892 {strides = array<i32>} : memref<3x8x64xf32, #tpu.memory_space<vmem>>, vector<1x8x64xf32>,
    %c2_578 = arith.constant 2 : index
    %c0_579 = arith.constant 0 : index
    %c0_580 = arith.constant 0 : index
    %893 = vector.load %arg12[%c2_578, %c0_579, %c0_580] : memref<3x8x64xf32, #tpu.memory_space<vmem>>, vector<1x8x64xf32>
    %894 = vector.shape_cast %893 : vector<1x8x64xf32> to vector<8x64xf32>
    %895 = vector.shape_cast %889 : vector<8x64xf32> to vector<1x8x64xf32>
    tpu.vector_store %arg12[%c2_578, %c0_579, %c0_580], %895 {strides = array<i32>} : memref<3x8x64xf32, #tpu.memory_space<vmem>>, vector<1x8x64xf32>,
    %c7_581 = arith.constant 7 : index
    %c0_582 = arith.constant 0 : index
    %c0_583 = arith.constant 0 : index
    %896 = vector.load %arg14[%c7_581, %c0_582, %c0_583] : memref<8x8x64xf32, #tpu.memory_space<vmem>>, vector<1x8x64xf32>
    %897 = vector.shape_cast %896 : vector<1x8x64xf32> to vector<8x64xf32>
    %898 = vector.shape_cast %889 : vector<8x64xf32> to vector<1x8x64xf32>
    tpu.vector_store %arg14[%c7_581, %c0_582, %c0_583], %898 {strides = array<i32>} : memref<8x8x64xf32, #tpu.memory_space<vmem>>, vector<1x8x64xf32>,
    %c0_584 = arith.constant 0 : index
    %c0_585 = arith.constant 0 : index
    %c0_586 = arith.constant 0 : index
    %899 = vector.load %arg14[%c0_584, %c0_585, %c0_586] : memref<8x8x64xf32, #tpu.memory_space<vmem>>, vector<8x8x64xf32>
    %900 = vector.shape_cast %899 : vector<8x8x64xf32> to vector<64x64xf32>
    %c0_587 = arith.constant 0 : index
    %c0_588 = arith.constant 0 : index
    %c0_589 = arith.constant 0 : index
    %901 = vector.load %arg7[%c0_587, %c0_588, %c0_589] : memref<4x64x64xf32, #tpu.memory_space<vmem>>, vector<1x64x64xf32>
    %902 = vector.shape_cast %901 : vector<1x64x64xf32> to vector<64x64xf32>
    %cst_590 = arith.constant dense<0.000000e+00> : vector<64x64xf32>
    %903 = tpu.matmul %900, %902, %cst_590 {dimension_numbers = #tpu.dot_dimension_numbers<[1], [0], [0], [1], [0, 0, 1, 1], [], []>} : vector<64x64xf32>, vector<64x64xf32>, vector<64x64xf32> -> vector<64x64xf32>
    %c0_591 = arith.constant 0 : index
    %c0_592 = arith.constant 0 : index
    %904 = vector.load %arg8[%c0_591, %c0_592] : memref<4x64xf32, #tpu.memory_space<vmem>>, vector<1x64xf32>
    %905 = vector.broadcast %904 : vector<1x64xf32> to vector<64x64xf32>
    %906 = arith.addf %903, %905 : vector<64x64xf32>
    %cst_593 = arith.constant 0.000000e+00 : f32
    %907 = vector.broadcast %cst_593 : f32 to vector<64x64xf32>
    %908 = arith.maximumf %906, %907 : vector<64x64xf32>
    %c1_594 = arith.constant 1 : index
    %c0_595 = arith.constant 0 : index
    %c0_596 = arith.constant 0 : index
    %909 = vector.load %arg7[%c1_594, %c0_595, %c0_596] : memref<4x64x64xf32, #tpu.memory_space<vmem>>, vector<1x64x64xf32>
    %910 = vector.shape_cast %909 : vector<1x64x64xf32> to vector<64x64xf32>
    %cst_597 = arith.constant dense<0.000000e+00> : vector<64x64xf32>
    %911 = tpu.matmul %908, %910, %cst_597 {dimension_numbers = #tpu.dot_dimension_numbers<[1], [0], [0], [1], [0, 0, 1, 1], [], []>} : vector<64x64xf32>, vector<64x64xf32>, vector<64x64xf32> -> vector<64x64xf32>
    %c1_598 = arith.constant 1 : index
    %c0_599 = arith.constant 0 : index
    %912 = vector.load %arg8[%c1_598, %c0_599] : memref<4x64xf32, #tpu.memory_space<vmem>>, vector<1x64xf32>
    %913 = vector.broadcast %912 : vector<1x64xf32> to vector<64x64xf32>
    %914 = arith.addf %911, %913 : vector<64x64xf32>
    %cst_600 = arith.constant 0.000000e+00 : f32
    %915 = vector.broadcast %cst_600 : f32 to vector<64x64xf32>
    %916 = arith.maximumf %914, %915 : vector<64x64xf32>
    %c2_601 = arith.constant 2 : index
    %c0_602 = arith.constant 0 : index
    %c0_603 = arith.constant 0 : index
    %917 = vector.load %arg7[%c2_601, %c0_602, %c0_603] : memref<4x64x64xf32, #tpu.memory_space<vmem>>, vector<1x64x64xf32>
    %918 = vector.shape_cast %917 : vector<1x64x64xf32> to vector<64x64xf32>
    %cst_604 = arith.constant dense<0.000000e+00> : vector<64x64xf32>
    %919 = tpu.matmul %916, %918, %cst_604 {dimension_numbers = #tpu.dot_dimension_numbers<[1], [0], [0], [1], [0, 0, 1, 1], [], []>} : vector<64x64xf32>, vector<64x64xf32>, vector<64x64xf32> -> vector<64x64xf32>
    %c2_605 = arith.constant 2 : index
    %c0_606 = arith.constant 0 : index
    %920 = vector.load %arg8[%c2_605, %c0_606] : memref<4x64xf32, #tpu.memory_space<vmem>>, vector<1x64xf32>
    %921 = vector.broadcast %920 : vector<1x64xf32> to vector<64x64xf32>
    %922 = arith.addf %919, %921 : vector<64x64xf32>
    %cst_607 = arith.constant 0.000000e+00 : f32
    %923 = vector.broadcast %cst_607 : f32 to vector<64x64xf32>
    %924 = arith.maximumf %922, %923 : vector<64x64xf32>
    %c3_608 = arith.constant 3 : index
    %c0_609 = arith.constant 0 : index
    %c0_610 = arith.constant 0 : index
    %925 = vector.load %arg7[%c3_608, %c0_609, %c0_610] : memref<4x64x64xf32, #tpu.memory_space<vmem>>, vector<1x64x64xf32>
    %926 = vector.shape_cast %925 : vector<1x64x64xf32> to vector<64x64xf32>
    %cst_611 = arith.constant dense<0.000000e+00> : vector<64x64xf32>
    %927 = tpu.matmul %924, %926, %cst_611 {dimension_numbers = #tpu.dot_dimension_numbers<[1], [0], [0], [1], [0, 0, 1, 1], [], []>} : vector<64x64xf32>, vector<64x64xf32>, vector<64x64xf32> -> vector<64x64xf32>
    %c3_612 = arith.constant 3 : index
    %c0_613 = arith.constant 0 : index
    %928 = vector.load %arg8[%c3_612, %c0_613] : memref<4x64xf32, #tpu.memory_space<vmem>>, vector<1x64xf32>
    %929 = vector.broadcast %928 : vector<1x64xf32> to vector<64x64xf32>
    %930 = arith.addf %927, %929 : vector<64x64xf32>
    %cst_614 = arith.constant 0.000000e+00 : f32
    %931 = vector.broadcast %cst_614 : f32 to vector<64x64xf32>
    %932 = arith.maximumf %930, %931 : vector<64x64xf32>
    %c0_615 = arith.constant 0 : index
    %c0_616 = arith.constant 0 : index
    %933 = vector.load %arg9[%c0_615, %c0_616] : memref<64x4xf32, #tpu.memory_space<vmem>>, vector<64x4xf32>
    %cst_617 = arith.constant dense<0.000000e+00> : vector<64x4xf32>
    %934 = tpu.matmul %932, %933, %cst_617 {dimension_numbers = #tpu.dot_dimension_numbers<[1], [0], [0], [1], [0, 0, 1, 1], [], []>} : vector<64x64xf32>, vector<64x4xf32>, vector<64x4xf32> -> vector<64x4xf32>
    %c0_618 = arith.constant 0 : index
    %c0_619 = arith.constant 0 : index
    %935 = vector.load %arg10[%c0_618, %c0_619] : memref<1x4xf32, #tpu.memory_space<vmem>>, vector<1x4xf32>
    %936 = vector.broadcast %935 : vector<1x4xf32> to vector<64x4xf32>
    %937 = arith.addf %934, %936 : vector<64x4xf32>
    %c0_620 = arith.constant 0 : index
    %c0_621 = arith.constant 0 : index
    %c0_622 = arith.constant 0 : index
    %938 = vector.load %arg2[%c0_620, %c0_621, %c0_622] : memref<8x8x10xf32, #tpu.memory_space<vmem>>, vector<8x8x10xf32>
    %939 = vector.shape_cast %938 : vector<8x8x10xf32> to vector<64x10xf32>
    %940 = vector.extract_strided_slice %939 {offsets = [0, 0], sizes = [64, 3], strides = [1, 1]} : vector<64x10xf32> to vector<64x3xf32>
    %941 = vector.extract_strided_slice %939 {offsets = [0, 3], sizes = [64, 1], strides = [1, 1]} : vector<64x10xf32> to vector<64x1xf32>
    %942 = vector.extract_strided_slice %939 {offsets = [0, 4], sizes = [64, 1], strides = [1, 1]} : vector<64x10xf32> to vector<64x1xf32>
    %943 = vector.extract_strided_slice %939 {offsets = [0, 5], sizes = [64, 1], strides = [1, 1]} : vector<64x10xf32> to vector<64x1xf32>
    %944 = vector.extract_strided_slice %939 {offsets = [0, 6], sizes = [64, 1], strides = [1, 1]} : vector<64x10xf32> to vector<64x1xf32>
    %945 = vector.extract_strided_slice %939 {offsets = [0, 7], sizes = [64, 1], strides = [1, 1]} : vector<64x10xf32> to vector<64x1xf32>
    %946 = vector.extract_strided_slice %939 {offsets = [0, 8], sizes = [64, 1], strides = [1, 1]} : vector<64x10xf32> to vector<64x1xf32>
    %947 = vector.extract_strided_slice %939 {offsets = [0, 9], sizes = [64, 1], strides = [1, 1]} : vector<64x10xf32> to vector<64x1xf32>
    %cst_623 = arith.constant 1.000000e-01 : f32
    %948 = vector.broadcast %cst_623 : f32 to vector<64x4xf32>
    %949 = arith.mulf %937, %948 : vector<64x4xf32>
    %950 = vector.extract_strided_slice %949 {offsets = [0, 0], sizes = [64, 1], strides = [1, 1]} : vector<64x4xf32> to vector<64x1xf32>
    %951 = vector.extract_strided_slice %949 {offsets = [0, 1], sizes = [64, 1], strides = [1, 1]} : vector<64x4xf32> to vector<64x1xf32>
    %952 = vector.extract_strided_slice %949 {offsets = [0, 2], sizes = [64, 1], strides = [1, 1]} : vector<64x4xf32> to vector<64x1xf32>
    %953 = vector.extract_strided_slice %949 {offsets = [0, 3], sizes = [64, 1], strides = [1, 1]} : vector<64x4xf32> to vector<64x1xf32>
    %954 = arith.subf %945, %952 : vector<64x1xf32>
    %955 = arith.subf %954, %953 : vector<64x1xf32>
    %956 = arith.addf %946, %952 : vector<64x1xf32>
    %957 = arith.addf %947, %953 : vector<64x1xf32>
    %958 = arith.mulf %941, %945 : vector<64x1xf32>
    %959 = arith.subf %958, %950 : vector<64x1xf32>
    %cst_624 = arith.constant 9.99999997E-7 : f32
    %960 = vector.broadcast %cst_624 : f32 to vector<64x1xf32>
    %961 = arith.addf %955, %960 : vector<64x1xf32>
    %962 = arith.divf %959, %961 : vector<64x1xf32>
    %963 = arith.mulf %942, %945 : vector<64x1xf32>
    %964 = arith.subf %963, %951 : vector<64x1xf32>
    %cst_625 = arith.constant 9.99999997E-7 : f32
    %965 = vector.broadcast %cst_625 : f32 to vector<64x1xf32>
    %966 = arith.addf %955, %965 : vector<64x1xf32>
    %967 = arith.divf %964, %966 : vector<64x1xf32>
    %968 = arith.mulf %943, %946 : vector<64x1xf32>
    %969 = arith.addf %968, %950 : vector<64x1xf32>
    %cst_626 = arith.constant 9.99999997E-7 : f32
    %970 = vector.broadcast %cst_626 : f32 to vector<64x1xf32>
    %971 = arith.addf %956, %970 : vector<64x1xf32>
    %972 = arith.divf %969, %971 : vector<64x1xf32>
    %973 = arith.mulf %944, %947 : vector<64x1xf32>
    %974 = arith.addf %973, %951 : vector<64x1xf32>
    %cst_627 = arith.constant 9.99999997E-7 : f32
    %975 = vector.broadcast %cst_627 : f32 to vector<64x1xf32>
    %976 = arith.addf %957, %975 : vector<64x1xf32>
    %977 = arith.divf %974, %976 : vector<64x1xf32>
    %978 = tpu.concatenate %937, %940, %962, %967, %972, %977, %955, %956, %957 in 1 : vector<64x4xf32>, vector<64x3xf32>, vector<64x1xf32>, vector<64x1xf32>, vector<64x1xf32>, vector<64x1xf32>, vector<64x1xf32>, vector<64x1xf32>, vector<64x1xf32> -> vector<64x14xf32>
    %979 = vector.shape_cast %978 : vector<64x14xf32> to vector<8x8x14xf32>
    %c0_628 = arith.constant 0 : index
    %c0_629 = arith.constant 0 : index
    %c0_630 = arith.constant 0 : index
    %980 = vector.load %arg11[%c0_628, %c0_629, %c0_630] : memref<8x8x14xf32, #tpu.memory_space<vmem>>, vector<8x8x14xf32>
    tpu.vector_store %arg11[%c0_628, %c0_629, %c0_630], %979 {strides = array<i32>} : memref<8x8x14xf32, #tpu.memory_space<vmem>>, vector<8x8x14xf32>,
    return
  }
  func.func @transform_0(%arg0: i32, %arg1: i32) -> (i32, i32, i32) {
    %c0_i32 = arith.constant 0 : i32
    %c0_i32_0 = arith.constant 0 : i32
    return %arg1, %arg0, %c0_i32 : i32, i32, i32
  }
  func.func @transform_1(%arg0: i32, %arg1: i32) -> (i32, i32) {
    %c0_i32 = arith.constant 0 : i32
    %c0_i32_0 = arith.constant 0 : i32
    %c0_i32_1 = arith.constant 0 : i32
    return %c0_i32, %c0_i32_0 : i32, i32
  }
  func.func @transform_2(%arg0: i32, %arg1: i32) -> (i32, i32, i32) {
    %c0_i32 = arith.constant 0 : i32
    %c0_i32_0 = arith.constant 0 : i32
    %c0_i32_1 = arith.constant 0 : i32
    %c0_i32_2 = arith.constant 0 : i32
    return %c0_i32, %c0_i32_0, %c0_i32_1 : i32, i32, i32
  }
  func.func @transform_3(%arg0: i32, %arg1: i32) -> (i32, i32, i32) {
    %c0_i32 = arith.constant 0 : i32
    %c0_i32_0 = arith.constant 0 : i32
    %c0_i32_1 = arith.constant 0 : i32
    %c0_i32_2 = arith.constant 0 : i32
    return %c0_i32, %c0_i32_0, %c0_i32_1 : i32, i32, i32
  }
  func.func @transform_4(%arg0: i32, %arg1: i32) -> (i32, i32) {
    %c0_i32 = arith.constant 0 : i32
    %c0_i32_0 = arith.constant 0 : i32
    %c0_i32_1 = arith.constant 0 : i32
    return %c0_i32, %c0_i32_0 : i32, i32
  }
  func.func @transform_5(%arg0: i32, %arg1: i32) -> (i32, i32, i32) {
    %c0_i32 = arith.constant 0 : i32
    %c0_i32_0 = arith.constant 0 : i32
    %c0_i32_1 = arith.constant 0 : i32
    %c0_i32_2 = arith.constant 0 : i32
    return %c0_i32, %c0_i32_0, %c0_i32_1 : i32, i32, i32
  }
  func.func @transform_6(%arg0: i32, %arg1: i32) -> (i32, i32) {
    %c0_i32 = arith.constant 0 : i32
    %c0_i32_0 = arith.constant 0 : i32
    %c0_i32_1 = arith.constant 0 : i32
    return %c0_i32, %c0_i32_0 : i32, i32
  }
  func.func @transform_7(%arg0: i32, %arg1: i32) -> (i32, i32) {
    %c0_i32 = arith.constant 0 : i32
    %c0_i32_0 = arith.constant 0 : i32
    %c0_i32_1 = arith.constant 0 : i32
    return %c0_i32, %c0_i32_0 : i32, i32
  }
  func.func @transform_8(%arg0: i32, %arg1: i32) -> (i32, i32) {
    %c0_i32 = arith.constant 0 : i32
    %c0_i32_0 = arith.constant 0 : i32
    %c0_i32_1 = arith.constant 0 : i32
    return %c0_i32, %c0_i32_0 : i32, i32
  }
  func.func @transform_9(%arg0: i32, %arg1: i32) -> (i32, i32, i32) {
    %c0_i32 = arith.constant 0 : i32
    %c0_i32_0 = arith.constant 0 : i32
    return %arg1, %arg0, %c0_i32 : i32, i32, i32
  }
}

</mosaic_0001>

<bundles_post_ra>
// kernel: membrane_forward.1
= control target key start
LH: loop header
LB: loop body
LE: loop exit
PB: predicated region body
PF: predicated region fallthrough
CT: control target
= control target key end

     0   :  { %vm36_vm0 = vcmask 523264   ;;  %v11909_v3 = vmov 0.0   ;;  %vm368_vm1 = vcmask 1041408   ;;  %vm364_vm2 = vcmask 80896   ;;  %s8237_s24 = smov 64   ;;  %s8238_s28 = smov 124   ;;  %s11899_s3 = inlined_call_operand.vmem [shape: f32[3,64,256], index: 3, kind: input, shape index: {}]   ;;  %s11900_s1 = inlined_call_operand.vmem [shape: f32[10,256], index: 1, kind: input, shape index: {}]   ;;  %s11901_s0 = inlined_call_operand.vmem [shape: f32[8,8,10], index: 0, kind: input, shape index: {}]   ;;  %s11902_s4 = inlined_call_operand.vmem [shape: f32[3,256], index: 4, kind: input, shape index: {}]   ;;  %s11903_s2 = inlined_call_operand.vmem [shape: f32[2,64,256], index: 2, kind: input, shape index: {}]   ;;  %s11904_s5 = inlined_call_operand.vmem [shape: f32[4,64,64], index: 5, kind: input, shape index: {}]   ;;  %s11905_s6 = inlined_call_operand.vmem [shape: f32[4,64], index: 6, kind: input, shape index: {}]   ;;  %s11906_s7 = inlined_call_operand.vmem [shape: f32[64,4], index: 7, kind: input, shape index: {}]   ;;  %s11907_s8 = inlined_call_operand.vmem [shape: f32[1,4], index: 8, kind: input, shape index: {}]   ;;  %s11908_s9 = inlined_call_operand.vmem [shape: f32[8,8,14], index: 9, kind: output, shape index: {}]  }
   0x1   :  { %v8297_v0 = vld [vmem:[%s11899_s3 + $0x78] sm:$0xff]  ;;  %v8307_v2 = vld [vmem:[%s11899_s3 + $0x70] sm:$0xff]  ;;  %141 = vmatprep.mubr.f32.mxu0 %v11909_v3  ;;  %247 = vmatprep.mubr.f32.mxu1 %v11909_v3  ;;  %37 = vst.msk [vmem:[#allocation2] sm:$0xff] %vm36_vm0, %v11909_v3  ;;  %38 = vst.msk [vmem:[#allocation2 + $0x8] sm:$0xff] %vm36_vm0, %v11909_v3  ;;  %v63_v40 = vlaneseq  ;;  %s8239_s17 = smov 125   ;;  %s8241_s19 = smov 4  }
   0x2   :  { %11969 = vst [vmem:[#allocation5_spill] sm:$0xff] %v8297_v0  ;;  %v8302_v1 = vld [vmem:[%s11899_s3 + $0xf8] sm:$0xff]  ;;  %39 = vst.msk [vmem:[#allocation2 + $0x10] sm:$0xff] %vm36_vm0, %v11909_v3  ;;  %93 = vmatprep.subr.mxu0 %v8297_v0  ;;  %v8328_v4 = vld [vmem:[%s11899_s3 + $0xf0] sm:$0xff]  ;;  %s8243_s20 = smov 3   ;;  %vm6984_vm3 = vcmask 31744  }
   0x3   :  { %40 = vst.msk [vmem:[#allocation3] sm:$0xff] %vm36_vm0, %v11909_v3  ;;  %41 = vst.msk [vmem:[#allocation3 + $0x8] sm:$0xff] %vm36_vm0, %v11909_v3  ;;  %199 = vmatprep.subr.mxu1 %v8302_v1  ;;  %v8333_v5 = vld [vmem:[%s11899_s3 + $0x68] sm:$0xff]  ;;  %94 = vmatpush1.msra.mxu0 %v8307_v2  ;;  %v8345_v7 = vld [vmem:[%s11899_s3 + $0x60] sm:$0xff]  ;;  %v64_v41 = vshrl.u32 %v63_v40, 7  ;;  %vm6993_vm4 = vcmask 56320  }
   0x4   :  { %42 = vst.msk [vmem:[#allocation3 + $0x10] sm:$0xff] %vm36_vm0, %v11909_v3  ;;  %v8338_v6 = vld [vmem:[%s11899_s3 + $0xe8] sm:$0xff]  ;;  %200 = vmatpush1.msra.mxu1 %v8328_v4  ;;  %v8350_v8 = vld [vmem:[%s11899_s3 + $0xe0] sm:$0xff]  ;;  %v8355_v9 = vld [vmem:[%s11899_s3 + $0x58] sm:$0xff]  ;;  %95 = vmatprep.subr.mxu0 %v8333_v5  ;;  %vm7002_vm5 = vcmask 64512   ;;  %vm7011_vm6 = vcmask 72704  }
   0x5   :  { %201 = vmatprep.subr.mxu1 %v8338_v6  ;;  %v8362_v10 = vld [vmem:[%s11899_s3 + $0xd8] sm:$0xff]  ;;  %v8367_v11 = vld [vmem:[%s11899_s3 + $0x50] sm:$0xff]  ;;  %96 = vmatpush1.msra.mxu0 %v8345_v7  ;;  %v8379_v13 = vld [vmem:[%s11899_s3 + $0x48] sm:$0xff]  ;;  %v8529_v42 = vsub.s32 0, %v64_v41  ;;  %v8542_v47 = vsub.s32 1, %v64_v41  ;;  %vm7028_vm7 = vcmask 89088  }
   0x6   :  { %v8372_v12 = vld [vmem:[%s11899_s3 + $0xd0] sm:$0xff]  ;;  %202 = vmatpush1.msra.mxu1 %v8350_v8  ;;  %v8384_v14 = vld [vmem:[%s11899_s3 + $0xc8] sm:$0xff]  ;;  %97 = vmatprep.subr.mxu0 %v8355_v9  ;;  %v8391_v15 = vld [vmem:[%s11899_s3 + $0x40] sm:$0xff]  ;;  %vm7037_vm8 = vcmask 97280   ;;  %vm7046_vm9 = vcmask 105472   ;;  %vm7055_vm10 = vcmask 113664  }
   0x7   :  { %203 = vmatprep.subr.mxu1 %v8362_v10  ;;  %v8396_v16 = vld [vmem:[%s11899_s3 + $0xc0] sm:$0xff]  ;;  %98 = vmatpush1.msra.mxu0 %v8367_v11  ;;  %v8403_v17 = vld [vmem:[%s11899_s3 + $0x38] sm:$0xff]  ;;  %v8415_v19 = vld [vmem:[%s11899_s3 + $0x30] sm:$0xff] }
   0x8   :  { %204 = vmatpush1.msra.mxu1 %v8372_v12  ;;  %v8408_v18 = vld [vmem:[%s11899_s3 + $0xb8] sm:$0xff]  ;;  %99 = vmatprep.subr.mxu0 %v8379_v13  ;;  %v8420_v20 = vld [vmem:[%s11899_s3 + $0xb0] sm:$0xff]  ;;  %v8427_v21 = vld [vmem:[%s11899_s3 + $0x28] sm:$0xff] }
   0x9   :  { %205 = vmatprep.subr.mxu1 %v8384_v14  ;;  %100 = vmatpush1.msra.mxu0 %v8391_v15  ;;  %v8432_v22 = vld [vmem:[%s11899_s3 + $0xa8] sm:$0xff]  ;;  %v8439_v23 = vld [vmem:[%s11899_s3 + $0x20] sm:$0xff]  ;;  %v8451_v25 = vld [vmem:[%s11899_s3 + $0x18] sm:$0xff] }
   0xa   :  { %206 = vmatpush1.msra.mxu1 %v8396_v16  ;;  %101 = vmatprep.subr.mxu0 %v8403_v17  ;;  %v8444_v24 = vld [vmem:[%s11899_s3 + $0xa0] sm:$0xff]  ;;  %v8456_v26 = vld [vmem:[%s11899_s3 + $0x98] sm:$0xff]  ;;  %v8463_v27 = vld [vmem:[%s11899_s3 + $0x10] sm:$0xff] }
   0xb   :  { %207 = vmatprep.subr.mxu1 %v8408_v18  ;;  %102 = vmatpush1.msra.mxu0 %v8415_v19  ;;  %v8468_v28 = vld [vmem:[%s11899_s3 + $0x90] sm:$0xff]  ;;  %v8475_v29 = vld [vmem:[%s11899_s3 + $0x8] sm:$0xff]  ;;  %v8487_v31 = vld [vmem:[%s11899_s3] sm:$0xff] }
   0xc   :  { %208 = vmatpush1.msra.mxu1 %v8420_v20  ;;  %103 = vmatprep.subr.mxu0 %v8427_v21  ;;  %v8480_v30 = vld [vmem:[%s11899_s3 + $0x88] sm:$0xff]  ;;  %11970 = vst [vmem:[#allocation6_spill] sm:$0xff] %v8487_v31  ;;  %v8492_v32 = vld [vmem:[%s11899_s3 + $0x80] sm:$0xff]  ;;  %v363_v35 = vld [vmem:[%s11900_s1 + $0x18] sm:$0x3] }
   0xd   :  { %209 = vmatprep.subr.mxu1 %v8432_v22  ;;  %104 = vmatpush1.msra.mxu0 %v8439_v23  ;;  %v44_v33 = vld [vmem:[#allocation2] sm:$0xff]  ;;  %v149_v34 = vld [vmem:[#allocation2 + $0x8] sm:$0xff]  ;;  %v362_v36 = vld [vmem:[%s11900_s1 + $0x10] sm:$0x3] }
   0xe   :  { %210 = vmatpush1.msra.mxu1 %v8444_v24  ;;  %105 = vmatprep.subr.mxu0 %v8451_v25  ;;  %v8511_v37 = vld [vmem:[%s11900_s1 + $0x8] sm:$0xff]  ;;  %v8517_v38 = vld [vmem:[%s11900_s1] sm:$0xff]  ;;  %v459_v61 = vld [vmem:[#allocation3] sm:$0xff] }
   0xf   :  { %211 = vmatprep.subr.mxu1 %v8456_v26  ;;  %106 = vmatpush1.msra.mxu0 %v8463_v27  ;;  %v43_v39 = vld [vmem:[%s11901_s0] sm:$0xff]  ;;  %v8560_v40 = vld [vmem:[%s11903_s2 + $0x70] sm:$0xff]  ;;  %v8565_v41 = vld [vmem:[%s11903_s2 + $0x68] sm:$0xff] }
  0x10   :  { %212 = vmatpush1.msra.mxu1 %v8468_v28  ;;  %107 = vmatprep.subr.mxu0 %v8475_v29  ;;  %v8534_v43 = vld [vmem:[%s11902_s4 + $0x1] ss:$4 sm:$0x3]  ;;  %v61_v44 = vld [vmem:[%s11902_s4] ss:$4 sm:$0x3] }
  0x11   :  { %213 = vmatprep.subr.mxu1 %v8480_v30  ;;  %108 = vmatpush1.msra.mxu0 %v8487_v31  ;;  %v173_v45 = vrot.slane %v8534_v43, %v8529_v42  ;;  %v66_v46 = vrot.slane %v61_v44, %v8529_v42  ;;  %v70_v52 = vrot.slane %v61_v44, %v8542_v47  ;;  %v8571_v44 = vld [vmem:[%s11903_s2 + $0x60] sm:$0xff] }
  0x12   :  { %214 = vmatpush1.msra.mxu1 %v8492_v32  ;;  %7068 = vmatmul.mubr.msk.f32.vlgmr.msra.gmra.mxu0 %vm36_vm0, %v44_v33 }
  0x13   :  { %7086 = vmatmul.mubr.msk.f32.vlgmr.msra.gmra.mxu1 %vm36_vm0, %v149_v34  ;;  %7105 = vmatprep.subr.msk.mxu1 %vm368_vm1, %v363_v35 }
  0x14   :  { %439 = vmatprep.mubr.f32.mxu1 %v11909_v3  ;;  %7106 = vmatpush1.msk.msra.mxu1 %vm368_vm1, %v362_v36 }
  0x15   :  { %353 = vmatprep.mubr.f32.mxu0 %v11909_v3  ;;  %405 = vmatprep.subr.mxu1 %v8511_v37 }
  0x16   :  { %406 = vmatpush1.msra.mxu1 %v8517_v38 }
  0x17   :  { %7107 = vmatmul.mubr.msk.f32.vlgmr.msra.gmra.mxu1 %vm364_vm2, %v43_v39  ;;  %v8555_v39 = vld [vmem:[%s11903_s2 + $0x78] sm:$0xff] }
  0x18   :  { %570 = vmatprep.mubr.f32.mxu1 %v11909_v3  ;;  %522 = vmatprep.subr.mxu1 %v8555_v39 }
  0x19   :  { %523 = vmatpush1.msra.mxu1 %v8560_v40 }
  0x1a   :  { %524 = vmatprep.subr.mxu1 %v8565_v41 }
  0x1b   :  { %525 = vmatpush1.msra.mxu1 %v8571_v44 }
  0xd2   :  { %v143_v48 = vpop.f32.mrf.mxu0 }
  0xd3   :  { %v249_v49 = vpop.f32.mrf.mxu1  ;;  %v144_v51 = vadd.f32 %v143_v48, %v66_v46  ;;  %v8583_v46 = vld [vmem:[%s11903_s2 + $0x50] sm:$0xff]  ;;  %v8589_v48 = vld [vmem:[%s11903_s2 + $0x48] sm:$0xff] }
  0xd4   :  { %v8544_v50 = vadd.f32 %v249_v49, %v173_v45  ;;  %v145_v54 = vpop.f32.mrf.mxu0  ;;  %v8577_v45 = vld [vmem:[%s11903_s2 + $0x58] sm:$0xff]  ;;  %v8595_v49 = vld [vmem:[%s11903_s2 + $0x40] sm:$0xff] }
  0xd5   :  { %v8547_v53 = vpop.f32.mrf.mxu1  ;;  %v146_v56 = vadd.f32 %v145_v54, %v70_v52  ;;  %526 = vmatprep.subr.mxu1 %v8577_v45  ;;  %v8607_v52 = vld [vmem:[%s11903_s2 + $0x30] sm:$0xff]  ;;  %v8613_v54 = vld [vmem:[%s11903_s2 + $0x28] sm:$0xff] }
  0xd6   :  { %527 = vmatpush1.msra.mxu1 %v8583_v46 }
  0xd7   :  { %v441_v55 = vpop.f32.mrf.mxu1  ;;  %528 = vmatprep.subr.mxu1 %v8589_v48 }
  0xd8   :  { %v442_v57 = vadd.f32 %v441_v55, %v144_v51  ;;  %v8601_v51 = vld [vmem:[%s11903_s2 + $0x38] sm:$0xff]  ;;  %529 = vmatpush1.msra.mxu1 %v8595_v49  ;;  %v8619_v55 = vld [vmem:[%s11903_s2 + $0x20] sm:$0xff] }
  0xd9   :  { %v443_v58 = vpop.f32.mrf.mxu1  ;;  %530 = vmatprep.subr.mxu1 %v8601_v51 }
  0xda   :  { %v444_v59 = vadd.f32 %v443_v58, %v146_v56  ;;  %v7108_v62 = vmul.f32 -1.442695, %v442_v57  ;;  %531 = vmatpush1.msra.mxu1 %v8607_v52  ;;  %v8625_v56 = vld [vmem:[%s11903_s2 + $0x18] sm:$0xff]  ;;  %v8631_v57 = vld [vmem:[%s11903_s2 + $0x10] sm:$0xff]  ;;  %v8637_v58 = vld [vmem:[%s11903_s2 + $0x8] sm:$0xff] }
  0xdb   :  { %532 = vmatprep.subr.mxu1 %v8613_v54  ;;  %11971 = vst [vmem:[#allocation7_spill] sm:$0xff] %v8637_v58 }
  0xdc   :  { %7900 = vtanh.f32 %v444_v59  ;;  %533 = vmatpush1.msra.mxu1 %v8619_v55  ;;  %v7109_v3 = vmul.f32 -1.442695, %v444_v59  ;;  %v177_v59 = vrot.slane %v8534_v43, %v8542_v47 }
  0xdd   :  { %7902 = vpow2.f32 %v7108_v62  ;;  %534 = vmatprep.subr.mxu1 %v8625_v56 }
  0xde   :  { %535 = vmatpush1.msra.mxu1 %v8631_v57 }
  0xdf   :  { %536 = vmatprep.subr.mxu1 %v8637_v58 }
  0xe9   :  { %v7901_v60 = vpop.eup %7900 }
  0xea   :  { %466 = vrot.lane.b32.xlu0 %v7901_v60, %s8237_s24  ;;  %v7903_v63 = vpop.eup %7902 }
  0xeb   :  { %v452_v33 = vadd.f32 1.0, %v7903_v63 }
  0xed   :  { %7904 = vrcp.f32 %v452_v33  ;;  %v8645_v33 = vld [vmem:[%s11903_s2] sm:$0xff] }
  0xee   :  { %461 = vrot.lane.b32.xlu0 %v459_v61, %s8237_s24  ;;  %537 = vmatpush1.msra.mxu1 %v8645_v33 }
  0xef   :  { %803 = vmatprep.subr.mxu1 %v8297_v0  ;;  %v11972_v0 = vmov 0.0  }
  0xfa   :  { %v7905_v34 = vpop.eup %7904 }
 0x15c   :  { %v467_v35 = vpop.permute.xlu0 %466 }
 0x15d   :  { %v469_v36 = vmul.f32 %v7905_v34, %v467_v35 }
 0x15f   :  { %471 = vrot.lane.b32.xlu1 %v469_v36, %s8237_s24  ;;  %v591_v36 = vld [vmem:[#allocation3 + $0x8] sm:$0xff] }
 0x160   :  { %v462_v60 = vpop.permute.xlu0 %461 }
 0x161   :  { %v464_v61 = vmul.f32 %v7905_v34, %v462_v60 }
 0x1d1   :  { %v472_v62 = vpop.permute.xlu1 %471 }
 0x1d2   :  { %v474_v63 = vadd.f32 %v472_v62, %v464_v61 }
 0x1d4   :  { %7906 = vtanh.f32 %v474_v63 }
 0x1d5   :  { %7908 = vpow2.f32 %v7109_v3 }
 0x1e1   :  { %v7907_v35 = vpop.eup %7906 }
 0x1e2   :  { %477 = vrot.lane.b32.xlu1 %v7907_v35, %s8237_s24  ;;  %v7909_v34 = vpop.eup %7908  ;;  %v252_v35 = vadd.f32 %v8547_v53, %v177_v59 }
 0x1e3   :  { %v453_v60 = vadd.f32 1.0, %v7909_v34 }
 0x1e5   :  { %7910 = vrcp.f32 %v453_v60 }
 0x1e6   :  { %593 = vrot.lane.b32.xlu1 %v591_v36, %s8237_s24 }
 0x1f2   :  { %v7911_v61 = vpop.eup %7910 }
 0x254   :  { %v478_v62 = vpop.permute.xlu1 %477 }
 0x255   :  { %v480_v58 = vmul.f32 %v7911_v61, %v478_v62  ;;  %v8681_v61 = vld [vmem:[%s11902_s4] ss:$4 sm:$0x3] }
 0x256   :  { %v777_v62 = vrot.slane %v8681_v61, %v8529_v42 }
 0x257   :  { %486 = vst.msk [vmem:[#allocation2] sm:$0xff] %vm36_vm0, %v480_v58  ;;  %7110 = vmatmul.mubr.msk.f32.vlgmr.msra.gmra.mxu1 %vm36_vm0, %v480_v58 }
 0x258   :  { %804 = vmatpush1.msra.mxu1 %v8307_v2  ;;  %851 = vmatprep.mubr.f32.mxu1 %v11972_v0 }
 0x259   :  { %805 = vmatprep.subr.mxu1 %v8333_v5 }
 0x25a   :  { %806 = vmatpush1.msra.mxu1 %v8345_v7 }
 0x25b   :  { %807 = vmatprep.subr.mxu1 %v8355_v9 }
 0x25c   :  { %808 = vmatpush1.msra.mxu1 %v8367_v11 }
 0x25d   :  { %809 = vmatprep.subr.mxu1 %v8379_v13 }
 0x25e   :  { %810 = vmatpush1.msra.mxu1 %v8391_v15  ;;  %v755_v3 = vld [vmem:[#allocation2] sm:$0xff] }
 0x25f   :  { %811 = vmatprep.subr.mxu1 %v8403_v17 }
 0x260   :  { %812 = vmatpush1.msra.mxu1 %v8415_v19 }
 0x261   :  { %813 = vmatprep.subr.mxu1 %v8427_v21 }
 0x262   :  { %814 = vmatpush1.msra.mxu1 %v8439_v23 }
 0x263   :  { %815 = vmatprep.subr.mxu1 %v8451_v25 }
 0x264   :  { %816 = vmatpush1.msra.mxu1 %v8463_v27 }
 0x265   :  { %817 = vmatprep.subr.mxu1 %v8475_v29 }
 0x266   :  { %818 = vmatpush1.msra.mxu1 %v8487_v31 }
 0x267   :  { %7133 = vmatmul.mubr.msk.f32.vlgmr.msra.gmra.mxu1 %vm36_vm0, %v755_v3 }
 0x268   :  { %1057 = vmatprep.mubr.f32.mxu1 %v11972_v0 }
 0x317   :  { %v572_v58 = vpop.f32.mrf.mxu1 }
 0x318   :  { %v573_v36 = vadd.f32 %v572_v58, %v8544_v50 }
 0x319   :  { %v574_v34 = vpop.f32.mrf.mxu1 }
 0x31a   :  { %v8675_v60 = vadd.f32 %v574_v34, %v252_v35  ;;  %v7111_v50 = vmul.f32 -1.442695, %v573_v36  ;;  %v7100_v36 = vld [vmem:[%s11899_s3 + $0x168] sm:$0xff] }
 0x31c   :  { %7912 = vtanh.f32 %v8675_v60 }
 0x31d   :  { %7914 = vpow2.f32 %v7111_v50  ;;  %v7098_v50 = vld [vmem:[%s11899_s3 + $0x158] sm:$0xff] }
 0x327   :  { %v853_v3 = vpop.f32.mrf.mxu1 }
 0x328   :  { %v8685_v43 = vadd.f32 %v853_v3, %v777_v62  ;;  %v7102_v62 = vld [vmem:[%s11899_s3 + $0x178] sm:$0xff]  ;;  %v7099_v3 = vld [vmem:[%s11899_s3 + $0x160] sm:$0xff] }
 0x329   :  { %v7913_v31 = vpop.eup %7912  ;;  %305 = vmatprep.subr.mxu0 %v7102_v62  ;;  %1009 = vmatprep.subr.mxu1 %v7102_v62  ;;  %v7092_v62 = vld [vmem:[%s11899_s3 + $0x128] sm:$0xff] }
 0x32a   :  { %598 = vrot.lane.b32.xlu0 %v7913_v31, %s8237_s24  ;;  %v7915_v53 = vpop.eup %7914  ;;  %v7101_v31 = vld [vmem:[%s11899_s3 + $0x170] sm:$0xff] }
 0x32b   :  { %v583_v59 = vadd.f32 1.0, %v7915_v53  ;;  %306 = vmatpush1.msra.mxu0 %v7101_v31  ;;  %v7097_v53 = vld [vmem:[%s11899_s3 + $0x150] sm:$0xff]  ;;  %1010 = vmatpush1.msra.mxu1 %v7101_v31  ;;  %v7091_v31 = vld [vmem:[%s11899_s3 + $0x120] sm:$0xff] }
 0x32c   :  { %307 = vmatprep.subr.mxu0 %v7100_v36  ;;  %1011 = vmatprep.subr.mxu1 %v7100_v36  ;;  %v7090_v36 = vld [vmem:[%s11899_s3 + $0x118] sm:$0xff] }
 0x32d   :  { %7916 = vrcp.f32 %v583_v59  ;;  %308 = vmatpush1.msra.mxu0 %v7099_v3  ;;  %v7095_v59 = vld [vmem:[%s11899_s3 + $0x140] sm:$0xff]  ;;  %1012 = vmatpush1.msra.mxu1 %v7099_v3  ;;  %v7089_v3 = vld [vmem:[%s11899_s3 + $0x110] sm:$0xff] }
 0x32e   :  { %309 = vmatprep.subr.mxu0 %v7098_v50  ;;  %1013 = vmatprep.subr.mxu1 %v7098_v50  ;;  %v7088_v50 = vld [vmem:[%s11899_s3 + $0x108] sm:$0xff] }
 0x32f   :  { %310 = vmatpush1.msra.mxu0 %v7097_v53  ;;  %1014 = vmatpush1.msra.mxu1 %v7097_v53  ;;  %v7087_v53 = vld [vmem:[%s11899_s3 + $0x100] sm:$0xff] }
 0x33a   :  { %v8688_v58 = vpop.eup %7916 }
 0x39c   :  { %v599_v35 = vpop.permute.xlu0 %598 }
 0x39d   :  { %v601_v34 = vmul.f32 %v8688_v58, %v599_v35  ;;  %v7094_v35 = vld [vmem:[%s11899_s3 + $0x138] sm:$0xff] }
 0x39f   :  { %603 = vrot.lane.b32.xlu0 %v601_v34, %s8237_s24  ;;  %v7093_v34 = vld [vmem:[%s11899_s3 + $0x130] sm:$0xff] }
 0x3a3   :  { %482 = vrot.lane.b32.xlu0 %v474_v63, %s8237_s24  ;;  %v7096_v63 = vld [vmem:[%s11899_s3 + $0x148] sm:$0xff] }
 0x3a4   :  { %311 = vmatprep.subr.mxu0 %v7096_v63  ;;  %1015 = vmatprep.subr.mxu1 %v7096_v63  ;;  %v255_v63 = vld [vmem:[#allocation2 + $0x10] sm:$0xff] }
 0x3a5   :  { %312 = vmatpush1.msra.mxu0 %v7095_v59  ;;  %1016 = vmatpush1.msra.mxu1 %v7095_v59  ;;  %v7128_v59 = vld [vmem:[%s11903_s2 + $0xf8] sm:$0xff] }
 0x3a6   :  { %313 = vmatprep.subr.mxu0 %v7094_v35  ;;  %1017 = vmatprep.subr.mxu1 %v7094_v35  ;;  %v8747_v35 = vld [vmem:[%s11903_s2 + $0xf0] sm:$0xff] }
 0x3a7   :  { %314 = vmatpush1.msra.mxu0 %v7093_v34  ;;  %1018 = vmatpush1.msra.mxu1 %v7093_v34  ;;  %11973 = vst [vmem:[#allocation8_spill] sm:$0xff] %v8747_v35  ;;  %v8752_v34 = vld [vmem:[%s11903_s2 + $0xe8] sm:$0xff] }
 0x3a8   :  { %315 = vmatprep.subr.mxu0 %v7092_v62  ;;  %1019 = vmatprep.subr.mxu1 %v7092_v62  ;;  %11974 = vst [vmem:[#allocation9_spill] sm:$0xff] %v8752_v34  ;;  %v8758_v62 = vld [vmem:[%s11903_s2 + $0xe0] sm:$0xff] }
 0x3a9   :  { %316 = vmatpush1.msra.mxu0 %v7091_v31  ;;  %1020 = vmatpush1.msra.mxu1 %v7091_v31  ;;  %11975 = vst [vmem:[#allocation10_spill] sm:$0xff] %v8758_v62  ;;  %v8764_v31 = vld [vmem:[%s11903_s2 + $0xd8] sm:$0xff] }
 0x3aa   :  { %317 = vmatprep.subr.mxu0 %v7090_v36  ;;  %1021 = vmatprep.subr.mxu1 %v7090_v36  ;;  %11976 = vst [vmem:[#allocation11_spill] sm:$0xff] %v8764_v31  ;;  %v8771_v36 = vld [vmem:[%s11903_s2 + $0xd0] sm:$0xff] }
 0x3ab   :  { %318 = vmatpush1.msra.mxu0 %v7089_v3  ;;  %1022 = vmatpush1.msra.mxu1 %v7089_v3  ;;  %11977 = vst [vmem:[#allocation12_spill] sm:$0xff] %v8771_v36  ;;  %v8777_v3 = vld [vmem:[%s11903_s2 + $0xc8] sm:$0xff] }
 0x3ac   :  { %319 = vmatprep.subr.mxu0 %v7088_v50  ;;  %1023 = vmatprep.subr.mxu1 %v7088_v50  ;;  %11978 = vst [vmem:[#allocation13_spill] sm:$0xff] %v8777_v3  ;;  %v8783_v50 = vld [vmem:[%s11903_s2 + $0xc0] sm:$0xff] }
 0x3ad   :  { %320 = vmatpush1.msra.mxu0 %v7087_v53  ;;  %1024 = vmatpush1.msra.mxu1 %v7087_v53  ;;  %11979 = vst [vmem:[#allocation14_spill] sm:$0xff] %v8783_v50  ;;  %v8789_v53 = vld [vmem:[%s11903_s2 + $0xb8] sm:$0xff] }
 0x3ae   :  { %7104 = vmatmul.mubr.msk.f32.vlgmr.msra.gmra.mxu0 %vm36_vm0, %v255_v63  ;;  %655 = vmatprep.subr.mxu0 %v7128_v59  ;;  %11980 = vst [vmem:[#allocation15_spill] sm:$0xff] %v8789_v53  ;;  %v8795_v63 = vld [vmem:[%s11903_s2 + $0xb0] sm:$0xff] }
 0x3af   :  { %656 = vmatpush1.msra.mxu0 %v8747_v35  ;;  %703 = vmatprep.mubr.f32.mxu0 %v11972_v0  ;;  %11981 = vst [vmem:[#allocation16_spill] sm:$0xff] %v8795_v63 }
 0x3b0   :  { %657 = vmatprep.subr.mxu0 %v8752_v34  ;;  %1355 = vmatprep.subr.mxu1 %v7128_v59  ;;  %v8801_v59 = vld [vmem:[%s11903_s2 + $0xa8] sm:$0xff] }
 0x3b1   :  { %658 = vmatpush1.msra.mxu0 %v8758_v62  ;;  %11982 = vst [vmem:[#allocation17_spill] sm:$0xff] %v8801_v59 }
 0x3b2   :  { %659 = vmatprep.subr.mxu0 %v8764_v31  ;;  %v8810_v31 = vld [vmem:[%s11903_s2 + $0xa0] sm:$0xff] }
 0x3b3   :  { %660 = vmatpush1.msra.mxu0 %v8771_v36  ;;  %v594_v36 = vpop.permute.xlu1 %593  ;;  %11983 = vst [vmem:[#allocation18_spill] sm:$0xff] %v8810_v31 }
 0x3b4   :  { %661 = vmatprep.subr.mxu0 %v8777_v3  ;;  %v596_v3 = vmul.f32 %v8688_v58, %v594_v36  ;;  %v8826_v58 = vld [vmem:[%s11903_s2 + $0x88] sm:$0xff] }
 0x3b5   :  { %662 = vmatpush1.msra.mxu0 %v8783_v50  ;;  %v8815_v50 = vld [vmem:[%s11903_s2 + $0x98] sm:$0xff]  ;;  %11986 = vst [vmem:[#allocation21_spill] sm:$0xff] %v8826_v58 }
 0x3b6   :  { %663 = vmatprep.subr.mxu0 %v8789_v53  ;;  %11984 = vst [vmem:[#allocation19_spill] sm:$0xff] %v8815_v50  ;;  %v8820_v53 = vld [vmem:[%s11903_s2 + $0x90] sm:$0xff] }
 0x3b7   :  { %664 = vmatpush1.msra.mxu0 %v8795_v63  ;;  %11985 = vst [vmem:[#allocation20_spill] sm:$0xff] %v8820_v53 }
 0x3b8   :  { %665 = vmatprep.subr.mxu0 %v8801_v59  ;;  %v8837_v59 = vld [vmem:[%s11903_s2 + $0x80] sm:$0xff] }
 0x3b9   :  { %666 = vmatpush1.msra.mxu0 %v8810_v31  ;;  %11987 = vst [vmem:[#allocation22_spill] sm:$0xff] %v8837_v59 }
 0x3ba   :  { %667 = vmatprep.subr.mxu0 %v8815_v50 }
 0x3bb   :  { %668 = vmatpush1.msra.mxu0 %v8820_v53  ;;  %v7112_v53 = vmul.f32 -1.442695, %v8675_v60 }
 0x3bc   :  { %669 = vmatprep.subr.mxu0 %v8826_v58  ;;  %v8847_v58 = vld [vmem:[%s11902_s4 + $0x2] ss:$4 sm:$0x3] }
 0x3bd   :  { %670 = vmatpush1.msra.mxu0 %v8837_v59  ;;  %v279_v59 = vrot.slane %v8847_v58, %v8529_v42 }
 0x3be   :  { %906 = vmatprep.subr.mxu0 %v8302_v1 }
 0x411   :  { %v604_v63 = vpop.permute.xlu0 %603 }
 0x412   :  { %v8828_v36 = vadd.f32 %v604_v63, %v596_v3 }
 0x414   :  { %7918 = vtanh.f32 %v8828_v36 }
 0x415   :  { %v483_v31 = vpop.permute.xlu0 %482  ;;  %7920 = vpow2.f32 %v7112_v53 }
 0x416   :  { %485 = vst.msk [vmem:[#allocation3] sm:$0xff] %vm36_vm0, %v483_v31 }
 0x41d   :  { %v1161_v3 = vld [vmem:[#allocation3] sm:$0xff] }
 0x41e   :  { %1163 = vrot.lane.b32.xlu0 %v1161_v3, %s8237_s24 }
 0x421   :  { %v7919_v63 = vpop.eup %7918 }
 0x422   :  { %609 = vrot.lane.b32.xlu1 %v7919_v63, %s8237_s24  ;;  %v7921_v1 = vpop.eup %7920 }
 0x423   :  { %v584_v62 = vadd.f32 1.0, %v7921_v1 }
 0x425   :  { %7922 = vrcp.f32 %v584_v62 }
 0x432   :  { %v7923_v3 = vpop.eup %7922 }
 0x46e   :  { %v355_v31 = vpop.f32.mrf.mxu0 }
 0x46f   :  { %v356_v50 = vadd.f32 %v355_v31, %v279_v59 }
 0x494   :  { %v610_v34 = vpop.permute.xlu1 %609 }
 0x495   :  { %v612_v35 = vmul.f32 %v7923_v3, %v610_v34 }
 0x497   :  { %618 = vst.msk [vmem:[#allocation2 + $0x8] sm:$0xff] %vm36_vm0, %v612_v35  ;;  %7129 = vmatmul.mubr.msk.f32.vlgmr.msra.gmra.mxu0 %vm36_vm0, %v612_v35 }
 0x498   :  { %907 = vmatpush1.msra.mxu0 %v8328_v4  ;;  %954 = vmatprep.mubr.f32.mxu0 %v11972_v0  ;;  %v1067_v4 = vld [vmem:[%s11900_s1 + $0x18] sm:$0x3] }
 0x499   :  { %908 = vmatprep.subr.mxu0 %v8338_v6  ;;  %v1066_v6 = vld [vmem:[%s11900_s1 + $0x10] sm:$0x3] }
 0x49a   :  { %909 = vmatpush1.msra.mxu0 %v8350_v8 }
 0x49b   :  { %910 = vmatprep.subr.mxu0 %v8362_v10  ;;  %v7132_v10 = vld [vmem:[%s11901_s0 + $0x8] sm:$0xff] }
 0x49c   :  { %911 = vmatpush1.msra.mxu0 %v8372_v12  ;;  %v11988_v12 = vld [vmem:[#allocation7_spill] sm:$0xff] }
 0x49d   :  { %912 = vmatprep.subr.mxu0 %v8384_v14  ;;  %v11989_v14 = vld [vmem:[#allocation5_spill] sm:$0xff] }
 0x49e   :  { %913 = vmatpush1.msra.mxu0 %v8396_v16  ;;  %v858_v8 = vld [vmem:[#allocation2 + $0x8] sm:$0xff]  ;;  %v357_v16 = vpop.f32.mrf.mxu0 }
 0x49f   :  { %914 = vmatprep.subr.mxu0 %v8408_v18 }
 0x4a0   :  { %915 = vmatpush1.msra.mxu0 %v8420_v20 }
 0x4a1   :  { %916 = vmatprep.subr.mxu0 %v8432_v22  ;;  %v8909_v22 = vld [vmem:[%s11902_s4 + $0x1] ss:$4 sm:$0x3] }
 0x4a2   :  { %917 = vmatpush1.msra.mxu0 %v8444_v24  ;;  %v880_v24 = vrot.slane %v8909_v22, %v8529_v42 }
 0x4a3   :  { %918 = vmatprep.subr.mxu0 %v8456_v26 }
 0x4a4   :  { %919 = vmatpush1.msra.mxu0 %v8468_v28 }
 0x4a5   :  { %920 = vmatprep.subr.mxu0 %v8480_v30  ;;  %v781_v30 = vrot.slane %v8681_v61, %v8542_v47  ;;  %v1164_v61 = vpop.permute.xlu0 %1163 }
 0x4a6   :  { %921 = vmatpush1.msra.mxu0 %v8492_v32 }
 0x4a7   :  { %7151 = vmatmul.mubr.msk.f32.vlgmr.msra.gmra.mxu0 %vm36_vm0, %v858_v8  ;;  %7170 = vmatprep.subr.msk.mxu0 %vm368_vm1, %v1067_v4 }
 0x4a8   :  { %7171 = vmatpush1.msk.msra.mxu0 %vm368_vm1, %v1066_v6  ;;  %1141 = vmatprep.mubr.f32.mxu0 %v11972_v0 }
 0x4a9   :  { %1107 = vmatprep.subr.mxu0 %v8511_v37  ;;  %v855_v37 = vpop.f32.mrf.mxu1 }
 0x4aa   :  { %1108 = vmatpush1.msra.mxu0 %v8517_v38 }
 0x4ab   :  { %7172 = vmatmul.mubr.msk.f32.vlgmr.msra.gmra.mxu0 %vm364_vm2, %v7132_v10  ;;  %1224 = vmatprep.subr.mxu0 %v8555_v39 }
 0x4ac   :  { %1225 = vmatpush1.msra.mxu0 %v8560_v40  ;;  %1272 = vmatprep.mubr.f32.mxu0 %v11972_v0  ;;  %v856_v40 = vadd.f32 %v855_v37, %v781_v30 }
 0x4ad   :  { %1226 = vmatprep.subr.mxu0 %v8565_v41 }
 0x4ae   :  { %1227 = vmatpush1.msra.mxu0 %v8571_v44 }
 0x4af   :  { %1228 = vmatprep.subr.mxu0 %v8577_v45 }
 0x4b0   :  { %1229 = vmatpush1.msra.mxu0 %v8583_v46 }
 0x4b1   :  { %1230 = vmatprep.subr.mxu0 %v8589_v48 }
 0x4b2   :  { %1231 = vmatpush1.msra.mxu0 %v8595_v49 }
 0x4b3   :  { %1232 = vmatprep.subr.mxu0 %v8601_v51  ;;  %v283_v51 = vrot.slane %v8847_v58, %v8542_v47 }
 0x4b4   :  { %1233 = vmatpush1.msra.mxu0 %v8607_v52 }
 0x4b5   :  { %1234 = vmatprep.subr.mxu0 %v8613_v54  ;;  %v358_v54 = vadd.f32 %v357_v16, %v283_v51 }
 0x4b6   :  { %1235 = vmatpush1.msra.mxu0 %v8619_v55 }
 0x4b7   :  { %1236 = vmatprep.subr.mxu0 %v8625_v56 }
 0x4b8   :  { %1237 = vmatpush1.msra.mxu0 %v8631_v57 }
 0x4b9   :  { %1238 = vmatprep.subr.mxu0 %v11988_v12 }
 0x4ba   :  { %1239 = vmatpush1.msra.mxu0 %v8645_v33 }
 0x4bb   :  { %1503 = vmatprep.subr.mxu0 %v11989_v14 }
 0x557   :  { %v705_v18 = vpop.f32.mrf.mxu0 }
 0x558   :  { %v8904_v20 = vadd.f32 %v705_v18, %v356_v50  ;;  %v724_v50 = vld [vmem:[#allocation3 + $0x10] sm:$0xff] }
 0x559   :  { %v707_v26 = vpop.f32.mrf.mxu0 }
 0x55a   :  { %v8923_v55 = vadd.f32 %v707_v26, %v358_v54 }
 0x567   :  { %v956_v28 = vpop.f32.mrf.mxu0 }
 0x568   :  { %v8915_v32 = vadd.f32 %v956_v28, %v880_v24 }
 0x569   :  { %v8917_v38 = vpop.f32.mrf.mxu0 }
 0x56b   :  { %v1143_v39 = vpop.f32.mrf.mxu0 }
 0x56c   :  { %v1144_v41 = vadd.f32 %v1143_v39, %v8685_v43 }
 0x56d   :  { %v1145_v44 = vpop.f32.mrf.mxu0 }
 0x56e   :  { %v1146_v45 = vadd.f32 %v1145_v44, %v856_v40  ;;  %v7173_v48 = vmul.f32 -1.442695, %v1144_v41 }
 0x570   :  { %7924 = vtanh.f32 %v1146_v45  ;;  %v7174_v53 = vmul.f32 -1.442695, %v1146_v45 }
 0x571   :  { %7926 = vpow2.f32 %v7173_v48 }
 0x57d   :  { %v7925_v46 = vpop.eup %7924 }
 0x57e   :  { %1168 = vrot.lane.b32.xlu1 %v7925_v46, %s8237_s24  ;;  %v7927_v49 = vpop.eup %7926 }
 0x57f   :  { %v1154_v52 = vadd.f32 1.0, %v7927_v49 }
 0x581   :  { %7928 = vrcp.f32 %v1154_v52 }
 0x582   :  { %7930 = vtanh.f32 %v8923_v55 }
 0x58e   :  { %v7929_v56 = vpop.eup %7928 }
 0x58f   :  { %v7931_v60 = vpop.eup %7930  ;;  %v1166_v43 = vmul.f32 %v7929_v56, %v1164_v61  ;;  %v11994_v61 = vld [vmem:[#allocation11_spill] sm:$0xff] }
 0x5f0   :  { %v1169_v57 = vpop.permute.xlu1 %1168 }
 0x5f1   :  { %v1171_v33 = vmul.f32 %v7929_v56, %v1169_v57  ;;  %v11991_v57 = vld [vmem:[#allocation8_spill] sm:$0xff] }
 0x5f3   :  { %1173 = vrot.lane.b32.xlu1 %v1171_v33, %s8237_s24  ;;  %v11992_v33 = vld [vmem:[#allocation9_spill] sm:$0xff] }
 0x5f7   :  { %731 = vrot.lane.b32.xlu1 %v7931_v60, %s8237_s24  ;;  %v11993_v60 = vld [vmem:[#allocation10_spill] sm:$0xff] }
 0x665   :  { %v1174_v35 = vpop.permute.xlu1 %1173 }
 0x666   :  { %v8928_v34 = vadd.f32 %v1174_v35, %v1166_v43  ;;  %v11995_v43 = vld [vmem:[#allocation12_spill] sm:$0xff]  ;;  %v11996_v35 = vld [vmem:[#allocation13_spill] sm:$0xff] }
 0x668   :  { %7932 = vtanh.f32 %v8928_v34 }
 0x669   :  { %7934 = vpow2.f32 %v7174_v53  ;;  %v732_v8 = vpop.permute.xlu1 %731  ;;  %v12000_v53 = vld [vmem:[#allocation17_spill] sm:$0xff] }
 0x675   :  { %v7933_v62 = vpop.eup %7932 }
 0x676   :  { %1179 = vrot.lane.b32.xlu0 %v7933_v62, %s8237_s24  ;;  %v7935_v59 = vpop.eup %7934  ;;  %v11998_v62 = vld [vmem:[#allocation15_spill] sm:$0xff] }
 0x677   :  { %v1155_v58 = vadd.f32 1.0, %v7935_v59  ;;  %v12001_v59 = vld [vmem:[#allocation18_spill] sm:$0xff] }
 0x679   :  { %7936 = vrcp.f32 %v1155_v58  ;;  %v12002_v58 = vld [vmem:[#allocation19_spill] sm:$0xff] }
 0x67a   :  { %614 = vrot.lane.b32.xlu0 %v8828_v36, %s8237_s24 }
 0x67e   :  { %726 = vrot.lane.b32.xlu0 %v724_v50, %s8237_s24  ;;  %v11999_v50 = vld [vmem:[#allocation16_spill] sm:$0xff] }
 0x686   :  { %v7937_v63 = vpop.eup %7936 }
 0x6e8   :  { %v1180_v31 = vpop.permute.xlu0 %1179 }
 0x6e9   :  { %v1182_v1 = vmul.f32 %v7937_v63, %v1180_v31  ;;  %v12003_v63 = vld [vmem:[#allocation20_spill] sm:$0xff]  ;;  %v9010_v31 = vld [vmem:[%s11899_s3 + $0xf8] sm:$0xff] }
 0x6eb   :  { %1188 = vst.msk [vmem:[#allocation2] sm:$0xff] %vm36_vm0, %v1182_v1  ;;  %7175 = vmatmul.mubr.msk.f32.vlgmr.msra.gmra.mxu0 %vm36_vm0, %v1182_v1  ;;  %v12004_v1 = vld [vmem:[#allocation21_spill] sm:$0xff] }
 0x6ec   :  { %1504 = vmatpush1.msra.mxu0 %v8307_v2  ;;  %v615_v3 = vpop.permute.xlu0 %614  ;;  %1551 = vmatprep.mubr.f32.mxu0 %v11972_v0 }
 0x6ed   :  { %1505 = vmatprep.subr.mxu0 %v8333_v5  ;;  %617 = vst.msk [vmem:[#allocation3 + $0x8] sm:$0xff] %vm36_vm0, %v615_v3  ;;  %v11990_v5 = vld [vmem:[#allocation6_spill] sm:$0xff] }
 0x6ee   :  { %1506 = vmatpush1.msra.mxu0 %v8345_v7  ;;  %v12005_v3 = vld [vmem:[#allocation22_spill] sm:$0xff] }
 0x6ef   :  { %1507 = vmatprep.subr.mxu0 %v8355_v9  ;;  %v7130_v9 = vmul.f32 -1.442695, %v8904_v20 }
 0x6f0   :  { %1508 = vmatpush1.msra.mxu0 %v8367_v11  ;;  %v884_v11 = vrot.slane %v8909_v22, %v8542_v47  ;;  %v727_v22 = vpop.permute.xlu0 %726 }
 0x6f1   :  { %1509 = vmatprep.subr.mxu0 %v8379_v13  ;;  %7938 = vpow2.f32 %v7130_v9 }
 0x6f2   :  { %1510 = vmatpush1.msra.mxu0 %v8391_v15  ;;  %v1455_v7 = vld [vmem:[#allocation2] sm:$0xff] }
 0x6f3   :  { %1511 = vmatprep.subr.mxu0 %v8403_v17  ;;  %v959_v17 = vadd.f32 %v8917_v38, %v884_v11  ;;  %v7131_v38 = vmul.f32 -1.442695, %v8923_v55 }
 0x6f4   :  { %1512 = vmatpush1.msra.mxu0 %v8415_v19  ;;  %v1292_v2 = vld [vmem:[#allocation3 + $0x8] sm:$0xff] }
 0x6f5   :  { %1513 = vmatprep.subr.mxu0 %v8427_v21  ;;  %1294 = vrot.lane.b32.xlu0 %v1292_v2, %s8237_s24 }
 0x6f6   :  { %1514 = vmatpush1.msra.mxu0 %v8439_v23 }
 0x6f7   :  { %1515 = vmatprep.subr.mxu0 %v8451_v25 }
 0x6f8   :  { %1516 = vmatpush1.msra.mxu0 %v8463_v27  ;;  %v8968_v27 = vld [vmem:[%s11902_s4] ss:$4 sm:$0x3] }
 0x6f9   :  { %1517 = vmatprep.subr.mxu0 %v8475_v29  ;;  %v1477_v29 = vrot.slane %v8968_v27, %v8529_v42 }
 0x6fa   :  { %1518 = vmatpush1.msra.mxu0 %v11990_v5 }
 0x6fb   :  { %7198 = vmatmul.mubr.msk.f32.vlgmr.msra.gmra.mxu0 %vm36_vm0, %v1455_v7 }
 0x6fc   :  { %1757 = vmatprep.mubr.f32.mxu0 %v11972_v0 }
 0x6fe   :  { %v7939_v15 = vpop.eup %7938 }
 0x6ff   :  { %v716_v25 = vadd.f32 1.0, %v7939_v15  ;;  %v9019_v15 = vld [vmem:[%s11899_s3 + $0xf0] sm:$0xff] }
 0x767   :  { %v1295_v40 = vpop.permute.xlu0 %1294 }
 0x7ab   :  { %v1274_v13 = vpop.f32.mrf.mxu0 }
 0x7ac   :  { %v1275_v19 = vadd.f32 %v1274_v13, %v8915_v32 }
 0x7ad   :  { %v1276_v21 = vpop.f32.mrf.mxu0 }
 0x7ae   :  { %v8962_v23 = vadd.f32 %v1276_v21, %v959_v17  ;;  %v7176_v14 = vmul.f32 -1.442695, %v1275_v19  ;;  %v9024_v17 = vld [vmem:[%s11899_s3 + $0xe8] sm:$0xff]  ;;  %v9031_v19 = vld [vmem:[%s11899_s3 + $0xe0] sm:$0xff]  ;;  %v9037_v21 = vld [vmem:[%s11899_s3 + $0xd8] sm:$0xff] }
 0x7b0   :  { %7940 = vtanh.f32 %v8962_v23  ;;  %v7177_v2 = vmul.f32 -1.442695, %v8962_v23  ;;  %v9044_v23 = vld [vmem:[%s11899_s3 + $0xd0] sm:$0xff] }
 0x7b1   :  { %7942 = vrcp.f32 %v716_v25  ;;  %v9050_v25 = vld [vmem:[%s11899_s3 + $0xc8] sm:$0xff] }
 0x7b2   :  { %7944 = vpow2.f32 %v7176_v14  ;;  %v9092_v14 = vld [vmem:[%s11899_s3 + $0x90] sm:$0xff] }
 0x7bb   :  { %v1553_v36 = vpop.f32.mrf.mxu0 }
 0x7bc   :  { %v8972_v4 = vadd.f32 %v1553_v36, %v1477_v29  ;;  %v9056_v29 = vld [vmem:[%s11899_s3 + $0xc0] sm:$0xff]  ;;  %v9062_v36 = vld [vmem:[%s11899_s3 + $0xb8] sm:$0xff] }
 0x7bd   :  { %v7941_v6 = vpop.eup %7940 }
 0x7be   :  { %1299 = vrot.lane.b32.xlu1 %v7941_v6, %s8237_s24  ;;  %v7943_v10 = vpop.eup %7942  ;;  %v9068_v6 = vld [vmem:[%s11899_s3 + $0xb0] sm:$0xff] }
 0x7bf   :  { %v734_v12 = vmul.f32 %v7943_v10, %v732_v8  ;;  %v7945_v16 = vpop.eup %7944  ;;  %v729_v28 = vmul.f32 %v7943_v10, %v727_v22  ;;  %v9074_v8 = vld [vmem:[%s11899_s3 + $0xa8] sm:$0xff]  ;;  %v9080_v10 = vld [vmem:[%s11899_s3 + $0xa0] sm:$0xff]  ;;  %v1766_v22 = vld [vmem:[%s11900_s1 + $0x10] sm:$0x3] }
 0x7c0   :  { %v1285_v18 = vadd.f32 1.0, %v7945_v16  ;;  %v9098_v16 = vld [vmem:[%s11899_s3 + $0x88] sm:$0xff] }
 0x7c2   :  { %736 = vrot.lane.b32.xlu1 %v734_v12, %s8237_s24  ;;  %7946 = vrcp.f32 %v1285_v18  ;;  %v9086_v12 = vld [vmem:[%s11899_s3 + $0x98] sm:$0xff]  ;;  %v9104_v18 = vld [vmem:[%s11899_s3 + $0x80] sm:$0xff] }
 0x7cf   :  { %v7947_v20 = vpop.eup %7946 }
 0x7d0   :  { %v1297_v41 = vmul.f32 %v7947_v20, %v1295_v40 }
 0x830   :  { %v1300_v24 = vpop.permute.xlu1 %1299 }
 0x831   :  { %v1302_v26 = vmul.f32 %v7947_v20, %v1300_v24  ;;  %v1767_v20 = vld [vmem:[%s11900_s1 + $0x18] sm:$0x3] }
 0x833   :  { %1304 = vrot.lane.b32.xlu1 %v1302_v26, %s8237_s24  ;;  %v9118_v26 = vld [vmem:[%s11900_s1 + $0x8] sm:$0xff] }
 0x834   :  { %v737_v30 = vpop.permute.xlu1 %736 }
 0x835   :  { %v8977_v32 = vadd.f32 %v737_v30, %v729_v28  ;;  %v9125_v28 = vld [vmem:[%s11900_s1] sm:$0xff]  ;;  %v7197_v30 = vld [vmem:[%s11901_s0 + $0x10] sm:$0xff] }
 0x837   :  { %7948 = vtanh.f32 %v8977_v32 }
 0x838   :  { %7950 = vpow2.f32 %v7131_v38 }
 0x844   :  { %v7949_v37 = vpop.eup %7948 }
 0x845   :  { %742 = vrot.lane.b32.xlu0 %v7949_v37, %s8237_s24  ;;  %v7951_v39 = vpop.eup %7950  ;;  %v9139_v37 = vld [vmem:[%s11902_s4 + $0x2] ss:$4 sm:$0x3] }
 0x846   :  { %v717_v45 = vadd.f32 1.0, %v7951_v39  ;;  %v983_v39 = vrot.slane %v9139_v37, %v8529_v42 }
 0x849   :  { %1184 = vrot.lane.b32.xlu0 %v8928_v34, %s8237_s24  ;;  %v11997_v34 = vld [vmem:[#allocation14_spill] sm:$0xff] }
 0x8a5   :  { %v1305_v44 = vpop.permute.xlu1 %1304 }
 0x8a6   :  { %v8984_v46 = vadd.f32 %v1305_v44, %v1297_v41 }
 0x8a8   :  { %7952 = vtanh.f32 %v8984_v46 }
 0x8a9   :  { %7954 = vrcp.f32 %v717_v45 }
 0x8aa   :  { %7956 = vpow2.f32 %v7177_v2  ;;  %v9205_v2 = vld [vmem:[%s11903_s2 + $0x48] sm:$0xff] }
 0x8b5   :  { %v7953_v48 = vpop.eup %7952 }
 0x8b6   :  { %1310 = vrot.lane.b32.xlu1 %v7953_v48, %s8237_s24  ;;  %v7955_v49 = vpop.eup %7954  ;;  %v9148_v48 = vld [vmem:[%s11902_s4 + $0x1] ss:$4 sm:$0x3] }
 0x8b7   :  { %v743_v51 = vpop.permute.xlu0 %742  ;;  %v7957_v5 = vpop.eup %7956 }
 0x8b8   :  { %v745_v52 = vmul.f32 %v7955_v49, %v743_v51  ;;  %v1286_v7 = vadd.f32 1.0, %v7957_v5  ;;  %v1580_v49 = vrot.slane %v9148_v48, %v8529_v42  ;;  %v9211_v5 = vld [vmem:[%s11903_s2 + $0x40] sm:$0xff] }
 0x8ba   :  { %751 = vst.msk [vmem:[#allocation2 + $0x10] sm:$0xff] %vm36_vm0, %v745_v52  ;;  %752 = vst.msk [vmem:[#allocation4] sm:$0xff] %vm36_vm0, %v745_v52  ;;  %7958 = vrcp.f32 %v1286_v7  ;;  %v9217_v7 = vld [vmem:[%s11903_s2 + $0x38] sm:$0xff] }
 0x8bb   :  { %v1185_v54 = vpop.permute.xlu0 %1184 }
 0x8bc   :  { %1187 = vst.msk [vmem:[#allocation3] sm:$0xff] %vm36_vm0, %v1185_v54  ;;  %v1481_v54 = vrot.slane %v8968_v27, %v8542_v47 }
 0x8c1   :  { %v961_v55 = vld [vmem:[#allocation2 + $0x10] sm:$0xff] }
 0x8c2   :  { %7169 = vmatmul.mubr.msk.f32.vlgmr.msra.gmra.mxu1 %vm36_vm0, %v961_v55 }
 0x8c3   :  { %v1861_v56 = vld [vmem:[#allocation3] sm:$0xff]  ;;  %1356 = vmatpush1.msra.mxu1 %v11991_v57  ;;  %1403 = vmatprep.mubr.f32.mxu1 %v11972_v0 }
 0x8c4   :  { %1863 = vrot.lane.b32.xlu0 %v1861_v56, %s8237_s24  ;;  %1357 = vmatprep.subr.mxu1 %v11992_v33  ;;  %v1555_v56 = vpop.f32.mrf.mxu0 }
 0x8c5   :  { %1358 = vmatpush1.msra.mxu1 %v11993_v60  ;;  %v1556_v60 = vadd.f32 %v1555_v56, %v1481_v54 }
 0x8c6   :  { %1359 = vmatprep.subr.mxu1 %v11994_v61 }
 0x8c7   :  { %1360 = vmatpush1.msra.mxu1 %v11995_v43  ;;  %v7959_v9 = vpop.eup %7958 }
 0x8c8   :  { %1361 = vmatprep.subr.mxu1 %v11996_v35 }
 0x8c9   :  { %1362 = vmatpush1.msra.mxu1 %v11997_v34 }
 0x8ca   :  { %1363 = vmatprep.subr.mxu1 %v11998_v62 }
 0x8cb   :  { %1364 = vmatpush1.msra.mxu1 %v11999_v50 }
 0x8cc   :  { %1365 = vmatprep.subr.mxu1 %v12000_v53 }
 0x8cd   :  { %1366 = vmatpush1.msra.mxu1 %v12001_v59 }
 0x8ce   :  { %1367 = vmatprep.subr.mxu1 %v12002_v58 }
 0x8cf   :  { %1368 = vmatpush1.msra.mxu1 %v12003_v63  ;;  %v9174_v63 = vld [vmem:[%s11903_s2 + $0x70] sm:$0xff] }
 0x8d0   :  { %1369 = vmatprep.subr.mxu1 %v12004_v1  ;;  %v9179_v1 = vld [vmem:[%s11903_s2 + $0x68] sm:$0xff] }
 0x8d1   :  { %1370 = vmatpush1.msra.mxu1 %v12005_v3  ;;  %v9193_v3 = vld [vmem:[%s11903_s2 + $0x58] sm:$0xff] }
 0x8d2   :  { %1606 = vmatprep.subr.mxu1 %v9010_v31 }
 0x928   :  { %v1311_v11 = vpop.permute.xlu1 %1310 }
 0x929   :  { %v1313_v13 = vmul.f32 %v7959_v9, %v1311_v11  ;;  %v9223_v9 = vld [vmem:[%s11903_s2 + $0x30] sm:$0xff]  ;;  %v9229_v11 = vld [vmem:[%s11903_s2 + $0x28] sm:$0xff] }
 0x92b   :  { %1319 = vst.msk [vmem:[#allocation2 + $0x8] sm:$0xff] %vm36_vm0, %v1313_v13  ;;  %7194 = vmatmul.mubr.msk.f32.vlgmr.msra.gmra.mxu1 %vm36_vm0, %v1313_v13  ;;  %v987_v13 = vrot.slane %v9139_v37, %v8542_v47  ;;  %v9255_v37 = vld [vmem:[%s11903_s2 + $0x8] sm:$0xff] }
 0x92c   :  { %1607 = vmatpush1.msra.mxu1 %v9019_v15  ;;  %1654 = vmatprep.mubr.f32.mxu1 %v11972_v0 }
 0x92d   :  { %1608 = vmatprep.subr.mxu1 %v9024_v17 }
 0x92e   :  { %1609 = vmatpush1.msra.mxu1 %v9031_v19 }
 0x92f   :  { %1610 = vmatprep.subr.mxu1 %v9037_v21 }
 0x930   :  { %1611 = vmatpush1.msra.mxu1 %v9044_v23 }
 0x931   :  { %1612 = vmatprep.subr.mxu1 %v9050_v25 }
 0x932   :  { %1613 = vmatpush1.msra.mxu1 %v9056_v29  ;;  %v1558_v24 = vld [vmem:[#allocation2 + $0x8] sm:$0xff] }
 0x933   :  { %1614 = vmatprep.subr.mxu1 %v9062_v36 }
 0x934   :  { %1615 = vmatpush1.msra.mxu1 %v9068_v6 }
 0x935   :  { %1616 = vmatprep.subr.mxu1 %v9074_v8 }
 0x936   :  { %1617 = vmatpush1.msra.mxu1 %v9080_v10 }
 0x937   :  { %1618 = vmatprep.subr.mxu1 %v9086_v12 }
 0x938   :  { %1619 = vmatpush1.msra.mxu1 %v9092_v14 }
 0x939   :  { %1620 = vmatprep.subr.mxu1 %v9098_v16 }
 0x93a   :  { %1621 = vmatpush1.msra.mxu1 %v9104_v18 }
 0x93b   :  { %7216 = vmatmul.mubr.msk.f32.vlgmr.msra.gmra.mxu1 %vm36_vm0, %v1558_v24  ;;  %7235 = vmatprep.subr.msk.mxu1 %vm368_vm1, %v1767_v20  ;;  %v1864_v20 = vpop.permute.xlu0 %1863  ;;  %v9239_v24 = vld [vmem:[%s11903_s2 + $0x20] sm:$0xff] }
 0x93c   :  { %7236 = vmatpush1.msk.msra.mxu1 %vm368_vm1, %v1766_v22  ;;  %1841 = vmatprep.mubr.f32.mxu1 %v11972_v0 }
 0x93d   :  { %1807 = vmatprep.subr.mxu1 %v9118_v26 }
 0x93e   :  { %1808 = vmatpush1.msra.mxu1 %v9125_v28 }
 0x93f   :  { %7237 = vmatmul.mubr.msk.f32.vlgmr.msra.gmra.mxu1 %vm364_vm2, %v7197_v30 }
 0x940   :  { %1972 = vmatprep.mubr.f32.mxu1 %v11972_v0 }
 0x982   :  { %v1059_v38 = vpop.f32.mrf.mxu1 }
 0x983   :  { %v1060_v41 = vadd.f32 %v1059_v38, %v983_v39  ;;  %v9245_v38 = vld [vmem:[%s11903_s2 + $0x18] sm:$0xff]  ;;  %v9250_v39 = vld [vmem:[%s11903_s2 + $0x10] sm:$0xff] }
 0x984   :  { %v1061_v40 = vpop.f32.mrf.mxu1 }
 0x9eb   :  { %v1405_v44 = vpop.f32.mrf.mxu1 }
 0x9ec   :  { %v9143_v45 = vadd.f32 %v1405_v44, %v1060_v41  ;;  %v1062_v41 = vadd.f32 %v1061_v40, %v987_v13  ;;  %v9274_v40 = vld [vmem:[%s11899_s3 + $0x78] sm:$0xff] }
 0x9ed   :  { %v1407_v51 = vpop.f32.mrf.mxu1  ;;  %v9306_v13 = vld [vmem:[%s11899_s3 + $0x58] sm:$0xff] }
 0x9fb   :  { %v1656_v52 = vpop.f32.mrf.mxu1 }
 0x9fc   :  { %v9154_v55 = vadd.f32 %v1656_v52, %v1580_v49  ;;  %v9261_v49 = vadd.f32 %v1407_v51, %v1062_v41  ;;  %v9268_v52 = vld [vmem:[%s11903_s2] sm:$0xff]  ;;  %v9331_v41 = vld [vmem:[%s11899_s3 + $0x38] sm:$0xff] }
 0x9fd   :  { %v9156_v57 = vpop.f32.mrf.mxu1 }
 0x9ff   :  { %v1843_v33 = vpop.f32.mrf.mxu1 }
 0xa00   :  { %v1844_v61 = vadd.f32 %v1843_v33, %v8972_v4  ;;  %v9169_v4 = vld [vmem:[%s11903_s2 + $0x78] sm:$0xff] }
 0xa01   :  { %v1845_v43 = vpop.f32.mrf.mxu1  ;;  %1924 = vmatprep.subr.mxu1 %v9169_v4 }
 0xa02   :  { %v9159_v35 = vadd.f32 %v1845_v43, %v1556_v60  ;;  %v7238_v62 = vmul.f32 -1.442695, %v1844_v61  ;;  %1925 = vmatpush1.msra.mxu1 %v9174_v63 }
 0xa03   :  { %1926 = vmatprep.subr.mxu1 %v9179_v1 }
 0xa04   :  { %7960 = vtanh.f32 %v9159_v35  ;;  %v7239_v43 = vmul.f32 -1.442695, %v9159_v35  ;;  %v9300_v35 = vld [vmem:[%s11899_s3 + $0x60] sm:$0xff] }
 0xa05   :  { %7962 = vpow2.f32 %v7238_v62 }
 0xa11   :  { %v7961_v34 = vpop.eup %7960 }
 0xa12   :  { %1868 = vrot.lane.b32.xlu1 %v7961_v34, %s8237_s24  ;;  %v7963_v27 = vpop.eup %7962 }
 0xa13   :  { %v1854_v50 = vadd.f32 1.0, %v7963_v27 }
 0xa15   :  { %7964 = vrcp.f32 %v1854_v50 }
 0xa22   :  { %v7965_v53 = vpop.eup %7964 }
 0xa23   :  { %v1866_v22 = vmul.f32 %v7965_v53, %v1864_v20  ;;  %v9313_v20 = vld [vmem:[%s11899_s3 + $0x50] sm:$0xff] }
 0xa84   :  { %v1869_v59 = vpop.permute.xlu1 %1868 }
 0xa85   :  { %v1871_v58 = vmul.f32 %v7965_v53, %v1869_v59  ;;  %v9288_v59 = vld [vmem:[%s11899_s3 + $0x70] sm:$0xff] }
 0xa87   :  { %1873 = vrot.lane.b32.xlu1 %v1871_v58, %s8237_s24  ;;  %v9293_v58 = vld [vmem:[%s11899_s3 + $0x68] sm:$0xff] }
 0xa8b   :  { %747 = vrot.lane.b32.xlu1 %v8977_v32, %s8237_s24  ;;  %v9187_v32 = vld [vmem:[%s11903_s2 + $0x60] sm:$0xff] }
 0xa8c   :  { %1927 = vmatpush1.msra.mxu1 %v9187_v32 }
 0xa8d   :  { %1928 = vmatprep.subr.mxu1 %v9193_v3 }
 0xa8f   :  { %1315 = vrot.lane.b32.xlu1 %v8984_v46, %s8237_s24  ;;  %v9199_v46 = vld [vmem:[%s11903_s2 + $0x50] sm:$0xff] }
 0xa90   :  { %1929 = vmatpush1.msra.mxu1 %v9199_v46 }
 0xa91   :  { %1930 = vmatprep.subr.mxu1 %v9205_v2 }
 0xa92   :  { %1931 = vmatpush1.msra.mxu1 %v9211_v5 }
 0xa93   :  { %1932 = vmatprep.subr.mxu1 %v9217_v7 }
 0xa94   :  { %1933 = vmatpush1.msra.mxu1 %v9223_v9 }
 0xa95   :  { %1934 = vmatprep.subr.mxu1 %v9229_v11 }
 0xa96   :  { %1935 = vmatpush1.msra.mxu1 %v9239_v24 }
 0xa97   :  { %1936 = vmatprep.subr.mxu1 %v9245_v38 }
 0xa98   :  { %1937 = vmatpush1.msra.mxu1 %v9250_v39 }
 0xa99   :  { %1938 = vmatprep.subr.mxu1 %v9255_v37 }
 0xa9a   :  { %1939 = vmatpush1.msra.mxu1 %v9268_v52 }
 0xa9b   :  { %2203 = vmatprep.subr.mxu1 %v9274_v40 }
 0xaf9   :  { %v1874_v30 = vpop.permute.xlu1 %1873 }
 0xafa   :  { %v9257_v44 = vadd.f32 %v1874_v30, %v1866_v22  ;;  %v9319_v22 = vld [vmem:[%s11899_s3 + $0x48] sm:$0xff]  ;;  %v9325_v30 = vld [vmem:[%s11899_s3 + $0x40] sm:$0xff] }
 0xafc   :  { %7966 = vtanh.f32 %v9257_v44 }
 0xafd   :  { %v748_v54 = vpop.permute.xlu1 %747  ;;  %7968 = vtanh.f32 %v9261_v49 }
 0xafe   :  { %750 = vst.msk [vmem:[#allocation3 + $0x10] sm:$0xff] %vm36_vm0, %v748_v54  ;;  %7970 = vpow2.f32 %v7239_v43  ;;  %v9337_v54 = vld [vmem:[%s11899_s3 + $0x30] sm:$0xff]  ;;  %v9373_v43 = vld [vmem:[%s11899_s3] sm:$0xff] }
 0xaff   :  { %12006 = vst [vmem:[#allocation7_spill] sm:$0xff] %v9337_v54  ;;  %12012 = vst [vmem:[#allocation11_spill] sm:$0xff] %v9373_v43 }
 0xb01   :  { %v1316_v51 = vpop.permute.xlu1 %1315 }
 0xb02   :  { %1318 = vst.msk [vmem:[#allocation3 + $0x8] sm:$0xff] %vm36_vm0, %v1316_v51  ;;  %v9343_v51 = vld [vmem:[%s11899_s3 + $0x28] sm:$0xff] }
 0xb03   :  { %12007 = vst [vmem:[#allocation5_spill] sm:$0xff] %v9343_v51 }
 0xb05   :  { %v1423_v56 = vld [vmem:[#allocation3 + $0x10] sm:$0xff] }
 0xb06   :  { %1425 = vrot.lane.b32.xlu1 %v1423_v56, %s8237_s24  ;;  %v9349_v56 = vld [vmem:[%s11899_s3 + $0x20] sm:$0xff] }
 0xb07   :  { %12008 = vst [vmem:[#allocation6_spill] sm:$0xff] %v9349_v56 }
 0xb09   :  { %v7967_v33 = vpop.eup %7966  ;;  %v1992_v60 = vld [vmem:[#allocation3 + $0x8] sm:$0xff] }
 0xb0a   :  { %1994 = vrot.lane.b32.xlu1 %v1992_v60, %s8237_s24  ;;  %1879 = vrot.lane.b32.xlu0 %v7967_v33, %s8237_s24  ;;  %v7969_v61 = vpop.eup %7968  ;;  %v9355_v33 = vld [vmem:[%s11899_s3 + $0x18] sm:$0xff]  ;;  %v9361_v60 = vld [vmem:[%s11899_s3 + $0x10] sm:$0xff] }
 0xb0b   :  { %v7971_v34 = vpop.eup %7970  ;;  %12009 = vst [vmem:[#allocation8_spill] sm:$0xff] %v9355_v33  ;;  %12010 = vst [vmem:[#allocation9_spill] sm:$0xff] %v9361_v60 }
 0xb0c   :  { %v1855_v62 = vadd.f32 1.0, %v7971_v34 }
 0xb0e   :  { %1430 = vrot.lane.b32.xlu0 %v7969_v61, %s8237_s24  ;;  %7972 = vrcp.f32 %v1855_v62  ;;  %v9367_v61 = vld [vmem:[%s11899_s3 + $0x8] sm:$0xff]  ;;  %v7195_v62 = vmul.f32 -1.442695, %v9143_v45  ;;  %v9391_v45 = vld [vmem:[%s11902_s4] ss:$4 sm:$0x3] }
 0xb0f   :  { %12011 = vst [vmem:[#allocation10_spill] sm:$0xff] %v9367_v61 }
 0xb10   :  { %7974 = vpow2.f32 %v7195_v62 }
 0xb1b   :  { %v7973_v27 = vpop.eup %7972 }
 0xb7c   :  { %v1880_v50 = vpop.permute.xlu0 %1879 }
 0xb7d   :  { %v1882_v53 = vmul.f32 %v7973_v27, %v1880_v50  ;;  %v1584_v27 = vrot.slane %v9148_v48, %v8542_v47  ;;  %v2177_v48 = vrot.slane %v9391_v45, %v8529_v42 }
 0xb7f   :  { %1888 = vst.msk [vmem:[#allocation2] sm:$0xff] %vm36_vm0, %v1882_v53  ;;  %7240 = vmatmul.mubr.msk.f32.vlgmr.msra.gmra.mxu1 %vm36_vm0, %v1882_v53  ;;  %v7975_v53 = vpop.eup %7974 }
 0xb80   :  { %2204 = vmatpush1.msra.mxu1 %v9288_v59  ;;  %2251 = vmatprep.mubr.f32.mxu1 %v11972_v0 }
 0xb81   :  { %2205 = vmatprep.subr.mxu1 %v9293_v58 }
 0xb82   :  { %2206 = vmatpush1.msra.mxu1 %v9300_v35 }
 0xb83   :  { %2207 = vmatprep.subr.mxu1 %v9306_v13 }
 0xb84   :  { %2208 = vmatpush1.msra.mxu1 %v9313_v20 }
 0xb85   :  { %2209 = vmatprep.subr.mxu1 %v9319_v22 }
 0xb86   :  { %2210 = vmatpush1.msra.mxu1 %v9325_v30  ;;  %v2155_v34 = vld [vmem:[#allocation2] sm:$0xff] }
 0xb87   :  { %2211 = vmatprep.subr.mxu1 %v9331_v41 }
 0xb88   :  { %2212 = vmatpush1.msra.mxu1 %v9337_v54 }
 0xb89   :  { %2213 = vmatprep.subr.mxu1 %v9343_v51 }
 0xb8a   :  { %2214 = vmatpush1.msra.mxu1 %v9349_v56 }
 0xb8b   :  { %2215 = vmatprep.subr.mxu1 %v9355_v33  ;;  %v1659_v33 = vadd.f32 %v9156_v57, %v1584_v27 }
 0xb8c   :  { %2216 = vmatpush1.msra.mxu1 %v9361_v60 }
 0xb8d   :  { %2217 = vmatprep.subr.mxu1 %v9367_v61 }
 0xb8e   :  { %2218 = vmatpush1.msra.mxu1 %v9373_v43  ;;  %v1416_v43 = vadd.f32 1.0, %v7975_v53  ;;  %v7232_v53 = vld [vmem:[%s11899_s3 + $0x178] sm:$0xff] }
 0xb8f   :  { %7263 = vmatmul.mubr.msk.f32.vlgmr.msra.gmra.mxu1 %vm36_vm0, %v2155_v34  ;;  %1709 = vmatprep.subr.mxu0 %v7232_v53 }
 0xb90   :  { %2457 = vmatprep.mubr.f32.mxu1 %v11972_v0  ;;  %2409 = vmatprep.subr.mxu1 %v7232_v53 }
 0xc3f   :  { %v1974_v50 = vpop.f32.mrf.mxu1 }
 0xc40   :  { %v1975_v60 = vadd.f32 %v1974_v50, %v9154_v55  ;;  %v1431_v55 = vpop.permute.xlu0 %1430 }
 0xc41   :  { %v1976_v61 = vpop.f32.mrf.mxu1 }
 0xc42   :  { %v9385_v56 = vadd.f32 %v1976_v61, %v1659_v33 }
 0xc44   :  { %7976 = vtanh.f32 %v9385_v56 }
 0xc45   :  { %7978 = vrcp.f32 %v1416_v43  ;;  %v7241_v43 = vmul.f32 -1.442695, %v1975_v60  ;;  %v7229_v60 = vld [vmem:[%s11899_s3 + $0x160] sm:$0xff] }
 0xc47   :  { %7980 = vpow2.f32 %v7241_v43 }
 0xc4f   :  { %v2253_v34 = vpop.f32.mrf.mxu1 }
 0xc50   :  { %v9395_v62 = vadd.f32 %v2253_v34, %v2177_v48  ;;  %v7231_v48 = vld [vmem:[%s11899_s3 + $0x170] sm:$0xff]  ;;  %v7230_v34 = vld [vmem:[%s11899_s3 + $0x168] sm:$0xff] }
 0xc51   :  { %v7977_v57 = vpop.eup %7976  ;;  %1710 = vmatpush1.msra.mxu0 %v7231_v48  ;;  %2410 = vmatpush1.msra.mxu1 %v7231_v48  ;;  %v7227_v48 = vld [vmem:[%s11899_s3 + $0x150] sm:$0xff] }
 0xc52   :  { %1999 = vrot.lane.b32.xlu0 %v7977_v57, %s8237_s24  ;;  %v7979_v33 = vpop.eup %7978  ;;  %v7228_v57 = vld [vmem:[%s11899_s3 + $0x158] sm:$0xff]  ;;  %1711 = vmatprep.subr.mxu0 %v7230_v34 }
 0xc53   :  { %v1433_v61 = vmul.f32 %v7979_v33, %v1431_v55  ;;  %2411 = vmatprep.subr.mxu1 %v7230_v34  ;;  %1712 = vmatpush1.msra.mxu0 %v7229_v60  ;;  %v7226_v34 = vld [vmem:[%s11899_s3 + $0x148] sm:$0xff] }
 0xc54   :  { %v7981_v27 = vpop.eup %7980  ;;  %2412 = vmatpush1.msra.mxu1 %v7229_v60  ;;  %1713 = vmatprep.subr.mxu0 %v7228_v57  ;;  %v7224_v60 = vld [vmem:[%s11899_s3 + $0x138] sm:$0xff] }
 0xc55   :  { %v1985_v50 = vadd.f32 1.0, %v7981_v27  ;;  %2413 = vmatprep.subr.mxu1 %v7228_v57  ;;  %1714 = vmatpush1.msra.mxu0 %v7227_v48  ;;  %v7223_v57 = vld [vmem:[%s11899_s3 + $0x130] sm:$0xff] }
 0xc56   :  { %1435 = vrot.lane.b32.xlu0 %v1433_v61, %s8237_s24  ;;  %v1426_v61 = vpop.permute.xlu1 %1425  ;;  %2414 = vmatpush1.msra.mxu1 %v7227_v48  ;;  %v7217_v48 = vld [vmem:[%s11899_s3 + $0x100] sm:$0xff] }
 0xc57   :  { %7982 = vrcp.f32 %v1985_v50  ;;  %v1428_v50 = vmul.f32 %v7979_v33, %v1426_v61  ;;  %1715 = vmatprep.subr.mxu0 %v7226_v34  ;;  %v7225_v33 = vld [vmem:[%s11899_s3 + $0x140] sm:$0xff]  ;;  %2415 = vmatprep.subr.mxu1 %v7226_v34  ;;  %v7222_v61 = vld [vmem:[%s11899_s3 + $0x128] sm:$0xff] }
 0xc58   :  { %1716 = vmatpush1.msra.mxu0 %v7225_v33  ;;  %2416 = vmatpush1.msra.mxu1 %v7225_v33  ;;  %v7258_v33 = vld [vmem:[%s11903_s2 + $0xf8] sm:$0xff] }
 0xc59   :  { %1717 = vmatprep.subr.mxu0 %v7224_v60  ;;  %2417 = vmatprep.subr.mxu1 %v7224_v60  ;;  %v7196_v60 = vmul.f32 -1.442695, %v9261_v49  ;;  %v9468_v49 = vld [vmem:[%s11903_s2 + $0xf0] sm:$0xff] }
 0xc5a   :  { %1718 = vmatpush1.msra.mxu0 %v7223_v57  ;;  %2418 = vmatpush1.msra.mxu1 %v7223_v57 }
 0xc5b   :  { %1719 = vmatprep.subr.mxu0 %v7222_v61  ;;  %2419 = vmatprep.subr.mxu1 %v7222_v61  ;;  %v1995_v61 = vpop.permute.xlu1 %1994 }
 0xc64   :  { %v7983_v55 = vpop.eup %7982 }
 0xcc4   :  { %v2000_v43 = vpop.permute.xlu0 %1999 }
 0xcc5   :  { %v2002_v27 = vmul.f32 %v7983_v55, %v2000_v43  ;;  %v7221_v43 = vld [vmem:[%s11899_s3 + $0x120] sm:$0xff] }
 0xcc6   :  { %1720 = vmatpush1.msra.mxu0 %v7221_v43  ;;  %2420 = vmatpush1.msra.mxu1 %v7221_v43  ;;  %v1997_v43 = vmul.f32 %v7983_v55, %v1995_v61  ;;  %v9485_v61 = vld [vmem:[%s11903_s2 + $0xd8] sm:$0xff] }
 0xcc7   :  { %2004 = vrot.lane.b32.xlu0 %v2002_v27, %s8237_s24  ;;  %v7220_v27 = vld [vmem:[%s11899_s3 + $0x118] sm:$0xff] }
 0xcc8   :  { %v1436_v53 = vpop.permute.xlu0 %1435  ;;  %1721 = vmatprep.subr.mxu0 %v7220_v27  ;;  %2421 = vmatprep.subr.mxu1 %v7220_v27 }
 0xcc9   :  { %v9415_v51 = vadd.f32 %v1436_v53, %v1428_v50  ;;  %v7219_v50 = vld [vmem:[%s11899_s3 + $0x110] sm:$0xff]  ;;  %v7218_v53 = vld [vmem:[%s11899_s3 + $0x108] sm:$0xff] }
 0xcca   :  { %1722 = vmatpush1.msra.mxu0 %v7219_v50  ;;  %2422 = vmatpush1.msra.mxu1 %v7219_v50 }
 0xccb   :  { %7984 = vtanh.f32 %v9415_v51  ;;  %1723 = vmatprep.subr.mxu0 %v7218_v53  ;;  %2423 = vmatprep.subr.mxu1 %v7218_v53 }
 0xccc   :  { %1724 = vmatpush1.msra.mxu0 %v7217_v48  ;;  %2424 = vmatpush1.msra.mxu1 %v7217_v48  ;;  %7986 = vpow2.f32 %v7196_v60  ;;  %v9473_v60 = vld [vmem:[%s11903_s2 + $0xe8] sm:$0xff] }
 0xccd   :  { %2055 = vmatprep.subr.mxu0 %v7258_v33  ;;  %2755 = vmatprep.subr.mxu1 %v7258_v33 }
 0xcd8   :  { %v7985_v34 = vpop.eup %7984 }
 0xcd9   :  { %1441 = vrot.lane.b32.xlu1 %v7985_v34, %s8237_s24  ;;  %v7987_v57 = vpop.eup %7986 }
 0xcda   :  { %v1417_v50 = vadd.f32 1.0, %v7987_v57 }
 0xcdd   :  { %1884 = vrot.lane.b32.xlu1 %v9257_v44, %s8237_s24 }
 0xd39   :  { %v2005_v27 = vpop.permute.xlu0 %2004 }
 0xd3a   :  { %v9458_v53 = vadd.f32 %v2005_v27, %v1997_v43  ;;  %v9493_v43 = vld [vmem:[%s11903_s2 + $0xd0] sm:$0xff]  ;;  %v9499_v27 = vld [vmem:[%s11903_s2 + $0xc8] sm:$0xff] }
 0xd3b   :  { %12013 = vst [vmem:[#allocation12_spill] sm:$0xff] %v9493_v43  ;;  %12014 = vst [vmem:[#allocation13_spill] sm:$0xff] %v9499_v27 }
 0xd3c   :  { %7988 = vtanh.f32 %v9458_v53 }
 0xd3d   :  { %7990 = vrcp.f32 %v1417_v50  ;;  %v9505_v50 = vld [vmem:[%s11903_s2 + $0xc0] sm:$0xff] }
 0xd3e   :  { %12015 = vst [vmem:[#allocation14_spill] sm:$0xff] %v9505_v50 }
 0xd49   :  { %v7989_v48 = vpop.eup %7988 }
 0xd4a   :  { %2010 = vrot.lane.b32.xlu0 %v7989_v48, %s8237_s24  ;;  %v7991_v34 = vpop.eup %7990  ;;  %v9511_v48 = vld [vmem:[%s11903_s2 + $0xb8] sm:$0xff] }
 0xd4b   :  { %v1442_v33 = vpop.permute.xlu1 %1441  ;;  %12016 = vst [vmem:[#allocation15_spill] sm:$0xff] %v9511_v48 }
 0xd4c   :  { %v1444_v54 = vmul.f32 %v7991_v34, %v1442_v33  ;;  %v9517_v34 = vld [vmem:[%s11903_s2 + $0xb0] sm:$0xff]  ;;  %v9523_v33 = vld [vmem:[%s11903_s2 + $0xa8] sm:$0xff] }
 0xd4d   :  { %12017 = vst [vmem:[#allocation16_spill] sm:$0xff] %v9517_v34  ;;  %12018 = vst [vmem:[#allocation17_spill] sm:$0xff] %v9523_v33 }
 0xd4e   :  { %1450 = vst.msk [vmem:[#allocation2 + $0x10] sm:$0xff] %vm36_vm0, %v1444_v54  ;;  %1452 = vst.msk [vmem:[#allocation4 + $0x8] sm:$0xff] %vm36_vm0, %v1444_v54  ;;  %v9479_v54 = vld [vmem:[%s11903_s2 + $0xe0] sm:$0xff] }
 0xd4f   :  { %v1885_v44 = vpop.permute.xlu1 %1884 }
 0xd50   :  { %1887 = vst.msk [vmem:[#allocation3] sm:$0xff] %vm36_vm0, %v1885_v44  ;;  %v9529_v44 = vld [vmem:[%s11903_s2 + $0xa0] sm:$0xff] }
 0xd51   :  { %12019 = vst [vmem:[#allocation18_spill] sm:$0xff] %v9529_v44 }
 0xd55   :  { %v1661_v55 = vld [vmem:[#allocation2 + $0x10] sm:$0xff] }
 0xd56   :  { %7234 = vmatmul.mubr.msk.f32.vlgmr.msra.gmra.mxu0 %vm36_vm0, %v1661_v55  ;;  %v9535_v55 = vld [vmem:[%s11903_s2 + $0x98] sm:$0xff] }
 0xd57   :  { %v2561_v57 = vld [vmem:[#allocation3] sm:$0xff]  ;;  %2056 = vmatpush1.msra.mxu0 %v9468_v49  ;;  %2103 = vmatprep.mubr.f32.mxu0 %v11972_v0  ;;  %12020 = vst [vmem:[#allocation19_spill] sm:$0xff] %v9535_v55 }
 0xd58   :  { %2563 = vrot.lane.b32.xlu1 %v2561_v57, %s8237_s24  ;;  %2057 = vmatprep.subr.mxu0 %v9473_v60  ;;  %v9541_v57 = vld [vmem:[%s11903_s2 + $0x90] sm:$0xff] }
 0xd59   :  { %2058 = vmatpush1.msra.mxu0 %v9479_v54 }
 0xd5a   :  { %2059 = vmatprep.subr.mxu0 %v9485_v61 }
 0xd5b   :  { %2060 = vmatpush1.msra.mxu0 %v9493_v43 }
 0xd5c   :  { %2061 = vmatprep.subr.mxu0 %v9499_v27 }
 0xd5d   :  { %2062 = vmatpush1.msra.mxu0 %v9505_v50 }
 0xd5e   :  { %2063 = vmatprep.subr.mxu0 %v9511_v48  ;;  %v9547_v48 = vld [vmem:[%s11903_s2 + $0x88] sm:$0xff] }
 0xd5f   :  { %2064 = vmatpush1.msra.mxu0 %v9517_v34  ;;  %v9553_v34 = vld [vmem:[%s11903_s2 + $0x80] sm:$0xff] }
 0xd60   :  { %2065 = vmatprep.subr.mxu0 %v9523_v33 }
 0xd61   :  { %2066 = vmatpush1.msra.mxu0 %v9529_v44  ;;  %v7242_v44 = vmul.f32 -1.442695, %v9385_v56 }
 0xd62   :  { %2067 = vmatprep.subr.mxu0 %v9535_v55 }
 0xd63   :  { %2068 = vmatpush1.msra.mxu0 %v9541_v57  ;;  %7992 = vpow2.f32 %v7242_v44 }
 0xd64   :  { %2069 = vmatprep.subr.mxu0 %v9547_v48 }
 0xd65   :  { %2070 = vmatpush1.msra.mxu0 %v9553_v34 }
 0xd66   :  { %2306 = vmatprep.subr.mxu0 %v9010_v31  ;;  %v2467_v31 = vld [vmem:[%s11900_s1 + $0x18] sm:$0x3] }
 0xd70   :  { %v7993_v33 = vpop.eup %7992 }
 0xd71   :  { %v1986_v50 = vadd.f32 1.0, %v7993_v33 }
 0xd73   :  { %7994 = vrcp.f32 %v1986_v50 }
 0xd80   :  { %v7995_v55 = vpop.eup %7994 }
 0xdbc   :  { %v2011_v27 = vpop.permute.xlu0 %2010 }
 0xdbd   :  { %v2013_v43 = vmul.f32 %v7995_v55, %v2011_v27 }
 0xdbf   :  { %2019 = vst.msk [vmem:[#allocation2 + $0x8] sm:$0xff] %vm36_vm0, %v2013_v43  ;;  %7259 = vmatmul.mubr.msk.f32.vlgmr.msra.gmra.mxu0 %vm36_vm0, %v2013_v43 }
 0xdc0   :  { %2307 = vmatpush1.msra.mxu0 %v9019_v15  ;;  %2354 = vmatprep.mubr.f32.mxu0 %v11972_v0  ;;  %v2466_v15 = vld [vmem:[%s11900_s1 + $0x10] sm:$0x3] }
 0xdc1   :  { %2308 = vmatprep.subr.mxu0 %v9024_v17 }
 0xdc2   :  { %2309 = vmatpush1.msra.mxu0 %v9031_v19  ;;  %v7262_v19 = vld [vmem:[%s11901_s0 + $0x18] sm:$0xff] }
 0xdc3   :  { %2310 = vmatprep.subr.mxu0 %v9037_v21  ;;  %v7233_v21 = vld [vmem:[%s11902_s4 + $0x2] ss:$4 sm:$0x3] }
 0xdc4   :  { %2311 = vmatpush1.msra.mxu0 %v9044_v23 }
 0xdc5   :  { %2312 = vmatprep.subr.mxu0 %v9050_v25  ;;  %v1683_v25 = vrot.slane %v7233_v21, %v8529_v42 }
 0xdc6   :  { %2313 = vmatpush1.msra.mxu0 %v9056_v29  ;;  %v2258_v17 = vld [vmem:[#allocation2 + $0x8] sm:$0xff] }
 0xdc7   :  { %2314 = vmatprep.subr.mxu0 %v9062_v36 }
 0xdc8   :  { %2315 = vmatpush1.msra.mxu0 %v9068_v6 }
 0xdc9   :  { %2316 = vmatprep.subr.mxu0 %v9074_v8 }
 0xdca   :  { %2317 = vmatpush1.msra.mxu0 %v9080_v10  ;;  %v9621_v10 = vld [vmem:[%s11902_s4 + $0x1] ss:$4 sm:$0x3] }
 0xdcb   :  { %2318 = vmatprep.subr.mxu0 %v9086_v12  ;;  %v2280_v12 = vrot.slane %v9621_v10, %v8529_v42 }
 0xdcc   :  { %2319 = vmatpush1.msra.mxu0 %v9092_v14 }
 0xdcd   :  { %2320 = vmatprep.subr.mxu0 %v9098_v16 }
 0xdce   :  { %2321 = vmatpush1.msra.mxu0 %v9104_v18  ;;  %v2181_v18 = vrot.slane %v9391_v45, %v8542_v47 }
 0xdcf   :  { %7281 = vmatmul.mubr.msk.f32.vlgmr.msra.gmra.mxu0 %vm36_vm0, %v2258_v17  ;;  %7300 = vmatprep.subr.msk.mxu0 %vm368_vm1, %v2467_v31 }
 0xdd0   :  { %7301 = vmatpush1.msk.msra.mxu0 %vm368_vm1, %v2466_v15  ;;  %2541 = vmatprep.mubr.f32.mxu0 %v11972_v0 }
 0xdd1   :  { %2507 = vmatprep.subr.mxu0 %v9118_v26 }
 0xdd2   :  { %2508 = vmatpush1.msra.mxu0 %v9125_v28  ;;  %v2255_v28 = vpop.f32.mrf.mxu1 }
 0xdd3   :  { %7302 = vmatmul.mubr.msk.f32.vlgmr.msra.gmra.mxu0 %vm364_vm2, %v7262_v19  ;;  %2624 = vmatprep.subr.mxu0 %v9169_v4 }
 0xdd4   :  { %2625 = vmatpush1.msra.mxu0 %v9174_v63  ;;  %2672 = vmatprep.mubr.f32.mxu0 %v11972_v0 }
 0xdd5   :  { %2626 = vmatprep.subr.mxu0 %v9179_v1  ;;  %v2256_v1 = vadd.f32 %v2255_v28, %v2181_v18 }
 0xdd6   :  { %2627 = vmatpush1.msra.mxu0 %v9187_v32 }
 0xdd7   :  { %2628 = vmatprep.subr.mxu0 %v9193_v3 }
 0xdd8   :  { %2629 = vmatpush1.msra.mxu0 %v9199_v46 }
 0xdd9   :  { %2630 = vmatprep.subr.mxu0 %v9205_v2 }
 0xdda   :  { %2631 = vmatpush1.msra.mxu0 %v9211_v5 }
 0xddb   :  { %2632 = vmatprep.subr.mxu0 %v9217_v7 }
 0xddc   :  { %2633 = vmatpush1.msra.mxu0 %v9223_v9 }
 0xddd   :  { %2634 = vmatprep.subr.mxu0 %v9229_v11 }
 0xdde   :  { %2635 = vmatpush1.msra.mxu0 %v9239_v24 }
 0xddf   :  { %2636 = vmatprep.subr.mxu0 %v9245_v38 }
 0xde0   :  { %2637 = vmatpush1.msra.mxu0 %v9250_v39  ;;  %v1687_v39 = vrot.slane %v7233_v21, %v8542_v47  ;;  %v12021_v21 = vld [vmem:[#allocation7_spill] sm:$0xff] }
 0xde1   :  { %2638 = vmatprep.subr.mxu0 %v9255_v37  ;;  %v2564_v37 = vpop.permute.xlu1 %2563 }
 0xde2   :  { %2639 = vmatpush1.msra.mxu0 %v9268_v52 }
 0xde3   :  { %2903 = vmatprep.subr.mxu0 %v9274_v40 }
 0xe16   :  { %v1759_v23 = vpop.f32.mrf.mxu0 }
 0xe17   :  { %v1760_v36 = vadd.f32 %v1759_v23, %v1683_v25  ;;  %v12022_v23 = vld [vmem:[#allocation5_spill] sm:$0xff]  ;;  %v12024_v25 = vld [vmem:[#allocation8_spill] sm:$0xff] }
 0xe18   :  { %v1761_v29 = vpop.f32.mrf.mxu0 }
 0xe19   :  { %v1762_v56 = vadd.f32 %v1761_v29, %v1687_v39 }
 0xe7f   :  { %v2105_v6 = vpop.f32.mrf.mxu0 }
 0xe80   :  { %v9616_v8 = vadd.f32 %v2105_v6, %v1760_v36 }
 0xe81   :  { %v2107_v14 = vpop.f32.mrf.mxu0 }
 0xe8f   :  { %v2356_v16 = vpop.f32.mrf.mxu0 }
 0xe90   :  { %v9627_v26 = vadd.f32 %v2356_v16, %v2280_v12 }
 0xe91   :  { %v9629_v4 = vpop.f32.mrf.mxu0 }
 0xe93   :  { %v2543_v63 = vpop.f32.mrf.mxu0 }
 0xe94   :  { %v2544_v32 = vadd.f32 %v2543_v63, %v9395_v62  ;;  %v9641_v62 = vadd.f32 %v2107_v14, %v1762_v56 }
 0xe95   :  { %v2545_v3 = vpop.f32.mrf.mxu0 }
 0xe96   :  { %v2546_v46 = vadd.f32 %v2545_v3, %v2256_v1  ;;  %v7303_v5 = vmul.f32 -1.442695, %v2544_v32 }
 0xe98   :  { %7996 = vtanh.f32 %v2546_v46  ;;  %v7304_v44 = vmul.f32 -1.442695, %v2546_v46 }
 0xe99   :  { %7998 = vpow2.f32 %v7303_v5 }
 0xea5   :  { %v7997_v2 = vpop.eup %7996 }
 0xea6   :  { %2568 = vrot.lane.b32.xlu0 %v7997_v2, %s8237_s24  ;;  %v7999_v7 = vpop.eup %7998 }
 0xea7   :  { %v2554_v9 = vadd.f32 1.0, %v7999_v7 }
 0xea9   :  { %8000 = vrcp.f32 %v2554_v9 }
 0xeb6   :  { %v8001_v11 = vpop.eup %8000 }
 0xeb7   :  { %v2566_v52 = vmul.f32 %v8001_v11, %v2564_v37  ;;  %v7261_v37 = vmul.f32 -1.442695, %v9641_v62 }
 0xf18   :  { %v2569_v24 = vpop.permute.xlu0 %2568 }
 0xf19   :  { %v2571_v38 = vmul.f32 %v8001_v11, %v2569_v24 }
 0xf1b   :  { %2573 = vrot.lane.b32.xlu0 %v2571_v38, %s8237_s24 }
 0xf1f   :  { %1446 = vrot.lane.b32.xlu0 %v9415_v51, %s8237_s24 }
 0xf23   :  { %2015 = vrot.lane.b32.xlu0 %v9458_v53, %s8237_s24 }
 0xf8d   :  { %v2574_v40 = vpop.permute.xlu0 %2573 }
 0xf8e   :  { %v9639_v45 = vadd.f32 %v2574_v40, %v2566_v52 }
 0xf90   :  { %8002 = vtanh.f32 %v9639_v45 }
 0xf91   :  { %v1447_v43 = vpop.permute.xlu0 %1446  ;;  %8004 = vtanh.f32 %v9641_v62 }
 0xf92   :  { %1449 = vst.msk [vmem:[#allocation3 + $0x10] sm:$0xff] %vm36_vm0, %v1447_v43  ;;  %8006 = vpow2.f32 %v7304_v44 }
 0xf95   :  { %v2016_v51 = vpop.permute.xlu0 %2015 }
 0xf96   :  { %2018 = vst.msk [vmem:[#allocation3 + $0x8] sm:$0xff] %vm36_vm0, %v2016_v51 }
 0xf99   :  { %v2123_v53 = vld [vmem:[#allocation3 + $0x10] sm:$0xff] }
 0xf9a   :  { %2125 = vrot.lane.b32.xlu0 %v2123_v53, %s8237_s24 }
 0xf9d   :  { %v8003_v27 = vpop.eup %8002  ;;  %v2692_v50 = vld [vmem:[#allocation3 + $0x8] sm:$0xff] }
 0xf9e   :  { %2694 = vrot.lane.b32.xlu0 %v2692_v50, %s8237_s24  ;;  %2579 = vrot.lane.b32.xlu1 %v8003_v27, %s8237_s24  ;;  %v8005_v33 = vpop.eup %8004 }
 0xf9f   :  { %v8007_v55 = vpop.eup %8006 }
 0xfa0   :  { %v2555_v31 = vadd.f32 1.0, %v8007_v55 }
 0xfa2   :  { %2130 = vrot.lane.b32.xlu1 %v8005_v33, %s8237_s24  ;;  %8008 = vrcp.f32 %v2555_v31  ;;  %v12028_v31 = vld [vmem:[#allocation12_spill] sm:$0xff] }
 0xfaf   :  { %v8009_v15 = vpop.eup %8008 }
0x100c   :  { %v2126_v5 = vpop.permute.xlu0 %2125 }
0x1010   :  { %v2580_v17 = vpop.permute.xlu1 %2579  ;;  %v2695_v40 = vpop.permute.xlu0 %2694 }
0x1011   :  { %v2582_v19 = vmul.f32 %v8009_v15, %v2580_v17  ;;  %v12029_v15 = vld [vmem:[#allocation13_spill] sm:$0xff]  ;;  %v12030_v17 = vld [vmem:[#allocation14_spill] sm:$0xff] }
0x1013   :  { %2588 = vst.msk [vmem:[#allocation2] sm:$0xff] %vm36_vm0, %v2582_v19  ;;  %7305 = vmatmul.mubr.msk.f32.vlgmr.msra.gmra.mxu0 %vm36_vm0, %v2582_v19  ;;  %v12031_v19 = vld [vmem:[#allocation15_spill] sm:$0xff] }
0x1014   :  { %2904 = vmatpush1.msra.mxu0 %v9288_v59  ;;  %2951 = vmatprep.mubr.f32.mxu0 %v11972_v0  ;;  %v12023_v59 = vld [vmem:[#allocation6_spill] sm:$0xff] }
0x1015   :  { %2905 = vmatprep.subr.mxu0 %v9293_v58  ;;  %v12025_v58 = vld [vmem:[#allocation9_spill] sm:$0xff] }
0x1016   :  { %2906 = vmatpush1.msra.mxu0 %v9300_v35  ;;  %v12026_v35 = vld [vmem:[#allocation10_spill] sm:$0xff] }
0x1017   :  { %2907 = vmatprep.subr.mxu0 %v9306_v13  ;;  %v12027_v13 = vld [vmem:[#allocation11_spill] sm:$0xff] }
0x1018   :  { %2908 = vmatpush1.msra.mxu0 %v9313_v20 }
0x1019   :  { %2909 = vmatprep.subr.mxu0 %v9319_v22  ;;  %v7260_v22 = vmul.f32 -1.442695, %v9616_v8  ;;  %v9682_v8 = vld [vmem:[%s11902_s4] ss:$4 sm:$0x3] }
0x101a   :  { %2910 = vmatpush1.msra.mxu0 %v9325_v30  ;;  %v2855_v20 = vld [vmem:[#allocation2] sm:$0xff]  ;;  %v2284_v30 = vrot.slane %v9621_v10, %v8542_v47  ;;  %v2877_v10 = vrot.slane %v9682_v8, %v8529_v42 }
0x101b   :  { %2911 = vmatprep.subr.mxu0 %v9331_v41  ;;  %8010 = vpow2.f32 %v7260_v22  ;;  %v9758_v22 = vld [vmem:[%s11899_s3 + $0xd0] sm:$0xff] }
0x101c   :  { %2912 = vmatpush1.msra.mxu0 %v12021_v21  ;;  %v2359_v36 = vadd.f32 %v9629_v4, %v2284_v30  ;;  %v12032_v21 = vld [vmem:[#allocation16_spill] sm:$0xff] }
0x101d   :  { %2913 = vmatprep.subr.mxu0 %v12022_v23  ;;  %v12034_v23 = vld [vmem:[#allocation18_spill] sm:$0xff]  ;;  %v9764_v30 = vld [vmem:[%s11899_s3 + $0xc8] sm:$0xff] }
0x101e   :  { %2914 = vmatpush1.msra.mxu0 %v12023_v59  ;;  %v12035_v59 = vld [vmem:[#allocation19_spill] sm:$0xff] }
0x101f   :  { %2915 = vmatprep.subr.mxu0 %v12024_v25 }
0x1020   :  { %2916 = vmatpush1.msra.mxu0 %v12025_v58 }
0x1021   :  { %2917 = vmatprep.subr.mxu0 %v12026_v35 }
0x1022   :  { %2918 = vmatpush1.msra.mxu0 %v12027_v13  ;;  %v9733_v13 = vld [vmem:[%s11899_s3 + $0xf0] sm:$0xff] }
0x1023   :  { %7328 = vmatmul.mubr.msk.f32.vlgmr.msra.gmra.mxu0 %vm36_vm0, %v2855_v20  ;;  %v9751_v20 = vld [vmem:[%s11899_s3 + $0xd8] sm:$0xff] }
0x1024   :  { %3157 = vmatprep.mubr.f32.mxu0 %v11972_v0 }
0x1028   :  { %v8011_v29 = vpop.eup %8010 }
0x1029   :  { %v2116_v16 = vadd.f32 1.0, %v8011_v29  ;;  %v9776_v29 = vld [vmem:[%s11899_s3 + $0xb8] sm:$0xff] }
0x10d3   :  { %v2674_v41 = vpop.f32.mrf.mxu0 }
0x10d4   :  { %v2675_v6 = vadd.f32 %v2674_v41, %v9627_v26  ;;  %v2131_v26 = vpop.permute.xlu1 %2130  ;;  %v9770_v41 = vld [vmem:[%s11899_s3 + $0xc0] sm:$0xff] }
0x10d5   :  { %v2676_v12 = vpop.f32.mrf.mxu0 }
0x10d6   :  { %v9676_v14 = vadd.f32 %v2676_v12, %v2359_v36  ;;  %v7306_v32 = vmul.f32 -1.442695, %v2675_v6  ;;  %v9782_v36 = vld [vmem:[%s11899_s3 + $0xb0] sm:$0xff]  ;;  %v9788_v6 = vld [vmem:[%s11899_s3 + $0xa8] sm:$0xff]  ;;  %v9794_v12 = vld [vmem:[%s11899_s3 + $0xa0] sm:$0xff] }
0x10d8   :  { %8012 = vtanh.f32 %v9676_v14 }
0x10d9   :  { %8014 = vrcp.f32 %v2116_v16  ;;  %v9806_v16 = vld [vmem:[%s11899_s3 + $0x90] sm:$0xff] }
0x10da   :  { %8016 = vpow2.f32 %v7306_v32  ;;  %v9839_v32 = vld [vmem:[%s11900_s1] sm:$0xff] }
0x10e3   :  { %v2953_v18 = vpop.f32.mrf.mxu0 }
0x10e4   :  { %v9686_v28 = vadd.f32 %v2953_v18, %v2877_v10  ;;  %v9812_v10 = vld [vmem:[%s11899_s3 + $0x88] sm:$0xff]  ;;  %v9818_v18 = vld [vmem:[%s11899_s3 + $0x80] sm:$0xff] }
0x10e5   :  { %v8013_v4 = vpop.eup %8012 }
0x10e6   :  { %2699 = vrot.lane.b32.xlu1 %v8013_v4, %s8237_s24  ;;  %v8015_v63 = vpop.eup %8014  ;;  %v3167_v4 = vld [vmem:[%s11900_s1 + $0x18] sm:$0x3] }
0x10e7   :  { %v2133_v1 = vmul.f32 %v8015_v63, %v2131_v26  ;;  %v8017_v3 = vpop.eup %8016  ;;  %v2128_v11 = vmul.f32 %v8015_v63, %v2126_v5  ;;  %v3166_v26 = vld [vmem:[%s11900_s1 + $0x10] sm:$0x3] }
0x10e8   :  { %v2685_v46 = vadd.f32 1.0, %v8017_v3  ;;  %v7327_v3 = vld [vmem:[%s11901_s0 + $0x20] sm:$0xff] }
0x10ea   :  { %2135 = vrot.lane.b32.xlu1 %v2133_v1, %s8237_s24  ;;  %8018 = vrcp.f32 %v2685_v46  ;;  %v9832_v1 = vld [vmem:[%s11900_s1 + $0x8] sm:$0xff]  ;;  %v9853_v46 = vld [vmem:[%s11902_s4 + $0x2] ss:$4 sm:$0x3] }
0x10eb   :  { %v2383_v5 = vrot.slane %v9853_v46, %v8529_v42 }
0x10f7   :  { %v8019_v2 = vpop.eup %8018 }
0x10f8   :  { %v2697_v56 = vmul.f32 %v8019_v2, %v2695_v40 }
0x1158   :  { %v2700_v7 = vpop.permute.xlu1 %2699 }
0x1159   :  { %v2702_v9 = vmul.f32 %v8019_v2, %v2700_v7 }
0x115b   :  { %2704 = vrot.lane.b32.xlu1 %v2702_v9, %s8237_s24 }
0x115c   :  { %v2136_v24 = vpop.permute.xlu1 %2135 }
0x115d   :  { %v9691_v38 = vadd.f32 %v2136_v24, %v2128_v11 }
0x115f   :  { %8020 = vtanh.f32 %v9691_v38 }
0x1160   :  { %8022 = vpow2.f32 %v7261_v37 }
0x116c   :  { %v8021_v39 = vpop.eup %8020 }
0x116d   :  { %2141 = vrot.lane.b32.xlu0 %v8021_v39, %s8237_s24  ;;  %v8023_v52 = vpop.eup %8022  ;;  %v9862_v39 = vld [vmem:[%s11902_s4 + $0x1] ss:$4 sm:$0x3] }
0x116e   :  { %v2117_v51 = vadd.f32 1.0, %v8023_v52  ;;  %v2980_v37 = vrot.slane %v9862_v39, %v8529_v42 }
0x1171   :  { %2584 = vrot.lane.b32.xlu0 %v9639_v45, %s8237_s24 }
0x11cd   :  { %v2705_v43 = vpop.permute.xlu1 %2704 }
0x11ce   :  { %v9698_v53 = vadd.f32 %v2705_v43, %v2697_v56  ;;  %v2881_v56 = vrot.slane %v9682_v8, %v8542_v47 }
0x11d0   :  { %8024 = vtanh.f32 %v9698_v53 }
0x11d1   :  { %8026 = vrcp.f32 %v2117_v51  ;;  %v2955_v51 = vpop.f32.mrf.mxu0 }
0x11dd   :  { %v8025_v27 = vpop.eup %8024 }
0x11de   :  { %2710 = vrot.lane.b32.xlu1 %v8025_v27, %s8237_s24  ;;  %v8027_v50 = vpop.eup %8026 }
0x11df   :  { %v2142_v33 = vpop.permute.xlu0 %2141 }
0x11e0   :  { %v2144_v44 = vmul.f32 %v8027_v50, %v2142_v33  ;;  %v2956_v33 = vadd.f32 %v2955_v51, %v2881_v56 }
0x11e2   :  { %2150 = vst.msk [vmem:[#allocation2 + $0x10] sm:$0xff] %vm36_vm0, %v2144_v44  ;;  %2152 = vst.msk [vmem:[#allocation4 + $0x10] sm:$0xff] %vm36_vm0, %v2144_v44 }
0x11e3   :  { %v2585_v45 = vpop.permute.xlu0 %2584 }
0x11e4   :  { %2587 = vst.msk [vmem:[#allocation3] sm:$0xff] %vm36_vm0, %v2585_v45 }
0x11e9   :  { %v2361_v62 = vld [vmem:[#allocation2 + $0x10] sm:$0xff] }
0x11ea   :  { %7299 = vmatmul.mubr.msk.f32.vlgmr.msra.gmra.mxu1 %vm36_vm0, %v2361_v62 }
0x11eb   :  { %v3261_v55 = vld [vmem:[#allocation3] sm:$0xff]  ;;  %2756 = vmatpush1.msra.mxu1 %v9468_v49  ;;  %2803 = vmatprep.mubr.f32.mxu1 %v11972_v0  ;;  %v12033_v49 = vld [vmem:[#allocation17_spill] sm:$0xff] }
0x11ec   :  { %3263 = vrot.lane.b32.xlu0 %v3261_v55, %s8237_s24  ;;  %2757 = vmatprep.subr.mxu1 %v9473_v60  ;;  %v9724_v60 = vld [vmem:[%s11899_s3 + $0xf8] sm:$0xff] }
0x11ed   :  { %2758 = vmatpush1.msra.mxu1 %v9479_v54  ;;  %v7307_v54 = vmul.f32 -1.442695, %v9676_v14  ;;  %v9800_v14 = vld [vmem:[%s11899_s3 + $0x98] sm:$0xff] }
0x11ee   :  { %2759 = vmatprep.subr.mxu1 %v9485_v61 }
0x11ef   :  { %2760 = vmatpush1.msra.mxu1 %v12028_v31  ;;  %8028 = vpow2.f32 %v7307_v54  ;;  %v9919_v54 = vld [vmem:[%s11903_s2 + $0x48] sm:$0xff] }
0x11f0   :  { %2761 = vmatprep.subr.mxu1 %v12029_v15 }
0x11f1   :  { %2762 = vmatpush1.msra.mxu1 %v12030_v17 }
0x11f2   :  { %2763 = vmatprep.subr.mxu1 %v12031_v19 }
0x11f3   :  { %2764 = vmatpush1.msra.mxu1 %v12032_v21 }
0x11f4   :  { %2765 = vmatprep.subr.mxu1 %v12033_v49  ;;  %v9888_v49 = vld [vmem:[%s11903_s2 + $0x70] sm:$0xff] }
0x11f5   :  { %2766 = vmatpush1.msra.mxu1 %v12034_v23  ;;  %v9893_v23 = vld [vmem:[%s11903_s2 + $0x68] sm:$0xff] }
0x11f6   :  { %2767 = vmatprep.subr.mxu1 %v12035_v59  ;;  %v9907_v59 = vld [vmem:[%s11903_s2 + $0x58] sm:$0xff] }
0x11f7   :  { %2768 = vmatpush1.msra.mxu1 %v9541_v57 }
0x11f8   :  { %2769 = vmatprep.subr.mxu1 %v9547_v48  ;;  %v9738_v48 = vld [vmem:[%s11899_s3 + $0xe8] sm:$0xff] }
0x11f9   :  { %2770 = vmatpush1.msra.mxu1 %v9553_v34  ;;  %v9745_v34 = vld [vmem:[%s11899_s3 + $0xe0] sm:$0xff] }
0x11fa   :  { %3006 = vmatprep.subr.mxu1 %v9724_v60 }
0x11fc   :  { %v8029_v61 = vpop.eup %8028 }
0x11fd   :  { %v2686_v25 = vadd.f32 1.0, %v8029_v61  ;;  %v9925_v61 = vld [vmem:[%s11903_s2 + $0x40] sm:$0xff] }
0x11ff   :  { %8030 = vrcp.f32 %v2686_v25  ;;  %v9931_v25 = vld [vmem:[%s11903_s2 + $0x38] sm:$0xff] }
0x120c   :  { %v8031_v58 = vpop.eup %8030 }
0x1250   :  { %v2711_v35 = vpop.permute.xlu1 %2710 }
0x1251   :  { %v2713_v57 = vmul.f32 %v8031_v58, %v2711_v35  ;;  %v9937_v58 = vld [vmem:[%s11903_s2 + $0x30] sm:$0xff]  ;;  %v9943_v35 = vld [vmem:[%s11903_s2 + $0x28] sm:$0xff] }
0x1253   :  { %2719 = vst.msk [vmem:[#allocation2 + $0x8] sm:$0xff] %vm36_vm0, %v2713_v57  ;;  %7324 = vmatmul.mubr.msk.f32.vlgmr.msra.gmra.mxu1 %vm36_vm0, %v2713_v57  ;;  %v2387_v57 = vrot.slane %v9853_v46, %v8542_v47  ;;  %v9969_v46 = vld [vmem:[%s11903_s2 + $0x8] sm:$0xff] }
0x1254   :  { %3007 = vmatpush1.msra.mxu1 %v9733_v13  ;;  %3054 = vmatprep.mubr.f32.mxu1 %v11972_v0 }
0x1255   :  { %3008 = vmatprep.subr.mxu1 %v9738_v48 }
0x1256   :  { %3009 = vmatpush1.msra.mxu1 %v9745_v34 }
0x1257   :  { %3010 = vmatprep.subr.mxu1 %v9751_v20 }
0x1258   :  { %3011 = vmatpush1.msra.mxu1 %v9758_v22 }
0x1259   :  { %3012 = vmatprep.subr.mxu1 %v9764_v30 }
0x125a   :  { %3013 = vmatpush1.msra.mxu1 %v9770_v41  ;;  %v2958_v63 = vld [vmem:[#allocation2 + $0x8] sm:$0xff] }
0x125b   :  { %3014 = vmatprep.subr.mxu1 %v9776_v29 }
0x125c   :  { %3015 = vmatpush1.msra.mxu1 %v9782_v36 }
0x125d   :  { %3016 = vmatprep.subr.mxu1 %v9788_v6 }
0x125e   :  { %3017 = vmatpush1.msra.mxu1 %v9794_v12 }
0x125f   :  { %3018 = vmatprep.subr.mxu1 %v9800_v14 }
0x1260   :  { %3019 = vmatpush1.msra.mxu1 %v9806_v16 }
0x1261   :  { %3020 = vmatprep.subr.mxu1 %v9812_v10 }
0x1262   :  { %3021 = vmatpush1.msra.mxu1 %v9818_v18 }
0x1263   :  { %7346 = vmatmul.mubr.msk.f32.vlgmr.msra.gmra.mxu1 %vm36_vm0, %v2958_v63  ;;  %7365 = vmatprep.subr.msk.mxu1 %vm368_vm1, %v3167_v4  ;;  %v3264_v4 = vpop.permute.xlu0 %3263  ;;  %v9953_v63 = vld [vmem:[%s11903_s2 + $0x20] sm:$0xff] }
0x1264   :  { %7366 = vmatpush1.msk.msra.mxu1 %vm368_vm1, %v3166_v26  ;;  %3241 = vmatprep.mubr.f32.mxu1 %v11972_v0 }
0x1265   :  { %3207 = vmatprep.subr.mxu1 %v9832_v1 }
0x1266   :  { %3208 = vmatpush1.msra.mxu1 %v9839_v32 }
0x1267   :  { %7367 = vmatmul.mubr.msk.f32.vlgmr.msra.gmra.mxu1 %vm364_vm2, %v7327_v3 }
0x1268   :  { %3372 = vmatprep.mubr.f32.mxu1 %v11972_v0 }
0x12aa   :  { %v2459_v2 = vpop.f32.mrf.mxu1 }
0x12ab   :  { %v2460_v9 = vadd.f32 %v2459_v2, %v2383_v5  ;;  %v9959_v2 = vld [vmem:[%s11903_s2 + $0x18] sm:$0xff]  ;;  %v9964_v5 = vld [vmem:[%s11903_s2 + $0x10] sm:$0xff] }
0x12ac   :  { %v2461_v7 = vpop.f32.mrf.mxu1 }
0x1313   :  { %v2805_v11 = vpop.f32.mrf.mxu1 }
0x1314   :  { %v9857_v24 = vadd.f32 %v2805_v11, %v2460_v9  ;;  %v2462_v9 = vadd.f32 %v2461_v7, %v2387_v57  ;;  %v9988_v7 = vld [vmem:[%s11899_s3 + $0x78] sm:$0xff] }
0x1315   :  { %v2807_v52 = vpop.f32.mrf.mxu1  ;;  %v10020_v57 = vld [vmem:[%s11899_s3 + $0x58] sm:$0xff] }
0x1323   :  { %v3056_v40 = vpop.f32.mrf.mxu1 }
0x1324   :  { %v9868_v43 = vadd.f32 %v3056_v40, %v2980_v37  ;;  %v9975_v37 = vadd.f32 %v2807_v52, %v2462_v9  ;;  %v9982_v40 = vld [vmem:[%s11903_s2] sm:$0xff]  ;;  %v10045_v9 = vld [vmem:[%s11899_s3 + $0x38] sm:$0xff] }
0x1325   :  { %v9870_v27 = vpop.f32.mrf.mxu1 }
0x1327   :  { %v3243_v50 = vpop.f32.mrf.mxu1 }
0x1328   :  { %v3244_v44 = vadd.f32 %v3243_v50, %v9686_v28  ;;  %v9883_v28 = vld [vmem:[%s11903_s2 + $0x78] sm:$0xff] }
0x1329   :  { %v3245_v45 = vpop.f32.mrf.mxu1  ;;  %3324 = vmatprep.subr.mxu1 %v9883_v28 }
0x132a   :  { %v9873_v62 = vadd.f32 %v3245_v45, %v2956_v33  ;;  %v7368_v31 = vmul.f32 -1.442695, %v3244_v44  ;;  %3325 = vmatpush1.msra.mxu1 %v9888_v49 }
0x132b   :  { %3326 = vmatprep.subr.mxu1 %v9893_v23 }
0x132c   :  { %8032 = vtanh.f32 %v9873_v62  ;;  %v7369_v45 = vmul.f32 -1.442695, %v9873_v62  ;;  %v10014_v62 = vld [vmem:[%s11899_s3 + $0x60] sm:$0xff] }
0x132d   :  { %8034 = vpow2.f32 %v7368_v31 }
0x1339   :  { %v8033_v55 = vpop.eup %8032 }
0x133a   :  { %3268 = vrot.lane.b32.xlu1 %v8033_v55, %s8237_s24  ;;  %v8035_v8 = vpop.eup %8034 }
0x133b   :  { %v3254_v15 = vadd.f32 1.0, %v8035_v8 }
0x133d   :  { %8036 = vrcp.f32 %v3254_v15 }
0x134a   :  { %v8037_v17 = vpop.eup %8036 }
0x134b   :  { %v3266_v26 = vmul.f32 %v8037_v17, %v3264_v4  ;;  %v10027_v4 = vld [vmem:[%s11899_s3 + $0x50] sm:$0xff] }
0x13ac   :  { %v3269_v19 = vpop.permute.xlu1 %3268 }
0x13ad   :  { %v3271_v21 = vmul.f32 %v8037_v17, %v3269_v19  ;;  %v10002_v19 = vld [vmem:[%s11899_s3 + $0x70] sm:$0xff] }
0x13af   :  { %3273 = vrot.lane.b32.xlu1 %v3271_v21, %s8237_s24  ;;  %v10007_v21 = vld [vmem:[%s11899_s3 + $0x68] sm:$0xff] }
0x13b3   :  { %2146 = vrot.lane.b32.xlu1 %v9691_v38, %s8237_s24  ;;  %v9901_v38 = vld [vmem:[%s11903_s2 + $0x60] sm:$0xff] }
0x13b4   :  { %3327 = vmatpush1.msra.mxu1 %v9901_v38 }
0x13b5   :  { %3328 = vmatprep.subr.mxu1 %v9907_v59 }
0x13b7   :  { %2715 = vrot.lane.b32.xlu1 %v9698_v53, %s8237_s24  ;;  %v9913_v53 = vld [vmem:[%s11903_s2 + $0x50] sm:$0xff] }
0x13b8   :  { %3329 = vmatpush1.msra.mxu1 %v9913_v53 }
0x13b9   :  { %3330 = vmatprep.subr.mxu1 %v9919_v54 }
0x13ba   :  { %3331 = vmatpush1.msra.mxu1 %v9925_v61 }
0x13bb   :  { %3332 = vmatprep.subr.mxu1 %v9931_v25 }
0x13bc   :  { %3333 = vmatpush1.msra.mxu1 %v9937_v58 }
0x13bd   :  { %3334 = vmatprep.subr.mxu1 %v9943_v35 }
0x13be   :  { %3335 = vmatpush1.msra.mxu1 %v9953_v63 }
0x13bf   :  { %3336 = vmatprep.subr.mxu1 %v9959_v2 }
0x13c0   :  { %3337 = vmatpush1.msra.mxu1 %v9964_v5 }
0x13c1   :  { %3338 = vmatprep.subr.mxu1 %v9969_v46 }
0x13c2   :  { %3339 = vmatpush1.msra.mxu1 %v9982_v40 }
0x13c3   :  { %3603 = vmatprep.subr.mxu1 %v9988_v7 }
0x1421   :  { %v3274_v3 = vpop.permute.xlu1 %3273 }
0x1422   :  { %v9971_v11 = vadd.f32 %v3274_v3, %v3266_v26  ;;  %v10033_v26 = vld [vmem:[%s11899_s3 + $0x48] sm:$0xff]  ;;  %v10039_v3 = vld [vmem:[%s11899_s3 + $0x40] sm:$0xff] }
0x1424   :  { %8038 = vtanh.f32 %v9971_v11 }
0x1425   :  { %v2147_v56 = vpop.permute.xlu1 %2146  ;;  %8040 = vtanh.f32 %v9975_v37 }
0x1426   :  { %2149 = vst.msk [vmem:[#allocation3 + $0x10] sm:$0xff] %vm36_vm0, %v2147_v56  ;;  %8042 = vpow2.f32 %v7369_v45  ;;  %v10051_v56 = vld [vmem:[%s11899_s3 + $0x30] sm:$0xff]  ;;  %v10087_v45 = vld [vmem:[%s11899_s3] sm:$0xff] }
0x1427   :  { %12036 = vst [vmem:[#allocation20_spill] sm:$0xff] %v10051_v56  ;;  %12042 = vst [vmem:[#allocation8_spill] sm:$0xff] %v10087_v45 }
0x1429   :  { %v2716_v52 = vpop.permute.xlu1 %2715 }
0x142a   :  { %2718 = vst.msk [vmem:[#allocation3 + $0x8] sm:$0xff] %vm36_vm0, %v2716_v52  ;;  %v10057_v52 = vld [vmem:[%s11899_s3 + $0x28] sm:$0xff] }
0x142b   :  { %12037 = vst [vmem:[#allocation21_spill] sm:$0xff] %v10057_v52 }
0x142d   :  { %v2823_v51 = vld [vmem:[#allocation3 + $0x10] sm:$0xff] }
0x142e   :  { %2825 = vrot.lane.b32.xlu1 %v2823_v51, %s8237_s24  ;;  %v10063_v51 = vld [vmem:[%s11899_s3 + $0x20] sm:$0xff] }
0x142f   :  { %12038 = vst [vmem:[#allocation22_spill] sm:$0xff] %v10063_v51 }
0x1431   :  { %v8039_v50 = vpop.eup %8038  ;;  %v3392_v33 = vld [vmem:[#allocation3 + $0x8] sm:$0xff] }
0x1432   :  { %3394 = vrot.lane.b32.xlu1 %v3392_v33, %s8237_s24  ;;  %3279 = vrot.lane.b32.xlu0 %v8039_v50, %s8237_s24  ;;  %v8041_v44 = vpop.eup %8040  ;;  %v10069_v50 = vld [vmem:[%s11899_s3 + $0x18] sm:$0xff]  ;;  %v10075_v33 = vld [vmem:[%s11899_s3 + $0x10] sm:$0xff] }
0x1433   :  { %v8043_v55 = vpop.eup %8042  ;;  %12039 = vst [vmem:[#allocation7_spill] sm:$0xff] %v10069_v50  ;;  %12040 = vst [vmem:[#allocation5_spill] sm:$0xff] %v10075_v33 }
0x1434   :  { %v3255_v31 = vadd.f32 1.0, %v8043_v55 }
0x1436   :  { %2830 = vrot.lane.b32.xlu0 %v8041_v44, %s8237_s24  ;;  %8044 = vrcp.f32 %v3255_v31  ;;  %v10081_v44 = vld [vmem:[%s11899_s3 + $0x8] sm:$0xff]  ;;  %v7325_v31 = vmul.f32 -1.442695, %v9857_v24  ;;  %v10105_v24 = vld [vmem:[%s11902_s4] ss:$4 sm:$0x3] }
0x1437   :  { %12041 = vst [vmem:[#allocation6_spill] sm:$0xff] %v10081_v44 }
0x1438   :  { %8046 = vpow2.f32 %v7325_v31 }
0x1443   :  { %v8045_v8 = vpop.eup %8044 }
0x14a4   :  { %v3280_v15 = vpop.permute.xlu0 %3279 }
0x14a5   :  { %v3282_v17 = vmul.f32 %v8045_v8, %v3280_v15  ;;  %v2984_v8 = vrot.slane %v9862_v39, %v8542_v47  ;;  %v3577_v39 = vrot.slane %v10105_v24, %v8529_v42 }
0x14a7   :  { %3288 = vst.msk [vmem:[#allocation2] sm:$0xff] %vm36_vm0, %v3282_v17  ;;  %7370 = vmatmul.mubr.msk.f32.vlgmr.msra.gmra.mxu1 %vm36_vm0, %v3282_v17  ;;  %v8047_v17 = vpop.eup %8046 }
0x14a8   :  { %3604 = vmatpush1.msra.mxu1 %v10002_v19  ;;  %3651 = vmatprep.mubr.f32.mxu1 %v11972_v0 }
0x14a9   :  { %3605 = vmatprep.subr.mxu1 %v10007_v21 }
0x14aa   :  { %3606 = vmatpush1.msra.mxu1 %v10014_v62 }
0x14ab   :  { %3607 = vmatprep.subr.mxu1 %v10020_v57 }
0x14ac   :  { %3608 = vmatpush1.msra.mxu1 %v10027_v4 }
0x14ad   :  { %3609 = vmatprep.subr.mxu1 %v10033_v26 }
0x14ae   :  { %3610 = vmatpush1.msra.mxu1 %v10039_v3  ;;  %v3555_v55 = vld [vmem:[#allocation2] sm:$0xff] }
0x14af   :  { %3611 = vmatprep.subr.mxu1 %v10045_v9 }
0x14b0   :  { %3612 = vmatpush1.msra.mxu1 %v10051_v56 }
0x14b1   :  { %3613 = vmatprep.subr.mxu1 %v10057_v52 }
0x14b2   :  { %3614 = vmatpush1.msra.mxu1 %v10063_v51 }
0x14b3   :  { %3615 = vmatprep.subr.mxu1 %v10069_v50  ;;  %v3059_v50 = vadd.f32 %v9870_v27, %v2984_v8 }
0x14b4   :  { %3616 = vmatpush1.msra.mxu1 %v10075_v33 }
0x14b5   :  { %3617 = vmatprep.subr.mxu1 %v10081_v44 }
0x14b6   :  { %3618 = vmatpush1.msra.mxu1 %v10087_v45  ;;  %v2816_v45 = vadd.f32 1.0, %v8047_v17  ;;  %v7362_v17 = vld [vmem:[%s11899_s3 + $0x178] sm:$0xff] }
0x14b7   :  { %7393 = vmatmul.mubr.msk.f32.vlgmr.msra.gmra.mxu1 %vm36_vm0, %v3555_v55  ;;  %3109 = vmatprep.subr.mxu0 %v7362_v17 }
0x14b8   :  { %3857 = vmatprep.mubr.f32.mxu1 %v11972_v0  ;;  %3809 = vmatprep.subr.mxu1 %v7362_v17 }
0x1567   :  { %v3374_v15 = vpop.f32.mrf.mxu1 }
0x1568   :  { %v3375_v33 = vadd.f32 %v3374_v15, %v9868_v43  ;;  %v2831_v43 = vpop.permute.xlu0 %2830 }
0x1569   :  { %v3376_v44 = vpop.f32.mrf.mxu1 }
0x156a   :  { %v10099_v51 = vadd.f32 %v3376_v44, %v3059_v50 }
0x156c   :  { %8048 = vtanh.f32 %v10099_v51 }
0x156d   :  { %8050 = vrcp.f32 %v2816_v45  ;;  %v7371_v45 = vmul.f32 -1.442695, %v3375_v33  ;;  %v7359_v33 = vld [vmem:[%s11899_s3 + $0x160] sm:$0xff] }
0x156f   :  { %8052 = vpow2.f32 %v7371_v45 }
0x1577   :  { %v3653_v55 = vpop.f32.mrf.mxu1 }
0x1578   :  { %v10109_v31 = vadd.f32 %v3653_v55, %v3577_v39  ;;  %v7361_v39 = vld [vmem:[%s11899_s3 + $0x170] sm:$0xff]  ;;  %v7360_v55 = vld [vmem:[%s11899_s3 + $0x168] sm:$0xff] }
0x1579   :  { %v8049_v27 = vpop.eup %8048  ;;  %3110 = vmatpush1.msra.mxu0 %v7361_v39  ;;  %3810 = vmatpush1.msra.mxu1 %v7361_v39  ;;  %v7357_v39 = vld [vmem:[%s11899_s3 + $0x150] sm:$0xff] }
0x157a   :  { %3399 = vrot.lane.b32.xlu0 %v8049_v27, %s8237_s24  ;;  %v8051_v50 = vpop.eup %8050  ;;  %v7358_v27 = vld [vmem:[%s11899_s3 + $0x158] sm:$0xff]  ;;  %3111 = vmatprep.subr.mxu0 %v7360_v55 }
0x157b   :  { %v2833_v44 = vmul.f32 %v8051_v50, %v2831_v43  ;;  %3811 = vmatprep.subr.mxu1 %v7360_v55  ;;  %3112 = vmatpush1.msra.mxu0 %v7359_v33  ;;  %v7356_v55 = vld [vmem:[%s11899_s3 + $0x148] sm:$0xff] }
0x157c   :  { %v8053_v8 = vpop.eup %8052  ;;  %3812 = vmatpush1.msra.mxu1 %v7359_v33  ;;  %3113 = vmatprep.subr.mxu0 %v7358_v27  ;;  %v7354_v33 = vld [vmem:[%s11899_s3 + $0x138] sm:$0xff] }
0x157d   :  { %v3385_v15 = vadd.f32 1.0, %v8053_v8  ;;  %3813 = vmatprep.subr.mxu1 %v7358_v27  ;;  %3114 = vmatpush1.msra.mxu0 %v7357_v39  ;;  %v7353_v27 = vld [vmem:[%s11899_s3 + $0x130] sm:$0xff] }
0x157e   :  { %2835 = vrot.lane.b32.xlu0 %v2833_v44, %s8237_s24  ;;  %v2826_v44 = vpop.permute.xlu1 %2825  ;;  %3814 = vmatpush1.msra.mxu1 %v7357_v39  ;;  %v7347_v39 = vld [vmem:[%s11899_s3 + $0x100] sm:$0xff] }
0x157f   :  { %8054 = vrcp.f32 %v3385_v15  ;;  %v2828_v15 = vmul.f32 %v8051_v50, %v2826_v44  ;;  %3115 = vmatprep.subr.mxu0 %v7356_v55  ;;  %v7355_v50 = vld [vmem:[%s11899_s3 + $0x140] sm:$0xff]  ;;  %3815 = vmatprep.subr.mxu1 %v7356_v55  ;;  %v7352_v44 = vld [vmem:[%s11899_s3 + $0x128] sm:$0xff] }
0x1580   :  { %3116 = vmatpush1.msra.mxu0 %v7355_v50  ;;  %3816 = vmatpush1.msra.mxu1 %v7355_v50  ;;  %v7388_v50 = vld [vmem:[%s11903_s2 + $0xf8] sm:$0xff] }
0x1581   :  { %3117 = vmatprep.subr.mxu0 %v7354_v33  ;;  %3817 = vmatprep.subr.mxu1 %v7354_v33  ;;  %v7326_v33 = vmul.f32 -1.442695, %v9975_v37  ;;  %v10182_v37 = vld [vmem:[%s11903_s2 + $0xf0] sm:$0xff] }
0x1582   :  { %3118 = vmatpush1.msra.mxu0 %v7353_v27  ;;  %3818 = vmatpush1.msra.mxu1 %v7353_v27 }
0x1583   :  { %3119 = vmatprep.subr.mxu0 %v7352_v44  ;;  %3819 = vmatprep.subr.mxu1 %v7352_v44  ;;  %v3395_v44 = vpop.permute.xlu1 %3394 }
0x158c   :  { %v8055_v43 = vpop.eup %8054 }
0x15ec   :  { %v3400_v45 = vpop.permute.xlu0 %3399 }
0x15ed   :  { %v3402_v8 = vmul.f32 %v8055_v43, %v3400_v45  ;;  %v7351_v45 = vld [vmem:[%s11899_s3 + $0x120] sm:$0xff] }
0x15ee   :  { %3120 = vmatpush1.msra.mxu0 %v7351_v45  ;;  %3820 = vmatpush1.msra.mxu1 %v7351_v45  ;;  %v3397_v45 = vmul.f32 %v8055_v43, %v3395_v44  ;;  %v10199_v44 = vld [vmem:[%s11903_s2 + $0xd8] sm:$0xff] }
0x15ef   :  { %3404 = vrot.lane.b32.xlu0 %v3402_v8, %s8237_s24  ;;  %v7350_v8 = vld [vmem:[%s11899_s3 + $0x118] sm:$0xff] }
0x15f0   :  { %v2836_v17 = vpop.permute.xlu0 %2835  ;;  %3121 = vmatprep.subr.mxu0 %v7350_v8  ;;  %3821 = vmatprep.subr.mxu1 %v7350_v8 }
0x15f1   :  { %v10129_v52 = vadd.f32 %v2836_v17, %v2828_v15  ;;  %v7349_v15 = vld [vmem:[%s11899_s3 + $0x110] sm:$0xff]  ;;  %v7348_v17 = vld [vmem:[%s11899_s3 + $0x108] sm:$0xff] }
0x15f2   :  { %3122 = vmatpush1.msra.mxu0 %v7349_v15  ;;  %3822 = vmatpush1.msra.mxu1 %v7349_v15 }
0x15f3   :  { %8056 = vtanh.f32 %v10129_v52  ;;  %3123 = vmatprep.subr.mxu0 %v7348_v17  ;;  %3823 = vmatprep.subr.mxu1 %v7348_v17 }
0x15f4   :  { %3124 = vmatpush1.msra.mxu0 %v7347_v39  ;;  %3824 = vmatpush1.msra.mxu1 %v7347_v39  ;;  %8058 = vpow2.f32 %v7326_v33  ;;  %v10187_v33 = vld [vmem:[%s11903_s2 + $0xe8] sm:$0xff] }
0x15f5   :  { %3455 = vmatprep.subr.mxu0 %v7388_v50  ;;  %4155 = vmatprep.subr.mxu1 %v7388_v50 }
0x1600   :  { %v8057_v55 = vpop.eup %8056 }
0x1601   :  { %2841 = vrot.lane.b32.xlu1 %v8057_v55, %s8237_s24  ;;  %v8059_v27 = vpop.eup %8058 }
0x1602   :  { %v2817_v15 = vadd.f32 1.0, %v8059_v27 }
0x1605   :  { %3284 = vrot.lane.b32.xlu1 %v9971_v11, %s8237_s24 }
0x1661   :  { %v3405_v8 = vpop.permute.xlu0 %3404 }
0x1662   :  { %v10172_v17 = vadd.f32 %v3405_v8, %v3397_v45  ;;  %v10207_v45 = vld [vmem:[%s11903_s2 + $0xd0] sm:$0xff]  ;;  %v10213_v8 = vld [vmem:[%s11903_s2 + $0xc8] sm:$0xff] }
0x1663   :  { %12043 = vst [vmem:[#allocation9_spill] sm:$0xff] %v10207_v45  ;;  %12044 = vst [vmem:[#allocation10_spill] sm:$0xff] %v10213_v8 }
0x1664   :  { %8060 = vtanh.f32 %v10172_v17 }
0x1665   :  { %8062 = vrcp.f32 %v2817_v15  ;;  %v10219_v15 = vld [vmem:[%s11903_s2 + $0xc0] sm:$0xff] }
0x1666   :  { %12045 = vst [vmem:[#allocation11_spill] sm:$0xff] %v10219_v15 }
0x1671   :  { %v8061_v39 = vpop.eup %8060 }
0x1672   :  { %3410 = vrot.lane.b32.xlu0 %v8061_v39, %s8237_s24  ;;  %v8063_v55 = vpop.eup %8062  ;;  %v10225_v39 = vld [vmem:[%s11903_s2 + $0xb8] sm:$0xff] }
0x1673   :  { %v2842_v50 = vpop.permute.xlu1 %2841  ;;  %12046 = vst [vmem:[#allocation12_spill] sm:$0xff] %v10225_v39 }
0x1674   :  { %v2844_v56 = vmul.f32 %v8063_v55, %v2842_v50  ;;  %v10231_v55 = vld [vmem:[%s11903_s2 + $0xb0] sm:$0xff]  ;;  %v10237_v50 = vld [vmem:[%s11903_s2 + $0xa8] sm:$0xff] }
0x1675   :  { %12047 = vst [vmem:[#allocation13_spill] sm:$0xff] %v10231_v55  ;;  %12048 = vst [vmem:[#allocation14_spill] sm:$0xff] %v10237_v50 }
0x1676   :  { %2850 = vst.msk [vmem:[#allocation2 + $0x10] sm:$0xff] %vm36_vm0, %v2844_v56  ;;  %2852 = vst.msk [vmem:[#allocation4 + $0x18] sm:$0xff] %vm36_vm0, %v2844_v56  ;;  %v10193_v56 = vld [vmem:[%s11903_s2 + $0xe0] sm:$0xff] }
0x1677   :  { %v3285_v11 = vpop.permute.xlu1 %3284 }
0x1678   :  { %3287 = vst.msk [vmem:[#allocation3] sm:$0xff] %vm36_vm0, %v3285_v11  ;;  %v10243_v11 = vld [vmem:[%s11903_s2 + $0xa0] sm:$0xff] }
0x1679   :  { %12049 = vst [vmem:[#allocation15_spill] sm:$0xff] %v10243_v11 }
0x167d   :  { %v3061_v43 = vld [vmem:[#allocation2 + $0x10] sm:$0xff] }
0x167e   :  { %7364 = vmatmul.mubr.msk.f32.vlgmr.msra.gmra.mxu0 %vm36_vm0, %v3061_v43  ;;  %v10249_v43 = vld [vmem:[%s11903_s2 + $0x98] sm:$0xff] }
0x167f   :  { %v3961_v27 = vld [vmem:[#allocation3] sm:$0xff]  ;;  %3456 = vmatpush1.msra.mxu0 %v10182_v37  ;;  %3503 = vmatprep.mubr.f32.mxu0 %v11972_v0  ;;  %12050 = vst [vmem:[#allocation16_spill] sm:$0xff] %v10249_v43 }
0x1680   :  { %3963 = vrot.lane.b32.xlu1 %v3961_v27, %s8237_s24  ;;  %3457 = vmatprep.subr.mxu0 %v10187_v33  ;;  %v10255_v27 = vld [vmem:[%s11903_s2 + $0x90] sm:$0xff] }
0x1681   :  { %3458 = vmatpush1.msra.mxu0 %v10193_v56 }
0x1682   :  { %3459 = vmatprep.subr.mxu0 %v10199_v44 }
0x1683   :  { %3460 = vmatpush1.msra.mxu0 %v10207_v45 }
0x1684   :  { %3461 = vmatprep.subr.mxu0 %v10213_v8 }
0x1685   :  { %3462 = vmatpush1.msra.mxu0 %v10219_v15 }
0x1686   :  { %3463 = vmatprep.subr.mxu0 %v10225_v39  ;;  %v10261_v39 = vld [vmem:[%s11903_s2 + $0x88] sm:$0xff] }
0x1687   :  { %3464 = vmatpush1.msra.mxu0 %v10231_v55  ;;  %v10267_v55 = vld [vmem:[%s11903_s2 + $0x80] sm:$0xff] }
0x1688   :  { %3465 = vmatprep.subr.mxu0 %v10237_v50 }
0x1689   :  { %3466 = vmatpush1.msra.mxu0 %v10243_v11  ;;  %v7372_v11 = vmul.f32 -1.442695, %v10099_v51 }
0x168a   :  { %3467 = vmatprep.subr.mxu0 %v10249_v43 }
0x168b   :  { %3468 = vmatpush1.msra.mxu0 %v10255_v27  ;;  %8064 = vpow2.f32 %v7372_v11 }
0x168c   :  { %3469 = vmatprep.subr.mxu0 %v10261_v39 }
0x168d   :  { %3470 = vmatpush1.msra.mxu0 %v10267_v55 }
0x168e   :  { %3706 = vmatprep.subr.mxu0 %v9724_v60  ;;  %v3867_v60 = vld [vmem:[%s11900_s1 + $0x18] sm:$0x3] }
0x1698   :  { %v8065_v50 = vpop.eup %8064 }
0x1699   :  { %v3386_v15 = vadd.f32 1.0, %v8065_v50 }
0x169b   :  { %8066 = vrcp.f32 %v3386_v15 }
0x16a8   :  { %v8067_v43 = vpop.eup %8066 }
0x16e4   :  { %v3411_v8 = vpop.permute.xlu0 %3410 }
0x16e5   :  { %v3413_v45 = vmul.f32 %v8067_v43, %v3411_v8 }
0x16e7   :  { %3419 = vst.msk [vmem:[#allocation2 + $0x8] sm:$0xff] %vm36_vm0, %v3413_v45  ;;  %7389 = vmatmul.mubr.msk.f32.vlgmr.msra.gmra.mxu0 %vm36_vm0, %v3413_v45 }
0x16e8   :  { %3707 = vmatpush1.msra.mxu0 %v9733_v13  ;;  %3754 = vmatprep.mubr.f32.mxu0 %v11972_v0  ;;  %v3866_v13 = vld [vmem:[%s11900_s1 + $0x10] sm:$0x3] }
0x16e9   :  { %3708 = vmatprep.subr.mxu0 %v9738_v48 }
0x16ea   :  { %3709 = vmatpush1.msra.mxu0 %v9745_v34  ;;  %v7392_v34 = vld [vmem:[%s11901_s0 + $0x28] sm:$0xff] }
0x16eb   :  { %3710 = vmatprep.subr.mxu0 %v9751_v20  ;;  %v7363_v20 = vld [vmem:[%s11902_s4 + $0x2] ss:$4 sm:$0x3] }
0x16ec   :  { %3711 = vmatpush1.msra.mxu0 %v9758_v22 }
0x16ed   :  { %3712 = vmatprep.subr.mxu0 %v9764_v30  ;;  %v3083_v30 = vrot.slane %v7363_v20, %v8529_v42 }
0x16ee   :  { %3713 = vmatpush1.msra.mxu0 %v9770_v41  ;;  %v3658_v48 = vld [vmem:[#allocation2 + $0x8] sm:$0xff] }
0x16ef   :  { %3714 = vmatprep.subr.mxu0 %v9776_v29 }
0x16f0   :  { %3715 = vmatpush1.msra.mxu0 %v9782_v36 }
0x16f1   :  { %3716 = vmatprep.subr.mxu0 %v9788_v6 }
0x16f2   :  { %3717 = vmatpush1.msra.mxu0 %v9794_v12  ;;  %v10335_v12 = vld [vmem:[%s11902_s4 + $0x1] ss:$4 sm:$0x3] }
0x16f3   :  { %3718 = vmatprep.subr.mxu0 %v9800_v14  ;;  %v3680_v14 = vrot.slane %v10335_v12, %v8529_v42 }
0x16f4   :  { %3719 = vmatpush1.msra.mxu0 %v9806_v16 }
0x16f5   :  { %3720 = vmatprep.subr.mxu0 %v9812_v10 }
0x16f6   :  { %3721 = vmatpush1.msra.mxu0 %v9818_v18  ;;  %v3581_v18 = vrot.slane %v10105_v24, %v8542_v47 }
0x16f7   :  { %7411 = vmatmul.mubr.msk.f32.vlgmr.msra.gmra.mxu0 %vm36_vm0, %v3658_v48  ;;  %7430 = vmatprep.subr.msk.mxu0 %vm368_vm1, %v3867_v60 }
0x16f8   :  { %7431 = vmatpush1.msk.msra.mxu0 %vm368_vm1, %v3866_v13  ;;  %3941 = vmatprep.mubr.f32.mxu0 %v11972_v0 }
0x16f9   :  { %3907 = vmatprep.subr.mxu0 %v9832_v1 }
0x16fa   :  { %3908 = vmatpush1.msra.mxu0 %v9839_v32  ;;  %v3655_v32 = vpop.f32.mrf.mxu1 }
0x16fb   :  { %7432 = vmatmul.mubr.msk.f32.vlgmr.msra.gmra.mxu0 %vm364_vm2, %v7392_v34  ;;  %4024 = vmatprep.subr.mxu0 %v9883_v28 }
0x16fc   :  { %4025 = vmatpush1.msra.mxu0 %v9888_v49  ;;  %4072 = vmatprep.mubr.f32.mxu0 %v11972_v0 }
0x16fd   :  { %4026 = vmatprep.subr.mxu0 %v9893_v23  ;;  %v3656_v23 = vadd.f32 %v3655_v32, %v3581_v18 }
0x16fe   :  { %4027 = vmatpush1.msra.mxu0 %v9901_v38 }
0x16ff   :  { %4028 = vmatprep.subr.mxu0 %v9907_v59 }
0x1700   :  { %4029 = vmatpush1.msra.mxu0 %v9913_v53 }
0x1701   :  { %4030 = vmatprep.subr.mxu0 %v9919_v54 }
0x1702   :  { %4031 = vmatpush1.msra.mxu0 %v9925_v61 }
0x1703   :  { %4032 = vmatprep.subr.mxu0 %v9931_v25 }
0x1704   :  { %4033 = vmatpush1.msra.mxu0 %v9937_v58 }
0x1705   :  { %4034 = vmatprep.subr.mxu0 %v9943_v35 }
0x1706   :  { %4035 = vmatpush1.msra.mxu0 %v9953_v63 }
0x1707   :  { %4036 = vmatprep.subr.mxu0 %v9959_v2 }
0x1708   :  { %4037 = vmatpush1.msra.mxu0 %v9964_v5  ;;  %v3087_v5 = vrot.slane %v7363_v20, %v8542_v47  ;;  %v12051_v20 = vld [vmem:[#allocation20_spill] sm:$0xff] }
0x1709   :  { %4038 = vmatprep.subr.mxu0 %v9969_v46  ;;  %v3964_v46 = vpop.permute.xlu1 %3963 }
0x170a   :  { %4039 = vmatpush1.msra.mxu0 %v9982_v40 }
0x170b   :  { %4303 = vmatprep.subr.mxu0 %v9988_v7 }
0x173e   :  { %v3159_v22 = vpop.f32.mrf.mxu0 }
0x173f   :  { %v3160_v29 = vadd.f32 %v3159_v22, %v3083_v30  ;;  %v12052_v22 = vld [vmem:[#allocation21_spill] sm:$0xff]  ;;  %v12054_v30 = vld [vmem:[#allocation7_spill] sm:$0xff] }
0x1740   :  { %v3161_v41 = vpop.f32.mrf.mxu0 }
0x1741   :  { %v3162_v51 = vadd.f32 %v3161_v41, %v3087_v5 }
0x17a7   :  { %v3505_v36 = vpop.f32.mrf.mxu0 }
0x17a8   :  { %v10330_v6 = vadd.f32 %v3505_v36, %v3160_v29 }
0x17a9   :  { %v3507_v16 = vpop.f32.mrf.mxu0 }
0x17b7   :  { %v3756_v10 = vpop.f32.mrf.mxu0 }
0x17b8   :  { %v10341_v1 = vadd.f32 %v3756_v10, %v3680_v14 }
0x17b9   :  { %v10343_v28 = vpop.f32.mrf.mxu0 }
0x17bb   :  { %v3943_v49 = vpop.f32.mrf.mxu0 }
0x17bc   :  { %v3944_v38 = vadd.f32 %v3943_v49, %v10109_v31  ;;  %v10355_v31 = vadd.f32 %v3507_v16, %v3162_v51 }
0x17bd   :  { %v3945_v59 = vpop.f32.mrf.mxu0 }
0x17be   :  { %v3946_v53 = vadd.f32 %v3945_v59, %v3656_v23  ;;  %v7433_v61 = vmul.f32 -1.442695, %v3944_v38 }
0x17c0   :  { %8068 = vtanh.f32 %v3946_v53  ;;  %v7434_v11 = vmul.f32 -1.442695, %v3946_v53 }
0x17c1   :  { %8070 = vpow2.f32 %v7433_v61 }
0x17cd   :  { %v8069_v54 = vpop.eup %8068 }
0x17ce   :  { %3968 = vrot.lane.b32.xlu0 %v8069_v54, %s8237_s24  ;;  %v8071_v25 = vpop.eup %8070 }
0x17cf   :  { %v3954_v58 = vadd.f32 1.0, %v8071_v25 }
0x17d1   :  { %8072 = vrcp.f32 %v3954_v58 }
0x17de   :  { %v8073_v35 = vpop.eup %8072 }
0x17df   :  { %v3966_v40 = vmul.f32 %v8073_v35, %v3964_v46  ;;  %v7391_v46 = vmul.f32 -1.442695, %v10355_v31 }
0x1840   :  { %v3969_v63 = vpop.permute.xlu0 %3968 }
0x1841   :  { %v3971_v2 = vmul.f32 %v8073_v35, %v3969_v63 }
0x1843   :  { %3973 = vrot.lane.b32.xlu0 %v3971_v2, %s8237_s24 }
0x1847   :  { %2846 = vrot.lane.b32.xlu0 %v10129_v52, %s8237_s24 }
0x184b   :  { %3415 = vrot.lane.b32.xlu0 %v10172_v17, %s8237_s24 }
0x18b5   :  { %v3974_v7 = vpop.permute.xlu0 %3973 }
0x18b6   :  { %v10353_v24 = vadd.f32 %v3974_v7, %v3966_v40 }
0x18b8   :  { %8074 = vtanh.f32 %v10353_v24 }
0x18b9   :  { %v2847_v45 = vpop.permute.xlu0 %2846  ;;  %8076 = vtanh.f32 %v10355_v31 }
0x18ba   :  { %2849 = vst.msk [vmem:[#allocation3 + $0x10] sm:$0xff] %vm36_vm0, %v2847_v45  ;;  %8078 = vpow2.f32 %v7434_v11 }
0x18bd   :  { %v3416_v52 = vpop.permute.xlu0 %3415 }
0x18be   :  { %3418 = vst.msk [vmem:[#allocation3 + $0x8] sm:$0xff] %vm36_vm0, %v3416_v52 }
0x18c1   :  { %v3523_v17 = vld [vmem:[#allocation3 + $0x10] sm:$0xff] }
0x18c2   :  { %3525 = vrot.lane.b32.xlu0 %v3523_v17, %s8237_s24 }
0x18c5   :  { %v8075_v8 = vpop.eup %8074  ;;  %v4092_v15 = vld [vmem:[#allocation3 + $0x8] sm:$0xff] }
0x18c6   :  { %4094 = vrot.lane.b32.xlu0 %v4092_v15, %s8237_s24  ;;  %3979 = vrot.lane.b32.xlu1 %v8075_v8, %s8237_s24  ;;  %v8077_v50 = vpop.eup %8076 }
0x18c7   :  { %v8079_v43 = vpop.eup %8078 }
0x18c8   :  { %v3955_v60 = vadd.f32 1.0, %v8079_v43 }
0x18ca   :  { %3530 = vrot.lane.b32.xlu1 %v8077_v50, %s8237_s24  ;;  %8080 = vrcp.f32 %v3955_v60  ;;  %v12058_v60 = vld [vmem:[#allocation9_spill] sm:$0xff] }
0x18d7   :  { %v8081_v13 = vpop.eup %8080 }
0x1934   :  { %v3526_v61 = vpop.permute.xlu0 %3525 }
0x1938   :  { %v3980_v48 = vpop.permute.xlu1 %3979  ;;  %v4095_v7 = vpop.permute.xlu0 %4094 }
0x1939   :  { %v3982_v34 = vmul.f32 %v8081_v13, %v3980_v48  ;;  %v12059_v13 = vld [vmem:[#allocation10_spill] sm:$0xff]  ;;  %v12060_v48 = vld [vmem:[#allocation11_spill] sm:$0xff] }
0x193b   :  { %3988 = vst.msk [vmem:[#allocation2] sm:$0xff] %vm36_vm0, %v3982_v34  ;;  %7435 = vmatmul.mubr.msk.f32.vlgmr.msra.gmra.mxu0 %vm36_vm0, %v3982_v34  ;;  %v12061_v34 = vld [vmem:[#allocation12_spill] sm:$0xff] }
0x193c   :  { %4304 = vmatpush1.msra.mxu0 %v10002_v19  ;;  %4351 = vmatprep.mubr.f32.mxu0 %v11972_v0  ;;  %v12053_v19 = vld [vmem:[#allocation22_spill] sm:$0xff] }
0x193d   :  { %4305 = vmatprep.subr.mxu0 %v10007_v21  ;;  %v12055_v21 = vld [vmem:[#allocation5_spill] sm:$0xff] }
0x193e   :  { %4306 = vmatpush1.msra.mxu0 %v10014_v62  ;;  %v12056_v62 = vld [vmem:[#allocation6_spill] sm:$0xff] }
0x193f   :  { %4307 = vmatprep.subr.mxu0 %v10020_v57  ;;  %v12057_v57 = vld [vmem:[#allocation8_spill] sm:$0xff] }
0x1940   :  { %4308 = vmatpush1.msra.mxu0 %v10027_v4 }
0x1941   :  { %4309 = vmatprep.subr.mxu0 %v10033_v26  ;;  %v7390_v26 = vmul.f32 -1.442695, %v10330_v6  ;;  %v10396_v6 = vld [vmem:[%s11902_s4] ss:$4 sm:$0x3] }
0x1942   :  { %4310 = vmatpush1.msra.mxu0 %v10039_v3  ;;  %v4255_v4 = vld [vmem:[#allocation2] sm:$0xff]  ;;  %v3684_v3 = vrot.slane %v10335_v12, %v8542_v47  ;;  %v4277_v12 = vrot.slane %v10396_v6, %v8529_v42 }
0x1943   :  { %4311 = vmatprep.subr.mxu0 %v10045_v9  ;;  %8082 = vpow2.f32 %v7390_v26  ;;  %v10472_v26 = vld [vmem:[%s11899_s3 + $0xd0] sm:$0xff] }
0x1944   :  { %4312 = vmatpush1.msra.mxu0 %v12051_v20  ;;  %v3759_v29 = vadd.f32 %v10343_v28, %v3684_v3  ;;  %v12062_v20 = vld [vmem:[#allocation13_spill] sm:$0xff]  ;;  %v10478_v3 = vld [vmem:[%s11899_s3 + $0xc8] sm:$0xff] }
0x1945   :  { %4313 = vmatprep.subr.mxu0 %v12052_v22  ;;  %v12064_v22 = vld [vmem:[#allocation15_spill] sm:$0xff] }
0x1946   :  { %4314 = vmatpush1.msra.mxu0 %v12053_v19  ;;  %v12065_v19 = vld [vmem:[#allocation16_spill] sm:$0xff] }
0x1947   :  { %4315 = vmatprep.subr.mxu0 %v12054_v30 }
0x1948   :  { %4316 = vmatpush1.msra.mxu0 %v12055_v21 }
0x1949   :  { %4317 = vmatprep.subr.mxu0 %v12056_v62 }
0x194a   :  { %4318 = vmatpush1.msra.mxu0 %v12057_v57  ;;  %v10447_v57 = vld [vmem:[%s11899_s3 + $0xf0] sm:$0xff] }
0x194b   :  { %7458 = vmatmul.mubr.msk.f32.vlgmr.msra.gmra.mxu0 %vm36_vm0, %v4255_v4  ;;  %v10465_v4 = vld [vmem:[%s11899_s3 + $0xd8] sm:$0xff] }
0x194c   :  { %4557 = vmatprep.mubr.f32.mxu0 %v11972_v0 }
0x1950   :  { %v8083_v41 = vpop.eup %8082 }
0x1951   :  { %v3516_v10 = vadd.f32 1.0, %v8083_v41  ;;  %v10490_v41 = vld [vmem:[%s11899_s3 + $0xb8] sm:$0xff] }
0x19fb   :  { %v4074_v9 = vpop.f32.mrf.mxu0 }
0x19fc   :  { %v4075_v36 = vadd.f32 %v4074_v9, %v10341_v1  ;;  %v3531_v1 = vpop.permute.xlu1 %3530  ;;  %v10484_v9 = vld [vmem:[%s11899_s3 + $0xc0] sm:$0xff] }
0x19fd   :  { %v4076_v14 = vpop.f32.mrf.mxu0 }
0x19fe   :  { %v10390_v16 = vadd.f32 %v4076_v14, %v3759_v29  ;;  %v7436_v38 = vmul.f32 -1.442695, %v4075_v36  ;;  %v10496_v29 = vld [vmem:[%s11899_s3 + $0xb0] sm:$0xff]  ;;  %v10502_v36 = vld [vmem:[%s11899_s3 + $0xa8] sm:$0xff]  ;;  %v10508_v14 = vld [vmem:[%s11899_s3 + $0xa0] sm:$0xff] }
0x1a00   :  { %8084 = vtanh.f32 %v10390_v16 }
0x1a01   :  { %8086 = vrcp.f32 %v3516_v10  ;;  %v10520_v10 = vld [vmem:[%s11899_s3 + $0x90] sm:$0xff] }
0x1a02   :  { %8088 = vpow2.f32 %v7436_v38  ;;  %v10553_v38 = vld [vmem:[%s11900_s1] sm:$0xff] }
0x1a0b   :  { %v4353_v18 = vpop.f32.mrf.mxu0 }
0x1a0c   :  { %v10400_v32 = vadd.f32 %v4353_v18, %v4277_v12  ;;  %v10526_v12 = vld [vmem:[%s11899_s3 + $0x88] sm:$0xff]  ;;  %v10532_v18 = vld [vmem:[%s11899_s3 + $0x80] sm:$0xff] }
0x1a0d   :  { %v8085_v28 = vpop.eup %8084 }
0x1a0e   :  { %4099 = vrot.lane.b32.xlu1 %v8085_v28, %s8237_s24  ;;  %v8087_v49 = vpop.eup %8086  ;;  %v4567_v28 = vld [vmem:[%s11900_s1 + $0x18] sm:$0x3] }
0x1a0f   :  { %v3533_v23 = vmul.f32 %v8087_v49, %v3531_v1  ;;  %v8089_v59 = vpop.eup %8088  ;;  %v3528_v35 = vmul.f32 %v8087_v49, %v3526_v61  ;;  %v4566_v1 = vld [vmem:[%s11900_s1 + $0x10] sm:$0x3] }
0x1a10   :  { %v4085_v53 = vadd.f32 1.0, %v8089_v59  ;;  %v7457_v59 = vld [vmem:[%s11901_s0 + $0x30] sm:$0xff] }
0x1a12   :  { %3535 = vrot.lane.b32.xlu1 %v3533_v23, %s8237_s24  ;;  %8090 = vrcp.f32 %v4085_v53  ;;  %v10546_v23 = vld [vmem:[%s11900_s1 + $0x8] sm:$0xff]  ;;  %v10567_v53 = vld [vmem:[%s11902_s4 + $0x2] ss:$4 sm:$0x3] }
0x1a13   :  { %v3783_v61 = vrot.slane %v10567_v53, %v8529_v42 }
0x1a1f   :  { %v8091_v54 = vpop.eup %8090 }
0x1a20   :  { %v4097_v51 = vmul.f32 %v8091_v54, %v4095_v7 }
0x1a80   :  { %v4100_v25 = vpop.permute.xlu1 %4099 }
0x1a81   :  { %v4102_v58 = vmul.f32 %v8091_v54, %v4100_v25 }
0x1a83   :  { %4104 = vrot.lane.b32.xlu1 %v4102_v58, %s8237_s24 }
0x1a84   :  { %v3536_v63 = vpop.permute.xlu1 %3535 }
0x1a85   :  { %v10405_v2 = vadd.f32 %v3536_v63, %v3528_v35 }
0x1a87   :  { %8092 = vtanh.f32 %v10405_v2 }
0x1a88   :  { %8094 = vpow2.f32 %v7391_v46 }
0x1a94   :  { %v8093_v5 = vpop.eup %8092 }
0x1a95   :  { %3541 = vrot.lane.b32.xlu0 %v8093_v5, %s8237_s24  ;;  %v8095_v40 = vpop.eup %8094  ;;  %v10576_v5 = vld [vmem:[%s11902_s4 + $0x1] ss:$4 sm:$0x3] }
0x1a96   :  { %v3517_v52 = vadd.f32 1.0, %v8095_v40  ;;  %v4380_v46 = vrot.slane %v10576_v5, %v8529_v42 }
0x1a99   :  { %3984 = vrot.lane.b32.xlu0 %v10353_v24, %s8237_s24 }
0x1af5   :  { %v4105_v45 = vpop.permute.xlu1 %4104 }
0x1af6   :  { %v10412_v17 = vadd.f32 %v4105_v45, %v4097_v51  ;;  %v4281_v51 = vrot.slane %v10396_v6, %v8542_v47 }
0x1af8   :  { %8096 = vtanh.f32 %v10412_v17 }
0x1af9   :  { %8098 = vrcp.f32 %v3517_v52  ;;  %v4355_v52 = vpop.f32.mrf.mxu0 }
0x1b05   :  { %v8097_v8 = vpop.eup %8096 }
0x1b06   :  { %4110 = vrot.lane.b32.xlu1 %v8097_v8, %s8237_s24  ;;  %v8099_v15 = vpop.eup %8098 }
0x1b07   :  { %v3542_v50 = vpop.permute.xlu0 %3541 }
0x1b08   :  { %v3544_v11 = vmul.f32 %v8099_v15, %v3542_v50  ;;  %v4356_v50 = vadd.f32 %v4355_v52, %v4281_v51 }
0x1b0a   :  { %3550 = vst.msk [vmem:[#allocation2 + $0x10] sm:$0xff] %vm36_vm0, %v3544_v11  ;;  %3552 = vst.msk [vmem:[#allocation4 + $0x20] sm:$0xff] %vm36_vm0, %v3544_v11 }
0x1b0b   :  { %v3985_v24 = vpop.permute.xlu0 %3984 }
0x1b0c   :  { %3987 = vst.msk [vmem:[#allocation3] sm:$0xff] %vm36_vm0, %v3985_v24 }
0x1b11   :  { %v3761_v31 = vld [vmem:[#allocation2 + $0x10] sm:$0xff] }
0x1b12   :  { %7429 = vmatmul.mubr.msk.f32.vlgmr.msra.gmra.mxu1 %vm36_vm0, %v3761_v31 }
0x1b13   :  { %v4661_v43 = vld [vmem:[#allocation3] sm:$0xff]  ;;  %4156 = vmatpush1.msra.mxu1 %v10182_v37  ;;  %4203 = vmatprep.mubr.f32.mxu1 %v11972_v0 }
0x1b14   :  { %4663 = vrot.lane.b32.xlu0 %v4661_v43, %s8237_s24  ;;  %4157 = vmatprep.subr.mxu1 %v10187_v33  ;;  %v12063_v37 = vld [vmem:[#allocation14_spill] sm:$0xff] }
0x1b15   :  { %4158 = vmatpush1.msra.mxu1 %v10193_v56  ;;  %v10438_v33 = vld [vmem:[%s11899_s3 + $0xf8] sm:$0xff]  ;;  %v7437_v56 = vmul.f32 -1.442695, %v10390_v16 }
0x1b16   :  { %4159 = vmatprep.subr.mxu1 %v10199_v44  ;;  %v10514_v16 = vld [vmem:[%s11899_s3 + $0x98] sm:$0xff] }
0x1b17   :  { %4160 = vmatpush1.msra.mxu1 %v12058_v60  ;;  %8100 = vpow2.f32 %v7437_v56  ;;  %v10633_v56 = vld [vmem:[%s11903_s2 + $0x48] sm:$0xff] }
0x1b18   :  { %4161 = vmatprep.subr.mxu1 %v12059_v13 }
0x1b19   :  { %4162 = vmatpush1.msra.mxu1 %v12060_v48 }
0x1b1a   :  { %4163 = vmatprep.subr.mxu1 %v12061_v34 }
0x1b1b   :  { %4164 = vmatpush1.msra.mxu1 %v12062_v20 }
0x1b1c   :  { %4165 = vmatprep.subr.mxu1 %v12063_v37  ;;  %v10602_v37 = vld [vmem:[%s11903_s2 + $0x70] sm:$0xff] }
0x1b1d   :  { %4166 = vmatpush1.msra.mxu1 %v12064_v22  ;;  %v10607_v22 = vld [vmem:[%s11903_s2 + $0x68] sm:$0xff] }
0x1b1e   :  { %4167 = vmatprep.subr.mxu1 %v12065_v19  ;;  %v10621_v19 = vld [vmem:[%s11903_s2 + $0x58] sm:$0xff] }
0x1b1f   :  { %4168 = vmatpush1.msra.mxu1 %v10255_v27 }
0x1b20   :  { %4169 = vmatprep.subr.mxu1 %v10261_v39  ;;  %v10452_v39 = vld [vmem:[%s11899_s3 + $0xe8] sm:$0xff] }
0x1b21   :  { %4170 = vmatpush1.msra.mxu1 %v10267_v55  ;;  %v10459_v55 = vld [vmem:[%s11899_s3 + $0xe0] sm:$0xff] }
0x1b22   :  { %4406 = vmatprep.subr.mxu1 %v10438_v33 }
0x1b24   :  { %v8101_v44 = vpop.eup %8100 }
0x1b25   :  { %v4086_v30 = vadd.f32 1.0, %v8101_v44  ;;  %v10639_v44 = vld [vmem:[%s11903_s2 + $0x40] sm:$0xff] }
0x1b27   :  { %8102 = vrcp.f32 %v4086_v30  ;;  %v10645_v30 = vld [vmem:[%s11903_s2 + $0x38] sm:$0xff] }
0x1b34   :  { %v8103_v21 = vpop.eup %8102 }
0x1b78   :  { %v4111_v62 = vpop.permute.xlu1 %4110 }
0x1b79   :  { %v4113_v27 = vmul.f32 %v8103_v21, %v4111_v62  ;;  %v10651_v21 = vld [vmem:[%s11903_s2 + $0x30] sm:$0xff]  ;;  %v10657_v62 = vld [vmem:[%s11903_s2 + $0x28] sm:$0xff] }
0x1b7b   :  { %4119 = vst.msk [vmem:[#allocation2 + $0x8] sm:$0xff] %vm36_vm0, %v4113_v27  ;;  %7454 = vmatmul.mubr.msk.f32.vlgmr.msra.gmra.mxu1 %vm36_vm0, %v4113_v27  ;;  %v3787_v27 = vrot.slane %v10567_v53, %v8542_v47  ;;  %v10683_v53 = vld [vmem:[%s11903_s2 + $0x8] sm:$0xff] }
0x1b7c   :  { %4407 = vmatpush1.msra.mxu1 %v10447_v57  ;;  %4454 = vmatprep.mubr.f32.mxu1 %v11972_v0 }
0x1b7d   :  { %4408 = vmatprep.subr.mxu1 %v10452_v39 }
0x1b7e   :  { %4409 = vmatpush1.msra.mxu1 %v10459_v55 }
0x1b7f   :  { %4410 = vmatprep.subr.mxu1 %v10465_v4 }
0x1b80   :  { %4411 = vmatpush1.msra.mxu1 %v10472_v26 }
0x1b81   :  { %4412 = vmatprep.subr.mxu1 %v10478_v3 }
0x1b82   :  { %4413 = vmatpush1.msra.mxu1 %v10484_v9  ;;  %v4358_v49 = vld [vmem:[#allocation2 + $0x8] sm:$0xff] }
0x1b83   :  { %4414 = vmatprep.subr.mxu1 %v10490_v41 }
0x1b84   :  { %4415 = vmatpush1.msra.mxu1 %v10496_v29 }
0x1b85   :  { %4416 = vmatprep.subr.mxu1 %v10502_v36 }
0x1b86   :  { %4417 = vmatpush1.msra.mxu1 %v10508_v14 }
0x1b87   :  { %4418 = vmatprep.subr.mxu1 %v10514_v16 }
0x1b88   :  { %4419 = vmatpush1.msra.mxu1 %v10520_v10 }
0x1b89   :  { %4420 = vmatprep.subr.mxu1 %v10526_v12 }
0x1b8a   :  { %4421 = vmatpush1.msra.mxu1 %v10532_v18 }
0x1b8b   :  { %7476 = vmatmul.mubr.msk.f32.vlgmr.msra.gmra.mxu1 %vm36_vm0, %v4358_v49  ;;  %7495 = vmatprep.subr.msk.mxu1 %vm368_vm1, %v4567_v28  ;;  %v4664_v28 = vpop.permute.xlu0 %4663  ;;  %v10667_v49 = vld [vmem:[%s11903_s2 + $0x20] sm:$0xff] }
0x1b8c   :  { %7496 = vmatpush1.msk.msra.mxu1 %vm368_vm1, %v4566_v1  ;;  %4641 = vmatprep.mubr.f32.mxu1 %v11972_v0 }
0x1b8d   :  { %4607 = vmatprep.subr.mxu1 %v10546_v23 }
0x1b8e   :  { %4608 = vmatpush1.msra.mxu1 %v10553_v38 }
0x1b8f   :  { %7497 = vmatmul.mubr.msk.f32.vlgmr.msra.gmra.mxu1 %vm364_vm2, %v7457_v59 }
0x1b90   :  { %4772 = vmatprep.mubr.f32.mxu1 %v11972_v0 }
0x1bd2   :  { %v3859_v54 = vpop.f32.mrf.mxu1 }
0x1bd3   :  { %v3860_v58 = vadd.f32 %v3859_v54, %v3783_v61  ;;  %v10673_v54 = vld [vmem:[%s11903_s2 + $0x18] sm:$0xff]  ;;  %v10678_v61 = vld [vmem:[%s11903_s2 + $0x10] sm:$0xff] }
0x1bd4   :  { %v3861_v25 = vpop.f32.mrf.mxu1 }
0x1c3b   :  { %v4205_v35 = vpop.f32.mrf.mxu1 }
0x1c3c   :  { %v10571_v63 = vadd.f32 %v4205_v35, %v3860_v58  ;;  %v3862_v58 = vadd.f32 %v3861_v25, %v3787_v27  ;;  %v4971_v25 = vld [vmem:[%s11899_s3 + $0x78] sm:$0xff] }
0x1c3d   :  { %v4207_v40 = vpop.f32.mrf.mxu1  ;;  %v4967_v27 = vld [vmem:[%s11899_s3 + $0x58] sm:$0xff] }
0x1c4b   :  { %v4456_v7 = vpop.f32.mrf.mxu1 }
0x1c4c   :  { %v10582_v45 = vadd.f32 %v4456_v7, %v4380_v46  ;;  %v10689_v46 = vadd.f32 %v4207_v40, %v3862_v58  ;;  %v10696_v7 = vld [vmem:[%s11903_s2] sm:$0xff]  ;;  %v4963_v58 = vld [vmem:[%s11899_s3 + $0x38] sm:$0xff] }
0x1c4d   :  { %v10584_v8 = vpop.f32.mrf.mxu1 }
0x1c4f   :  { %v4643_v15 = vpop.f32.mrf.mxu1 }
0x1c50   :  { %v4644_v11 = vadd.f32 %v4643_v15, %v10400_v32  ;;  %v10597_v32 = vld [vmem:[%s11903_s2 + $0x78] sm:$0xff] }
0x1c51   :  { %v4645_v24 = vpop.f32.mrf.mxu1  ;;  %4724 = vmatprep.subr.mxu1 %v10597_v32 }
0x1c52   :  { %v10587_v31 = vadd.f32 %v4645_v24, %v4356_v50  ;;  %v7498_v60 = vmul.f32 -1.442695, %v4644_v11  ;;  %4725 = vmatpush1.msra.mxu1 %v10602_v37 }
0x1c53   :  { %4726 = vmatprep.subr.mxu1 %v10607_v22 }
0x1c54   :  { %8104 = vtanh.f32 %v10587_v31  ;;  %v7499_v24 = vmul.f32 -1.442695, %v10587_v31  ;;  %v4968_v31 = vld [vmem:[%s11899_s3 + $0x60] sm:$0xff] }
0x1c55   :  { %8106 = vpow2.f32 %v7498_v60 }
0x1c61   :  { %v8105_v43 = vpop.eup %8104 }
0x1c62   :  { %4668 = vrot.lane.b32.xlu1 %v8105_v43, %s8237_s24  ;;  %v8107_v6 = vpop.eup %8106 }
0x1c63   :  { %v4654_v13 = vadd.f32 1.0, %v8107_v6 }
0x1c65   :  { %8108 = vrcp.f32 %v4654_v13 }
0x1c72   :  { %v8109_v48 = vpop.eup %8108 }
0x1c73   :  { %v4666_v1 = vmul.f32 %v8109_v48, %v4664_v28  ;;  %v4966_v28 = vld [vmem:[%s11899_s3 + $0x50] sm:$0xff] }
0x1cd4   :  { %v4669_v34 = vpop.permute.xlu1 %4668 }
0x1cd5   :  { %v4671_v20 = vmul.f32 %v8109_v48, %v4669_v34  ;;  %v4970_v34 = vld [vmem:[%s11899_s3 + $0x70] sm:$0xff] }
0x1cd7   :  { %4673 = vrot.lane.b32.xlu1 %v4671_v20, %s8237_s24  ;;  %v4969_v20 = vld [vmem:[%s11899_s3 + $0x68] sm:$0xff] }
0x1cdb   :  { %3546 = vrot.lane.b32.xlu1 %v10405_v2, %s8237_s24  ;;  %v10615_v2 = vld [vmem:[%s11903_s2 + $0x60] sm:$0xff] }
0x1cdc   :  { %4727 = vmatpush1.msra.mxu1 %v10615_v2 }
0x1cdd   :  { %4728 = vmatprep.subr.mxu1 %v10621_v19 }
0x1cdf   :  { %4115 = vrot.lane.b32.xlu1 %v10412_v17, %s8237_s24  ;;  %v10627_v17 = vld [vmem:[%s11903_s2 + $0x50] sm:$0xff] }
0x1ce0   :  { %4729 = vmatpush1.msra.mxu1 %v10627_v17 }
0x1ce1   :  { %4730 = vmatprep.subr.mxu1 %v10633_v56 }
0x1ce2   :  { %4731 = vmatpush1.msra.mxu1 %v10639_v44 }
0x1ce3   :  { %4732 = vmatprep.subr.mxu1 %v10645_v30 }
0x1ce4   :  { %4733 = vmatpush1.msra.mxu1 %v10651_v21 }
0x1ce5   :  { %4734 = vmatprep.subr.mxu1 %v10657_v62 }
0x1ce6   :  { %4735 = vmatpush1.msra.mxu1 %v10667_v49 }
0x1ce7   :  { %4736 = vmatprep.subr.mxu1 %v10673_v54 }
0x1ce8   :  { %4737 = vmatpush1.msra.mxu1 %v10678_v61 }
0x1ce9   :  { %4738 = vmatprep.subr.mxu1 %v10683_v53 }
0x1cea   :  { %4739 = vmatpush1.msra.mxu1 %v10696_v7 }
0x1ceb   :  { %5003 = vmatprep.subr.mxu1 %v4971_v25  ;;  %v4961_v25 = vld [vmem:[%s11899_s3 + $0x28] sm:$0xff] }
0x1d49   :  { %v4674_v59 = vpop.permute.xlu1 %4673 }
0x1d4a   :  { %v10685_v35 = vadd.f32 %v4674_v59, %v4666_v1  ;;  %v4965_v1 = vld [vmem:[%s11899_s3 + $0x48] sm:$0xff]  ;;  %v4964_v59 = vld [vmem:[%s11899_s3 + $0x40] sm:$0xff] }
0x1d4c   :  { %8110 = vtanh.f32 %v10685_v35 }
0x1d4d   :  { %v3547_v51 = vpop.permute.xlu1 %3546  ;;  %8112 = vtanh.f32 %v10689_v46 }
0x1d4e   :  { %3549 = vst.msk [vmem:[#allocation3 + $0x10] sm:$0xff] %vm36_vm0, %v3547_v51  ;;  %8114 = vpow2.f32 %v7499_v24  ;;  %v4962_v51 = vld [vmem:[%s11899_s3 + $0x30] sm:$0xff] }
0x1d51   :  { %v4116_v40 = vpop.permute.xlu1 %4115 }
0x1d52   :  { %4118 = vst.msk [vmem:[#allocation3 + $0x8] sm:$0xff] %vm36_vm0, %v4116_v40  ;;  %v4960_v40 = vld [vmem:[%s11899_s3 + $0x20] sm:$0xff] }
0x1d55   :  { %v4223_v52 = vld [vmem:[#allocation3 + $0x10] sm:$0xff] }
0x1d56   :  { %4225 = vrot.lane.b32.xlu1 %v4223_v52, %s8237_s24  ;;  %v4959_v52 = vld [vmem:[%s11899_s3 + $0x18] sm:$0xff] }
0x1d59   :  { %v8111_v15 = vpop.eup %8110  ;;  %v4792_v50 = vld [vmem:[#allocation3 + $0x8] sm:$0xff] }
0x1d5a   :  { %4794 = vrot.lane.b32.xlu1 %v4792_v50, %s8237_s24  ;;  %4679 = vrot.lane.b32.xlu0 %v8111_v15, %s8237_s24  ;;  %v8113_v11 = vpop.eup %8112  ;;  %v4958_v15 = vld [vmem:[%s11899_s3 + $0x10] sm:$0xff]  ;;  %v4957_v50 = vld [vmem:[%s11899_s3 + $0x8] sm:$0xff] }
0x1d5b   :  { %v8115_v43 = vpop.eup %8114 }
0x1d5c   :  { %v4655_v60 = vadd.f32 1.0, %v8115_v43  ;;  %v7455_v43 = vmul.f32 -1.442695, %v10571_v63  ;;  %v10771_v63 = vld [vmem:[%s11902_s4] ss:$4 sm:$0x3] }
0x1d5e   :  { %4230 = vrot.lane.b32.xlu0 %v8113_v11, %s8237_s24  ;;  %8116 = vrcp.f32 %v4655_v60  ;;  %v4956_v11 = vld [vmem:[%s11899_s3] sm:$0xff]  ;;  %v4384_v60 = vrot.slane %v10576_v5, %v8542_v47  ;;  %v4977_v5 = vrot.slane %v10771_v63, %v8529_v42 }
0x1d5f   :  { %8118 = vpow2.f32 %v7455_v43 }
0x1d6b   :  { %v8117_v6 = vpop.eup %8116 }
0x1dcc   :  { %v4680_v13 = vpop.permute.xlu0 %4679 }
0x1dcd   :  { %v4682_v48 = vmul.f32 %v8117_v6, %v4680_v13  ;;  %v8119_v13 = vpop.eup %8118 }
0x1dcf   :  { %4688 = vst.msk [vmem:[#allocation2] sm:$0xff] %vm36_vm0, %v4682_v48  ;;  %7500 = vmatmul.mubr.msk.f32.vlgmr.msra.gmra.mxu1 %vm36_vm0, %v4682_v48  ;;  %v4459_v48 = vadd.f32 %v10584_v8, %v4384_v60  ;;  %v4226_v60 = vpop.permute.xlu1 %4225 }
0x1dd0   :  { %5004 = vmatpush1.msra.mxu1 %v4970_v34  ;;  %5051 = vmatprep.mubr.f32.mxu1 %v11972_v0 }
0x1dd1   :  { %5005 = vmatprep.subr.mxu1 %v4969_v20 }
0x1dd2   :  { %5006 = vmatpush1.msra.mxu1 %v4968_v31 }
0x1dd3   :  { %5007 = vmatprep.subr.mxu1 %v4967_v27  ;;  %v4216_v27 = vadd.f32 1.0, %v8119_v13 }
0x1dd4   :  { %5008 = vmatpush1.msra.mxu1 %v4966_v28 }
0x1dd5   :  { %5009 = vmatprep.subr.mxu1 %v4965_v1 }
0x1dd6   :  { %5010 = vmatpush1.msra.mxu1 %v4964_v59  ;;  %v4955_v24 = vld [vmem:[#allocation2] sm:$0xff] }
0x1dd7   :  { %5011 = vmatprep.subr.mxu1 %v4963_v58 }
0x1dd8   :  { %5012 = vmatpush1.msra.mxu1 %v4962_v51 }
0x1dd9   :  { %5013 = vmatprep.subr.mxu1 %v4961_v25 }
0x1dda   :  { %5014 = vmatpush1.msra.mxu1 %v4960_v40 }
0x1ddb   :  { %5015 = vmatprep.subr.mxu1 %v4959_v52  ;;  %v7492_v52 = vld [vmem:[%s11899_s3 + $0x178] sm:$0xff] }
0x1ddc   :  { %5016 = vmatpush1.msra.mxu1 %v4958_v15  ;;  %v7491_v15 = vld [vmem:[%s11899_s3 + $0x170] sm:$0xff]  ;;  %4509 = vmatprep.subr.mxu0 %v7492_v52 }
0x1ddd   :  { %5017 = vmatprep.subr.mxu1 %v4957_v50  ;;  %v7490_v50 = vld [vmem:[%s11899_s3 + $0x168] sm:$0xff]  ;;  %4510 = vmatpush1.msra.mxu0 %v7491_v15 }
0x1dde   :  { %5018 = vmatpush1.msra.mxu1 %v4956_v11  ;;  %v7489_v11 = vld [vmem:[%s11899_s3 + $0x160] sm:$0xff]  ;;  %4511 = vmatprep.subr.mxu0 %v7490_v50 }
0x1ddf   :  { %7523 = vmatmul.mubr.msk.f32.vlgmr.msra.gmra.mxu1 %vm36_vm0, %v4955_v24  ;;  %5209 = vmatprep.subr.mxu1 %v7492_v52  ;;  %v7488_v24 = vld [vmem:[%s11899_s3 + $0x158] sm:$0xff]  ;;  %v7477_v52 = vld [vmem:[%s11899_s3 + $0x100] sm:$0xff] }
0x1de0   :  { %5257 = vmatprep.mubr.f32.mxu1 %v11972_v0  ;;  %5210 = vmatpush1.msra.mxu1 %v7491_v15 }
0x1de1   :  { %5211 = vmatprep.subr.mxu1 %v7490_v50  ;;  %4512 = vmatpush1.msra.mxu0 %v7489_v11  ;;  %v7518_v50 = vld [vmem:[%s11903_s2 + $0xf8] sm:$0xff] }
0x1de2   :  { %5212 = vmatpush1.msra.mxu1 %v7489_v11  ;;  %4513 = vmatprep.subr.mxu0 %v7488_v24  ;;  %v7456_v11 = vmul.f32 -1.442695, %v10689_v46  ;;  %v10848_v46 = vld [vmem:[%s11903_s2 + $0xf0] sm:$0xff] }
0x1de3   :  { %5213 = vmatprep.subr.mxu1 %v7488_v24 }
0x1e8f   :  { %v4774_v6 = vpop.f32.mrf.mxu1 }
0x1e90   :  { %v4775_v34 = vadd.f32 %v4774_v6, %v10582_v45  ;;  %v4231_v45 = vpop.permute.xlu0 %4230 }
0x1e91   :  { %v4776_v20 = vpop.f32.mrf.mxu1 }
0x1e92   :  { %v10765_v31 = vadd.f32 %v4776_v20, %v4459_v48  ;;  %v7501_v51 = vmul.f32 -1.442695, %v4775_v34 }
0x1e94   :  { %8120 = vtanh.f32 %v10765_v31 }
0x1e95   :  { %8122 = vrcp.f32 %v4216_v27  ;;  %v7487_v27 = vld [vmem:[%s11899_s3 + $0x150] sm:$0xff] }
0x1e96   :  { %8124 = vpow2.f32 %v7501_v51  ;;  %4514 = vmatpush1.msra.mxu0 %v7487_v27  ;;  %5214 = vmatpush1.msra.mxu1 %v7487_v27  ;;  %v7480_v51 = vld [vmem:[%s11899_s3 + $0x118] sm:$0xff] }
0x1e9f   :  { %v5053_v28 = vpop.f32.mrf.mxu1 }
0x1ea0   :  { %v10775_v1 = vadd.f32 %v5053_v28, %v4977_v5  ;;  %v7486_v5 = vld [vmem:[%s11899_s3 + $0x148] sm:$0xff]  ;;  %v7485_v28 = vld [vmem:[%s11899_s3 + $0x140] sm:$0xff] }
0x1ea1   :  { %v8121_v8 = vpop.eup %8120  ;;  %4515 = vmatprep.subr.mxu0 %v7486_v5  ;;  %5215 = vmatprep.subr.mxu1 %v7486_v5 }
0x1ea2   :  { %4799 = vrot.lane.b32.xlu0 %v8121_v8, %s8237_s24  ;;  %v8123_v59 = vpop.eup %8122  ;;  %4516 = vmatpush1.msra.mxu0 %v7485_v28  ;;  %v7484_v8 = vld [vmem:[%s11899_s3 + $0x138] sm:$0xff] }
0x1ea3   :  { %v4233_v58 = vmul.f32 %v8123_v59, %v4231_v45  ;;  %v8125_v25 = vpop.eup %8124  ;;  %v4228_v48 = vmul.f32 %v8123_v59, %v4226_v60  ;;  %5216 = vmatpush1.msra.mxu1 %v7485_v28  ;;  %4517 = vmatprep.subr.mxu0 %v7484_v8  ;;  %v7483_v45 = vld [vmem:[%s11899_s3 + $0x130] sm:$0xff]  ;;  %v7482_v59 = vld [vmem:[%s11899_s3 + $0x128] sm:$0xff]  ;;  %v4795_v60 = vpop.permute.xlu1 %4794 }
0x1ea4   :  { %v4785_v40 = vadd.f32 1.0, %v8125_v25  ;;  %5217 = vmatprep.subr.mxu1 %v7484_v8  ;;  %4518 = vmatpush1.msra.mxu0 %v7483_v45  ;;  %v7479_v25 = vld [vmem:[%s11899_s3 + $0x110] sm:$0xff] }
0x1ea5   :  { %5218 = vmatpush1.msra.mxu1 %v7483_v45  ;;  %4519 = vmatprep.subr.mxu0 %v7482_v59  ;;  %v10853_v45 = vld [vmem:[%s11903_s2 + $0xe8] sm:$0xff] }
0x1ea6   :  { %4235 = vrot.lane.b32.xlu0 %v4233_v58, %s8237_s24  ;;  %8126 = vrcp.f32 %v4785_v40  ;;  %v7481_v58 = vld [vmem:[%s11899_s3 + $0x120] sm:$0xff]  ;;  %5219 = vmatprep.subr.mxu1 %v7482_v59  ;;  %v7478_v40 = vld [vmem:[%s11899_s3 + $0x108] sm:$0xff] }
0x1ea7   :  { %4520 = vmatpush1.msra.mxu0 %v7481_v58  ;;  %5220 = vmatpush1.msra.mxu1 %v7481_v58  ;;  %v10859_v59 = vld [vmem:[%s11903_s2 + $0xe0] sm:$0xff] }
0x1ea8   :  { %4521 = vmatprep.subr.mxu0 %v7480_v51  ;;  %5221 = vmatprep.subr.mxu1 %v7480_v51  ;;  %v10865_v51 = vld [vmem:[%s11903_s2 + $0xd8] sm:$0xff] }
0x1ea9   :  { %4522 = vmatpush1.msra.mxu0 %v7479_v25  ;;  %5222 = vmatpush1.msra.mxu1 %v7479_v25  ;;  %v10873_v25 = vld [vmem:[%s11903_s2 + $0xd0] sm:$0xff] }
0x1eaa   :  { %4523 = vmatprep.subr.mxu0 %v7478_v40  ;;  %5223 = vmatprep.subr.mxu1 %v7478_v40  ;;  %v10879_v40 = vld [vmem:[%s11903_s2 + $0xc8] sm:$0xff] }
0x1eab   :  { %4524 = vmatpush1.msra.mxu0 %v7477_v52  ;;  %5224 = vmatpush1.msra.mxu1 %v7477_v52  ;;  %v10885_v52 = vld [vmem:[%s11903_s2 + $0xc0] sm:$0xff] }
0x1eac   :  { %4855 = vmatprep.subr.mxu0 %v7518_v50  ;;  %5555 = vmatprep.subr.mxu1 %v7518_v50  ;;  %v10897_v50 = vld [vmem:[%s11903_s2 + $0xb0] sm:$0xff] }
0x1eb3   :  { %v8127_v43 = vpop.eup %8126 }
0x1f14   :  { %v4800_v6 = vpop.permute.xlu0 %4799 }
0x1f15   :  { %v4802_v13 = vmul.f32 %v8127_v43, %v4800_v6  ;;  %v4797_v6 = vmul.f32 %v8127_v43, %v4795_v60  ;;  %v10915_v60 = vld [vmem:[%s11903_s2 + $0x98] sm:$0xff] }
0x1f17   :  { %4804 = vrot.lane.b32.xlu0 %v4802_v13, %s8237_s24 }
0x1f18   :  { %v4236_v34 = vpop.permute.xlu0 %4235 }
0x1f19   :  { %v10795_v20 = vadd.f32 %v4236_v34, %v4228_v48 }
0x1f1b   :  { %8128 = vtanh.f32 %v10795_v20 }
0x1f1c   :  { %8130 = vpow2.f32 %v7456_v11  ;;  %v10903_v11 = vld [vmem:[%s11903_s2 + $0xa8] sm:$0xff] }
0x1f28   :  { %v8129_v15 = vpop.eup %8128 }
0x1f29   :  { %4241 = vrot.lane.b32.xlu1 %v8129_v15, %s8237_s24  ;;  %v8131_v24 = vpop.eup %8130  ;;  %v10891_v15 = vld [vmem:[%s11903_s2 + $0xb8] sm:$0xff] }
0x1f2a   :  { %v4217_v48 = vadd.f32 1.0, %v8131_v24  ;;  %v10909_v24 = vld [vmem:[%s11903_s2 + $0xa0] sm:$0xff] }
0x1f2d   :  { %4684 = vrot.lane.b32.xlu1 %v10685_v35, %s8237_s24 }
0x1f89   :  { %v4805_v13 = vpop.permute.xlu0 %4804 }
0x1f8a   :  { %v10838_v34 = vadd.f32 %v4805_v13, %v4797_v6  ;;  %v10921_v6 = vld [vmem:[%s11903_s2 + $0x90] sm:$0xff]  ;;  %v10927_v13 = vld [vmem:[%s11903_s2 + $0x88] sm:$0xff] }
0x1f8c   :  { %8132 = vtanh.f32 %v10838_v34 }
0x1f8d   :  { %8134 = vrcp.f32 %v4217_v48  ;;  %v10933_v48 = vld [vmem:[%s11903_s2 + $0x80] sm:$0xff] }
0x1f99   :  { %v8133_v27 = vpop.eup %8132 }
0x1f9a   :  { %4810 = vrot.lane.b32.xlu0 %v8133_v27, %s8237_s24  ;;  %v8135_v5 = vpop.eup %8134  ;;  %v7502_v27 = vmul.f32 -1.442695, %v10765_v31 }
0x1f9b   :  { %v4242_v28 = vpop.permute.xlu1 %4241 }
0x1f9c   :  { %v4244_v8 = vmul.f32 %v8135_v5, %v4242_v28  ;;  %8136 = vpow2.f32 %v7502_v27 }
0x1f9e   :  { %4250 = vst.msk [vmem:[#allocation2 + $0x10] sm:$0xff] %vm36_vm0, %v4244_v8  ;;  %4252 = vst.msk [vmem:[#allocation4 + $0x28] sm:$0xff] %vm36_vm0, %v4244_v8 }
0x1f9f   :  { %v4685_v35 = vpop.permute.xlu1 %4684 }
0x1fa0   :  { %4687 = vst.msk [vmem:[#allocation3] sm:$0xff] %vm36_vm0, %v4685_v35 }
0x1fa5   :  { %v4461_v43 = vld [vmem:[#allocation2 + $0x10] sm:$0xff] }
0x1fa6   :  { %7494 = vmatmul.mubr.msk.f32.vlgmr.msra.gmra.mxu0 %vm36_vm0, %v4461_v43 }
0x1fa7   :  { %v5361_v58 = vld [vmem:[#allocation3] sm:$0xff]  ;;  %4856 = vmatpush1.msra.mxu0 %v10848_v46  ;;  %4903 = vmatprep.mubr.f32.mxu0 %v11972_v0 }
0x1fa8   :  { %5363 = vrot.lane.b32.xlu1 %v5361_v58, %s8237_s24  ;;  %4857 = vmatprep.subr.mxu0 %v10853_v45 }
0x1fa9   :  { %4858 = vmatpush1.msra.mxu0 %v10859_v59  ;;  %v8137_v5 = vpop.eup %8136 }
0x1faa   :  { %4859 = vmatprep.subr.mxu0 %v10865_v51  ;;  %v4786_v28 = vadd.f32 1.0, %v8137_v5 }
0x1fab   :  { %4860 = vmatpush1.msra.mxu0 %v10873_v25 }
0x1fac   :  { %4861 = vmatprep.subr.mxu0 %v10879_v40  ;;  %8138 = vrcp.f32 %v4786_v28 }
0x1fad   :  { %4862 = vmatpush1.msra.mxu0 %v10885_v52 }
0x1fae   :  { %4863 = vmatprep.subr.mxu0 %v10891_v15 }
0x1faf   :  { %4864 = vmatpush1.msra.mxu0 %v10897_v50 }
0x1fb0   :  { %4865 = vmatprep.subr.mxu0 %v10903_v11 }
0x1fb1   :  { %4866 = vmatpush1.msra.mxu0 %v10909_v24 }
0x1fb2   :  { %4867 = vmatprep.subr.mxu0 %v10915_v60 }
0x1fb3   :  { %4868 = vmatpush1.msra.mxu0 %v10921_v6 }
0x1fb4   :  { %4869 = vmatprep.subr.mxu0 %v10927_v13 }
0x1fb5   :  { %4870 = vmatpush1.msra.mxu0 %v10933_v48 }
0x1fb6   :  { %5106 = vmatprep.subr.mxu0 %v10438_v33  ;;  %v5267_v33 = vld [vmem:[%s11900_s1 + $0x18] sm:$0x3] }
0x1fb9   :  { %v8139_v8 = vpop.eup %8138 }
0x200c   :  { %v4811_v35 = vpop.permute.xlu0 %4810 }
0x200d   :  { %v4813_v43 = vmul.f32 %v8139_v8, %v4811_v35 }
0x200f   :  { %4819 = vst.msk [vmem:[#allocation2 + $0x8] sm:$0xff] %vm36_vm0, %v4813_v43  ;;  %7519 = vmatmul.mubr.msk.f32.vlgmr.msra.gmra.mxu0 %vm36_vm0, %v4813_v43 }
0x2010   :  { %5107 = vmatpush1.msra.mxu0 %v10447_v57  ;;  %5154 = vmatprep.mubr.f32.mxu0 %v11972_v0  ;;  %v5266_v57 = vld [vmem:[%s11900_s1 + $0x10] sm:$0x3] }
0x2011   :  { %5108 = vmatprep.subr.mxu0 %v10452_v39 }
0x2012   :  { %5109 = vmatpush1.msra.mxu0 %v10459_v55  ;;  %v7522_v55 = vld [vmem:[%s11901_s0 + $0x38] sm:$0xff] }
0x2013   :  { %5110 = vmatprep.subr.mxu0 %v10465_v4  ;;  %v7493_v4 = vld [vmem:[%s11902_s4 + $0x2] ss:$4 sm:$0x3] }
0x2014   :  { %5111 = vmatpush1.msra.mxu0 %v10472_v26 }
0x2015   :  { %5112 = vmatprep.subr.mxu0 %v10478_v3  ;;  %v4483_v3 = vrot.slane %v7493_v4, %v8529_v42 }
0x2016   :  { %5113 = vmatpush1.msra.mxu0 %v10484_v9  ;;  %v5058_v39 = vld [vmem:[#allocation2 + $0x8] sm:$0xff] }
0x2017   :  { %5114 = vmatprep.subr.mxu0 %v10490_v41 }
0x2018   :  { %5115 = vmatpush1.msra.mxu0 %v10496_v29 }
0x2019   :  { %5116 = vmatprep.subr.mxu0 %v10502_v36 }
0x201a   :  { %5117 = vmatpush1.msra.mxu0 %v10508_v14  ;;  %v11000_v14 = vld [vmem:[%s11902_s4 + $0x1] ss:$4 sm:$0x3] }
0x201b   :  { %5118 = vmatprep.subr.mxu0 %v10514_v16  ;;  %v5080_v16 = vrot.slane %v11000_v14, %v8529_v42 }
0x201c   :  { %5119 = vmatpush1.msra.mxu0 %v10520_v10 }
0x201d   :  { %5120 = vmatprep.subr.mxu0 %v10526_v12 }
0x201e   :  { %5121 = vmatpush1.msra.mxu0 %v10532_v18  ;;  %v4981_v18 = vrot.slane %v10771_v63, %v8542_v47 }
0x201f   :  { %7541 = vmatmul.mubr.msk.f32.vlgmr.msra.gmra.mxu0 %vm36_vm0, %v5058_v39  ;;  %7560 = vmatprep.subr.msk.mxu0 %vm368_vm1, %v5267_v33 }
0x2020   :  { %7561 = vmatpush1.msk.msra.mxu0 %vm368_vm1, %v5266_v57  ;;  %5341 = vmatprep.mubr.f32.mxu0 %v11972_v0 }
0x2021   :  { %5307 = vmatprep.subr.mxu0 %v10546_v23 }
0x2022   :  { %5308 = vmatpush1.msra.mxu0 %v10553_v38  ;;  %v5055_v38 = vpop.f32.mrf.mxu1 }
0x2023   :  { %7562 = vmatmul.mubr.msk.f32.vlgmr.msra.gmra.mxu0 %vm364_vm2, %v7522_v55  ;;  %5424 = vmatprep.subr.mxu0 %v10597_v32 }
0x2024   :  { %5425 = vmatpush1.msra.mxu0 %v10602_v37  ;;  %5472 = vmatprep.mubr.f32.mxu0 %v11972_v0 }
0x2025   :  { %5426 = vmatprep.subr.mxu0 %v10607_v22  ;;  %v5056_v22 = vadd.f32 %v5055_v38, %v4981_v18  ;;  %v5654_v18 = vld [vmem:[#allocation4 + $0x8] sm:$0xff]  ;;  %v5655_v38 = vld [vmem:[#allocation4 + $0x10] sm:$0xff] }
0x2026   :  { %5427 = vmatpush1.msra.mxu0 %v10615_v2 }
0x2027   :  { %5428 = vmatprep.subr.mxu0 %v10621_v19 }
0x2028   :  { %5429 = vmatpush1.msra.mxu0 %v10627_v17 }
0x2029   :  { %5430 = vmatprep.subr.mxu0 %v10633_v56 }
0x202a   :  { %5431 = vmatpush1.msra.mxu0 %v10639_v44 }
0x202b   :  { %5432 = vmatprep.subr.mxu0 %v10645_v30 }
0x202c   :  { %5433 = vmatpush1.msra.mxu0 %v10651_v21 }
0x202d   :  { %5434 = vmatprep.subr.mxu0 %v10657_v62 }
0x202e   :  { %5435 = vmatpush1.msra.mxu0 %v10667_v49 }
0x202f   :  { %5436 = vmatprep.subr.mxu0 %v10673_v54 }
0x2030   :  { %5437 = vmatpush1.msra.mxu0 %v10678_v61  ;;  %v4487_v61 = vrot.slane %v7493_v4, %v8542_v47 }
0x2031   :  { %5438 = vmatprep.subr.mxu0 %v10683_v53  ;;  %v5364_v53 = vpop.permute.xlu1 %5363 }
0x2032   :  { %5439 = vmatpush1.msra.mxu0 %v10696_v7 }
0x2066   :  { %v4559_v26 = vpop.f32.mrf.mxu0 }
0x2067   :  { %v4560_v41 = vadd.f32 %v4559_v26, %v4483_v3  ;;  %v5667_v26 = vld [vmem:[%s11904_s5 + $0x30] sm:$0xff] }
0x2068   :  { %v4561_v9 = vpop.f32.mrf.mxu0  ;;  %v5653_v3 = vld [vmem:[#allocation4] sm:$0xff] }
0x2069   :  { %v4562_v63 = vadd.f32 %v4561_v9, %v4487_v61  ;;  %v5666_v9 = vld [vmem:[%s11904_s5 + $0x28] sm:$0xff] }
0x20cf   :  { %v4905_v29 = vpop.f32.mrf.mxu0 }
0x20d0   :  { %v10995_v36 = vadd.f32 %v4905_v29, %v4560_v41  ;;  %v5665_v41 = vld [vmem:[%s11904_s5 + $0x20] sm:$0xff]  ;;  %v5664_v29 = vld [vmem:[%s11904_s5 + $0x18] sm:$0xff] }
0x20d1   :  { %v4907_v10 = vpop.f32.mrf.mxu0 }
0x20d2   :  { %v11020_v58 = vadd.f32 %v4907_v10, %v4562_v63  ;;  %v5662_v10 = vld [vmem:[%s11904_s5 + $0x8] sm:$0xff] }
0x20df   :  { %v5156_v12 = vpop.f32.mrf.mxu0 }
0x20e0   :  { %v11006_v23 = vadd.f32 %v5156_v12, %v5080_v16  ;;  %v5663_v16 = vld [vmem:[%s11904_s5 + $0x10] sm:$0xff]  ;;  %v5661_v12 = vld [vmem:[%s11904_s5] sm:$0xff] }
0x20e1   :  { %v11008_v32 = vpop.f32.mrf.mxu0 }
0x20e3   :  { %v5343_v37 = vpop.f32.mrf.mxu0 }
0x20e4   :  { %v5344_v2 = vadd.f32 %v5343_v37, %v10775_v1  ;;  %v5656_v37 = vld [vmem:[#allocation4 + $0x18] sm:$0xff] }
0x20e5   :  { %v5345_v19 = vpop.f32.mrf.mxu0 }
0x20e6   :  { %v5346_v17 = vadd.f32 %v5345_v19, %v5056_v22  ;;  %v7563_v44 = vmul.f32 -1.442695, %v5344_v2  ;;  %v5657_v22 = vld [vmem:[#allocation4 + $0x20] sm:$0xff]  ;;  %v5658_v2 = vld [vmem:[#allocation4 + $0x28] sm:$0xff]  ;;  %v7520_v19 = vmul.f32 -1.442695, %v10995_v36 }
0x20e8   :  { %8140 = vtanh.f32 %v5346_v17  ;;  %v7564_v43 = vmul.f32 -1.442695, %v5346_v17  ;;  %v5084_v17 = vrot.slane %v11000_v14, %v8542_v47 }
0x20e9   :  { %8142 = vpow2.f32 %v7563_v44 }
0x20f5   :  { %v8141_v56 = vpop.eup %8140 }
0x20f6   :  { %5368 = vrot.lane.b32.xlu0 %v8141_v56, %s8237_s24  ;;  %v8143_v30 = vpop.eup %8142 }
0x20f7   :  { %v5354_v21 = vadd.f32 1.0, %v8143_v30  ;;  %v5159_v30 = vadd.f32 %v11008_v32, %v5084_v17  ;;  %v7596_v17 = vld [vmem:[%s11904_s5 + $0x40] sm:$0xff] }
0x20f9   :  { %8144 = vrcp.f32 %v5354_v21 }
0x2106   :  { %v8145_v62 = vpop.eup %8144 }
0x2107   :  { %v5366_v7 = vmul.f32 %v8145_v62, %v5364_v53 }
0x2168   :  { %v5369_v49 = vpop.permute.xlu0 %5368 }
0x2169   :  { %v5371_v54 = vmul.f32 %v8145_v62, %v5369_v49 }
0x216b   :  { %5373 = vrot.lane.b32.xlu0 %v5371_v54, %s8237_s24 }
0x216f   :  { %4246 = vrot.lane.b32.xlu0 %v10795_v20, %s8237_s24  ;;  %v5668_v20 = vld [vmem:[%s11904_s5 + $0x38] sm:$0xff] }
0x2170   :  { %7736 = vmatprep.subr.mxu0 %v5668_v20 }
0x2173   :  { %4815 = vrot.lane.b32.xlu0 %v10838_v34, %s8237_s24 }
0x21dd   :  { %v5374_v31 = vpop.permute.xlu0 %5373 }
0x21de   :  { %v11018_v1 = vadd.f32 %v5374_v31, %v5366_v7 }
0x21e0   :  { %8146 = vtanh.f32 %v11018_v1 }
0x21e1   :  { %v4247_v27 = vpop.permute.xlu0 %4246  ;;  %8148 = vtanh.f32 %v11020_v58 }
0x21e2   :  { %4249 = vst.msk [vmem:[#allocation3 + $0x10] sm:$0xff] %vm36_vm0, %v4247_v27  ;;  %8150 = vpow2.f32 %v7564_v43 }
0x21e5   :  { %v4816_v34 = vpop.permute.xlu0 %4815 }
0x21e6   :  { %4818 = vst.msk [vmem:[#allocation3 + $0x8] sm:$0xff] %vm36_vm0, %v4816_v34 }
0x21e9   :  { %v4923_v5 = vld [vmem:[#allocation3 + $0x10] sm:$0xff] }
0x21ea   :  { %4925 = vrot.lane.b32.xlu0 %v4923_v5, %s8237_s24 }
0x21ed   :  { %v8147_v28 = vpop.eup %8146  ;;  %v5492_v8 = vld [vmem:[#allocation3 + $0x8] sm:$0xff] }
0x21ee   :  { %5494 = vrot.lane.b32.xlu0 %v5492_v8, %s8237_s24  ;;  %5379 = vrot.lane.b32.xlu1 %v8147_v28, %s8237_s24  ;;  %v8149_v35 = vpop.eup %8148 }
0x21ef   :  { %v8151_v33 = vpop.eup %8150 }
0x21f0   :  { %v5355_v57 = vadd.f32 1.0, %v8151_v33 }
0x21f2   :  { %4930 = vrot.lane.b32.xlu1 %v8149_v35, %s8237_s24  ;;  %8152 = vrcp.f32 %v5355_v57  ;;  %v7521_v35 = vmul.f32 -1.442695, %v11020_v58 }
0x21f3   :  { %8154 = vpow2.f32 %v7520_v19 }
0x21ff   :  { %v8153_v39 = vpop.eup %8152 }
0x2200   :  { %v8155_v44 = vpop.eup %8154 }
0x2201   :  { %v4916_v54 = vadd.f32 1.0, %v8155_v44 }
0x225c   :  { %v4926_v63 = vpop.permute.xlu0 %4925 }
0x2260   :  { %v5380_v55 = vpop.permute.xlu1 %5379  ;;  %v5495_v33 = vpop.permute.xlu0 %5494 }
0x2261   :  { %v5382_v4 = vmul.f32 %v8153_v39, %v5380_v55 }
0x2263   :  { %5388 = vst.msk [vmem:[#allocation2] sm:$0xff] %vm36_vm0, %v5382_v4  ;;  %7565 = vmatmul.mubr.msk.f32.vlgmr.msra.gmra.mxu0 %vm36_vm0, %v5382_v4 }
0x2264   :  { %7737 = vmatpush3.msra.mxu0 %v5668_v20  ;;  %7752 = vmatprep.mubr.msk.f32.mxu0 %vm36_vm0, %v5653_v3  ;;  %v4931_v53 = vpop.permute.xlu1 %4930 }
0x2265   :  { %7738 = vmatprep.subr.mxu0 %v5667_v26 }
0x2266   :  { %7739 = vmatpush3.msra.mxu0 %v5667_v26 }
0x2267   :  { %7740 = vmatprep.subr.mxu0 %v5666_v9 }
0x2268   :  { %7741 = vmatpush3.msra.mxu0 %v5666_v9 }
0x2269   :  { %7742 = vmatprep.subr.mxu0 %v5665_v41 }
0x226a   :  { %7743 = vmatpush3.msra.mxu0 %v5665_v41 }
0x226b   :  { %7744 = vmatprep.subr.mxu0 %v5664_v29 }
0x226c   :  { %7745 = vmatpush3.msra.mxu0 %v5664_v29 }
0x226d   :  { %7746 = vmatprep.subr.mxu0 %v5663_v16 }
0x226e   :  { %7747 = vmatpush3.msra.mxu0 %v5663_v16 }
0x226f   :  { %7748 = vmatprep.subr.mxu0 %v5662_v10 }
0x2270   :  { %7749 = vmatpush3.msra.mxu0 %v5662_v10 }
0x2271   :  { %7750 = vmatprep.subr.mxu0 %v5661_v12 }
0x2272   :  { %7751 = vmatpush3.msra.mxu0 %v5661_v12 }
0x2273   :  { %7753 = vmatmul.mubr.msk.f32.vlgmr.msra.gmra.mxu0 %vm36_vm0, %v5654_v18  ;;  %v7599_v18 = vld [vmem:[%s11904_s5 + $0x58] sm:$0xff] }
0x2274   :  { %7755 = vmatprep.mubr.msk.f32.mxu0 %vm36_vm0, %v5655_v38  ;;  %v7598_v38 = vld [vmem:[%s11904_s5 + $0x50] sm:$0xff] }
0x2277   :  { %7756 = vmatmul.mubr.msk.f32.gmra.mxu0 %vm36_vm0, %v5656_v37 }
0x2278   :  { %7758 = vmatprep.mubr.msk.f32.mxu0 %vm36_vm0, %v5657_v22  ;;  %v7597_v22 = vld [vmem:[%s11904_s5 + $0x48] sm:$0xff] }
0x227b   :  { %7759 = vmatmul.mubr.msk.f32.gmra.mxu0 %vm36_vm0, %v5658_v2 }
0x2323   :  { %v5474_v56 = vpop.f32.mrf.mxu0 }
0x2324   :  { %v5475_v21 = vadd.f32 %v5474_v56, %v11006_v23 }
0x2325   :  { %v5476_v62 = vpop.f32.mrf.mxu0 }
0x2326   :  { %v11067_v49 = vadd.f32 %v5476_v62, %v5159_v30  ;;  %v7566_v14 = vmul.f32 -1.442695, %v5475_v21 }
0x2328   :  { %8156 = vtanh.f32 %v11067_v49 }
0x2329   :  { %8158 = vrcp.f32 %v4916_v54 }
0x232a   :  { %8160 = vpow2.f32 %v7566_v14 }
0x2335   :  { %v8157_v61 = vpop.eup %8156 }
0x2336   :  { %5499 = vrot.lane.b32.xlu1 %v8157_v61, %s8237_s24  ;;  %v8159_v36 = vpop.eup %8158 }
0x2337   :  { %v4933_v7 = vmul.f32 %v8159_v36, %v4931_v53  ;;  %v8161_v32 = vpop.eup %8160  ;;  %v4928_v34 = vmul.f32 %v8159_v36, %v4926_v63  ;;  %v7558_v36 = vld [vmem:[%s11902_s4 + $0x2] ss:$4 sm:$0x3] }
0x2338   :  { %v5485_v31 = vadd.f32 1.0, %v8161_v32 }
0x233a   :  { %4935 = vrot.lane.b32.xlu1 %v4933_v7, %s8237_s24  ;;  %8162 = vrcp.f32 %v5485_v31  ;;  %v5183_v7 = vrot.slane %v7558_v36, %v8529_v42  ;;  %v5187_v31 = vrot.slane %v7558_v36, %v8542_v47  ;;  %v7620_v47 = vld [vmem:[%s11904_s5 + $0xb8] sm:$0xff]  ;;  %v7634_v36 = vld [vmem:[%s11904_s5 + $0xe0] sm:$0xff] }
0x233b   :  { %7792 = vmatprep.subr.mxu0 %v7620_v47 }
0x233c   :  { %7793 = vmatpush3.msra.mxu0 %v7620_v47 }
0x2347   :  { %v8163_v23 = vpop.eup %8162 }
0x2348   :  { %v5497_v57 = vmul.f32 %v8163_v23, %v5495_v33 }
0x23a8   :  { %v5500_v27 = vpop.permute.xlu1 %5499 }
0x23a9   :  { %v5502_v20 = vmul.f32 %v8163_v23, %v5500_v27 }
0x23ab   :  { %5504 = vrot.lane.b32.xlu1 %v5502_v20, %s8237_s24 }
0x23ac   :  { %v4936_v5 = vpop.permute.xlu1 %4935 }
0x23ad   :  { %v4938_v28 = vadd.f32 %v4936_v5, %v4928_v34 }
0x23af   :  { %8164 = vtanh.f32 %v4938_v28 }
0x23b0   :  { %8166 = vpow2.f32 %v7521_v35 }
0x23bc   :  { %v8165_v8 = vpop.eup %8164 }
0x23bd   :  { %4941 = vrot.lane.b32.xlu0 %v8165_v8, %s8237_s24  ;;  %v8167_v43 = vpop.eup %8166 }
0x23be   :  { %v4917_v55 = vadd.f32 1.0, %v8167_v43 }
0x23c1   :  { %4946 = vrot.lane.b32.xlu0 %v4938_v28, %s8237_s24 }
0x241d   :  { %v5505_v39 = vpop.permute.xlu1 %5504 }
0x241e   :  { %v11076_v4 = vadd.f32 %v5505_v39, %v5497_v57 }
0x2420   :  { %8168 = vtanh.f32 %v11076_v4 }
0x2421   :  { %8170 = vrcp.f32 %v4917_v55 }
0x242d   :  { %v8169_v26 = vpop.eup %8168 }
0x242e   :  { %5510 = vrot.lane.b32.xlu1 %v8169_v26, %s8237_s24  ;;  %v8171_v3 = vpop.eup %8170 }
0x242f   :  { %v4942_v9 = vpop.permute.xlu0 %4941 }
0x2430   :  { %v4944_v41 = vmul.f32 %v8171_v3, %v4942_v9  ;;  %v7619_v9 = vld [vmem:[%s11904_s5 + $0xb0] sm:$0xff] }
0x2431   :  { %7794 = vmatprep.subr.mxu0 %v7619_v9 }
0x2432   :  { %4950 = vst.msk [vmem:[#allocation2 + $0x10] sm:$0xff] %vm36_vm0, %v4944_v41  ;;  %4952 = vst.msk [vmem:[#allocation4 + $0x30] sm:$0xff] %vm36_vm0, %v4944_v41  ;;  %7795 = vmatpush3.msra.mxu0 %v7619_v9 }
0x2433   :  { %v4947_v58 = vpop.permute.xlu0 %4946 }
0x2434   :  { %4949 = vst.msk [vmem:[#allocation3 + $0x10] sm:$0xff] %vm36_vm0, %v4947_v58  ;;  %v7617_v58 = vld [vmem:[%s11904_s5 + $0xa0] sm:$0xff] }
0x2439   :  { %v5161_v29 = vld [vmem:[#allocation2 + $0x10] sm:$0xff]  ;;  %v5659_v16 = vld [vmem:[#allocation4 + $0x30] sm:$0xff] }
0x243a   :  { %7559 = vmatmul.mubr.msk.f32.vlgmr.msra.gmra.mxu1 %vm36_vm0, %v5161_v29  ;;  %7761 = vmatprep.mubr.msk.f32.mxu0 %vm36_vm0, %v5659_v16  ;;  %v7616_v29 = vld [vmem:[%s11904_s5 + $0x98] sm:$0xff]  ;;  %v7615_v16 = vld [vmem:[%s11904_s5 + $0x90] sm:$0xff] }
0x243b   :  { %v5623_v10 = vld [vmem:[#allocation3 + $0x10] sm:$0xff]  ;;  %5556 = vmatpush1.msra.mxu1 %v10848_v46  ;;  %5603 = vmatprep.mubr.f32.mxu1 %v11972_v0  ;;  %v7603_v0 = vld [vmem:[%s11904_s5 + $0x78] sm:$0xff]  ;;  %v7567_v46 = vmul.f32 -1.442695, %v11067_v49 }
0x243c   :  { %5625 = vrot.lane.b32.xlu0 %v5623_v10, %s8237_s24  ;;  %5557 = vmatprep.subr.mxu1 %v10853_v45  ;;  %v7614_v10 = vld [vmem:[%s11904_s5 + $0x88] sm:$0xff] }
0x243d   :  { %5558 = vmatpush1.msra.mxu1 %v10859_v59  ;;  %8172 = vpow2.f32 %v7567_v46 }
0x243e   :  { %5559 = vmatprep.subr.mxu1 %v10865_v51  ;;  %v7754_v51 = vpop.f32.mrf.mxu0 }
0x243f   :  { %5560 = vmatpush1.msra.mxu1 %v10873_v25 }
0x2440   :  { %5561 = vmatprep.subr.mxu1 %v10879_v40  ;;  %v5764_v25 = vpop.f32.mrf.mxu0  ;;  %v11109_v40 = vld [vmem:[%s11905_s6] ss:$0 sm:$0xff] }
0x2441   :  { %5562 = vmatpush1.msra.mxu1 %v10885_v52  ;;  %v5765_v52 = vadd.f32 %v11109_v40, %v5764_v25  ;;  %v5770_v2 = vadd.f32 %v7754_v51, %v11109_v40 }
0x2442   :  { %5563 = vmatprep.subr.mxu1 %v10891_v15 }
0x2443   :  { %5564 = vmatpush1.msra.mxu1 %v10897_v50  ;;  %v5804_v44 = vmax.f32 %v5770_v2, 0.0 }
0x2444   :  { %5565 = vmatprep.subr.mxu1 %v10903_v11 }
0x2445   :  { %5566 = vmatpush1.msra.mxu1 %v10909_v24  ;;  %v5803_v24 = vmax.f32 %v5765_v52, 0.0 }
0x2446   :  { %5567 = vmatprep.subr.mxu1 %v10915_v60  ;;  %v7602_v60 = vld [vmem:[%s11904_s5 + $0x70] sm:$0xff] }
0x2447   :  { %5568 = vmatpush1.msra.mxu1 %v10921_v6  ;;  %v7757_v6 = vpop.f32.mrf.mxu0 }
0x2448   :  { %5569 = vmatprep.subr.mxu1 %v10927_v13  ;;  %v7601_v13 = vld [vmem:[%s11904_s5 + $0x68] sm:$0xff]  ;;  %v5780_v30 = vadd.f32 %v7757_v6, %v11109_v40 }
0x2449   :  { %5570 = vmatpush1.msra.mxu1 %v10933_v48  ;;  %v7600_v48 = vld [vmem:[%s11904_s5 + $0x60] sm:$0xff]  ;;  %v5774_v12 = vpop.f32.mrf.mxu0 }
0x244a   :  { %7764 = vmatprep.subr.mxu1 %v7603_v0  ;;  %v8173_v45 = vpop.eup %8172  ;;  %v5775_v19 = vadd.f32 %v11109_v40, %v5774_v12  ;;  %v5806_v49 = vmax.f32 %v5780_v30, 0.0  ;;  %v11196_v12 = vld [vmem:[%s11905_s6 + $0x1] ss:$0 sm:$0xff] }
0x244b   :  { %v5486_v59 = vadd.f32 1.0, %v8173_v45  ;;  %v7760_v37 = vpop.f32.mrf.mxu0  ;;  %v7637_v45 = vld [vmem:[%s11904_s5 + $0xf8] sm:$0xff] }
0x244c   :  { %v5805_v21 = vmax.f32 %v5775_v19, 0.0  ;;  %v5790_v54 = vadd.f32 %v7760_v37, %v11109_v40 }
0x244d   :  { %8174 = vrcp.f32 %v5486_v59  ;;  %v5784_v56 = vpop.f32.mrf.mxu0  ;;  %v7636_v59 = vld [vmem:[%s11904_s5 + $0xf0] sm:$0xff] }
0x244e   :  { %v5785_v62 = vadd.f32 %v11109_v40, %v5784_v56  ;;  %v5808_v53 = vmax.f32 %v5790_v54, 0.0 }
0x2450   :  { %v5807_v61 = vmax.f32 %v5785_v62, 0.0 }
0x245a   :  { %v8175_v15 = vpop.eup %8174 }
0x24a0   :  { %v5511_v50 = vpop.permute.xlu1 %5510 }
0x24a1   :  { %v5513_v11 = vmul.f32 %v8175_v15, %v5511_v50 }
0x24a3   :  { %5519 = vst.msk [vmem:[#allocation2 + $0x8] sm:$0xff] %vm36_vm0, %v5513_v11  ;;  %7584 = vmatmul.mubr.msk.f32.vlgmr.msra.gmra.mxu1 %vm36_vm0, %v5513_v11 }
0x24a4   :  { %7765 = vmatpush3.msra.mxu1 %v7603_v0  ;;  %7780 = vmatprep.mubr.msk.f32.mxu1 %vm36_vm0, %v5803_v24  ;;  %v7613_v0 = vld [vmem:[%s11904_s5 + $0x80] sm:$0xff] }
0x24a5   :  { %7766 = vmatprep.subr.mxu1 %v7602_v60 }
0x24a6   :  { %7767 = vmatpush3.msra.mxu1 %v7602_v60 }
0x24a7   :  { %7768 = vmatprep.subr.mxu1 %v7601_v13 }
0x24a8   :  { %7769 = vmatpush3.msra.mxu1 %v7601_v13 }
0x24a9   :  { %7770 = vmatprep.subr.mxu1 %v7600_v48 }
0x24aa   :  { %7771 = vmatpush3.msra.mxu1 %v7600_v48 }
0x24ab   :  { %7772 = vmatprep.subr.mxu1 %v7599_v18 }
0x24ac   :  { %7773 = vmatpush3.msra.mxu1 %v7599_v18 }
0x24ad   :  { %7774 = vmatprep.subr.mxu1 %v7598_v38 }
0x24ae   :  { %7775 = vmatpush3.msra.mxu1 %v7598_v38  ;;  %v5626_v39 = vpop.permute.xlu0 %5625 }
0x24af   :  { %7776 = vmatprep.subr.mxu1 %v7597_v22 }
0x24b0   :  { %7777 = vmatpush3.msra.mxu1 %v7597_v22 }
0x24b1   :  { %7778 = vmatprep.subr.mxu1 %v7596_v17 }
0x24b2   :  { %7779 = vmatpush3.msra.mxu1 %v7596_v17 }
0x24b3   :  { %7781 = vmatmul.mubr.msk.f32.vlgmr.msra.gmra.mxu1 %vm36_vm0, %v5804_v44  ;;  %7820 = vmatprep.subr.mxu1 %v7637_v45 }
0x24b4   :  { %7783 = vmatprep.mubr.msk.f32.mxu1 %vm36_vm0, %v5805_v21  ;;  %7821 = vmatpush3.msra.mxu1 %v7637_v45  ;;  %v6268_v45 = vld [vmem:[%s11906_s7 + $0x20] sm:$0xff] }
0x24b5   :  { %7822 = vmatprep.subr.mxu1 %v7636_v59 }
0x24b6   :  { %7823 = vmatpush3.msra.mxu1 %v7636_v59  ;;  %v6267_v59 = vld [vmem:[%s11906_s7 + $0x18] sm:$0xff] }
0x24b7   :  { %7784 = vmatmul.mubr.msk.f32.gmra.mxu1 %vm36_vm0, %v5806_v49 }
0x24b8   :  { %7786 = vmatprep.mubr.msk.f32.mxu1 %vm36_vm0, %v5807_v61 }
0x24bb   :  { %7787 = vmatmul.mubr.msk.f32.gmra.mxu1 %vm36_vm0, %v5808_v53  ;;  %v7635_v53 = vld [vmem:[%s11904_s5 + $0xe8] sm:$0xff] }
0x24bc   :  { %7824 = vmatprep.subr.mxu1 %v7635_v53 }
0x24bd   :  { %7825 = vmatpush3.msra.mxu1 %v7635_v53 }
0x24be   :  { %7826 = vmatprep.subr.mxu1 %v7634_v36 }
0x24bf   :  { %7827 = vmatpush3.msra.mxu1 %v7634_v36  ;;  %v11344_v36 = vld [vmem:[%s11901_s0 + $0x38] sm:$0xff] }
0x24fa   :  { %v5259_v14 = vpop.f32.mrf.mxu1 }
0x24fb   :  { %v5260_v32 = vadd.f32 %v5259_v14, %v5183_v7  ;;  %v7633_v7 = vld [vmem:[%s11904_s5 + $0xd8] sm:$0xff]  ;;  %v7632_v14 = vld [vmem:[%s11904_s5 + $0xd0] sm:$0xff] }
0x24fc   :  { %v5261_v23 = vpop.f32.mrf.mxu1  ;;  %7828 = vmatprep.subr.mxu1 %v7633_v7 }
0x24fd   :  { %v5262_v27 = vadd.f32 %v5261_v23, %v5187_v31  ;;  %7829 = vmatpush3.msra.mxu1 %v7633_v7  ;;  %v7630_v31 = vld [vmem:[%s11904_s5 + $0xc0] sm:$0xff]  ;;  %v6271_v23 = vld [vmem:[%s11906_s7 + $0x38] sm:$0xff] }
0x24fe   :  { %7830 = vmatprep.subr.mxu1 %v7632_v14 }
0x24ff   :  { %7831 = vmatpush3.msra.mxu1 %v7632_v14 }
0x2563   :  { %v5605_v63 = vpop.f32.mrf.mxu1 }
0x2564   :  { %v5606_v20 = vadd.f32 %v5605_v63, %v5260_v32  ;;  %v7631_v32 = vld [vmem:[%s11904_s5 + $0xc8] sm:$0xff]  ;;  %v6270_v63 = vld [vmem:[%s11906_s7 + $0x30] sm:$0xff] }
0x2565   :  { %v5607_v34 = vpop.f32.mrf.mxu1  ;;  %7832 = vmatprep.subr.mxu1 %v7631_v32 }
0x2566   :  { %v5608_v5 = vadd.f32 %v5607_v34, %v5262_v27  ;;  %v7585_v8 = vmul.f32 -1.442695, %v5606_v20  ;;  %7833 = vmatpush3.msra.mxu1 %v7631_v32 }
0x2567   :  { %7834 = vmatprep.subr.mxu1 %v7630_v31 }
0x2568   :  { %8176 = vtanh.f32 %v5608_v5  ;;  %v7586_v51 = vmul.f32 -1.442695, %v5608_v5  ;;  %7835 = vmatpush3.msra.mxu1 %v7630_v31 }
0x2569   :  { %8178 = vpow2.f32 %v7585_v8  ;;  %7876 = vmatprep.subr.mxu1 %v6271_v23 }
0x2575   :  { %v8177_v28 = vpop.eup %8176 }
0x2576   :  { %5630 = vrot.lane.b32.xlu1 %v8177_v28, %s8237_s24  ;;  %v8179_v35 = vpop.eup %8178  ;;  %v11241_v28 = vld [vmem:[%s11905_s6 + $0x2] ss:$0 sm:$0xff] }
0x2577   :  { %v5616_v43 = vadd.f32 1.0, %v8179_v35 }
0x2579   :  { %8180 = vrcp.f32 %v5616_v43 }
0x2586   :  { %v8181_v42 = vpop.eup %8180 }
0x2587   :  { %v5628_v55 = vmul.f32 %v8181_v42, %v5626_v39 }
0x25e8   :  { %v5631_v33 = vpop.permute.xlu1 %5630 }
0x25e9   :  { %v5633_v57 = vmul.f32 %v8181_v42, %v5631_v33 }
0x25eb   :  { %5635 = vrot.lane.b32.xlu1 %v5633_v57, %s8237_s24 }
0x25ef   :  { %5384 = vrot.lane.b32.xlu1 %v11018_v1, %s8237_s24  ;;  %v7618_v1 = vld [vmem:[%s11904_s5 + $0xa8] sm:$0xff] }
0x25f0   :  { %7796 = vmatprep.subr.mxu0 %v7618_v1 }
0x25f1   :  { %7797 = vmatpush3.msra.mxu0 %v7618_v1 }
0x25f2   :  { %7798 = vmatprep.subr.mxu0 %v7617_v58 }
0x25f3   :  { %7799 = vmatpush3.msra.mxu0 %v7617_v58 }
0x25f4   :  { %7800 = vmatprep.subr.mxu0 %v7616_v29 }
0x25f5   :  { %7801 = vmatpush3.msra.mxu0 %v7616_v29 }
0x25f6   :  { %7802 = vmatprep.subr.mxu0 %v7615_v16 }
0x25f7   :  { %7803 = vmatpush3.msra.mxu0 %v7615_v16 }
0x25f8   :  { %7804 = vmatprep.subr.mxu0 %v7614_v10 }
0x25f9   :  { %7805 = vmatpush3.msra.mxu0 %v7614_v10 }
0x25fa   :  { %7806 = vmatprep.subr.mxu0 %v7613_v0 }
0x25fb   :  { %7807 = vmatpush3.msra.mxu0 %v7613_v0 }
0x25fc   :  { %7848 = vmatprep.subr.mxu0 %v6271_v23 }
0x265d   :  { %v5636_v26 = vpop.permute.xlu1 %5635 }
0x265e   :  { %v5638_v3 = vadd.f32 %v5636_v26, %v5628_v55 }
0x2660   :  { %8182 = vtanh.f32 %v5638_v3  ;;  %5646 = vrot.lane.b32.xlu1 %v5638_v3, %s8237_s24 }
0x2661   :  { %v5385_v41 = vpop.permute.xlu1 %5384  ;;  %8184 = vpow2.f32 %v7586_v51  ;;  %v6266_v51 = vld [vmem:[%s11906_s7 + $0x10] sm:$0xff] }
0x2662   :  { %5387 = vst.msk [vmem:[#allocation3] sm:$0xff] %vm36_vm0, %v5385_v41 }
0x266d   :  { %v8183_v46 = vpop.eup %8182 }
0x266e   :  { %5641 = vrot.lane.b32.xlu0 %v8183_v46, %s8237_s24  ;;  %v8185_v25 = vpop.eup %8184  ;;  %v6269_v46 = vld [vmem:[%s11906_s7 + $0x28] sm:$0xff] }
0x266f   :  { %v5617_v52 = vadd.f32 1.0, %v8185_v25  ;;  %v6265_v25 = vld [vmem:[%s11906_s7 + $0x8] sm:$0xff] }
0x2671   :  { %8186 = vrcp.f32 %v5617_v52  ;;  %v6264_v52 = vld [vmem:[%s11906_s7] sm:$0xff] }
0x2672   :  { %5515 = vrot.lane.b32.xlu0 %v11076_v4, %s8237_s24  ;;  %v7782_v4 = vpop.f32.mrf.mxu1  ;;  %s8242_s24 = smov 6  }
0x2673   :  { %v5921_v37 = vadd.f32 %v7782_v4, %v11196_v12  ;;  %v11283_v4 = vld [vmem:[%s11901_s0 + $0x8] sm:$0xff] }
0x2674   :  { %v5915_v50 = vpop.f32.mrf.mxu1  ;;  %6538 = vrot.lane.b32.xlu1 %v11283_v4, %s8238_s28 }
0x2675   :  { %v5916_v18 = vadd.f32 %v11196_v12, %v5915_v50  ;;  %v5955_v56 = vmax.f32 %v5921_v37, 0.0  ;;  %v11292_v50 = vld [vmem:[%s11901_s0 + $0x10] sm:$0xff]  ;;  %v11329_v37 = vld [vmem:[%s11905_s6 + $0x3] ss:$0 sm:$0xff] }
0x2676   :  { %v7785_v11 = vpop.f32.mrf.mxu1 }
0x2677   :  { %v5954_v22 = vmax.f32 %v5916_v18, 0.0  ;;  %v5931_v44 = vadd.f32 %v7785_v11, %v11196_v12  ;;  %v11297_v11 = vld [vmem:[%s11901_s0 + $0x18] sm:$0xff] }
0x2678   :  { %v5925_v13 = vpop.f32.mrf.mxu1  ;;  %6542 = vrot.lane.b32.xlu1 %v11297_v11, %s8238_s28 }
0x2679   :  { %v5926_v2 = vadd.f32 %v11196_v12, %v5925_v13  ;;  %v5957_v62 = vmax.f32 %v5931_v44, 0.0 }
0x267a   :  { %v7788_v38 = vpop.f32.mrf.mxu1 }
0x267b   :  { %v5956_v30 = vmax.f32 %v5926_v2, 0.0  ;;  %v5941_v49 = vadd.f32 %v7788_v38, %v11196_v12 }
0x267c   :  { %v5935_v17 = vpop.f32.mrf.mxu1 }
0x267d   :  { %v5936_v21 = vadd.f32 %v11196_v12, %v5935_v17  ;;  %v5959_v61 = vmax.f32 %v5941_v49, 0.0 }
0x267e   :  { %v8187_v24 = vpop.eup %8186 }
0x267f   :  { %v5958_v54 = vmax.f32 %v5936_v21, 0.0 }
0x26d2   :  { %v5647_v15 = vpop.permute.xlu1 %5646 }
0x26d3   :  { %5649 = vst.msk [vmem:[#allocation3 + $0x10] sm:$0xff] %vm36_vm0, %v5647_v15  ;;  %v11278_v15 = vld [vmem:[%s11901_s0] sm:$0xff] }
0x26d4   :  { %6536 = vrot.lane.b32.xlu0 %v11278_v15, %s8238_s28 }
0x26d8   :  { %6540 = vrot.lane.b32.xlu0 %v11292_v50, %s8238_s28 }
0x26e0   :  { %v5642_v60 = vpop.permute.xlu0 %5641 }
0x26e1   :  { %v5644_v6 = vmul.f32 %v8187_v24, %v5642_v60  ;;  %v11306_v24 = vld [vmem:[%s11901_s0 + $0x20] sm:$0xff]  ;;  %v11311_v60 = vld [vmem:[%s11901_s0 + $0x28] sm:$0xff] }
0x26e2   :  { %6544 = vrot.lane.b32.xlu0 %v11306_v24, %s8238_s28  ;;  %6546 = vrot.lane.b32.xlu1 %v11311_v60, %s8238_s28 }
0x26e3   :  { %5650 = vst.msk [vmem:[#allocation2 + $0x10] sm:$0xff] %vm36_vm0, %v5644_v6  ;;  %5652 = vst.msk [vmem:[#allocation4 + $0x38] sm:$0xff] %vm36_vm0, %v5644_v6  ;;  %v11320_v6 = vld [vmem:[%s11901_s0 + $0x30] sm:$0xff] }
0x26e4   :  { %v5516_v48 = vpop.permute.xlu0 %5515 }
0x26e5   :  { %5518 = vst.msk [vmem:[#allocation3 + $0x8] sm:$0xff] %vm36_vm0, %v5516_v48 }
0x26e6   :  { %6548 = vrot.lane.b32.xlu0 %v11320_v6, %s8238_s28  ;;  %6550 = vrot.lane.b32.xlu1 %v11344_v36, %s8238_s28 }
0x26ea   :  { %v5660_v19 = vld [vmem:[#allocation4 + $0x38] sm:$0xff]  ;;  %6656 = vrot.lane.b32.xlu0 %v11278_v15, %s8239_s17  ;;  %6658 = vrot.lane.b32.xlu1 %v11283_v4, %s8239_s17 }
0x26eb   :  { %7762 = vmatmul.mubr.msk.f32.gmra.mxu0 %vm36_vm0, %v5660_v19 }
0x26ec   :  { %7808 = vmatprep.mubr.msk.f32.mxu0 %vm36_vm0, %v5954_v22 }
0x26ee   :  { %6660 = vrot.lane.b32.xlu0 %v11292_v50, %s8239_s17 }
0x26ef   :  { %7809 = vmatmul.mubr.msk.f32.vlgmr.msra.gmra.mxu0 %vm36_vm0, %v5955_v56 }
0x26f0   :  { %7811 = vmatprep.mubr.msk.f32.mxu0 %vm36_vm0, %v5956_v30  ;;  %7849 = vmatpush3.msra.mxu0 %v6271_v23 }
0x26f1   :  { %7850 = vmatprep.subr.mxu0 %v6270_v63 }
0x26f2   :  { %7851 = vmatpush3.msra.mxu0 %v6270_v63 }
0x26f3   :  { %7812 = vmatmul.mubr.msk.f32.gmra.mxu0 %vm36_vm0, %v5957_v62  ;;  %7852 = vmatprep.subr.mxu0 %v6269_v46 }
0x26f4   :  { %7814 = vmatprep.mubr.msk.f32.mxu0 %vm36_vm0, %v5958_v54  ;;  %7853 = vmatpush3.msra.mxu0 %v6269_v46 }
0x26f5   :  { %7854 = vmatprep.subr.mxu0 %v6268_v45 }
0x26f6   :  { %7855 = vmatpush3.msra.mxu0 %v6268_v45 }
0x26f7   :  { %7815 = vmatmul.mubr.msk.f32.gmra.mxu0 %vm36_vm0, %v5959_v61  ;;  %7856 = vmatprep.subr.mxu0 %v6267_v59 }
0x26f8   :  { %7857 = vmatpush3.msra.mxu0 %v6267_v59 }
0x26f9   :  { %7858 = vmatprep.subr.mxu0 %v6266_v51 }
0x26fa   :  { %7859 = vmatpush3.msra.mxu0 %v6266_v51 }
0x26fb   :  { %7860 = vmatprep.subr.mxu0 %v6265_v25 }
0x26fc   :  { %7861 = vmatpush3.msra.mxu0 %v6265_v25 }
0x26fd   :  { %7862 = vmatprep.subr.mxu0 %v6264_v52 }
0x26fe   :  { %7863 = vmatpush3.msra.mxu0 %v6264_v52 }
0x27ab   :  { %v7763_v27 = vpop.f32.mrf.mxu0 }
0x27ac   :  { %v5800_v20 = vadd.f32 %v7763_v27, %v11109_v40 }
0x27ad   :  { %v5794_v34 = vpop.f32.mrf.mxu0 }
0x27ae   :  { %v5795_v5 = vadd.f32 %v11109_v40, %v5794_v34  ;;  %v5810_v43 = vmax.f32 %v5800_v20, 0.0 }
0x27af   :  { %v7810_v8 = vpop.f32.mrf.mxu0 }
0x27b0   :  { %v5809_v35 = vmax.f32 %v5795_v5, 0.0  ;;  %v6072_v42 = vadd.f32 %v7810_v8, %v11241_v28 }
0x27b1   :  { %v6066_v33 = vpop.f32.mrf.mxu0 }
0x27b2   :  { %v6067_v57 = vadd.f32 %v11241_v28, %v6066_v33  ;;  %7789 = vmatprep.mubr.msk.f32.mxu1 %vm36_vm0, %v5809_v35  ;;  %v6106_v40 = vmax.f32 %v6072_v42, 0.0 }
0x27b3   :  { %7790 = vmatmul.mubr.msk.f32.gmra.mxu1 %vm36_vm0, %v5810_v43  ;;  %v7813_v47 = vpop.f32.mrf.mxu0 }
0x27b4   :  { %v6105_v39 = vmax.f32 %v6067_v57, 0.0  ;;  %v6082_v55 = vadd.f32 %v7813_v47, %v11241_v28 }
0x27b5   :  { %v6076_v26 = vpop.f32.mrf.mxu0 }
0x27b6   :  { %v6077_v3 = vadd.f32 %v11241_v28, %v6076_v26  ;;  %7836 = vmatprep.mubr.msk.f32.mxu1 %vm36_vm0, %v6105_v39  ;;  %v6108_v1 = vmax.f32 %v6082_v55, 0.0 }
0x27b7   :  { %v7816_v9 = vpop.f32.mrf.mxu0  ;;  %7837 = vmatmul.mubr.msk.f32.vlgmr.msra.gmra.mxu1 %vm36_vm0, %v6106_v40 }
0x27b8   :  { %v6107_v41 = vmax.f32 %v6077_v3, 0.0  ;;  %7884 = vmatpush3.msra.mxu1 %v6271_v23  ;;  %v6092_v58 = vadd.f32 %v7816_v9, %v11241_v28 }
0x27b9   :  { %v6086_v29 = vpop.f32.mrf.mxu0  ;;  %7877 = vmatprep.subr.mxu1 %v6270_v63 }
0x27ba   :  { %v6087_v16 = vadd.f32 %v11241_v28, %v6086_v29  ;;  %7839 = vmatprep.mubr.msk.f32.mxu1 %vm36_vm0, %v6107_v41  ;;  %7885 = vmatpush3.msra.mxu1 %v6270_v63  ;;  %v6110_v0 = vmax.f32 %v6092_v58, 0.0  ;;  %v11358_v63 = vld [vmem:[%s11907_s8] ss:$0 sm:$0xff]  ;;  %s8240_s8 = smov 5   ;;  %v11401_v58 = vpop.permute.xlu1 %6538 }
0x27bb   :  { %7840 = vmatmul.mubr.msk.f32.gmra.mxu1 %vm36_vm0, %v6108_v1  ;;  %7878 = vmatprep.subr.mxu1 %v6269_v46  ;;  %v11399_v1 = vpop.permute.xlu0 %6536 }
0x27bc   :  { %v6109_v10 = vmax.f32 %v6087_v16, 0.0  ;;  %7886 = vmatpush3.msra.mxu1 %v6269_v46 }
0x27bd   :  { %7879 = vmatprep.subr.mxu1 %v6268_v45 }
0x27be   :  { %7842 = vmatprep.mubr.msk.f32.mxu1 %vm36_vm0, %v6109_v10  ;;  %7887 = vmatpush3.msra.mxu1 %v6268_v45  ;;  %v11405_v16 = vpop.permute.xlu1 %6542 }
0x27bf   :  { %7843 = vmatmul.mubr.msk.f32.gmra.mxu1 %vm36_vm0, %v6110_v0  ;;  %7880 = vmatprep.subr.mxu1 %v6267_v59  ;;  %v11403_v29 = vpop.permute.xlu0 %6540 }
0x27c0   :  { %7888 = vmatpush3.msra.mxu1 %v6267_v59 }
0x27c1   :  { %7881 = vmatprep.subr.mxu1 %v6266_v51 }
0x27c2   :  { %7889 = vmatpush3.msra.mxu1 %v6266_v51  ;;  %v11409_v0 = vpop.permute.xlu1 %6546 }
0x27c3   :  { %7882 = vmatprep.subr.mxu1 %v6265_v25  ;;  %v11407_v10 = vpop.permute.xlu0 %6544 }
0x27c4   :  { %7890 = vmatpush3.msra.mxu1 %v6265_v25 }
0x27c5   :  { %7883 = vmatprep.subr.mxu1 %v6264_v52 }
0x27c6   :  { %7891 = vmatpush3.msra.mxu1 %v6264_v52  ;;  %v11413_v45 = vpop.permute.xlu1 %6550 }
0x27c7   :  { %v11411_v46 = vpop.permute.xlu0 %6548 }
0x27c8   :  { %12070 = vst [vmem:[#allocation21_spill] sm:$0xff] %v11411_v46 }
0x27ca   :  { %v11417_v51 = vpop.permute.xlu1 %6658 }
0x27cb   :  { %v11415_v59 = vpop.permute.xlu0 %6656 }
0x27cf   :  { %v11419_v25 = vpop.permute.xlu0 %6660 }
0x2873   :  { %v7791_v13 = vpop.f32.mrf.mxu1 }
0x2874   :  { %v5951_v48 = vadd.f32 %v7791_v13, %v11196_v12 }
0x2875   :  { %v5945_v18 = vpop.f32.mrf.mxu1 }
0x2876   :  { %v5946_v38 = vadd.f32 %v11196_v12, %v5945_v18  ;;  %v5961_v19 = vmax.f32 %v5951_v48, 0.0 }
0x2877   :  { %v7838_v22 = vpop.f32.mrf.mxu1 }
0x2878   :  { %v5960_v2 = vmax.f32 %v5946_v38, 0.0  ;;  %v6223_v17 = vadd.f32 %v7838_v22, %v11329_v37 }
0x2879   :  { %v6217_v56 = vpop.f32.mrf.mxu1 }
0x287a   :  { %v6218_v44 = vadd.f32 %v11329_v37, %v6217_v56  ;;  %7817 = vmatprep.mubr.msk.f32.mxu0 %vm36_vm0, %v5960_v2  ;;  %v6257_v12 = vmax.f32 %v6223_v17, 0.0 }
0x287b   :  { %7818 = vmatmul.mubr.msk.f32.gmra.mxu0 %vm36_vm0, %v5961_v19  ;;  %v7841_v30 = vpop.f32.mrf.mxu1 }
0x287c   :  { %v6256_v21 = vmax.f32 %v6218_v44, 0.0  ;;  %v6233_v62 = vadd.f32 %v7841_v30, %v11329_v37 }
0x287d   :  { %v6227_v49 = vpop.f32.mrf.mxu1 }
0x287e   :  { %v6228_v54 = vadd.f32 %v11329_v37, %v6227_v49  ;;  %7864 = vmatprep.mubr.msk.f32.mxu0 %vm36_vm0, %v6256_v21  ;;  %v6259_v53 = vmax.f32 %v6233_v62, 0.0 }
0x287f   :  { %7865 = vmatmul.mubr.msk.f32.vlgmr.msra.gmra.mxu0 %vm36_vm0, %v6257_v12  ;;  %v7844_v7 = vpop.f32.mrf.mxu1 }
0x2880   :  { %v6258_v61 = vmax.f32 %v6228_v54, 0.0  ;;  %v6243_v35 = vadd.f32 %v7844_v7, %v11329_v37 }
0x2881   :  { %v6237_v14 = vpop.f32.mrf.mxu1 }
0x2882   :  { %7867 = vmatprep.mubr.msk.f32.mxu0 %vm36_vm0, %v6258_v61  ;;  %v6238_v27 = vadd.f32 %v11329_v37, %v6237_v14  ;;  %v6261_v39 = vmax.f32 %v6243_v35, 0.0 }
0x2883   :  { %7868 = vmatmul.mubr.msk.f32.gmra.mxu0 %vm36_vm0, %v6259_v53 }
0x2884   :  { %v6260_v33 = vmax.f32 %v6238_v27, 0.0 }
0x293b   :  { %v7819_v32 = vpop.f32.mrf.mxu0 }
0x293c   :  { %v6102_v31 = vadd.f32 %v7819_v32, %v11241_v28 }
0x293d   :  { %v6096_v23 = vpop.f32.mrf.mxu0 }
0x293e   :  { %v6097_v20 = vadd.f32 %v11241_v28, %v6096_v23  ;;  %v6112_v43 = vmax.f32 %v6102_v31, 0.0 }
0x293f   :  { %v7866_v34 = vpop.f32.mrf.mxu0 }
0x2940   :  { %v6111_v5 = vmax.f32 %v6097_v20, 0.0  ;;  %v11363_v8 = vadd.f32 %v7866_v34, %v11358_v63 }
0x2941   :  { %v6369_v42 = vpop.f32.mrf.mxu0 }
0x2942   :  { %12066 = vst [vmem:[#allocation17_spill] sm:$0xff] %v11363_v8  ;;  %v6417_v57 = vmul.f32 0.1, %v11363_v8  ;;  %v11368_v47 = vadd.f32 %v11358_v63, %v6369_v42  ;;  %7845 = vmatprep.mubr.msk.f32.mxu1 %vm36_vm0, %v6111_v5 }
0x2943   :  { %7846 = vmatmul.mubr.msk.f32.gmra.mxu1 %vm36_vm0, %v6112_v43  ;;  %v7869_v40 = vpop.f32.mrf.mxu0 }
0x2944   :  { %12067 = vst [vmem:[#allocation18_spill] sm:$0xff] %v11368_v47  ;;  %v6416_v28 = vmul.f32 0.1, %v11368_v47  ;;  %6434 = vrot.lane.b32.xlu1 %v6417_v57, %s8240_s8  ;;  %7870 = vmatprep.mubr.msk.f32.mxu1 %vm36_vm0, %v6260_v33  ;;  %v11381_v26 = vadd.f32 %v7869_v40, %v11358_v63 }
0x2945   :  { %v6379_v55 = vpop.f32.mrf.mxu0 }
0x2946   :  { %6432 = vrot.lane.b32.xlu0 %v6416_v28, %s8240_s8  ;;  %12068 = vst [vmem:[#allocation19_spill] sm:$0xff] %v11381_v26  ;;  %v11385_v3 = vadd.f32 %v11358_v63, %v6379_v55  ;;  %v6419_v9 = vmul.f32 0.1, %v11381_v26 }
0x2947   :  { %7871 = vmatmul.mubr.msk.f32.vlgmr.msra.gmra.mxu1 %vm36_vm0, %v6261_v39 }
0x2948   :  { %6466 = vrot.lane.b32.xlu1 %v6417_v57, %s8241_s19  ;;  %12069 = vst [vmem:[#allocation20_spill] sm:$0xff] %v11385_v3  ;;  %v6418_v41 = vmul.f32 0.1, %v11385_v3 }
0x294a   :  { %6464 = vrot.lane.b32.xlu0 %v6416_v28, %s8241_s19 }
0x294c   :  { %6498 = vrot.lane.b32.xlu1 %v6417_v57, %s8242_s24 }
0x294e   :  { %6496 = vrot.lane.b32.xlu0 %v6416_v28, %s8242_s24 }
0x2950   :  { %6570 = vrot.lane.b32.xlu1 %v6417_v57, %s8243_s20 }
0x2952   :  { %6568 = vrot.lane.b32.xlu0 %v6416_v28, %s8243_s20 }
0x2954   :  { %6438 = vrot.lane.b32.xlu1 %v6419_v9, %s8240_s8 }
0x2956   :  { %6436 = vrot.lane.b32.xlu0 %v6418_v41, %s8240_s8 }
0x2958   :  { %6470 = vrot.lane.b32.xlu1 %v6419_v9, %s8241_s19 }
0x295a   :  { %6468 = vrot.lane.b32.xlu0 %v6418_v41, %s8241_s19 }
0x295c   :  { %6502 = vrot.lane.b32.xlu1 %v6419_v9, %s8242_s24 }
0x295e   :  { %6500 = vrot.lane.b32.xlu0 %v6418_v41, %s8242_s24 }
0x2960   :  { %6574 = vrot.lane.b32.xlu1 %v6419_v9, %s8243_s20 }
0x2962   :  { %6572 = vrot.lane.b32.xlu0 %v6418_v41, %s8243_s20 }
0x29b6   :  { %v11421_v52 = vpop.permute.xlu1 %6434 }
0x29b7   :  { %v6457_v48 = vsub.f32 %v11283_v4, %v11421_v52 }
0x29b8   :  { %v11423_v13 = vpop.permute.xlu0 %6432 }
0x29b9   :  { %v6456_v38 = vsub.f32 %v11278_v15, %v11423_v13 }
0x29ba   :  { %v6467_v18 = vpop.permute.xlu1 %6466 }
0x29bb   :  { %v11429_v22 = vsub.f32 %v6457_v48, %v6467_v18 }
0x29bc   :  { %v6465_v2 = vpop.permute.xlu0 %6464 }
0x29bd   :  { %v6601_v19 = vadd.f32 1e-06, %v11429_v22  ;;  %v11432_v17 = vsub.f32 %v6456_v38, %v6465_v2 }
0x29be   :  { %v11434_v56 = vpop.permute.xlu1 %6498 }
0x29bf   :  { %6618 = vrot.lane.b32.xlu1 %v6601_v19, %s8238_s28  ;;  %6698 = vrot.lane.b32.xlu0 %v6601_v19, %s8239_s17  ;;  %v6600_v30 = vadd.f32 1e-06, %v11432_v17 }
0x29c0   :  { %v11438_v44 = vpop.permute.xlu0 %6496 }
0x29c2   :  { %v11441_v21 = vpop.permute.xlu1 %6570 }
0x29c3   :  { %6696 = vrot.lane.b32.xlu1 %v6600_v30, %s8239_s17  ;;  %6616 = vrot.lane.b32.xlu0 %v6600_v30, %s8238_s28 }
0x29c4   :  { %v11445_v12 = vpop.permute.xlu0 %6568 }
0x29c6   :  { %v11447_v62 = vpop.permute.xlu1 %6438 }
0x29c7   :  { %v6459_v54 = vsub.f32 %v11297_v11, %v11447_v62 }
0x29c8   :  { %v11449_v49 = vpop.permute.xlu0 %6436 }
0x29c9   :  { %v6458_v7 = vsub.f32 %v11292_v50, %v11449_v49 }
0x29ca   :  { %v6471_v61 = vpop.permute.xlu1 %6470 }
0x29cb   :  { %v11453_v53 = vsub.f32 %v6459_v54, %v6471_v61 }
0x29cc   :  { %v6469_v14 = vpop.permute.xlu0 %6468 }
0x29cd   :  { %v11458_v32 = vadd.f32 1e-06, %v11453_v53  ;;  %v11460_v31 = vsub.f32 %v6458_v7, %v6469_v14 }
0x29cf   :  { %v6602_v23 = vadd.f32 1e-06, %v11460_v31  ;;  %6622 = vrot.lane.b32.xlu1 %v11458_v32, %s8238_s28 }
0x29d0   :  { %v6501_v9 = vpop.permute.xlu0 %6500 }
0x29d1   :  { %6620 = vrot.lane.b32.xlu0 %v6602_v23, %s8238_s28 }
0x29d3   :  { %6700 = vrot.lane.b32.xlu1 %v6602_v23, %s8239_s17 }
0x29d4   :  { %v11491_v48 = vpop.permute.xlu0 %6572 }
0x2a03   :  { %v7847_v27 = vpop.f32.mrf.mxu1 }
0x2a04   :  { %v6253_v20 = vadd.f32 %v7847_v27, %v11329_v37 }
0x2a05   :  { %v6247_v34 = vpop.f32.mrf.mxu1 }
0x2a06   :  { %v6248_v5 = vadd.f32 %v11329_v37, %v6247_v34  ;;  %v6263_v33 = vmax.f32 %v6253_v20, 0.0  ;;  %v6503_v37 = vpop.permute.xlu1 %6502 }
0x2a07   :  { %v7872_v35 = vpop.f32.mrf.mxu1 }
0x2a08   :  { %v6262_v43 = vmax.f32 %v6248_v5, 0.0  ;;  %v11470_v42 = vadd.f32 %v7872_v35, %v11358_v63 }
0x2a09   :  { %v6389_v57 = vpop.f32.mrf.mxu1 }
0x2a0a   :  { %12071 = vst [vmem:[#allocation22_spill] sm:$0xff] %v11470_v42  ;;  %v6421_v28 = vmul.f32 0.1, %v11470_v42  ;;  %v11474_v39 = vadd.f32 %v11358_v63, %v6389_v57  ;;  %7873 = vmatprep.mubr.msk.f32.mxu1 %vm36_vm0, %v6262_v43  ;;  %v11487_v55 = vpop.permute.xlu1 %6574 }
0x2a0b   :  { %7874 = vmatmul.mubr.msk.f32.gmra.mxu1 %vm36_vm0, %v6263_v33 }
0x2a0c   :  { %12072 = vst [vmem:[#allocation7_spill] sm:$0xff] %v11474_v39  ;;  %v6420_v40 = vmul.f32 0.1, %v11474_v39  ;;  %6442 = vrot.lane.b32.xlu1 %v6421_v28, %s8240_s8 }
0x2a0e   :  { %6440 = vrot.lane.b32.xlu0 %v6420_v40, %s8240_s8 }
0x2a10   :  { %6474 = vrot.lane.b32.xlu1 %v6421_v28, %s8241_s19 }
0x2a12   :  { %6472 = vrot.lane.b32.xlu0 %v6420_v40, %s8241_s19 }
0x2a14   :  { %6506 = vrot.lane.b32.xlu1 %v6421_v28, %s8242_s24 }
0x2a16   :  { %6504 = vrot.lane.b32.xlu0 %v6420_v40, %s8242_s24 }
0x2a18   :  { %6578 = vrot.lane.b32.xlu1 %v6421_v28, %s8243_s20 }
0x2a1a   :  { %6576 = vrot.lane.b32.xlu0 %v6420_v40, %s8243_s20 }
0x2a31   :  { %v11489_v41 = vpop.permute.xlu1 %6618  ;;  %v11495_v38 = vpop.permute.xlu0 %6698 }
0x2a32   :  { %8188 = vrcp.f32 %v11489_v41 }
0x2a35   :  { %v11493_v18 = vpop.permute.xlu1 %6696  ;;  %v11499_v19 = vpop.permute.xlu0 %6616 }
0x2a36   :  { %8190 = vrcp.f32 %v11499_v19 }
0x2a41   :  { %v11497_v2 = vpop.permute.xlu1 %6622 }
0x2a42   :  { %8192 = vrcp.f32 %v11497_v2 }
0x2a43   :  { %v11503_v54 = vpop.permute.xlu0 %6620 }
0x2a44   :  { %8194 = vrcp.f32 %v11503_v54  ;;  %v6561_v54 = vmul.f32 %v11401_v58, %v11283_v4 }
0x2a45   :  { %v11501_v30 = vpop.permute.xlu1 %6700 }
0x2a46   :  { %v6593_v58 = vsub.f32 %v6561_v54, %v11441_v21 }
0x2a7e   :  { %v11505_v61 = vpop.permute.xlu1 %6442 }
0x2a7f   :  { %v6461_v14 = vsub.f32 %v11311_v60, %v11505_v61 }
0x2a80   :  { %v11507_v7 = vpop.permute.xlu0 %6440 }
0x2a81   :  { %v6460_v27 = vsub.f32 %v11306_v24, %v11507_v7 }
0x2a82   :  { %v6475_v23 = vpop.permute.xlu1 %6474 }
0x2a83   :  { %v11513_v20 = vsub.f32 %v6461_v14, %v6475_v23 }
0x2a84   :  { %v6473_v34 = vpop.permute.xlu0 %6472 }
0x2a85   :  { %v6605_v5 = vadd.f32 1e-06, %v11513_v20  ;;  %v11516_v35 = vsub.f32 %v6460_v27, %v6473_v34  ;;  %v11544_v27 = vadd.f32 %v11434_v56, %v11283_v4 }
0x2a87   :  { %v6604_v43 = vadd.f32 1e-06, %v11516_v35  ;;  %6626 = vrot.lane.b32.xlu1 %v6605_v5, %s8238_s28 }
0x2a89   :  { %6624 = vrot.lane.b32.xlu0 %v6604_v43, %s8238_s28 }
0x2acb   :  { %v7875_v33 = vpop.f32.mrf.mxu1 }
0x2acc   :  { %v11522_v57 = vadd.f32 %v7875_v33, %v11358_v63  ;;  %v11549_v33 = vadd.f32 %v6501_v9, %v11292_v50 }
0x2acd   :  { %v6399_v28 = vpop.f32.mrf.mxu1 }
0x2ace   :  { %12073 = vst [vmem:[#allocation5_spill] sm:$0xff] %v11522_v57  ;;  %v6423_v40 = vmul.f32 0.1, %v11522_v57  ;;  %v11526_v14 = vadd.f32 %v11358_v63, %v6399_v28  ;;  %v11538_v63 = vadd.f32 %v11438_v44, %v11278_v15  ;;  %v6505_v28 = vpop.permute.xlu0 %6504  ;;  %v6745_v44 = vadd.f32 1e-06, %v11544_v27 }
0x2acf   :  { %v6746_v56 = vadd.f32 1e-06, %v11549_v33 }
0x2ad0   :  { %v6422_v23 = vmul.f32 0.1, %v11526_v14  ;;  %6446 = vrot.lane.b32.xlu1 %v6423_v40, %s8240_s8  ;;  %v6744_v34 = vadd.f32 1e-06, %v11538_v63 }
0x2ad2   :  { %6444 = vrot.lane.b32.xlu0 %v6422_v23, %s8240_s8 }
0x2ad4   :  { %6478 = vrot.lane.b32.xlu1 %v6423_v40, %s8241_s19 }
0x2ad6   :  { %6476 = vrot.lane.b32.xlu0 %v6422_v23, %s8241_s19 }
0x2ad8   :  { %6510 = vrot.lane.b32.xlu1 %v6423_v40, %s8242_s24 }
0x2ada   :  { %6508 = vrot.lane.b32.xlu0 %v6422_v23, %s8242_s24 }
0x2adc   :  { %6582 = vrot.lane.b32.xlu1 %v6423_v40, %s8243_s20  ;;  %v11554_v40 = vadd.f32 %v6503_v37, %v11297_v11 }
0x2ade   :  { %6702 = vrot.lane.b32.xlu0 %v11458_v32, %s8239_s17  ;;  %v6507_v32 = vpop.permute.xlu1 %6506  ;;  %v6747_v9 = vadd.f32 1e-06, %v11554_v40 }
0x2ae0   :  { %6704 = vrot.lane.b32.xlu1 %v6604_v43, %s8239_s17  ;;  %v11559_v43 = vadd.f32 %v6505_v28, %v11306_v24 }
0x2ae2   :  { %6706 = vrot.lane.b32.xlu0 %v6605_v5, %s8239_s17  ;;  %v11564_v5 = vadd.f32 %v6507_v32, %v11311_v60  ;;  %v6748_v37 = vadd.f32 1e-06, %v11559_v43  ;;  %v11599_v28 = vpop.permute.xlu1 %6578 }
0x2ae4   :  { %6760 = vrot.lane.b32.xlu1 %v6744_v34, %s8239_s17  ;;  %v6749_v34 = vadd.f32 1e-06, %v11564_v5 }
0x2ae6   :  { %6762 = vrot.lane.b32.xlu0 %v6745_v44, %s8239_s17  ;;  %v11601_v44 = vpop.permute.xlu0 %6576 }
0x2ae8   :  { %6764 = vrot.lane.b32.xlu1 %v6746_v56, %s8239_s17 }
0x2aea   :  { %6766 = vrot.lane.b32.xlu0 %v6747_v9, %s8239_s17 }
0x2aec   :  { %6768 = vrot.lane.b32.xlu1 %v6748_v37, %s8239_s17 }
0x2aee   :  { %6770 = vrot.lane.b32.xlu0 %v6749_v34, %s8239_s17 }
0x2af0   :  { %6662 = vrot.lane.b32.xlu1 %v11297_v11, %s8239_s17 }
0x2af2   :  { %6664 = vrot.lane.b32.xlu0 %v11306_v24, %s8239_s17 }
0x2af4   :  { %6666 = vrot.lane.b32.xlu1 %v11311_v60, %s8239_s17 }
0x2af6   :  { %6668 = vrot.lane.b32.xlu0 %v11320_v6, %s8239_s17 }
0x2af8   :  { %6670 = vrot.lane.b32.xlu1 %v11344_v36, %s8239_s17 }
0x2af9   :  { %v6627_v32 = vpop.permute.xlu1 %6626 }
0x2afa   :  { %6800 = vrot.lane.b32.xlu0 %v11278_v15, %s8241_s19  ;;  %8196 = vrcp.f32 %v6627_v32  ;;  %v8189_v32 = vpop.eup %8188 }
0x2afb   :  { %v6625_v56 = vpop.permute.xlu0 %6624 }
0x2afc   :  { %6802 = vrot.lane.b32.xlu1 %v11283_v4, %s8241_s19  ;;  %8198 = vrcp.f32 %v6625_v56  ;;  %v8191_v56 = vpop.eup %8190 }
0x2afd   :  { %8200 = vrcp.f32 %v11495_v38 }
0x2afe   :  { %6804 = vrot.lane.b32.xlu0 %v11292_v50, %s8241_s19  ;;  %8202 = vrcp.f32 %v11493_v18 }
0x2aff   :  { %8204 = vrcp.f32 %v11501_v30  ;;  %v6564_v30 = vmul.f32 %v11407_v10, %v11306_v24 }
0x2b00   :  { %6806 = vrot.lane.b32.xlu1 %v11297_v11, %s8241_s19 }
0x2b02   :  { %6808 = vrot.lane.b32.xlu0 %v11306_v24, %s8241_s19 }
0x2b04   :  { %6810 = vrot.lane.b32.xlu1 %v11311_v60, %s8241_s19 }
0x2b06   :  { %6812 = vrot.lane.b32.xlu0 %v11320_v6, %s8241_s19 }
0x2b08   :  { %6814 = vrot.lane.b32.xlu1 %v11344_v36, %s8241_s19 }
0x2b0a   :  { %6580 = vrot.lane.b32.xlu0 %v6422_v23, %s8243_s20 }
0x2b42   :  { %v11603_v9 = vpop.permute.xlu1 %6446 }
0x2b43   :  { %v6463_v34 = vsub.f32 %v11344_v36, %v11603_v9 }
0x2b44   :  { %v11605_v37 = vpop.permute.xlu0 %6444 }
0x2b45   :  { %v6462_v41 = vsub.f32 %v11320_v6, %v11605_v37 }
0x2b46   :  { %v6479_v57 = vpop.permute.xlu1 %6478 }
0x2b47   :  { %v11610_v39 = vsub.f32 %v6463_v34, %v6479_v57 }
0x2b48   :  { %v6477_v42 = vpop.permute.xlu0 %6476 }
0x2b49   :  { %v6607_v23 = vadd.f32 1e-06, %v11610_v39  ;;  %v11628_v2 = vsub.f32 %v6462_v41, %v6477_v42 }
0x2b4a   :  { %v6511_v3 = vpop.permute.xlu1 %6510 }
0x2b4b   :  { %v11616_v26 = vadd.f32 %v6511_v3, %v11344_v36  ;;  %6630 = vrot.lane.b32.xlu1 %v6607_v23, %s8238_s28  ;;  %v6606_v42 = vadd.f32 1e-06, %v11628_v2 }
0x2b4c   :  { %v6509_v47 = vpop.permute.xlu0 %6508 }
0x2b4d   :  { %12074 = vst [vmem:[#allocation6_spill] sm:$0xff] %v11616_v26  ;;  %v6751_v57 = vadd.f32 1e-06, %v11616_v26  ;;  %v11624_v19 = vadd.f32 %v6509_v47, %v11320_v6  ;;  %v6560_v47 = vmul.f32 %v11399_v1, %v11278_v15  ;;  %v6562_v1 = vmul.f32 %v11403_v29, %v11292_v50 }
0x2b4e   :  { %v11626_v34 = vpop.permute.xlu1 %6582  ;;  %v6565_v29 = vmul.f32 %v11409_v0, %v11311_v60  ;;  %v6681_v0 = vmul.f32 %v11417_v51, %v11283_v4 }
0x2b4f   :  { %12075 = vst [vmem:[#allocation8_spill] sm:$0xff] %v11624_v19  ;;  %12076 = vst [vmem:[#allocation9_spill] sm:$0xff] %v11626_v34  ;;  %v6750_v3 = vadd.f32 1e-06, %v11624_v19  ;;  %6774 = vrot.lane.b32.xlu0 %v6751_v57, %s8239_s17  ;;  %v6563_v57 = vmul.f32 %v11405_v16, %v11297_v11  ;;  %v6592_v38 = vsub.f32 %v6560_v47, %v11445_v12  ;;  %v8193_v19 = vpop.eup %8192 }
0x2b50   :  { %v6703_v8 = vpop.permute.xlu0 %6702  ;;  %v8195_v46 = vpop.eup %8194  ;;  %v6594_v47 = vsub.f32 %v6562_v1, %v11491_v48  ;;  %v6596_v1 = vsub.f32 %v6564_v30, %v11601_v44 }
0x2b51   :  { %6772 = vrot.lane.b32.xlu1 %v6750_v3, %s8239_s17  ;;  %v6595_v54 = vsub.f32 %v6563_v57, %v11487_v55  ;;  %8206 = vrcp.f32 %v6703_v8  ;;  %v6641_v18 = vmul.f32 %v8191_v56, %v6592_v38  ;;  %v6597_v8 = vsub.f32 %v6565_v29, %v11599_v28 }
0x2b52   :  { %v6705_v26 = vpop.permute.xlu1 %6704  ;;  %v6645_v57 = vmul.f32 %v8195_v46, %v6594_v47  ;;  %v6682_v29 = vmul.f32 %v11419_v25, %v11292_v50 }
0x2b53   :  { %6710 = vrot.lane.b32.xlu0 %v6607_v23, %s8239_s17  ;;  %v6643_v23 = vmul.f32 %v8189_v32, %v6593_v58  ;;  %v8197_v32 = vpop.eup %8196 }
0x2b54   :  { %v6707_v41 = vpop.permute.xlu0 %6706  ;;  %v8199_v56 = vpop.eup %8198 }
0x2b55   :  { %6708 = vrot.lane.b32.xlu1 %v6606_v42, %s8239_s17  ;;  %8208 = vrcp.f32 %v6707_v41  ;;  %v6680_v41 = vmul.f32 %v11415_v59, %v11278_v15 }
0x2b56   :  { %v6761_v3 = vpop.permute.xlu1 %6760  ;;  %8210 = vrcp.f32 %v6705_v26  ;;  %v6649_v26 = vmul.f32 %v8199_v56, %v6596_v1 }
0x2b57   :  { %6628 = vrot.lane.b32.xlu0 %v6606_v42, %s8238_s28  ;;  %v6647_v42 = vmul.f32 %v8193_v19, %v6595_v54  ;;  %v6651_v19 = vmul.f32 %v8197_v32, %v6597_v8  ;;  %v6689_v54 = vsub.f32 %v6681_v0, %v11441_v21  ;;  %v6688_v4 = vsub.f32 %v6680_v41, %v11445_v12 }
0x2b58   :  { %v6763_v16 = vpop.permute.xlu0 %6762 }
0x2b59   :  { %6834 = vrot.lane.b32.xlu1 %v6643_v23, %s8241_s19  ;;  %8212 = vrcp.f32 %v6763_v16  ;;  %v8201_v23 = vpop.eup %8200 }
0x2b5a   :  { %v6765_v34 = vpop.permute.xlu1 %6764  ;;  %8214 = vrcp.f32 %v6761_v3  ;;  %v8203_v46 = vpop.eup %8202  ;;  %v6723_v16 = vmul.f32 %v8201_v23, %v6689_v54 }
0x2b5b   :  { %6832 = vrot.lane.b32.xlu0 %v6641_v18, %s8241_s19  ;;  %v8205_v59 = vpop.eup %8204  ;;  %v6721_v47 = vmul.f32 %v8203_v46, %v6688_v4 }
0x2b5c   :  { %v6767_v58 = vpop.permute.xlu0 %6766 }
0x2b5d   :  { %6838 = vrot.lane.b32.xlu1 %v6647_v42, %s8241_s19  ;;  %8216 = vrcp.f32 %v6767_v58 }
0x2b5e   :  { %v6769_v38 = vpop.permute.xlu1 %6768  ;;  %8218 = vrcp.f32 %v6765_v34  ;;  %v8207_v12 = vpop.eup %8206 }
0x2b5f   :  { %6836 = vrot.lane.b32.xlu0 %v6645_v57, %s8241_s19 }
0x2b60   :  { %v6771_v10 = vpop.permute.xlu0 %6770 }
0x2b61   :  { %6842 = vrot.lane.b32.xlu1 %v6651_v19, %s8241_s19  ;;  %8220 = vrcp.f32 %v6771_v10 }
0x2b62   :  { %v6663_v18 = vpop.permute.xlu1 %6662  ;;  %8222 = vrcp.f32 %v6769_v38  ;;  %v8209_v34 = vpop.eup %8208 }
0x2b63   :  { %v6683_v51 = vmul.f32 %v6663_v18, %v11297_v11  ;;  %6840 = vrot.lane.b32.xlu0 %v6649_v26, %s8241_s19  ;;  %v6690_v11 = vsub.f32 %v6682_v29, %v11491_v48  ;;  %v8211_v30 = vpop.eup %8210 }
0x2b64   :  { %v6665_v15 = vpop.permute.xlu0 %6664 }
0x2b65   :  { %v6691_v21 = vsub.f32 %v6683_v51, %v11487_v55  ;;  %v6684_v3 = vmul.f32 %v6665_v15, %v11306_v24  ;;  %6866 = vrot.lane.b32.xlu1 %v6723_v16, %s8241_s19  ;;  %v6725_v55 = vmul.f32 %v8205_v59, %v6690_v11  ;;  %v6739_v23 = vadd.f32 %v6683_v51, %v11447_v62  ;;  %v12077_v11 = vld [vmem:[#allocation9_spill] sm:$0xff] }
0x2b66   :  { %v6667_v42 = vpop.permute.xlu1 %6666  ;;  %v8213_v48 = vpop.eup %8212 }
0x2b67   :  { %v6727_v32 = vmul.f32 %v8207_v12, %v6691_v21  ;;  %v6685_v58 = vmul.f32 %v6667_v42, %v11311_v60  ;;  %6864 = vrot.lane.b32.xlu0 %v6721_v47, %s8241_s19  ;;  %v6692_v25 = vsub.f32 %v6684_v3, %v11601_v44  ;;  %v6737_v60 = vadd.f32 %v6681_v0, %v11421_v52  ;;  %v8215_v38 = vpop.eup %8214 }
0x2b68   :  { %v11679_v50 = vpop.permute.xlu0 %6668  ;;  %v6736_v44 = vadd.f32 %v6680_v41, %v11423_v13  ;;  %v6738_v52 = vadd.f32 %v6682_v29, %v11449_v49  ;;  %v6740_v62 = vadd.f32 %v6684_v3, %v11507_v7  ;;  %v6567_v21 = vmul.f32 %v11413_v45, %v11344_v36 }
0x2b69   :  { %v6693_v24 = vsub.f32 %v6685_v58, %v11599_v28  ;;  %6870 = vrot.lane.b32.xlu1 %v6727_v32, %s8241_s19  ;;  %v6729_v56 = vmul.f32 %v8211_v30, %v6692_v25  ;;  %v6787_v28 = vmul.f32 %v8213_v48, %v6737_v60  ;;  %v6741_v13 = vadd.f32 %v6685_v58, %v11505_v61 }
0x2b6a   :  { %v8217_v1 = vpop.eup %8216  ;;  %v6785_v10 = vmul.f32 %v8215_v38, %v6736_v44  ;;  %v6599_v32 = vsub.f32 %v6567_v21, %v12077_v11 }
0x2b6b   :  { %v6731_v8 = vmul.f32 %v8209_v34, %v6693_v24  ;;  %6868 = vrot.lane.b32.xlu0 %v6725_v55, %s8241_s19  ;;  %v8219_v54 = vpop.eup %8218  ;;  %v6791_v0 = vmul.f32 %v8217_v1, %v6739_v23  ;;  %v12079_v1 = vld [vmem:[#allocation6_spill] sm:$0xff] }
0x2b6c   :  { %v11685_v57 = vpop.permute.xlu0 %6800  ;;  %v6789_v41 = vmul.f32 %v8219_v54, %v6738_v52  ;;  %v12080_v54 = vld [vmem:[#allocation8_spill] sm:$0xff] }
0x2b6d   :  { %6874 = vrot.lane.b32.xlu1 %v6731_v8, %s8241_s19 }
0x2b6e   :  { %v8221_v26 = vpop.eup %8220 }
0x2b6f   :  { %6872 = vrot.lane.b32.xlu0 %v6729_v56, %s8241_s19  ;;  %v8223_v18 = vpop.eup %8222  ;;  %v6795_v4 = vmul.f32 %v8221_v26, %v6741_v13 }
0x2b70   :  { %v11691_v19 = vpop.permute.xlu0 %6804  ;;  %v6793_v49 = vmul.f32 %v8223_v18, %v6740_v62 }
0x2b71   :  { %6898 = vrot.lane.b32.xlu1 %v6787_v28, %s8241_s19 }
0x2b73   :  { %6896 = vrot.lane.b32.xlu0 %v6785_v10, %s8241_s19 }
0x2b74   :  { %v11697_v46 = vpop.permute.xlu0 %6808 }
0x2b75   :  { %6902 = vrot.lane.b32.xlu1 %v6791_v0, %s8241_s19 }
0x2b77   :  { %6900 = vrot.lane.b32.xlu0 %v6789_v41, %s8241_s19 }
0x2b78   :  { %v6813_v51 = vpop.permute.xlu0 %6812 }
0x2b79   :  { %v11705_v16 = vsel %vm6984_vm3, %v11526_v14, %v6813_v51  ;;  %6906 = vrot.lane.b32.xlu1 %v6795_v4, %s8241_s19 }
0x2b7b   :  { %6904 = vrot.lane.b32.xlu0 %v6793_v49, %s8241_s19 }
0x2b7c   :  { %v6581_v61 = vpop.permute.xlu0 %6580 }
0x2b7d   :  { %6930 = vrot.lane.b32.xlu1 %v11429_v22, %s8241_s19  ;;  %v6671_v22 = vpop.permute.xlu1 %6670 }
0x2b7f   :  { %6928 = vrot.lane.b32.xlu0 %v11432_v17, %s8241_s19 }
0x2b81   :  { %6934 = vrot.lane.b32.xlu1 %v11453_v53, %s8241_s19  ;;  %v11737_v17 = vpop.permute.xlu1 %6802 }
0x2b83   :  { %6932 = vrot.lane.b32.xlu0 %v11460_v31, %s8241_s19 }
0x2b85   :  { %6938 = vrot.lane.b32.xlu1 %v11513_v20, %s8241_s19  ;;  %v11739_v53 = vpop.permute.xlu1 %6806 }
0x2b87   :  { %6936 = vrot.lane.b32.xlu0 %v11516_v35, %s8241_s19 }
0x2b89   :  { %6942 = vrot.lane.b32.xlu1 %v11610_v39, %s8241_s19  ;;  %v11741_v31 = vpop.permute.xlu1 %6810 }
0x2b8b   :  { %6940 = vrot.lane.b32.xlu0 %v11628_v2, %s8241_s19 }
0x2b8d   :  { %6962 = vrot.lane.b32.xlu1 %v11544_v27, %s8241_s19  ;;  %v11743_v39 = vpop.permute.xlu1 %6814 }
0x2b8f   :  { %6960 = vrot.lane.b32.xlu0 %v11538_v63, %s8241_s19 }
0x2b91   :  { %6966 = vrot.lane.b32.xlu1 %v11554_v40, %s8241_s19 }
0x2b93   :  { %6964 = vrot.lane.b32.xlu0 %v11549_v33, %s8241_s19  ;;  %v6687_v33 = vmul.f32 %v6671_v22, %v11344_v36 }
0x2b95   :  { %6970 = vrot.lane.b32.xlu1 %v11564_v5, %s8241_s19  ;;  %v6743_v2 = vadd.f32 %v6687_v33, %v11603_v9  ;;  %v12078_v9 = vld [vmem:[#allocation21_spill] sm:$0xff] }
0x2b96   :  { %v6566_v25 = vmul.f32 %v12078_v9, %v11320_v6 }
0x2b97   :  { %6968 = vrot.lane.b32.xlu0 %v11559_v43, %s8241_s19  ;;  %v6686_v43 = vmul.f32 %v11679_v50, %v11320_v6 }
0x2b98   :  { %v6598_v55 = vsub.f32 %v6566_v25, %v6581_v61 }
0x2b99   :  { %v6742_v3 = vadd.f32 %v6686_v43, %v11605_v37  ;;  %v6695_v37 = vsub.f32 %v6687_v33, %v12077_v11  ;;  %v6694_v38 = vsub.f32 %v6686_v43, %v6581_v61  ;;  %v12081_v61 = vld [vmem:[#allocation17_spill] sm:$0xff] }
0x2bbd   :  { %v6631_v7 = vpop.permute.xlu1 %6630 }
0x2bc1   :  { %v6775_v20 = vpop.permute.xlu0 %6774 }
0x2bc2   :  { %8224 = vrcp.f32 %v6775_v20 }
0x2bc3   :  { %8226 = vrcp.f32 %v6631_v7  ;;  %v6773_v35 = vpop.permute.xlu1 %6772  ;;  %v6986_v7 = vsel %vm6984_vm3, %v12081_v61, %v11737_v17 }
0x2bc4   :  { %8228 = vrcp.f32 %v6773_v35 }
0x2bc5   :  { %v6711_v14 = vpop.permute.xlu0 %6710 }
0x2bc6   :  { %8230 = vrcp.f32 %v6711_v14  ;;  %v12082_v14 = vld [vmem:[#allocation18_spill] sm:$0xff] }
0x2bc7   :  { %v6709_v63 = vpop.permute.xlu1 %6708 }
0x2bc9   :  { %v6629_v27 = vpop.permute.xlu0 %6628 }
0x2bca   :  { %8232 = vrcp.f32 %v6629_v27 }
0x2bcb   :  { %v6835_v40 = vpop.permute.xlu1 %6834  ;;  %8234 = vrcp.f32 %v6709_v63  ;;  %v6985_v63 = vsel %vm6984_vm3, %v12082_v14, %v11685_v57  ;;  %v12087_v14 = vld [vmem:[#allocation5_spill] sm:$0xff] }
0x2bcc   :  { %v6995_v20 = vsel %vm6993_vm4, %v6986_v7, %v6835_v40 }
0x2bcd   :  { %v6833_v5 = vpop.permute.xlu0 %6832 }
0x2bce   :  { %v6994_v33 = vsel %vm6993_vm4, %v6985_v63, %v6833_v5  ;;  %v12084_v5 = vld [vmem:[#allocation20_spill] sm:$0xff]  ;;  %v6992_v63 = vsel %vm6984_vm3, %v12087_v14, %v11743_v39 }
0x2bcf   :  { %v8225_v29 = vpop.eup %8224  ;;  %v6839_v15 = vpop.permute.xlu1 %6838 }
0x2bd0   :  { %v8227_v59 = vpop.eup %8226  ;;  %v6799_v47 = vmul.f32 %v8225_v29, %v6743_v2  ;;  %v12083_v29 = vld [vmem:[#allocation19_spill] sm:$0xff] }
0x2bd1   :  { %v8229_v12 = vpop.eup %8228  ;;  %v11752_v42 = vpop.permute.xlu0 %6836  ;;  %v6655_v24 = vmul.f32 %v8227_v59, %v6599_v32  ;;  %v6988_v17 = vsel %vm6984_vm3, %v12083_v29, %v11739_v53 }
0x2bd2   :  { %6910 = vrot.lane.b32.xlu1 %v6799_v47, %s8241_s19  ;;  %v6797_v58 = vmul.f32 %v8229_v12, %v6742_v3  ;;  %v6997_v40 = vsel %vm6993_vm4, %v6988_v17, %v6839_v15  ;;  %v6987_v3 = vsel %vm6984_vm3, %v12084_v5, %v11691_v19 }
0x2bd3   :  { %v11756_v50 = vpop.permute.xlu1 %6842  ;;  %v8231_v36 = vpop.eup %8230  ;;  %v6996_v53 = vsel %vm6993_vm4, %v6987_v3, %v11752_v42 }
0x2bd4   :  { %6908 = vrot.lane.b32.xlu0 %v6797_v58, %s8241_s19  ;;  %v6735_v8 = vmul.f32 %v8231_v36, %v6695_v37  ;;  %v12085_v58 = vld [vmem:[#allocation22_spill] sm:$0xff] }
0x2bd5   :  { %v11761_v45 = vpop.permute.xlu0 %6840  ;;  %v6990_v9 = vsel %vm6984_vm3, %v12085_v58, %v11741_v31 }
0x2bd6   :  { %6846 = vrot.lane.b32.xlu1 %v6655_v24, %s8241_s19  ;;  %v6999_v36 = vsel %vm6993_vm4, %v6990_v9, %v11756_v50 }
0x2bd7   :  { %v8233_v34 = vpop.eup %8232  ;;  %v6867_v30 = vpop.permute.xlu1 %6866 }
0x2bd8   :  { %v6653_v48 = vmul.f32 %v8233_v34, %v6598_v55  ;;  %v8235_v60 = vpop.eup %8234  ;;  %v7004_v27 = vsel %vm7002_vm5, %v6995_v20, %v6867_v30  ;;  %v12086_v30 = vld [vmem:[#allocation7_spill] sm:$0xff] }
0x2bd9   :  { %v6865_v56 = vpop.permute.xlu0 %6864  ;;  %v6733_v44 = vmul.f32 %v8235_v60, %v6694_v38  ;;  %v6989_v31 = vsel %vm6984_vm3, %v12086_v30, %v11697_v46 }
0x2bda   :  { %6878 = vrot.lane.b32.xlu1 %v6735_v8, %s8241_s19  ;;  %6844 = vrot.lane.b32.xlu0 %v6653_v48, %s8241_s19  ;;  %v7003_v59 = vsel %vm7002_vm5, %v6994_v33, %v6865_v56  ;;  %v6998_v60 = vsel %vm6993_vm4, %v6989_v31, %v11761_v45 }
0x2bdb   :  { %v6871_v6 = vpop.permute.xlu1 %6870 }
0x2bdc   :  { %v7006_v47 = vsel %vm7002_vm5, %v6997_v40, %v6871_v6 }
0x2bdd   :  { %v6869_v28 = vpop.permute.xlu0 %6868 }
0x2bde   :  { %6974 = vrot.lane.b32.xlu1 %v12079_v1, %s8241_s19  ;;  %6876 = vrot.lane.b32.xlu0 %v6733_v44, %s8241_s19  ;;  %v7005_v19 = vsel %vm7002_vm5, %v6996_v53, %v6869_v28 }
0x2bdf   :  { %v6875_v23 = vpop.permute.xlu1 %6874 }
0x2be0   :  { %v7008_v8 = vsel %vm7002_vm5, %v6999_v36, %v6875_v23 }
0x2be1   :  { %v6873_v10 = vpop.permute.xlu0 %6872 }
0x2be2   :  { %6972 = vrot.lane.b32.xlu0 %v12080_v54, %s8241_s19  ;;  %v7007_v44 = vsel %vm7002_vm5, %v6998_v60, %v6873_v10 }
0x2be3   :  { %v6899_v52 = vpop.permute.xlu1 %6898 }
0x2be4   :  { %v7013_v43 = vsel %vm7011_vm6, %v7004_v27, %v6899_v52 }
0x2be5   :  { %v6897_v0 = vpop.permute.xlu0 %6896  ;;  %v7021_v12 = vsel %vm364_vm2, %v7013_v43, %v6899_v52 }
0x2be6   :  { %v7012_v21 = vsel %vm7011_vm6, %v7003_v59, %v6897_v0 }
0x2be7   :  { %v6903_v26 = vpop.permute.xlu1 %6902  ;;  %v7020_v25 = vsel %vm364_vm2, %v7012_v21, %v6897_v0 }
0x2be8   :  { %v7015_v11 = vsel %vm7011_vm6, %v7006_v47, %v6903_v26 }
0x2be9   :  { %v6901_v13 = vpop.permute.xlu0 %6900  ;;  %v7023_v48 = vsel %vm364_vm2, %v7015_v11, %v6903_v26 }
0x2bea   :  { %v7014_v42 = vsel %vm7011_vm6, %v7005_v19, %v6901_v13 }
0x2beb   :  { %v11772_v41 = vpop.permute.xlu1 %6906  ;;  %v7022_v28 = vsel %vm364_vm2, %v7014_v42, %v6901_v13 }
0x2bec   :  { %v7017_v56 = vsel %vm7011_vm6, %v7008_v8, %v11772_v41 }
0x2bed   :  { %v11774_v18 = vpop.permute.xlu0 %6904  ;;  %v7025_v10 = vsel %vm364_vm2, %v7017_v56, %v11772_v41 }
0x2bee   :  { %v7016_v45 = vsel %vm7011_vm6, %v7007_v44, %v11774_v18 }
0x2bef   :  { %v6931_v62 = vpop.permute.xlu1 %6930 }
0x2bf0   :  { %v7030_v15 = vsel %vm7028_vm7, %v7021_v12, %v6931_v62 }
0x2bf1   :  { %v6929_v4 = vpop.permute.xlu0 %6928 }
0x2bf2   :  { %v7029_v37 = vsel %vm7028_vm7, %v7020_v25, %v6929_v4  ;;  %v7024_v4 = vsel %vm364_vm2, %v7016_v45, %v11774_v18 }
0x2bf3   :  { %v6935_v51 = vpop.permute.xlu1 %6934 }
0x2bf4   :  { %v7032_v38 = vsel %vm7028_vm7, %v7023_v48, %v6935_v51 }
0x2bf5   :  { %v6933_v49 = vpop.permute.xlu0 %6932 }
0x2bf6   :  { %v7031_v23 = vsel %vm7028_vm7, %v7022_v28, %v6933_v49 }
0x2bf7   :  { %v6939_v22 = vpop.permute.xlu1 %6938 }
0x2bf8   :  { %v7034_v26 = vsel %vm7028_vm7, %v7025_v10, %v6939_v22 }
0x2bf9   :  { %v6937_v35 = vpop.permute.xlu0 %6936 }
0x2bfa   :  { %v7033_v51 = vsel %vm7028_vm7, %v7024_v4, %v6937_v35 }
0x2bfb   :  { %v11786_v2 = vpop.permute.xlu1 %6942 }
0x2bfd   :  { %v11794_v57 = vpop.permute.xlu0 %6940 }
0x2bff   :  { %v6963_v32 = vpop.permute.xlu1 %6962 }
0x2c00   :  { %v7039_v24 = vsel %vm7037_vm8, %v7030_v15, %v6963_v32 }
0x2c01   :  { %v7048_v55 = vsel %vm7046_vm9, %v7039_v24, %v6963_v32  ;;  %v6961_v34 = vpop.permute.xlu0 %6960 }
0x2c02   :  { %7057 = vst.msk [vmem:[%s11908_s9 + $0x8] sm:$0xff] %vm7055_vm10, %v7048_v55  ;;  %v7038_v50 = vsel %vm7037_vm8, %v7029_v37, %v6961_v34 }
0x2c03   :  { %v7047_v46 = vsel %vm7046_vm9, %v7038_v50, %v6961_v34  ;;  %v6967_v6 = vpop.permute.xlu1 %6966 }
0x2c04   :  { %7056 = vst.msk [vmem:[%s11908_s9] sm:$0xff] %vm7055_vm10, %v7047_v46  ;;  %v7041_v1 = vsel %vm7037_vm8, %v7032_v38, %v6967_v6 }
0x2c05   :  { %v7050_v54 = vsel %vm7046_vm9, %v7041_v1, %v6967_v6  ;;  %v6965_v52 = vpop.permute.xlu0 %6964 }
0x2c06   :  { %7059 = vst.msk [vmem:[%s11908_s9 + $0x18] sm:$0xff] %vm7055_vm10, %v7050_v54  ;;  %v7040_v0 = vsel %vm7037_vm8, %v7031_v23, %v6965_v52 }
0x2c07   :  { %v7049_v13 = vsel %vm7046_vm9, %v7040_v0, %v6965_v52  ;;  %v6971_v62 = vpop.permute.xlu1 %6970 }
0x2c08   :  { %7058 = vst.msk [vmem:[%s11908_s9 + $0x10] sm:$0xff] %vm7055_vm10, %v7049_v13  ;;  %v7043_v41 = vsel %vm7037_vm8, %v7034_v26, %v6971_v62 }
0x2c09   :  { %v7052_v49 = vsel %vm7046_vm9, %v7043_v41, %v6971_v62  ;;  %v6969_v61 = vpop.permute.xlu0 %6968 }
0x2c0a   :  { %7061 = vst.msk [vmem:[%s11908_s9 + $0x28] sm:$0xff] %vm7055_vm10, %v7052_v49  ;;  %v7042_v22 = vsel %vm7037_vm8, %v7033_v51, %v6969_v61 }
0x2c0b   :  { %v7051_v18 = vsel %vm7046_vm9, %v7042_v22, %v6969_v61 }
0x2c0c   :  { %7060 = vst.msk [vmem:[%s11908_s9 + $0x20] sm:$0xff] %vm7055_vm10, %v7051_v18 }
0x2c44   :  { %v6911_v7 = vpop.permute.xlu1 %6910 }
0x2c46   :  { %v6909_v20 = vpop.permute.xlu0 %6908 }
0x2c48   :  { %v6847_v35 = vpop.permute.xlu1 %6846 }
0x2c49   :  { %v7001_v27 = vsel %vm6993_vm4, %v6992_v63, %v6847_v35 }
0x2c4c   :  { %v6879_v33 = vpop.permute.xlu1 %6878  ;;  %v6845_v43 = vpop.permute.xlu0 %6844 }
0x2c4d   :  { %v7010_v29 = vsel %vm7002_vm5, %v7001_v27, %v6879_v33  ;;  %v7000_v40 = vsel %vm6993_vm4, %v11705_v16, %v6845_v43 }
0x2c4e   :  { %v7019_v17 = vsel %vm7011_vm6, %v7010_v29, %v6911_v7 }
0x2c4f   :  { %v7027_v59 = vsel %vm364_vm2, %v7019_v17, %v6911_v7 }
0x2c50   :  { %v7036_v21 = vsel %vm7028_vm7, %v7027_v59, %v11786_v2  ;;  %v6975_v5 = vpop.permute.xlu1 %6974  ;;  %v6877_v3 = vpop.permute.xlu0 %6876 }
0x2c51   :  { %v7045_v39 = vsel %vm7037_vm8, %v7036_v21, %v6975_v5  ;;  %v7009_v47 = vsel %vm7002_vm5, %v7000_v40, %v6877_v3 }
0x2c52   :  { %v7054_v12 = vsel %vm7046_vm9, %v7045_v39, %v6975_v5  ;;  %v7018_v53 = vsel %vm7011_vm6, %v7009_v47, %v6909_v20 }
0x2c53   :  { %7063 = vst.msk [vmem:[%s11908_s9 + $0x38] sm:$0xff] %vm7055_vm10, %v7054_v12  ;;  %v7026_v16 = vsel %vm364_vm2, %v7018_v53, %v6909_v20 }
0x2c54   :  { %v7035_v2 = vsel %vm7028_vm7, %v7026_v16, %v11794_v57  ;;  %v6973_v11 = vpop.permute.xlu0 %6972 }
0x2c55   :  { %v7044_v15 = vsel %vm7037_vm8, %v7035_v2, %v6973_v11 }
0x2c56   :  { %v7053_v32 = vsel %vm7046_vm9, %v7044_v15, %v6973_v11 }
0x2c57   :  { %7062 = vst.msk [vmem:[%s11908_s9 + $0x30] sm:$0xff] %vm7055_vm10, %v7053_v32 }

</bundles_post_ra>
